<compile_context>
chip_gen: v7x
topology: tpu7x:2x2x1
jax: 0.10.0
libtpu: 0.0.40
codegen_flags: <defaults>
</compile_context>

<pallas_src>
import functools

import jax
import jax.numpy as jnp
from jax.experimental import pallas as pl
from jax.experimental.pallas import tpu as pltpu


# ----------------------------------------------------------------------------
# helpers mirroring the PyTorch module
# ----------------------------------------------------------------------------
def make_div(v, divisor=8):
    min_value = divisor
    new_v = max(min_value, int(v + divisor / 2) // divisor * divisor)
    if new_v < 0.9 * v:
        new_v += divisor
    return new_v


def get_padding(kernel_size, stride, dilation=1):
    return ((stride - 1) + dilation * (kernel_size - 1)) // 2


# ----------------------------------------------------------------------------
# tiled matmul kernel (bf16 operands, f32 accumulation, fused bias / residual)
# ----------------------------------------------------------------------------
def _mm_kernel(*refs, nk, has_bias, has_res):
    a_ref, b_ref = refs[0], refs[1]
    idx = 2
    bias_ref = None
    res_ref = None
    if has_bias:
        bias_ref = refs[idx]
        idx += 1
    if has_res:
        res_ref = refs[idx]
        idx += 1
    o_ref = refs[idx]

    if nk == 1:
        # Single K tile: compute + epilogue directly into the output, no
        # accumulator round-trip.
        r = jnp.dot(a_ref[...], b_ref[...], preferred_element_type=jnp.float32)
        if has_bias:
            r = r + bias_ref[...].astype(jnp.float32)
        if has_res:
            r = r + res_ref[...].astype(jnp.float32)
        o_ref[...] = r.astype(o_ref.dtype)
        return

    acc_ref = refs[idx + 1]

    @pl.when(pl.program_id(2) == 0)
    def _():
        acc_ref[...] = jnp.zeros_like(acc_ref)

    acc_ref[...] += jnp.dot(a_ref[...], b_ref[...],
                            preferred_element_type=jnp.float32)

    @pl.when(pl.program_id(2) == nk - 1)
    def _():
        r = acc_ref[...]
        if has_bias:
            r = r + bias_ref[...].astype(jnp.float32)
        if has_res:
            r = r + res_ref[...].astype(jnp.float32)
        o_ref[...] = r.astype(o_ref.dtype)


def pallas_matmul(a, b, bias=None, residual=None, out_dtype=jnp.bfloat16):
    """(M, K) @ (K, N) with a 3-D (M, N, K) grid and a VMEM f32 accumulator."""
    M, K = a.shape
    Kb, N = b.shape
    assert K == Kb

    if M <= 256:
        TM = M
    elif M % 256 == 0:
        TM = 256
    else:
        TM = 128
    if N % 256 == 0:
        TN = 256
    elif N % 128 == 0:
        TN = 128
    else:
        TN = N
    if K % 512 == 0:
        TK = 512
    elif K % 256 == 0:
        TK = 256
    elif K % 128 == 0:
        TK = 128
    else:
        TK = K

    gm, gn, gk = pl.cdiv(M, TM), N // TN, K // TK

    in_specs = [pl.BlockSpec((TM, TK), lambda i, j, k: (i, k)),
                pl.BlockSpec((TK, TN), lambda i, j, k: (k, j))]
    inputs = [a, b]
    if bias is not None:
        in_specs.append(pl.BlockSpec((1, TN), lambda i, j, k: (0, j)))
        inputs.append(bias.reshape(1, N).astype(jnp.float32))
    if residual is not None:
        in_specs.append(pl.BlockSpec((TM, TN), lambda i, j, k: (i, j)))
        inputs.append(residual)

    scratch = [] if gk == 1 else [pltpu.VMEM((TM, TN), jnp.float32)]

    return pl.pallas_call(
        functools.partial(_mm_kernel, nk=gk, has_bias=bias is not None,
                          has_res=residual is not None),
        out_shape=jax.ShapeDtypeStruct((M, N), out_dtype),
        grid=(gm, gn, gk),
        in_specs=in_specs,
        out_specs=pl.BlockSpec((TM, TN), lambda i, j, k: (i, j)),
        scratch_shapes=scratch,
        compiler_params=pltpu.CompilerParams(
            dimension_semantics=("parallel", "parallel", "arbitrary")),
    )(*inputs)


# ----------------------------------------------------------------------------
# weight standardization (StdConv2d), tiled over Cout, bf16 output
# ----------------------------------------------------------------------------
def _ws_kernel(w_ref, o_ref, *, eps):
    w = w_ref[...].astype(jnp.float32)                 # (TCO, K)
    m = jnp.mean(w, axis=1, keepdims=True)
    c = w - m
    v = jnp.mean(c * c, axis=1, keepdims=True)         # centered -> no cancellation
    o_ref[...] = (c * jax.lax.rsqrt(v + eps)).astype(o_ref.dtype)


def standardize_weight(w_oihw, eps=1e-6):
    co, ci, kh, kw = w_oihw.shape
    K = ci * kh * kw
    w2 = w_oihw.reshape(co, K).astype(jnp.float32)
    TCO = 128 if co % 128 == 0 else co
    return pl.pallas_call(
        functools.partial(_ws_kernel, eps=eps),
        out_shape=jax.ShapeDtypeStruct((co, K), jnp.bfloat16),
        grid=(co // TCO,),
        in_specs=[pl.BlockSpec((TCO, K), lambda i: (i, 0))],
        out_specs=pl.BlockSpec((TCO, K), lambda i: (i, 0)),
        compiler_params=pltpu.CompilerParams(dimension_semantics=("parallel",)),
    )(w2)                                              # (co, ci*kh*kw) bf16


# ----------------------------------------------------------------------------
# fused KxK conv kernels (no HBM im2col), grid over batch samples
# ----------------------------------------------------------------------------
def _conv_s1_kernel(x_ref, w_ref, o_ref, acc_ref, *, OH, OW, kh, kw, dil):
    x = x_ref[0]                                       # (Hp, Wp, Cin) bf16
    cin = x.shape[-1]
    first = True
    for di in range(kh):
        for dj in range(kw):
            xs = x[di * dil:di * dil + OH, dj * dil:dj * dil + OW, :]
            p = jnp.dot(xs.reshape(OH * OW, cin), w_ref[di * kw + dj],
                        preferred_element_type=jnp.float32)
            if first:
                acc_ref[...] = p                       # first tap writes, no zero-fill
                first = False
            else:
                acc_ref[...] += p
    o_ref[0] = acc_ref[...].reshape(OH, OW, -1).astype(o_ref.dtype)


def _conv_s2_kernel(x_ref, w_ref, o_ref, acc_ref, *, OH, OW, kh, kw):
    x = x_ref[...]                                     # (4, Hp/2, Wp/2, Cin) bf16
    cin = x.shape[-1]
    first = True
    for di in range(kh):
        for dj in range(kw):
            xs = x[(di % 2) * 2 + (dj % 2),
                   di // 2:di // 2 + OH,
                   dj // 2:dj // 2 + OW, :]
            p = jnp.dot(xs.reshape(OH * OW, cin), w_ref[di * kw + dj],
                        preferred_element_type=jnp.float32)
            if first:
                acc_ref[...] = p
                first = False
            else:
                acc_ref[...] += p
    o_ref[0] = acc_ref[...].reshape(OH, OW, -1).astype(o_ref.dtype)


def conv_kxk_fused_s1(x, w_taps, kh, kw, dilation, pad):
    N, H, W, ci = x.shape
    co = w_taps.shape[-1]
    OH = H + 2 * pad - dilation * (kh - 1)
    OW = W + 2 * pad - dilation * (kw - 1)
    Hp, Wp = H + 2 * pad, W + 2 * pad
    xp = jnp.pad(x, ((0, 0), (pad, pad), (pad, pad), (0, 0)))
    return pl.pallas_call(
        functools.partial(_conv_s1_kernel, OH=OH, OW=OW, kh=kh, kw=kw, dil=dilation),
        out_shape=jax.ShapeDtypeStruct((N, OH, OW, co), jnp.bfloat16),
        grid=(N,),
        in_specs=[pl.BlockSpec((1, Hp, Wp, ci), lambda n: (n, 0, 0, 0)),
                  pl.BlockSpec((kh * kw, ci, co), lambda n: (0, 0, 0))],
        out_specs=pl.BlockSpec((1, OH, OW, co), lambda n: (n, 0, 0, 0)),
        scratch_shapes=[pltpu.VMEM((OH * OW, co), jnp.float32)],
        compiler_params=pltpu.CompilerParams(dimension_semantics=("parallel",)),
    )(xp, w_taps)


def conv_kxk_fused_s2(x, w_taps, kh, kw, pad):
    """Stride-2 KxK conv: even/odd pair re-layout so in-kernel taps are unit-stride."""
    N, H, W, ci = x.shape
    co = w_taps.shape[-1]
    OH = (H + 2 * pad - kh) // 2 + 1
    OW = (W + 2 * pad - kw) // 2 + 1
    Hp = 2 * (OH + (kh - 1) // 2)
    Wp = 2 * (OW + (kw - 1) // 2)
    xp = jnp.pad(x, ((0, 0), (pad, Hp - H - pad), (pad, Wp - W - pad), (0, 0)))
    xr = xp.reshape(N, Hp // 2, 2, Wp // 2, 2, ci)
    xr = jnp.transpose(xr, (0, 2, 4, 1, 3, 5)).reshape(N * 4, Hp // 2, Wp // 2, ci)
    return pl.pallas_call(
        functools.partial(_conv_s2_kernel, OH=OH, OW=OW, kh=kh, kw=kw),
        out_shape=jax.ShapeDtypeStruct((N, OH, OW, co), jnp.bfloat16),
        grid=(N,),
        in_specs=[pl.BlockSpec((4, Hp // 2, Wp // 2, ci), lambda n: (n, 0, 0, 0)),
                  pl.BlockSpec((kh * kw, ci, co), lambda n: (0, 0, 0))],
        out_specs=pl.BlockSpec((1, OH, OW, co), lambda n: (n, 0, 0, 0)),
        scratch_shapes=[pltpu.VMEM((OH * OW, co), jnp.float32)],
        compiler_params=pltpu.CompilerParams(dimension_semantics=("parallel",)),
    )(xr, w_taps)


def conv_1x1(x, w_kn, stride=1, residual=None):
    N, H, W, ci = x.shape
    co = w_kn.shape[-1]
    if stride > 1:
        x = x[:, ::stride, ::stride, :]
    _, OH, OW, _ = x.shape
    a = x.reshape(N * OH * OW, ci)
    res = residual.reshape(N * OH * OW, co) if residual is not None else None
    out = pallas_matmul(a, w_kn, residual=res)
    return out.reshape(N, OH, OW, co)


def conv_im2col(x, w_flat, kh, kw, stride, dilation, pad, residual=None):
    N, H, W, ci = x.shape
    co = w_flat.shape[-1]
    OH = (H + 2 * pad - dilation * (kh - 1) - 1) // stride + 1
    OW = (W + 2 * pad - dilation * (kw - 1) - 1) // stride + 1
    xp = jnp.pad(x, ((0, 0), (pad, pad), (pad, pad), (0, 0)))
    patches = []
    for di in range(kh):
        for dj in range(kw):
            hs = di * dilation
            ws_ = dj * dilation
            patches.append(xp[:, hs:hs + stride * OH:stride,
                              ws_:ws_ + stride * OW:stride, :])
    a = jnp.stack(patches, axis=3).reshape(N * OH * OW, kh * kw * ci)
    res = residual.reshape(N * OH * OW, co) if residual is not None else None
    out = pallas_matmul(a, w_flat, residual=res)
    return out.reshape(N, OH, OW, co)


def conv2d_std(x, w_oihw, stride=1, dilation=1, residual=None, eps=1e-6):
    """StdConv2d (weight-standardized conv), NHWC bf16 activations, OIHW weights."""
    co, ci, kh, kw = w_oihw.shape
    pad = get_padding(kh, stride, dilation)
    w_std = standardize_weight(w_oihw, eps)                       # (co, ci*kh*kw) bf16
    if kh == 1 and kw == 1:
        return conv_1x1(x, jnp.transpose(w_std, (1, 0)), stride=stride,
                        residual=residual)
    w_taps = jnp.transpose(w_std.reshape(co, ci, kh, kw),
                           (2, 3, 1, 0)).reshape(kh * kw, ci, co)
    if residual is None and kh * kw <= 9 and stride == 1:
        return conv_kxk_fused_s1(x, w_taps, kh, kw, dilation, pad)
    if residual is None and kh * kw <= 9 and stride == 2 and dilation == 1:
        return conv_kxk_fused_s2(x, w_taps, kh, kw, pad)
    return conv_im2col(x, w_taps.reshape(kh * kw * ci, co), kh, kw, stride,
                       dilation, pad, residual)


# ----------------------------------------------------------------------------
# GroupNorm(+ReLU) kernels, grid over batch samples
# ----------------------------------------------------------------------------
def _gn_common(x, mcg, mgc, g, b, eps, inv_cnt, apply_act):
    s_c = jnp.sum(x, axis=0, keepdims=True)                              # (1, C)
    mean_g = jnp.dot(s_c, mcg, preferred_element_type=jnp.float32) * inv_cnt
    mean_c = jnp.dot(mean_g, mgc, preferred_element_type=jnp.float32)
    d = x - mean_c
    ss_c = jnp.sum(d * d, axis=0, keepdims=True)
    var_g = jnp.dot(ss_c, mcg, preferred_element_type=jnp.float32) * inv_cnt
    inv_c = jnp.dot(jax.lax.rsqrt(var_g + eps), mgc,
                    preferred_element_type=jnp.float32)
    y = d * inv_c * g + b
    if apply_act:
        y = jnp.maximum(y, 0.0)
    return y


def _gn_kernel(x_ref, mcg_ref, mgc_ref, g_ref, b_ref, o_ref, *,
               eps, inv_cnt, apply_act):
    x = x_ref[0].astype(jnp.float32)                                     # (HW, C)
    y = _gn_common(x, mcg_ref[...], mgc_ref[...], g_ref[...], b_ref[...],
                   eps, inv_cnt, apply_act)
    o_ref[0] = y.astype(o_ref.dtype)


def _gn_pool_kernel(x_ref, mcg_ref, mgc_ref, g_ref, b_ref, o_ref, *,
                    eps, inv_cnt, inv_hw):
    x = x_ref[0].astype(jnp.float32)
    y = _gn_common(x, mcg_ref[...], mgc_ref[...], g_ref[...], b_ref[...],
                   eps, inv_cnt, True)
    o_ref[0] = (jnp.sum(y, axis=0, keepdims=True) * inv_hw).astype(o_ref.dtype)


def _gn_inputs(x, gamma, beta, num_groups):
    N, H, W, C = x.shape
    G = num_groups
    Cg = C // G
    assert C % G == 0
    x3 = x.reshape(N, H * W, C)
    mcg = (jnp.arange(C)[:, None] // Cg == jnp.arange(G)[None, :]).astype(jnp.float32)
    mgc = mcg.T
    g = gamma.reshape(1, C).astype(jnp.float32)
    b = beta.reshape(1, C).astype(jnp.float32)
    return x3, mcg, mgc, g, b, Cg


def group_norm_act(x, gamma, beta, num_groups=32, eps=1e-5, apply_act=True):
    N, H, W, C = x.shape
    x3, mcg, mgc, g, b, Cg = _gn_inputs(x, gamma, beta, num_groups)
    G = num_groups
    out = pl.pallas_call(
        functools.partial(_gn_kernel, eps=eps, inv_cnt=1.0 / (H * W * Cg),
                          apply_act=apply_act),
        out_shape=jax.ShapeDtypeStruct((N, H * W, C), jnp.bfloat16),
        grid=(N,),
        in_specs=[pl.BlockSpec((1, H * W, C), lambda n: (n, 0, 0)),
                  pl.BlockSpec((C, G), lambda n: (0, 0)),
                  pl.BlockSpec((G, C), lambda n: (0, 0)),
                  pl.BlockSpec((1, C), lambda n: (0, 0)),
                  pl.BlockSpec((1, C), lambda n: (0, 0))],
        out_specs=pl.BlockSpec((1, H * W, C), lambda n: (n, 0, 0)),
        compiler_params=pltpu.CompilerParams(dimension_semantics=("parallel",)),
    )(x3, mcg, mgc, g, b)
    return out.reshape(N, H, W, C)


def group_norm_act_pool(x, gamma, beta, num_groups=32, eps=1e-5):
    """Final GroupNormAct fused with the global average pool -> (N, C) f32."""
    N, H, W, C = x.shape
    x3, mcg, mgc, g, b, Cg = _gn_inputs(x, gamma, beta, num_groups)
    G = num_groups
    out = pl.pallas_call(
        functools.partial(_gn_pool_kernel, eps=eps, inv_cnt=1.0 / (H * W * Cg),
                          inv_hw=1.0 / (H * W)),
        out_shape=jax.ShapeDtypeStruct((N, 1, C), jnp.float32),
        grid=(N,),
        in_specs=[pl.BlockSpec((1, H * W, C), lambda n: (n, 0, 0)),
                  pl.BlockSpec((C, G), lambda n: (0, 0)),
                  pl.BlockSpec((G, C), lambda n: (0, 0)),
                  pl.BlockSpec((1, C), lambda n: (0, 0)),
                  pl.BlockSpec((1, C), lambda n: (0, 0))],
        out_specs=pl.BlockSpec((1, 1, C), lambda n: (n, 0, 0)),
        compiler_params=pltpu.CompilerParams(dimension_semantics=("parallel",)),
    )(x3, mcg, mgc, g, b)
    return out.reshape(N, C)


# ----------------------------------------------------------------------------
# MaxPool2d(3, stride=2, padding=1) — per-sample kernel on pair re-layout
# ----------------------------------------------------------------------------
def _maxpool_kernel(x_ref, o_ref, *, OH, OW):
    x = x_ref[...]                                     # (4, Hp/2, Wp/2, C)
    y = None
    for di in range(3):
        for dj in range(3):
            t = x[(di % 2) * 2 + (dj % 2),
                  di // 2:di // 2 + OH,
                  dj // 2:dj // 2 + OW, :]
            y = t if y is None else jnp.maximum(y, t)
    o_ref[0] = y.astype(o_ref.dtype)


def max_pool2d_3x3_s2_p1(x):
    N, H, W, C = x.shape
    OH = (H + 2 - 3) // 2 + 1
    OW = (W + 2 - 3) // 2 + 1
    Hp, Wp = 2 * OH + 2, 2 * OW + 2
    xp = jnp.pad(x, ((0, 0), (1, Hp - H - 1), (1, Wp - W - 1), (0, 0)),
                 constant_values=float("-inf"))
    xr = xp.reshape(N, Hp // 2, 2, Wp // 2, 2, C)
    xr = jnp.transpose(xr, (0, 2, 4, 1, 3, 5)).reshape(N * 4, Hp // 2, Wp // 2, C)
    return pl.pallas_call(
        functools.partial(_maxpool_kernel, OH=OH, OW=OW),
        out_shape=jax.ShapeDtypeStruct((N, OH, OW, C), x.dtype),
        grid=(N,),
        in_specs=[pl.BlockSpec((4, Hp // 2, Wp // 2, C), lambda n: (n, 0, 0, 0))],
        out_specs=pl.BlockSpec((1, OH, OW, C), lambda n: (n, 0, 0, 0)),
        compiler_params=pltpu.CompilerParams(dimension_semantics=("parallel",)),
    )(xr)


# ----------------------------------------------------------------------------
# classifier head: (fused) global-avg-pooled features -> fc (1x1 conv) + bias
# ----------------------------------------------------------------------------
def classifier_head(pooled, fc_w, fc_b):
    nc, C = fc_w.shape[0], fc_w.shape[1]
    w = jnp.transpose(fc_w.reshape(nc, C), (1, 0)).astype(jnp.bfloat16)   # (C, NC)
    return pallas_matmul(pooled.astype(jnp.bfloat16), w, bias=fc_b,
                         out_dtype=jnp.float32)


# ----------------------------------------------------------------------------
# ResNetV2 model (PreActBottleneck, preact=True, StdConv2d, GroupNormAct(32))
# ----------------------------------------------------------------------------
NUM_GROUPS = 32


def preact_bottleneck(x, p):
    x_preact = group_norm_act(x, p["norm1_g"], p["norm1_b"], NUM_GROUPS)
    shortcut = x
    if p["downsample_w"] is not None:
        # DownsampleConv: 1x1 StdConv2d, stride=block stride, no norm (preact)
        shortcut = conv2d_std(x_preact, p["downsample_w"], stride=p["stride"])
    y = conv2d_std(x_preact, p["conv1_w"], stride=1)
    y = group_norm_act(y, p["norm2_g"], p["norm2_b"], NUM_GROUPS)
    y = conv2d_std(y, p["conv2_w"], stride=p["stride"], dilation=p["first_dilation"])
    y = group_norm_act(y, p["norm3_g"], p["norm3_b"], NUM_GROUPS)
    # conv3 (1x1) with the residual add fused into the matmul epilogue
    return conv2d_std(y, p["conv3_w"], stride=1, residual=shortcut)


def resnetv2_forward(params, x_nchw):
    # PyTorch-style NCHW input -> NHWC bf16 internal layout
    x = jnp.transpose(x_nchw, (0, 2, 3, 1)).astype(jnp.bfloat16)
    # stem: StdConv2d 7x7 s2 (preact -> no stem norm), MaxPool 3x3 s2 p1
    x = conv2d_std(x, params["stem_conv_w"], stride=2)
    x = max_pool2d_3x3_s2_p1(x)
    # stages of pre-activation bottlenecks
    for stage in params["stages"]:
        for blk in stage["blocks"]:
            x = preact_bottleneck(x, blk)
    # final norm (GroupNormAct) fused with global avg pool, then fc + flatten
    pooled = group_norm_act_pool(x, params["norm_g"], params["norm_b"], NUM_GROUPS)
    return classifier_head(pooled, params["fc_w"], params["fc_b"])


# ----------------------------------------------------------------------------
# deterministic parameter construction (mirrors ResNetV2.__init__ shapes)
# ----------------------------------------------------------------------------
def _kaiming_conv(key, shape):
    co, ci, kh, kw = shape
    fan_out = co * kh * kw
    std = (2.0 / fan_out) ** 0.5
    return std * jax.random.normal(key, shape, dtype=jnp.float32)


def build_params(key, layers, channels, num_classes, in_chans, stem_chs,
                 width_factor=1, output_stride=32, bottle_ratio=0.25):
    keys = iter(jax.random.split(key, 256))
    wf = width_factor
    params = {}

    stem_chs = make_div(stem_chs * wf)
    params["stem_conv_w"] = _kaiming_conv(next(keys), (stem_chs, in_chans, 7, 7))

    prev_chs = stem_chs
    curr_stride = 4
    dilation = 1
    stages = []
    for stage_idx, (depth, c) in enumerate(zip(layers, channels)):
        out_chs = make_div(c * wf)
        stride = 1 if stage_idx == 0 else 2
        if curr_stride >= output_stride:
            dilation *= stride
            stride = 1
        first_dilation = 1 if dilation in (1, 2) else 2
        blocks = []
        for block_idx in range(depth):
            bstride = stride if block_idx == 0 else 1
            mid_chs = make_div(out_chs * bottle_ratio)
            blk = {
                "stride": bstride,
                "first_dilation": first_dilation,
                "norm1_g": jnp.ones((prev_chs,), jnp.float32),
                "norm1_b": jnp.zeros((prev_chs,), jnp.float32),
                "conv1_w": _kaiming_conv(next(keys), (mid_chs, prev_chs, 1, 1)),
                "norm2_g": jnp.ones((mid_chs,), jnp.float32),
                "norm2_b": jnp.zeros((mid_chs,), jnp.float32),
                "conv2_w": _kaiming_conv(next(keys), (mid_chs, mid_chs, 3, 3)),
                "norm3_g": jnp.ones((mid_chs,), jnp.float32),
                "norm3_b": jnp.zeros((mid_chs,), jnp.float32),
                "conv3_w": _kaiming_conv(next(keys), (out_chs, mid_chs, 1, 1)),
                "downsample_w": (_kaiming_conv(next(keys), (out_chs, prev_chs, 1, 1))
                                 if block_idx == 0 else None),
            }
            blocks.append(blk)
            prev_chs = out_chs
            first_dilation = dilation
        curr_stride *= stride
        stages.append({"blocks": blocks})
    params["stages"] = stages

    num_features = prev_chs
    params["norm_g"] = jnp.ones((num_features,), jnp.float32)
    params["norm_b"] = jnp.zeros((num_features,), jnp.float32)
    # head.fc: Conv2d(num_features, num_classes, 1, bias=True), init N(0, 0.01), zero bias
    params["fc_w"] = 0.01 * jax.random.normal(next(keys),
                                              (num_classes, num_features, 1, 1),
                                              dtype=jnp.float32)
    params["fc_b"] = jnp.zeros((num_classes,), jnp.float32)
    return params


# ----------------------------------------------------------------------------
if __name__ == "__main__":
    key = jax.random.PRNGKey(0)
    pkey, xkey = jax.random.split(key)

    # Small ResNetV2: 2 stages of depth 1, channel counts kept divisible by the
    # 32 GroupNorm groups (mid_chs = make_div(128*0.25) = 32).
    params = build_params(
        pkey,
        layers=(1, 1),
        channels=(128, 128),
        num_classes=10,
        in_chans=3,
        stem_chs=32,
    )

    x = jax.random.normal(xkey, (2, 3, 32, 32), dtype=jnp.float32)  # NCHW like PyTorch
    fwd = jax.jit(lambda xx: resnetv2_forward(params, xx))
    logits = fwd(x)
    logits = jax.block_until_ready(logits)
    assert logits.shape == (2, 10), logits.shape
    assert bool(jnp.all(jnp.isfinite(logits)))
    print("KERNEL_OK")
</pallas_src>

<mosaic_0001>
module attributes {stable_mosaic.version = 11 : i64} {
  func.func @_ws_kernel(%arg0: i32, %arg1: memref<32x147xf32, #tpu.memory_space<vmem>>, %arg2: memref<32x147xbf16, #tpu.memory_space<vmem>>) attributes {dimension_semantics = [#tpu.dimension_semantics<parallel>], iteration_bounds = array<i64: 1>, scalar_prefetch = 0 : i64, scratch_operands = 0 : i64, tpu.core_type = #tpu.core_type<tc>, window_params = [{transform_indices = @transform_0, window_bounds = array<i64: 32, 147>}, {transform_indices = @transform_1, window_bounds = array<i64: 32, 147>}]} {
    %c0 = arith.constant 0 : index
    %c0_0 = arith.constant 0 : index
    %0 = vector.load %arg1[%c0, %c0_0] : memref<32x147xf32, #tpu.memory_space<vmem>>, vector<32x147xf32>
    %cst = arith.constant dense<0.000000e+00> : vector<32xf32>
    %1 = vector.multi_reduction <add>, %0, %cst [1] : vector<32x147xf32> to vector<32xf32>
    %2 = vector.shape_cast %1 : vector<32xf32> to vector<32x1xf32>
    %cst_1 = arith.constant 1.470000e+02 : f32
    %3 = vector.broadcast %cst_1 : f32 to vector<32x1xf32>
    %4 = arith.divf %2, %3 : vector<32x1xf32>
    %5 = vector.broadcast %4 : vector<32x1xf32> to vector<32x147xf32>
    %6 = arith.subf %0, %5 : vector<32x147xf32>
    %7 = arith.mulf %6, %6 : vector<32x147xf32>
    %cst_2 = arith.constant dense<0.000000e+00> : vector<32xf32>
    %8 = vector.multi_reduction <add>, %7, %cst_2 [1] : vector<32x147xf32> to vector<32xf32>
    %9 = vector.shape_cast %8 : vector<32xf32> to vector<32x1xf32>
    %cst_3 = arith.constant 1.470000e+02 : f32
    %10 = vector.broadcast %cst_3 : f32 to vector<32x1xf32>
    %11 = arith.divf %9, %10 : vector<32x1xf32>
    %cst_4 = arith.constant 9.99999997E-7 : f32
    %12 = vector.broadcast %cst_4 : f32 to vector<32x1xf32>
    %13 = arith.addf %11, %12 : vector<32x1xf32>
    %14 = math.rsqrt %13 : vector<32x1xf32>
    %15 = vector.broadcast %14 : vector<32x1xf32> to vector<32x147xf32>
    %16 = arith.mulf %6, %15 : vector<32x147xf32>
    %17 = arith.truncf %16 : vector<32x147xf32> to vector<32x147xbf16>
    %c0_5 = arith.constant 0 : index
    %c0_6 = arith.constant 0 : index
    %18 = vector.load %arg2[%c0_5, %c0_6] : memref<32x147xbf16, #tpu.memory_space<vmem>>, vector<32x147xbf16>
    tpu.vector_store %arg2[%c0_5, %c0_6], %17 {strides = array<i32>} : memref<32x147xbf16, #tpu.memory_space<vmem>>, vector<32x147xbf16>,
    return
  }
  func.func @transform_0(%arg0: i32) -> (i32, i32) {
    %c0_i32 = arith.constant 0 : i32
    %c0_i32_0 = arith.constant 0 : i32
    return %arg0, %c0_i32 : i32, i32
  }
  func.func @transform_1(%arg0: i32) -> (i32, i32) {
    %c0_i32 = arith.constant 0 : i32
    %c0_i32_0 = arith.constant 0 : i32
    return %arg0, %c0_i32 : i32, i32
  }
}

module attributes {stable_mosaic.version = 11 : i64} {
  func.func @_mm_kernel(%arg0: i32, %arg1: i32, %arg2: i32, %arg3: memref<256x147xbf16, #tpu.memory_space<vmem>>, %arg4: memref<147x32xbf16, #tpu.memory_space<vmem>>, %arg5: memref<256x32xbf16, #tpu.memory_space<vmem>>) attributes {dimension_semantics = [#tpu.dimension_semantics<parallel>, #tpu.dimension_semantics<parallel>, #tpu.dimension_semantics<arbitrary>], iteration_bounds = array<i64: 2, 1, 1>, scalar_prefetch = 0 : i64, scratch_operands = 0 : i64, tpu.core_type = #tpu.core_type<tc>, window_params = [{transform_indices = @transform_0, window_bounds = array<i64: 256, 147>}, {transform_indices = @transform_1, window_bounds = array<i64: 147, 32>}, {transform_indices = @transform_2, window_bounds = array<i64: 256, 32>}]} {
    %c0 = arith.constant 0 : index
    %c0_0 = arith.constant 0 : index
    %0 = vector.load %arg3[%c0, %c0_0] : memref<256x147xbf16, #tpu.memory_space<vmem>>, vector<256x147xbf16>
    %c0_1 = arith.constant 0 : index
    %c0_2 = arith.constant 0 : index
    %1 = vector.load %arg4[%c0_1, %c0_2] : memref<147x32xbf16, #tpu.memory_space<vmem>>, vector<147x32xbf16>
    %cst = arith.constant dense<0.000000e+00> : vector<256x32xf32>
    %2 = tpu.matmul %0, %1, %cst {dimension_numbers = #tpu.dot_dimension_numbers<[1], [0], [0], [1], [0, 0, 1, 1], [], []>} : vector<256x147xbf16>, vector<147x32xbf16>, vector<256x32xf32> -> vector<256x32xf32>
    %3 = arith.truncf %2 : vector<256x32xf32> to vector<256x32xbf16>
    %c0_3 = arith.constant 0 : index
    %c0_4 = arith.constant 0 : index
    %4 = vector.load %arg5[%c0_3, %c0_4] : memref<256x32xbf16, #tpu.memory_space<vmem>>, vector<256x32xbf16>
    tpu.vector_store %arg5[%c0_3, %c0_4], %3 {strides = array<i32>} : memref<256x32xbf16, #tpu.memory_space<vmem>>, vector<256x32xbf16>,
    return
  }
  func.func @transform_0(%arg0: i32, %arg1: i32, %arg2: i32) -> (i32, i32) {
    %c0_i32 = arith.constant 0 : i32
    return %arg0, %arg2 : i32, i32
  }
  func.func @transform_1(%arg0: i32, %arg1: i32, %arg2: i32) -> (i32, i32) {
    %c0_i32 = arith.constant 0 : i32
    return %arg2, %arg1 : i32, i32
  }
  func.func @transform_2(%arg0: i32, %arg1: i32, %arg2: i32) -> (i32, i32) {
    %c0_i32 = arith.constant 0 : i32
    return %arg0, %arg1 : i32, i32
  }
}

module attributes {stable_mosaic.version = 11 : i64} {
  func.func @_maxpool_kernel(%arg0: i32, %arg1: memref<4x9x9x32xbf16, #tpu.memory_space<vmem>>, %arg2: memref<1x8x8x32xbf16, #tpu.memory_space<vmem>>) attributes {dimension_semantics = [#tpu.dimension_semantics<parallel>], iteration_bounds = array<i64: 2>, scalar_prefetch = 0 : i64, scratch_operands = 0 : i64, tpu.core_type = #tpu.core_type<tc>, window_params = [{transform_indices = @transform_0, window_bounds = array<i64: 4, 9, 9, 32>}, {transform_indices = @transform_1, window_bounds = array<i64: 1, 8, 8, 32>}]} {
    %c0 = arith.constant 0 : index
    %c0_0 = arith.constant 0 : index
    %c0_1 = arith.constant 0 : index
    %c0_2 = arith.constant 0 : index
    %0 = vector.load %arg1[%c0, %c0_0, %c0_1, %c0_2] : memref<4x9x9x32xbf16, #tpu.memory_space<vmem>>, vector<4x9x9x32xbf16>
    %1 = vector.extract_strided_slice %0 {offsets = [0, 0, 0, 0], sizes = [1, 8, 8, 32], strides = [1, 1, 1, 1]} : vector<4x9x9x32xbf16> to vector<1x8x8x32xbf16>
    %2 = vector.shape_cast %1 : vector<1x8x8x32xbf16> to vector<8x8x32xbf16>
    %3 = vector.extract_strided_slice %0 {offsets = [1, 0, 0, 0], sizes = [1, 8, 8, 32], strides = [1, 1, 1, 1]} : vector<4x9x9x32xbf16> to vector<1x8x8x32xbf16>
    %4 = vector.shape_cast %3 : vector<1x8x8x32xbf16> to vector<8x8x32xbf16>
    %5 = arith.maximumf %2, %4 : vector<8x8x32xbf16>
    %6 = vector.extract_strided_slice %0 {offsets = [0, 0, 1, 0], sizes = [1, 8, 8, 32], strides = [1, 1, 1, 1]} : vector<4x9x9x32xbf16> to vector<1x8x8x32xbf16>
    %7 = vector.shape_cast %6 : vector<1x8x8x32xbf16> to vector<8x8x32xbf16>
    %8 = arith.maximumf %5, %7 : vector<8x8x32xbf16>
    %9 = vector.extract_strided_slice %0 {offsets = [2, 0, 0, 0], sizes = [1, 8, 8, 32], strides = [1, 1, 1, 1]} : vector<4x9x9x32xbf16> to vector<1x8x8x32xbf16>
    %10 = vector.shape_cast %9 : vector<1x8x8x32xbf16> to vector<8x8x32xbf16>
    %11 = arith.maximumf %8, %10 : vector<8x8x32xbf16>
    %12 = vector.extract_strided_slice %0 {offsets = [3, 0, 0, 0], sizes = [1, 8, 8, 32], strides = [1, 1, 1, 1]} : vector<4x9x9x32xbf16> to vector<1x8x8x32xbf16>
    %13 = vector.shape_cast %12 : vector<1x8x8x32xbf16> to vector<8x8x32xbf16>
    %14 = arith.maximumf %11, %13 : vector<8x8x32xbf16>
    %15 = vector.extract_strided_slice %0 {offsets = [2, 0, 1, 0], sizes = [1, 8, 8, 32], strides = [1, 1, 1, 1]} : vector<4x9x9x32xbf16> to vector<1x8x8x32xbf16>
    %16 = vector.shape_cast %15 : vector<1x8x8x32xbf16> to vector<8x8x32xbf16>
    %17 = arith.maximumf %14, %16 : vector<8x8x32xbf16>
    %18 = vector.extract_strided_slice %0 {offsets = [0, 1, 0, 0], sizes = [1, 8, 8, 32], strides = [1, 1, 1, 1]} : vector<4x9x9x32xbf16> to vector<1x8x8x32xbf16>
    %19 = vector.shape_cast %18 : vector<1x8x8x32xbf16> to vector<8x8x32xbf16>
    %20 = arith.maximumf %17, %19 : vector<8x8x32xbf16>
    %21 = vector.extract_strided_slice %0 {offsets = [1, 1, 0, 0], sizes = [1, 8, 8, 32], strides = [1, 1, 1, 1]} : vector<4x9x9x32xbf16> to vector<1x8x8x32xbf16>
    %22 = vector.shape_cast %21 : vector<1x8x8x32xbf16> to vector<8x8x32xbf16>
    %23 = arith.maximumf %20, %22 : vector<8x8x32xbf16>
    %24 = vector.extract_strided_slice %0 {offsets = [0, 1, 1, 0], sizes = [1, 8, 8, 32], strides = [1, 1, 1, 1]} : vector<4x9x9x32xbf16> to vector<1x8x8x32xbf16>
    %25 = vector.shape_cast %24 : vector<1x8x8x32xbf16> to vector<8x8x32xbf16>
    %26 = arith.maximumf %23, %25 : vector<8x8x32xbf16>
    %c0_3 = arith.constant 0 : index
    %c0_4 = arith.constant 0 : index
    %c0_5 = arith.constant 0 : index
    %c0_6 = arith.constant 0 : index
    %27 = vector.load %arg2[%c0_3, %c0_4, %c0_5, %c0_6] : memref<1x8x8x32xbf16, #tpu.memory_space<vmem>>, vector<1x8x8x32xbf16>
    %28 = vector.shape_cast %27 : vector<1x8x8x32xbf16> to vector<8x8x32xbf16>
    %29 = vector.shape_cast %26 : vector<8x8x32xbf16> to vector<1x8x8x32xbf16>
    tpu.vector_store %arg2[%c0_3, %c0_4, %c0_5, %c0_6], %29 {strides = array<i32>} : memref<1x8x8x32xbf16, #tpu.memory_space<vmem>>, vector<1x8x8x32xbf16>,
    return
  }
  func.func @transform_0(%arg0: i32) -> (i32, i32, i32, i32) {
    %c0_i32 = arith.constant 0 : i32
    %c0_i32_0 = arith.constant 0 : i32
    %c0_i32_1 = arith.constant 0 : i32
    %c0_i32_2 = arith.constant 0 : i32
    return %arg0, %c0_i32, %c0_i32_0, %c0_i32_1 : i32, i32, i32, i32
  }
  func.func @transform_1(%arg0: i32) -> (i32, i32, i32, i32) {
    %c0_i32 = arith.constant 0 : i32
    %c0_i32_0 = arith.constant 0 : i32
    %c0_i32_1 = arith.constant 0 : i32
    %c0_i32_2 = arith.constant 0 : i32
    return %arg0, %c0_i32, %c0_i32_0, %c0_i32_1 : i32, i32, i32, i32
  }
}

module attributes {stable_mosaic.version = 11 : i64} {
  func.func @_gn_kernel(%arg0: i32, %arg1: memref<1x64x32xbf16, #tpu.memory_space<vmem>>, %arg2: memref<32x32xf32, #tpu.memory_space<vmem>>, %arg3: memref<32x32xf32, #tpu.memory_space<vmem>>, %arg4: memref<1x32xf32, #tpu.memory_space<vmem>>, %arg5: memref<1x32xf32, #tpu.memory_space<vmem>>, %arg6: memref<1x64x32xbf16, #tpu.memory_space<vmem>>) attributes {dimension_semantics = [#tpu.dimension_semantics<parallel>], iteration_bounds = array<i64: 2>, scalar_prefetch = 0 : i64, scratch_operands = 0 : i64, tpu.core_type = #tpu.core_type<tc>, window_params = [{transform_indices = @transform_0, window_bounds = array<i64: 1, 64, 32>}, {pipeline_mode = #tpu.pipeline_mode<synchronous>, transform_indices = @transform_1, window_bounds = array<i64: 32, 32>}, {pipeline_mode = #tpu.pipeline_mode<synchronous>, transform_indices = @transform_2, window_bounds = array<i64: 32, 32>}, {pipeline_mode = #tpu.pipeline_mode<synchronous>, transform_indices = @transform_3, window_bounds = array<i64: 1, 32>}, {pipeline_mode = #tpu.pipeline_mode<synchronous>, transform_indices = @transform_4, window_bounds = array<i64: 1, 32>}, {transform_indices = @transform_5, window_bounds = array<i64: 1, 64, 32>}]} {
    %c0 = arith.constant 0 : index
    %c0_0 = arith.constant 0 : index
    %c0_1 = arith.constant 0 : index
    %0 = vector.load %arg1[%c0, %c0_0, %c0_1] : memref<1x64x32xbf16, #tpu.memory_space<vmem>>, vector<1x64x32xbf16>
    %1 = vector.shape_cast %0 : vector<1x64x32xbf16> to vector<64x32xbf16>
    %2 = arith.extf %1 : vector<64x32xbf16> to vector<64x32xf32>
    %c0_2 = arith.constant 0 : index
    %c0_3 = arith.constant 0 : index
    %3 = vector.load %arg2[%c0_2, %c0_3] : memref<32x32xf32, #tpu.memory_space<vmem>>, vector<32x32xf32>
    %c0_4 = arith.constant 0 : index
    %c0_5 = arith.constant 0 : index
    %4 = vector.load %arg3[%c0_4, %c0_5] : memref<32x32xf32, #tpu.memory_space<vmem>>, vector<32x32xf32>
    %c0_6 = arith.constant 0 : index
    %c0_7 = arith.constant 0 : index
    %5 = vector.load %arg4[%c0_6, %c0_7] : memref<1x32xf32, #tpu.memory_space<vmem>>, vector<1x32xf32>
    %c0_8 = arith.constant 0 : index
    %c0_9 = arith.constant 0 : index
    %6 = vector.load %arg5[%c0_8, %c0_9] : memref<1x32xf32, #tpu.memory_space<vmem>>, vector<1x32xf32>
    %cst = arith.constant dense<0.000000e+00> : vector<32xf32>
    %7 = vector.multi_reduction <add>, %2, %cst [0] : vector<64x32xf32> to vector<32xf32>
    %8 = vector.shape_cast %7 : vector<32xf32> to vector<1x32xf32>
    %cst_10 = arith.constant dense<0.000000e+00> : vector<1x32xf32>
    %9 = tpu.matmul %8, %3, %cst_10 {dimension_numbers = #tpu.dot_dimension_numbers<[1], [0], [0], [1], [0, 0, 1, 1], [], []>} : vector<1x32xf32>, vector<32x32xf32>, vector<1x32xf32> -> vector<1x32xf32>
    %cst_11 = arith.constant 1.562500e-02 : f32
    %10 = vector.broadcast %cst_11 : f32 to vector<1x32xf32>
    %11 = arith.mulf %9, %10 : vector<1x32xf32>
    %cst_12 = arith.constant dense<0.000000e+00> : vector<1x32xf32>
    %12 = tpu.matmul %11, %4, %cst_12 {dimension_numbers = #tpu.dot_dimension_numbers<[1], [0], [0], [1], [0, 0, 1, 1], [], []>} : vector<1x32xf32>, vector<32x32xf32>, vector<1x32xf32> -> vector<1x32xf32>
    %13 = vector.broadcast %12 : vector<1x32xf32> to vector<64x32xf32>
    %14 = arith.subf %2, %13 : vector<64x32xf32>
    %15 = arith.mulf %14, %14 : vector<64x32xf32>
    %cst_13 = arith.constant dense<0.000000e+00> : vector<32xf32>
    %16 = vector.multi_reduction <add>, %15, %cst_13 [0] : vector<64x32xf32> to vector<32xf32>
    %17 = vector.shape_cast %16 : vector<32xf32> to vector<1x32xf32>
    %cst_14 = arith.constant dense<0.000000e+00> : vector<1x32xf32>
    %18 = tpu.matmul %17, %3, %cst_14 {dimension_numbers = #tpu.dot_dimension_numbers<[1], [0], [0], [1], [0, 0, 1, 1], [], []>} : vector<1x32xf32>, vector<32x32xf32>, vector<1x32xf32> -> vector<1x32xf32>
    %cst_15 = arith.constant 1.562500e-02 : f32
    %19 = vector.broadcast %cst_15 : f32 to vector<1x32xf32>
    %20 = arith.mulf %18, %19 : vector<1x32xf32>
    %cst_16 = arith.constant 9.99999974E-6 : f32
    %21 = vector.broadcast %cst_16 : f32 to vector<1x32xf32>
    %22 = arith.addf %20, %21 : vector<1x32xf32>
    %23 = math.rsqrt %22 : vector<1x32xf32>
    %cst_17 = arith.constant dense<0.000000e+00> : vector<1x32xf32>
    %24 = tpu.matmul %23, %4, %cst_17 {dimension_numbers = #tpu.dot_dimension_numbers<[1], [0], [0], [1], [0, 0, 1, 1], [], []>} : vector<1x32xf32>, vector<32x32xf32>, vector<1x32xf32> -> vector<1x32xf32>
    %25 = vector.broadcast %24 : vector<1x32xf32> to vector<64x32xf32>
    %26 = arith.mulf %14, %25 : vector<64x32xf32>
    %27 = vector.broadcast %5 : vector<1x32xf32> to vector<64x32xf32>
    %28 = arith.mulf %26, %27 : vector<64x32xf32>
    %29 = vector.broadcast %6 : vector<1x32xf32> to vector<64x32xf32>
    %30 = arith.addf %28, %29 : vector<64x32xf32>
    %cst_18 = arith.constant 0.000000e+00 : f32
    %31 = vector.broadcast %cst_18 : f32 to vector<64x32xf32>
    %32 = arith.maximumf %30, %31 : vector<64x32xf32>
    %33 = arith.truncf %32 : vector<64x32xf32> to vector<64x32xbf16>
    %c0_19 = arith.constant 0 : index
    %c0_20 = arith.constant 0 : index
    %c0_21 = arith.constant 0 : index
    %34 = vector.load %arg6[%c0_19, %c0_20, %c0_21] : memref<1x64x32xbf16, #tpu.memory_space<vmem>>, vector<1x64x32xbf16>
    %35 = vector.shape_cast %34 : vector<1x64x32xbf16> to vector<64x32xbf16>
    %36 = vector.shape_cast %33 : vector<64x32xbf16> to vector<1x64x32xbf16>
    tpu.vector_store %arg6[%c0_19, %c0_20, %c0_21], %36 {strides = array<i32>} : memref<1x64x32xbf16, #tpu.memory_space<vmem>>, vector<1x64x32xbf16>,
    return
  }
  func.func @transform_0(%arg0: i32) -> (i32, i32, i32) {
    %c0_i32 = arith.constant 0 : i32
    %c0_i32_0 = arith.constant 0 : i32
    %c0_i32_1 = arith.constant 0 : i32
    return %arg0, %c0_i32, %c0_i32_0 : i32, i32, i32
  }
  func.func @transform_1(%arg0: i32) -> (i32, i32) {
    %c0_i32 = arith.constant 0 : i32
    %c0_i32_0 = arith.constant 0 : i32
    %c0_i32_1 = arith.constant 0 : i32
    return %c0_i32, %c0_i32_0 : i32, i32
  }
  func.func @transform_2(%arg0: i32) -> (i32, i32) {
    %c0_i32 = arith.constant 0 : i32
    %c0_i32_0 = arith.constant 0 : i32
    %c0_i32_1 = arith.constant 0 : i32
    return %c0_i32, %c0_i32_0 : i32, i32
  }
  func.func @transform_3(%arg0: i32) -> (i32, i32) {
    %c0_i32 = arith.constant 0 : i32
    %c0_i32_0 = arith.constant 0 : i32
    %c0_i32_1 = arith.constant 0 : i32
    return %c0_i32, %c0_i32_0 : i32, i32
  }
  func.func @transform_4(%arg0: i32) -> (i32, i32) {
    %c0_i32 = arith.constant 0 : i32
    %c0_i32_0 = arith.constant 0 : i32
    %c0_i32_1 = arith.constant 0 : i32
    return %c0_i32, %c0_i32_0 : i32, i32
  }
  func.func @transform_5(%arg0: i32) -> (i32, i32, i32) {
    %c0_i32 = arith.constant 0 : i32
    %c0_i32_0 = arith.constant 0 : i32
    %c0_i32_1 = arith.constant 0 : i32
    return %arg0, %c0_i32, %c0_i32_0 : i32, i32, i32
  }
}

module attributes {stable_mosaic.version = 11 : i64} {
  func.func @_ws_kernel(%arg0: i32, %arg1: memref<32x32xf32, #tpu.memory_space<vmem>>, %arg2: memref<32x32xbf16, #tpu.memory_space<vmem>>) attributes {dimension_semantics = [#tpu.dimension_semantics<parallel>], iteration_bounds = array<i64: 1>, scalar_prefetch = 0 : i64, scratch_operands = 0 : i64, tpu.core_type = #tpu.core_type<tc>, window_params = [{transform_indices = @transform_0, window_bounds = array<i64: 32, 32>}, {transform_indices = @transform_1, window_bounds = array<i64: 32, 32>}]} {
    %c0 = arith.constant 0 : index
    %c0_0 = arith.constant 0 : index
    %0 = vector.load %arg1[%c0, %c0_0] : memref<32x32xf32, #tpu.memory_space<vmem>>, vector<32x32xf32>
    %cst = arith.constant dense<0.000000e+00> : vector<32xf32>
    %1 = vector.multi_reduction <add>, %0, %cst [1] : vector<32x32xf32> to vector<32xf32>
    %2 = vector.shape_cast %1 : vector<32xf32> to vector<32x1xf32>
    %cst_1 = arith.constant 3.200000e+01 : f32
    %3 = vector.broadcast %cst_1 : f32 to vector<32x1xf32>
    %4 = arith.divf %2, %3 : vector<32x1xf32>
    %5 = vector.broadcast %4 : vector<32x1xf32> to vector<32x32xf32>
    %6 = arith.subf %0, %5 : vector<32x32xf32>
    %7 = arith.mulf %6, %6 : vector<32x32xf32>
    %cst_2 = arith.constant dense<0.000000e+00> : vector<32xf32>
    %8 = vector.multi_reduction <add>, %7, %cst_2 [1] : vector<32x32xf32> to vector<32xf32>
    %9 = vector.shape_cast %8 : vector<32xf32> to vector<32x1xf32>
    %cst_3 = arith.constant 3.200000e+01 : f32
    %10 = vector.broadcast %cst_3 : f32 to vector<32x1xf32>
    %11 = arith.divf %9, %10 : vector<32x1xf32>
    %cst_4 = arith.constant 9.99999997E-7 : f32
    %12 = vector.broadcast %cst_4 : f32 to vector<32x1xf32>
    %13 = arith.addf %11, %12 : vector<32x1xf32>
    %14 = math.rsqrt %13 : vector<32x1xf32>
    %15 = vector.broadcast %14 : vector<32x1xf32> to vector<32x32xf32>
    %16 = arith.mulf %6, %15 : vector<32x32xf32>
    %17 = arith.truncf %16 : vector<32x32xf32> to vector<32x32xbf16>
    %c0_5 = arith.constant 0 : index
    %c0_6 = arith.constant 0 : index
    %18 = vector.load %arg2[%c0_5, %c0_6] : memref<32x32xbf16, #tpu.memory_space<vmem>>, vector<32x32xbf16>
    tpu.vector_store %arg2[%c0_5, %c0_6], %17 {strides = array<i32>} : memref<32x32xbf16, #tpu.memory_space<vmem>>, vector<32x32xbf16>,
    return
  }
  func.func @transform_0(%arg0: i32) -> (i32, i32) {
    %c0_i32 = arith.constant 0 : i32
    %c0_i32_0 = arith.constant 0 : i32
    return %arg0, %c0_i32 : i32, i32
  }
  func.func @transform_1(%arg0: i32) -> (i32, i32) {
    %c0_i32 = arith.constant 0 : i32
    %c0_i32_0 = arith.constant 0 : i32
    return %arg0, %c0_i32 : i32, i32
  }
}

module attributes {stable_mosaic.version = 11 : i64} {
  func.func @_mm_kernel(%arg0: i32, %arg1: i32, %arg2: i32, %arg3: memref<128x32xbf16, #tpu.memory_space<vmem>>, %arg4: memref<32x32xbf16, #tpu.memory_space<vmem>>, %arg5: memref<128x32xbf16, #tpu.memory_space<vmem>>) attributes {dimension_semantics = [#tpu.dimension_semantics<parallel>, #tpu.dimension_semantics<parallel>, #tpu.dimension_semantics<arbitrary>], iteration_bounds = array<i64: 1, 1, 1>, scalar_prefetch = 0 : i64, scratch_operands = 0 : i64, tpu.core_type = #tpu.core_type<tc>, window_params = [{transform_indices = @transform_0, window_bounds = array<i64: 128, 32>}, {transform_indices = @transform_1, window_bounds = array<i64: 32, 32>}, {transform_indices = @transform_2, window_bounds = array<i64: 128, 32>}]} {
    %c0 = arith.constant 0 : index
    %c0_0 = arith.constant 0 : index
    %0 = vector.load %arg3[%c0, %c0_0] : memref<128x32xbf16, #tpu.memory_space<vmem>>, vector<128x32xbf16>
    %c0_1 = arith.constant 0 : index
    %c0_2 = arith.constant 0 : index
    %1 = vector.load %arg4[%c0_1, %c0_2] : memref<32x32xbf16, #tpu.memory_space<vmem>>, vector<32x32xbf16>
    %cst = arith.constant dense<0.000000e+00> : vector<128x32xf32>
    %2 = tpu.matmul %0, %1, %cst {dimension_numbers = #tpu.dot_dimension_numbers<[1], [0], [0], [1], [0, 0, 1, 1], [], []>} : vector<128x32xbf16>, vector<32x32xbf16>, vector<128x32xf32> -> vector<128x32xf32>
    %3 = arith.truncf %2 : vector<128x32xf32> to vector<128x32xbf16>
    %c0_3 = arith.constant 0 : index
    %c0_4 = arith.constant 0 : index
    %4 = vector.load %arg5[%c0_3, %c0_4] : memref<128x32xbf16, #tpu.memory_space<vmem>>, vector<128x32xbf16>
    tpu.vector_store %arg5[%c0_3, %c0_4], %3 {strides = array<i32>} : memref<128x32xbf16, #tpu.memory_space<vmem>>, vector<128x32xbf16>,
    return
  }
  func.func @transform_0(%arg0: i32, %arg1: i32, %arg2: i32) -> (i32, i32) {
    %c0_i32 = arith.constant 0 : i32
    return %arg0, %arg2 : i32, i32
  }
  func.func @transform_1(%arg0: i32, %arg1: i32, %arg2: i32) -> (i32, i32) {
    %c0_i32 = arith.constant 0 : i32
    return %arg2, %arg1 : i32, i32
  }
  func.func @transform_2(%arg0: i32, %arg1: i32, %arg2: i32) -> (i32, i32) {
    %c0_i32 = arith.constant 0 : i32
    return %arg0, %arg1 : i32, i32
  }
}

module attributes {stable_mosaic.version = 11 : i64} {
  func.func @_ws_kernel(%arg0: i32, %arg1: memref<32x288xf32, #tpu.memory_space<vmem>>, %arg2: memref<32x288xbf16, #tpu.memory_space<vmem>>) attributes {dimension_semantics = [#tpu.dimension_semantics<parallel>], iteration_bounds = array<i64: 1>, scalar_prefetch = 0 : i64, scratch_operands = 0 : i64, tpu.core_type = #tpu.core_type<tc>, window_params = [{transform_indices = @transform_0, window_bounds = array<i64: 32, 288>}, {transform_indices = @transform_1, window_bounds = array<i64: 32, 288>}]} {
    %c0 = arith.constant 0 : index
    %c0_0 = arith.constant 0 : index
    %0 = vector.load %arg1[%c0, %c0_0] : memref<32x288xf32, #tpu.memory_space<vmem>>, vector<32x288xf32>
    %cst = arith.constant dense<0.000000e+00> : vector<32xf32>
    %1 = vector.multi_reduction <add>, %0, %cst [1] : vector<32x288xf32> to vector<32xf32>
    %2 = vector.shape_cast %1 : vector<32xf32> to vector<32x1xf32>
    %cst_1 = arith.constant 2.880000e+02 : f32
    %3 = vector.broadcast %cst_1 : f32 to vector<32x1xf32>
    %4 = arith.divf %2, %3 : vector<32x1xf32>
    %5 = vector.broadcast %4 : vector<32x1xf32> to vector<32x288xf32>
    %6 = arith.subf %0, %5 : vector<32x288xf32>
    %7 = arith.mulf %6, %6 : vector<32x288xf32>
    %cst_2 = arith.constant dense<0.000000e+00> : vector<32xf32>
    %8 = vector.multi_reduction <add>, %7, %cst_2 [1] : vector<32x288xf32> to vector<32xf32>
    %9 = vector.shape_cast %8 : vector<32xf32> to vector<32x1xf32>
    %cst_3 = arith.constant 2.880000e+02 : f32
    %10 = vector.broadcast %cst_3 : f32 to vector<32x1xf32>
    %11 = arith.divf %9, %10 : vector<32x1xf32>
    %cst_4 = arith.constant 9.99999997E-7 : f32
    %12 = vector.broadcast %cst_4 : f32 to vector<32x1xf32>
    %13 = arith.addf %11, %12 : vector<32x1xf32>
    %14 = math.rsqrt %13 : vector<32x1xf32>
    %15 = vector.broadcast %14 : vector<32x1xf32> to vector<32x288xf32>
    %16 = arith.mulf %6, %15 : vector<32x288xf32>
    %17 = arith.truncf %16 : vector<32x288xf32> to vector<32x288xbf16>
    %c0_5 = arith.constant 0 : index
    %c0_6 = arith.constant 0 : index
    %18 = vector.load %arg2[%c0_5, %c0_6] : memref<32x288xbf16, #tpu.memory_space<vmem>>, vector<32x288xbf16>
    tpu.vector_store %arg2[%c0_5, %c0_6], %17 {strides = array<i32>} : memref<32x288xbf16, #tpu.memory_space<vmem>>, vector<32x288xbf16>,
    return
  }
  func.func @transform_0(%arg0: i32) -> (i32, i32) {
    %c0_i32 = arith.constant 0 : i32
    %c0_i32_0 = arith.constant 0 : i32
    return %arg0, %c0_i32 : i32, i32
  }
  func.func @transform_1(%arg0: i32) -> (i32, i32) {
    %c0_i32 = arith.constant 0 : i32
    %c0_i32_0 = arith.constant 0 : i32
    return %arg0, %c0_i32 : i32, i32
  }
}

module attributes {stable_mosaic.version = 11 : i64} {
  func.func @_conv_s1_kernel(%arg0: i32, %arg1: memref<1x10x10x32xbf16, #tpu.memory_space<vmem>>, %arg2: memref<9x32x32xbf16, #tpu.memory_space<vmem>>, %arg3: memref<1x8x8x32xbf16, #tpu.memory_space<vmem>>, %arg4: memref<64x32xf32, #tpu.memory_space<vmem>>) attributes {dimension_semantics = [#tpu.dimension_semantics<parallel>], iteration_bounds = array<i64: 2>, scalar_prefetch = 0 : i64, scratch_operands = 1 : i64, tpu.core_type = #tpu.core_type<tc>, window_params = [{transform_indices = @transform_0, window_bounds = array<i64: 1, 10, 10, 32>}, {pipeline_mode = #tpu.pipeline_mode<synchronous>, transform_indices = @transform_1, window_bounds = array<i64: 9, 32, 32>}, {transform_indices = @transform_2, window_bounds = array<i64: 1, 8, 8, 32>}]} {
    %c0 = arith.constant 0 : index
    %c0_0 = arith.constant 0 : index
    %c0_1 = arith.constant 0 : index
    %c0_2 = arith.constant 0 : index
    %0 = vector.load %arg1[%c0, %c0_0, %c0_1, %c0_2] : memref<1x10x10x32xbf16, #tpu.memory_space<vmem>>, vector<1x10x10x32xbf16>
    %1 = vector.shape_cast %0 : vector<1x10x10x32xbf16> to vector<10x10x32xbf16>
    %2 = vector.extract_strided_slice %1 {offsets = [0, 0, 0], sizes = [8, 8, 32], strides = [1, 1, 1]} : vector<10x10x32xbf16> to vector<8x8x32xbf16>
    %3 = vector.shape_cast %2 : vector<8x8x32xbf16> to vector<64x32xbf16>
    %c0_3 = arith.constant 0 : index
    %c0_4 = arith.constant 0 : index
    %c0_5 = arith.constant 0 : index
    %4 = vector.load %arg2[%c0_3, %c0_4, %c0_5] : memref<9x32x32xbf16, #tpu.memory_space<vmem>>, vector<1x32x32xbf16>
    %5 = vector.shape_cast %4 : vector<1x32x32xbf16> to vector<32x32xbf16>
    %cst = arith.constant dense<0.000000e+00> : vector<64x32xf32>
    %6 = tpu.matmul %3, %5, %cst {dimension_numbers = #tpu.dot_dimension_numbers<[1], [0], [0], [1], [0, 0, 1, 1], [], []>} : vector<64x32xbf16>, vector<32x32xbf16>, vector<64x32xf32> -> vector<64x32xf32>
    %c0_6 = arith.constant 0 : index
    %c0_7 = arith.constant 0 : index
    %7 = vector.load %arg4[%c0_6, %c0_7] : memref<64x32xf32, #tpu.memory_space<vmem>>, vector<64x32xf32>
    tpu.vector_store %arg4[%c0_6, %c0_7], %6 {strides = array<i32>} : memref<64x32xf32, #tpu.memory_space<vmem>>, vector<64x32xf32>,
    %8 = vector.extract_strided_slice %1 {offsets = [0, 1, 0], sizes = [8, 8, 32], strides = [1, 1, 1]} : vector<10x10x32xbf16> to vector<8x8x32xbf16>
    %9 = vector.shape_cast %8 : vector<8x8x32xbf16> to vector<64x32xbf16>
    %c1 = arith.constant 1 : index
    %c0_8 = arith.constant 0 : index
    %c0_9 = arith.constant 0 : index
    %10 = vector.load %arg2[%c1, %c0_8, %c0_9] : memref<9x32x32xbf16, #tpu.memory_space<vmem>>, vector<1x32x32xbf16>
    %11 = vector.shape_cast %10 : vector<1x32x32xbf16> to vector<32x32xbf16>
    %cst_10 = arith.constant dense<0.000000e+00> : vector<64x32xf32>
    %12 = tpu.matmul %9, %11, %cst_10 {dimension_numbers = #tpu.dot_dimension_numbers<[1], [0], [0], [1], [0, 0, 1, 1], [], []>} : vector<64x32xbf16>, vector<32x32xbf16>, vector<64x32xf32> -> vector<64x32xf32>
    %c0_11 = arith.constant 0 : index
    %c0_12 = arith.constant 0 : index
    %13 = vector.load %arg4[%c0_11, %c0_12] : memref<64x32xf32, #tpu.memory_space<vmem>>, vector<64x32xf32>
    %14 = arith.addf %13, %12 : vector<64x32xf32>
    %c0_13 = arith.constant 0 : index
    %c0_14 = arith.constant 0 : index
    %15 = vector.load %arg4[%c0_13, %c0_14] : memref<64x32xf32, #tpu.memory_space<vmem>>, vector<64x32xf32>
    tpu.vector_store %arg4[%c0_13, %c0_14], %14 {strides = array<i32>} : memref<64x32xf32, #tpu.memory_space<vmem>>, vector<64x32xf32>,
    %16 = vector.extract_strided_slice %1 {offsets = [0, 2, 0], sizes = [8, 8, 32], strides = [1, 1, 1]} : vector<10x10x32xbf16> to vector<8x8x32xbf16>
    %17 = vector.shape_cast %16 : vector<8x8x32xbf16> to vector<64x32xbf16>
    %c2 = arith.constant 2 : index
    %c0_15 = arith.constant 0 : index
    %c0_16 = arith.constant 0 : index
    %18 = vector.load %arg2[%c2, %c0_15, %c0_16] : memref<9x32x32xbf16, #tpu.memory_space<vmem>>, vector<1x32x32xbf16>
    %19 = vector.shape_cast %18 : vector<1x32x32xbf16> to vector<32x32xbf16>
    %cst_17 = arith.constant dense<0.000000e+00> : vector<64x32xf32>
    %20 = tpu.matmul %17, %19, %cst_17 {dimension_numbers = #tpu.dot_dimension_numbers<[1], [0], [0], [1], [0, 0, 1, 1], [], []>} : vector<64x32xbf16>, vector<32x32xbf16>, vector<64x32xf32> -> vector<64x32xf32>
    %c0_18 = arith.constant 0 : index
    %c0_19 = arith.constant 0 : index
    %21 = vector.load %arg4[%c0_18, %c0_19] : memref<64x32xf32, #tpu.memory_space<vmem>>, vector<64x32xf32>
    %22 = arith.addf %21, %20 : vector<64x32xf32>
    %c0_20 = arith.constant 0 : index
    %c0_21 = arith.constant 0 : index
    %23 = vector.load %arg4[%c0_20, %c0_21] : memref<64x32xf32, #tpu.memory_space<vmem>>, vector<64x32xf32>
    tpu.vector_store %arg4[%c0_20, %c0_21], %22 {strides = array<i32>} : memref<64x32xf32, #tpu.memory_space<vmem>>, vector<64x32xf32>,
    %24 = vector.extract_strided_slice %1 {offsets = [1, 0, 0], sizes = [8, 8, 32], strides = [1, 1, 1]} : vector<10x10x32xbf16> to vector<8x8x32xbf16>
    %25 = vector.shape_cast %24 : vector<8x8x32xbf16> to vector<64x32xbf16>
    %c3 = arith.constant 3 : index
    %c0_22 = arith.constant 0 : index
    %c0_23 = arith.constant 0 : index
    %26 = vector.load %arg2[%c3, %c0_22, %c0_23] : memref<9x32x32xbf16, #tpu.memory_space<vmem>>, vector<1x32x32xbf16>
    %27 = vector.shape_cast %26 : vector<1x32x32xbf16> to vector<32x32xbf16>
    %cst_24 = arith.constant dense<0.000000e+00> : vector<64x32xf32>
    %28 = tpu.matmul %25, %27, %cst_24 {dimension_numbers = #tpu.dot_dimension_numbers<[1], [0], [0], [1], [0, 0, 1, 1], [], []>} : vector<64x32xbf16>, vector<32x32xbf16>, vector<64x32xf32> -> vector<64x32xf32>
    %c0_25 = arith.constant 0 : index
    %c0_26 = arith.constant 0 : index
    %29 = vector.load %arg4[%c0_25, %c0_26] : memref<64x32xf32, #tpu.memory_space<vmem>>, vector<64x32xf32>
    %30 = arith.addf %29, %28 : vector<64x32xf32>
    %c0_27 = arith.constant 0 : index
    %c0_28 = arith.constant 0 : index
    %31 = vector.load %arg4[%c0_27, %c0_28] : memref<64x32xf32, #tpu.memory_space<vmem>>, vector<64x32xf32>
    tpu.vector_store %arg4[%c0_27, %c0_28], %30 {strides = array<i32>} : memref<64x32xf32, #tpu.memory_space<vmem>>, vector<64x32xf32>,
    %32 = vector.extract_strided_slice %1 {offsets = [1, 1, 0], sizes = [8, 8, 32], strides = [1, 1, 1]} : vector<10x10x32xbf16> to vector<8x8x32xbf16>
    %33 = vector.shape_cast %32 : vector<8x8x32xbf16> to vector<64x32xbf16>
    %c4 = arith.constant 4 : index
    %c0_29 = arith.constant 0 : index
    %c0_30 = arith.constant 0 : index
    %34 = vector.load %arg2[%c4, %c0_29, %c0_30] : memref<9x32x32xbf16, #tpu.memory_space<vmem>>, vector<1x32x32xbf16>
    %35 = vector.shape_cast %34 : vector<1x32x32xbf16> to vector<32x32xbf16>
    %cst_31 = arith.constant dense<0.000000e+00> : vector<64x32xf32>
    %36 = tpu.matmul %33, %35, %cst_31 {dimension_numbers = #tpu.dot_dimension_numbers<[1], [0], [0], [1], [0, 0, 1, 1], [], []>} : vector<64x32xbf16>, vector<32x32xbf16>, vector<64x32xf32> -> vector<64x32xf32>
    %c0_32 = arith.constant 0 : index
    %c0_33 = arith.constant 0 : index
    %37 = vector.load %arg4[%c0_32, %c0_33] : memref<64x32xf32, #tpu.memory_space<vmem>>, vector<64x32xf32>
    %38 = arith.addf %37, %36 : vector<64x32xf32>
    %c0_34 = arith.constant 0 : index
    %c0_35 = arith.constant 0 : index
    %39 = vector.load %arg4[%c0_34, %c0_35] : memref<64x32xf32, #tpu.memory_space<vmem>>, vector<64x32xf32>
    tpu.vector_store %arg4[%c0_34, %c0_35], %38 {strides = array<i32>} : memref<64x32xf32, #tpu.memory_space<vmem>>, vector<64x32xf32>,
    %40 = vector.extract_strided_slice %1 {offsets = [1, 2, 0], sizes = [8, 8, 32], strides = [1, 1, 1]} : vector<10x10x32xbf16> to vector<8x8x32xbf16>
    %41 = vector.shape_cast %40 : vector<8x8x32xbf16> to vector<64x32xbf16>
    %c5 = arith.constant 5 : index
    %c0_36 = arith.constant 0 : index
    %c0_37 = arith.constant 0 : index
    %42 = vector.load %arg2[%c5, %c0_36, %c0_37] : memref<9x32x32xbf16, #tpu.memory_space<vmem>>, vector<1x32x32xbf16>
    %43 = vector.shape_cast %42 : vector<1x32x32xbf16> to vector<32x32xbf16>
    %cst_38 = arith.constant dense<0.000000e+00> : vector<64x32xf32>
    %44 = tpu.matmul %41, %43, %cst_38 {dimension_numbers = #tpu.dot_dimension_numbers<[1], [0], [0], [1], [0, 0, 1, 1], [], []>} : vector<64x32xbf16>, vector<32x32xbf16>, vector<64x32xf32> -> vector<64x32xf32>
    %c0_39 = arith.constant 0 : index
    %c0_40 = arith.constant 0 : index
    %45 = vector.load %arg4[%c0_39, %c0_40] : memref<64x32xf32, #tpu.memory_space<vmem>>, vector<64x32xf32>
    %46 = arith.addf %45, %44 : vector<64x32xf32>
    %c0_41 = arith.constant 0 : index
    %c0_42 = arith.constant 0 : index
    %47 = vector.load %arg4[%c0_41, %c0_42] : memref<64x32xf32, #tpu.memory_space<vmem>>, vector<64x32xf32>
    tpu.vector_store %arg4[%c0_41, %c0_42], %46 {strides = array<i32>} : memref<64x32xf32, #tpu.memory_space<vmem>>, vector<64x32xf32>,
    %48 = vector.extract_strided_slice %1 {offsets = [2, 0, 0], sizes = [8, 8, 32], strides = [1, 1, 1]} : vector<10x10x32xbf16> to vector<8x8x32xbf16>
    %49 = vector.shape_cast %48 : vector<8x8x32xbf16> to vector<64x32xbf16>
    %c6 = arith.constant 6 : index
    %c0_43 = arith.constant 0 : index
    %c0_44 = arith.constant 0 : index
    %50 = vector.load %arg2[%c6, %c0_43, %c0_44] : memref<9x32x32xbf16, #tpu.memory_space<vmem>>, vector<1x32x32xbf16>
    %51 = vector.shape_cast %50 : vector<1x32x32xbf16> to vector<32x32xbf16>
    %cst_45 = arith.constant dense<0.000000e+00> : vector<64x32xf32>
    %52 = tpu.matmul %49, %51, %cst_45 {dimension_numbers = #tpu.dot_dimension_numbers<[1], [0], [0], [1], [0, 0, 1, 1], [], []>} : vector<64x32xbf16>, vector<32x32xbf16>, vector<64x32xf32> -> vector<64x32xf32>
    %c0_46 = arith.constant 0 : index
    %c0_47 = arith.constant 0 : index
    %53 = vector.load %arg4[%c0_46, %c0_47] : memref<64x32xf32, #tpu.memory_space<vmem>>, vector<64x32xf32>
    %54 = arith.addf %53, %52 : vector<64x32xf32>
    %c0_48 = arith.constant 0 : index
    %c0_49 = arith.constant 0 : index
    %55 = vector.load %arg4[%c0_48, %c0_49] : memref<64x32xf32, #tpu.memory_space<vmem>>, vector<64x32xf32>
    tpu.vector_store %arg4[%c0_48, %c0_49], %54 {strides = array<i32>} : memref<64x32xf32, #tpu.memory_space<vmem>>, vector<64x32xf32>,
    %56 = vector.extract_strided_slice %1 {offsets = [2, 1, 0], sizes = [8, 8, 32], strides = [1, 1, 1]} : vector<10x10x32xbf16> to vector<8x8x32xbf16>
    %57 = vector.shape_cast %56 : vector<8x8x32xbf16> to vector<64x32xbf16>
    %c7 = arith.constant 7 : index
    %c0_50 = arith.constant 0 : index
    %c0_51 = arith.constant 0 : index
    %58 = vector.load %arg2[%c7, %c0_50, %c0_51] : memref<9x32x32xbf16, #tpu.memory_space<vmem>>, vector<1x32x32xbf16>
    %59 = vector.shape_cast %58 : vector<1x32x32xbf16> to vector<32x32xbf16>
    %cst_52 = arith.constant dense<0.000000e+00> : vector<64x32xf32>
    %60 = tpu.matmul %57, %59, %cst_52 {dimension_numbers = #tpu.dot_dimension_numbers<[1], [0], [0], [1], [0, 0, 1, 1], [], []>} : vector<64x32xbf16>, vector<32x32xbf16>, vector<64x32xf32> -> vector<64x32xf32>
    %c0_53 = arith.constant 0 : index
    %c0_54 = arith.constant 0 : index
    %61 = vector.load %arg4[%c0_53, %c0_54] : memref<64x32xf32, #tpu.memory_space<vmem>>, vector<64x32xf32>
    %62 = arith.addf %61, %60 : vector<64x32xf32>
    %c0_55 = arith.constant 0 : index
    %c0_56 = arith.constant 0 : index
    %63 = vector.load %arg4[%c0_55, %c0_56] : memref<64x32xf32, #tpu.memory_space<vmem>>, vector<64x32xf32>
    tpu.vector_store %arg4[%c0_55, %c0_56], %62 {strides = array<i32>} : memref<64x32xf32, #tpu.memory_space<vmem>>, vector<64x32xf32>,
    %64 = vector.extract_strided_slice %1 {offsets = [2, 2, 0], sizes = [8, 8, 32], strides = [1, 1, 1]} : vector<10x10x32xbf16> to vector<8x8x32xbf16>
    %65 = vector.shape_cast %64 : vector<8x8x32xbf16> to vector<64x32xbf16>
    %c8 = arith.constant 8 : index
    %c0_57 = arith.constant 0 : index
    %c0_58 = arith.constant 0 : index
    %66 = vector.load %arg2[%c8, %c0_57, %c0_58] : memref<9x32x32xbf16, #tpu.memory_space<vmem>>, vector<1x32x32xbf16>
    %67 = vector.shape_cast %66 : vector<1x32x32xbf16> to vector<32x32xbf16>
    %cst_59 = arith.constant dense<0.000000e+00> : vector<64x32xf32>
    %68 = tpu.matmul %65, %67, %cst_59 {dimension_numbers = #tpu.dot_dimension_numbers<[1], [0], [0], [1], [0, 0, 1, 1], [], []>} : vector<64x32xbf16>, vector<32x32xbf16>, vector<64x32xf32> -> vector<64x32xf32>
    %c0_60 = arith.constant 0 : index
    %c0_61 = arith.constant 0 : index
    %69 = vector.load %arg4[%c0_60, %c0_61] : memref<64x32xf32, #tpu.memory_space<vmem>>, vector<64x32xf32>
    %70 = arith.addf %69, %68 : vector<64x32xf32>
    %c0_62 = arith.constant 0 : index
    %c0_63 = arith.constant 0 : index
    %71 = vector.load %arg4[%c0_62, %c0_63] : memref<64x32xf32, #tpu.memory_space<vmem>>, vector<64x32xf32>
    tpu.vector_store %arg4[%c0_62, %c0_63], %70 {strides = array<i32>} : memref<64x32xf32, #tpu.memory_space<vmem>>, vector<64x32xf32>,
    %c0_64 = arith.constant 0 : index
    %c0_65 = arith.constant 0 : index
    %72 = vector.load %arg4[%c0_64, %c0_65] : memref<64x32xf32, #tpu.memory_space<vmem>>, vector<64x32xf32>
    %73 = vector.shape_cast %72 : vector<64x32xf32> to vector<8x8x32xf32>
    %74 = arith.truncf %73 : vector<8x8x32xf32> to vector<8x8x32xbf16>
    %c0_66 = arith.constant 0 : index
    %c0_67 = arith.constant 0 : index
    %c0_68 = arith.constant 0 : index
    %c0_69 = arith.constant 0 : index
    %75 = vector.load %arg3[%c0_66, %c0_67, %c0_68, %c0_69] : memref<1x8x8x32xbf16, #tpu.memory_space<vmem>>, vector<1x8x8x32xbf16>
    %76 = vector.shape_cast %75 : vector<1x8x8x32xbf16> to vector<8x8x32xbf16>
    %77 = vector.shape_cast %74 : vector<8x8x32xbf16> to vector<1x8x8x32xbf16>
    tpu.vector_store %arg3[%c0_66, %c0_67, %c0_68, %c0_69], %77 {strides = array<i32>} : memref<1x8x8x32xbf16, #tpu.memory_space<vmem>>, vector<1x8x8x32xbf16>,
    return
  }
  func.func @transform_0(%arg0: i32) -> (i32, i32, i32, i32) {
    %c0_i32 = arith.constant 0 : i32
    %c0_i32_0 = arith.constant 0 : i32
    %c0_i32_1 = arith.constant 0 : i32
    %c0_i32_2 = arith.constant 0 : i32
    return %arg0, %c0_i32, %c0_i32_0, %c0_i32_1 : i32, i32, i32, i32
  }
  func.func @transform_1(%arg0: i32) -> (i32, i32, i32) {
    %c0_i32 = arith.constant 0 : i32
    %c0_i32_0 = arith.constant 0 : i32
    %c0_i32_1 = arith.constant 0 : i32
    %c0_i32_2 = arith.constant 0 : i32
    return %c0_i32, %c0_i32_0, %c0_i32_1 : i32, i32, i32
  }
  func.func @transform_2(%arg0: i32) -> (i32, i32, i32, i32) {
    %c0_i32 = arith.constant 0 : i32
    %c0_i32_0 = arith.constant 0 : i32
    %c0_i32_1 = arith.constant 0 : i32
    %c0_i32_2 = arith.constant 0 : i32
    return %arg0, %c0_i32, %c0_i32_0, %c0_i32_1 : i32, i32, i32, i32
  }
}

module attributes {stable_mosaic.version = 11 : i64} {
  func.func @_ws_kernel(%arg0: i32, %arg1: memref<128x32xf32, #tpu.memory_space<vmem>>, %arg2: memref<128x32xbf16, #tpu.memory_space<vmem>>) attributes {dimension_semantics = [#tpu.dimension_semantics<parallel>], iteration_bounds = array<i64: 1>, scalar_prefetch = 0 : i64, scratch_operands = 0 : i64, tpu.core_type = #tpu.core_type<tc>, window_params = [{transform_indices = @transform_0, window_bounds = array<i64: 128, 32>}, {transform_indices = @transform_1, window_bounds = array<i64: 128, 32>}]} {
    %c0 = arith.constant 0 : index
    %c0_0 = arith.constant 0 : index
    %0 = vector.load %arg1[%c0, %c0_0] : memref<128x32xf32, #tpu.memory_space<vmem>>, vector<128x32xf32>
    %cst = arith.constant dense<0.000000e+00> : vector<128xf32>
    %1 = vector.multi_reduction <add>, %0, %cst [1] : vector<128x32xf32> to vector<128xf32>
    %2 = vector.shape_cast %1 : vector<128xf32> to vector<128x1xf32>
    %cst_1 = arith.constant 3.200000e+01 : f32
    %3 = vector.broadcast %cst_1 : f32 to vector<128x1xf32>
    %4 = arith.divf %2, %3 : vector<128x1xf32>
    %5 = vector.broadcast %4 : vector<128x1xf32> to vector<128x32xf32>
    %6 = arith.subf %0, %5 : vector<128x32xf32>
    %7 = arith.mulf %6, %6 : vector<128x32xf32>
    %cst_2 = arith.constant dense<0.000000e+00> : vector<128xf32>
    %8 = vector.multi_reduction <add>, %7, %cst_2 [1] : vector<128x32xf32> to vector<128xf32>
    %9 = vector.shape_cast %8 : vector<128xf32> to vector<128x1xf32>
    %cst_3 = arith.constant 3.200000e+01 : f32
    %10 = vector.broadcast %cst_3 : f32 to vector<128x1xf32>
    %11 = arith.divf %9, %10 : vector<128x1xf32>
    %cst_4 = arith.constant 9.99999997E-7 : f32
    %12 = vector.broadcast %cst_4 : f32 to vector<128x1xf32>
    %13 = arith.addf %11, %12 : vector<128x1xf32>
    %14 = math.rsqrt %13 : vector<128x1xf32>
    %15 = vector.broadcast %14 : vector<128x1xf32> to vector<128x32xf32>
    %16 = arith.mulf %6, %15 : vector<128x32xf32>
    %17 = arith.truncf %16 : vector<128x32xf32> to vector<128x32xbf16>
    %c0_5 = arith.constant 0 : index
    %c0_6 = arith.constant 0 : index
    %18 = vector.load %arg2[%c0_5, %c0_6] : memref<128x32xbf16, #tpu.memory_space<vmem>>, vector<128x32xbf16>
    tpu.vector_store %arg2[%c0_5, %c0_6], %17 {strides = array<i32>} : memref<128x32xbf16, #tpu.memory_space<vmem>>, vector<128x32xbf16>,
    return
  }
  func.func @transform_0(%arg0: i32) -> (i32, i32) {
    %c0_i32 = arith.constant 0 : i32
    %c0_i32_0 = arith.constant 0 : i32
    return %arg0, %c0_i32 : i32, i32
  }
  func.func @transform_1(%arg0: i32) -> (i32, i32) {
    %c0_i32 = arith.constant 0 : i32
    %c0_i32_0 = arith.constant 0 : i32
    return %arg0, %c0_i32 : i32, i32
  }
}

module attributes {stable_mosaic.version = 11 : i64} {
  func.func @_mm_kernel(%arg0: i32, %arg1: i32, %arg2: i32, %arg3: memref<128x32xbf16, #tpu.memory_space<vmem>>, %arg4: memref<32x128xbf16, #tpu.memory_space<vmem>>, %arg5: memref<128x128xbf16, #tpu.memory_space<vmem>>) attributes {dimension_semantics = [#tpu.dimension_semantics<parallel>, #tpu.dimension_semantics<parallel>, #tpu.dimension_semantics<arbitrary>], iteration_bounds = array<i64: 1, 1, 1>, scalar_prefetch = 0 : i64, scratch_operands = 0 : i64, tpu.core_type = #tpu.core_type<tc>, window_params = [{transform_indices = @transform_0, window_bounds = array<i64: 128, 32>}, {transform_indices = @transform_1, window_bounds = array<i64: 32, 128>}, {transform_indices = @transform_2, window_bounds = array<i64: 128, 128>}]} {
    %c0 = arith.constant 0 : index
    %c0_0 = arith.constant 0 : index
    %0 = vector.load %arg3[%c0, %c0_0] : memref<128x32xbf16, #tpu.memory_space<vmem>>, vector<128x32xbf16>
    %c0_1 = arith.constant 0 : index
    %c0_2 = arith.constant 0 : index
    %1 = vector.load %arg4[%c0_1, %c0_2] : memref<32x128xbf16, #tpu.memory_space<vmem>>, vector<32x128xbf16>
    %cst = arith.constant dense<0.000000e+00> : vector<128x128xf32>
    %2 = tpu.matmul %0, %1, %cst {dimension_numbers = #tpu.dot_dimension_numbers<[1], [0], [0], [1], [0, 0, 1, 1], [], []>} : vector<128x32xbf16>, vector<32x128xbf16>, vector<128x128xf32> -> vector<128x128xf32>
    %3 = arith.truncf %2 : vector<128x128xf32> to vector<128x128xbf16>
    %c0_3 = arith.constant 0 : index
    %c0_4 = arith.constant 0 : index
    %4 = vector.load %arg5[%c0_3, %c0_4] : memref<128x128xbf16, #tpu.memory_space<vmem>>, vector<128x128xbf16>
    tpu.vector_store %arg5[%c0_3, %c0_4], %3 {strides = array<i32>} : memref<128x128xbf16, #tpu.memory_space<vmem>>, vector<128x128xbf16>,
    return
  }
  func.func @transform_0(%arg0: i32, %arg1: i32, %arg2: i32) -> (i32, i32) {
    %c0_i32 = arith.constant 0 : i32
    return %arg0, %arg2 : i32, i32
  }
  func.func @transform_1(%arg0: i32, %arg1: i32, %arg2: i32) -> (i32, i32) {
    %c0_i32 = arith.constant 0 : i32
    return %arg2, %arg1 : i32, i32
  }
  func.func @transform_2(%arg0: i32, %arg1: i32, %arg2: i32) -> (i32, i32) {
    %c0_i32 = arith.constant 0 : i32
    return %arg0, %arg1 : i32, i32
  }
}

module attributes {stable_mosaic.version = 11 : i64} {
  func.func @_mm_kernel(%arg0: i32, %arg1: i32, %arg2: i32, %arg3: memref<128x32xbf16, #tpu.memory_space<vmem>>, %arg4: memref<32x128xbf16, #tpu.memory_space<vmem>>, %arg5: memref<128x128xbf16, #tpu.memory_space<vmem>>, %arg6: memref<128x128xbf16, #tpu.memory_space<vmem>>) attributes {dimension_semantics = [#tpu.dimension_semantics<parallel>, #tpu.dimension_semantics<parallel>, #tpu.dimension_semantics<arbitrary>], iteration_bounds = array<i64: 1, 1, 1>, scalar_prefetch = 0 : i64, scratch_operands = 0 : i64, tpu.core_type = #tpu.core_type<tc>, window_params = [{transform_indices = @transform_0, window_bounds = array<i64: 128, 32>}, {transform_indices = @transform_1, window_bounds = array<i64: 32, 128>}, {transform_indices = @transform_2, window_bounds = array<i64: 128, 128>}, {transform_indices = @transform_3, window_bounds = array<i64: 128, 128>}]} {
    %c0 = arith.constant 0 : index
    %c0_0 = arith.constant 0 : index
    %0 = vector.load %arg3[%c0, %c0_0] : memref<128x32xbf16, #tpu.memory_space<vmem>>, vector<128x32xbf16>
    %c0_1 = arith.constant 0 : index
    %c0_2 = arith.constant 0 : index
    %1 = vector.load %arg4[%c0_1, %c0_2] : memref<32x128xbf16, #tpu.memory_space<vmem>>, vector<32x128xbf16>
    %cst = arith.constant dense<0.000000e+00> : vector<128x128xf32>
    %2 = tpu.matmul %0, %1, %cst {dimension_numbers = #tpu.dot_dimension_numbers<[1], [0], [0], [1], [0, 0, 1, 1], [], []>} : vector<128x32xbf16>, vector<32x128xbf16>, vector<128x128xf32> -> vector<128x128xf32>
    %c0_3 = arith.constant 0 : index
    %c0_4 = arith.constant 0 : index
    %3 = vector.load %arg5[%c0_3, %c0_4] : memref<128x128xbf16, #tpu.memory_space<vmem>>, vector<128x128xbf16>
    %4 = arith.extf %3 : vector<128x128xbf16> to vector<128x128xf32>
    %5 = arith.addf %2, %4 : vector<128x128xf32>
    %6 = arith.truncf %5 : vector<128x128xf32> to vector<128x128xbf16>
    %c0_5 = arith.constant 0 : index
    %c0_6 = arith.constant 0 : index
    %7 = vector.load %arg6[%c0_5, %c0_6] : memref<128x128xbf16, #tpu.memory_space<vmem>>, vector<128x128xbf16>
    tpu.vector_store %arg6[%c0_5, %c0_6], %6 {strides = array<i32>} : memref<128x128xbf16, #tpu.memory_space<vmem>>, vector<128x128xbf16>,
    return
  }
  func.func @transform_0(%arg0: i32, %arg1: i32, %arg2: i32) -> (i32, i32) {
    %c0_i32 = arith.constant 0 : i32
    return %arg0, %arg2 : i32, i32
  }
  func.func @transform_1(%arg0: i32, %arg1: i32, %arg2: i32) -> (i32, i32) {
    %c0_i32 = arith.constant 0 : i32
    return %arg2, %arg1 : i32, i32
  }
  func.func @transform_2(%arg0: i32, %arg1: i32, %arg2: i32) -> (i32, i32) {
    %c0_i32 = arith.constant 0 : i32
    return %arg0, %arg1 : i32, i32
  }
  func.func @transform_3(%arg0: i32, %arg1: i32, %arg2: i32) -> (i32, i32) {
    %c0_i32 = arith.constant 0 : i32
    return %arg0, %arg1 : i32, i32
  }
}

module attributes {stable_mosaic.version = 11 : i64} {
  func.func @_gn_kernel(%arg0: i32, %arg1: memref<1x64x128xbf16, #tpu.memory_space<vmem>>, %arg2: memref<128x32xf32, #tpu.memory_space<vmem>>, %arg3: memref<32x128xf32, #tpu.memory_space<vmem>>, %arg4: memref<1x128xf32, #tpu.memory_space<vmem>>, %arg5: memref<1x128xf32, #tpu.memory_space<vmem>>, %arg6: memref<1x64x128xbf16, #tpu.memory_space<vmem>>) attributes {dimension_semantics = [#tpu.dimension_semantics<parallel>], iteration_bounds = array<i64: 2>, scalar_prefetch = 0 : i64, scratch_operands = 0 : i64, tpu.core_type = #tpu.core_type<tc>, window_params = [{transform_indices = @transform_0, window_bounds = array<i64: 1, 64, 128>}, {pipeline_mode = #tpu.pipeline_mode<synchronous>, transform_indices = @transform_1, window_bounds = array<i64: 128, 32>}, {pipeline_mode = #tpu.pipeline_mode<synchronous>, transform_indices = @transform_2, window_bounds = array<i64: 32, 128>}, {pipeline_mode = #tpu.pipeline_mode<synchronous>, transform_indices = @transform_3, window_bounds = array<i64: 1, 128>}, {pipeline_mode = #tpu.pipeline_mode<synchronous>, transform_indices = @transform_4, window_bounds = array<i64: 1, 128>}, {transform_indices = @transform_5, window_bounds = array<i64: 1, 64, 128>}]} {
    %c0 = arith.constant 0 : index
    %c0_0 = arith.constant 0 : index
    %c0_1 = arith.constant 0 : index
    %0 = vector.load %arg1[%c0, %c0_0, %c0_1] : memref<1x64x128xbf16, #tpu.memory_space<vmem>>, vector<1x64x128xbf16>
    %1 = vector.shape_cast %0 : vector<1x64x128xbf16> to vector<64x128xbf16>
    %2 = arith.extf %1 : vector<64x128xbf16> to vector<64x128xf32>
    %c0_2 = arith.constant 0 : index
    %c0_3 = arith.constant 0 : index
    %3 = vector.load %arg2[%c0_2, %c0_3] : memref<128x32xf32, #tpu.memory_space<vmem>>, vector<128x32xf32>
    %c0_4 = arith.constant 0 : index
    %c0_5 = arith.constant 0 : index
    %4 = vector.load %arg3[%c0_4, %c0_5] : memref<32x128xf32, #tpu.memory_space<vmem>>, vector<32x128xf32>
    %c0_6 = arith.constant 0 : index
    %c0_7 = arith.constant 0 : index
    %5 = vector.load %arg4[%c0_6, %c0_7] : memref<1x128xf32, #tpu.memory_space<vmem>>, vector<1x128xf32>
    %c0_8 = arith.constant 0 : index
    %c0_9 = arith.constant 0 : index
    %6 = vector.load %arg5[%c0_8, %c0_9] : memref<1x128xf32, #tpu.memory_space<vmem>>, vector<1x128xf32>
    %cst = arith.constant dense<0.000000e+00> : vector<128xf32>
    %7 = vector.multi_reduction <add>, %2, %cst [0] : vector<64x128xf32> to vector<128xf32>
    %8 = vector.shape_cast %7 : vector<128xf32> to vector<1x128xf32>
    %cst_10 = arith.constant dense<0.000000e+00> : vector<1x32xf32>
    %9 = tpu.matmul %8, %3, %cst_10 {dimension_numbers = #tpu.dot_dimension_numbers<[1], [0], [0], [1], [0, 0, 1, 1], [], []>} : vector<1x128xf32>, vector<128x32xf32>, vector<1x32xf32> -> vector<1x32xf32>
    %cst_11 = arith.constant 3.906250e-03 : f32
    %10 = vector.broadcast %cst_11 : f32 to vector<1x32xf32>
    %11 = arith.mulf %9, %10 : vector<1x32xf32>
    %cst_12 = arith.constant dense<0.000000e+00> : vector<1x128xf32>
    %12 = tpu.matmul %11, %4, %cst_12 {dimension_numbers = #tpu.dot_dimension_numbers<[1], [0], [0], [1], [0, 0, 1, 1], [], []>} : vector<1x32xf32>, vector<32x128xf32>, vector<1x128xf32> -> vector<1x128xf32>
    %13 = vector.broadcast %12 : vector<1x128xf32> to vector<64x128xf32>
    %14 = arith.subf %2, %13 : vector<64x128xf32>
    %15 = arith.mulf %14, %14 : vector<64x128xf32>
    %cst_13 = arith.constant dense<0.000000e+00> : vector<128xf32>
    %16 = vector.multi_reduction <add>, %15, %cst_13 [0] : vector<64x128xf32> to vector<128xf32>
    %17 = vector.shape_cast %16 : vector<128xf32> to vector<1x128xf32>
    %cst_14 = arith.constant dense<0.000000e+00> : vector<1x32xf32>
    %18 = tpu.matmul %17, %3, %cst_14 {dimension_numbers = #tpu.dot_dimension_numbers<[1], [0], [0], [1], [0, 0, 1, 1], [], []>} : vector<1x128xf32>, vector<128x32xf32>, vector<1x32xf32> -> vector<1x32xf32>
    %cst_15 = arith.constant 3.906250e-03 : f32
    %19 = vector.broadcast %cst_15 : f32 to vector<1x32xf32>
    %20 = arith.mulf %18, %19 : vector<1x32xf32>
    %cst_16 = arith.constant 9.99999974E-6 : f32
    %21 = vector.broadcast %cst_16 : f32 to vector<1x32xf32>
    %22 = arith.addf %20, %21 : vector<1x32xf32>
    %23 = math.rsqrt %22 : vector<1x32xf32>
    %cst_17 = arith.constant dense<0.000000e+00> : vector<1x128xf32>
    %24 = tpu.matmul %23, %4, %cst_17 {dimension_numbers = #tpu.dot_dimension_numbers<[1], [0], [0], [1], [0, 0, 1, 1], [], []>} : vector<1x32xf32>, vector<32x128xf32>, vector<1x128xf32> -> vector<1x128xf32>
    %25 = vector.broadcast %24 : vector<1x128xf32> to vector<64x128xf32>
    %26 = arith.mulf %14, %25 : vector<64x128xf32>
    %27 = vector.broadcast %5 : vector<1x128xf32> to vector<64x128xf32>
    %28 = arith.mulf %26, %27 : vector<64x128xf32>
    %29 = vector.broadcast %6 : vector<1x128xf32> to vector<64x128xf32>
    %30 = arith.addf %28, %29 : vector<64x128xf32>
    %cst_18 = arith.constant 0.000000e+00 : f32
    %31 = vector.broadcast %cst_18 : f32 to vector<64x128xf32>
    %32 = arith.maximumf %30, %31 : vector<64x128xf32>
    %33 = arith.truncf %32 : vector<64x128xf32> to vector<64x128xbf16>
    %c0_19 = arith.constant 0 : index
    %c0_20 = arith.constant 0 : index
    %c0_21 = arith.constant 0 : index
    %34 = vector.load %arg6[%c0_19, %c0_20, %c0_21] : memref<1x64x128xbf16, #tpu.memory_space<vmem>>, vector<1x64x128xbf16>
    %35 = vector.shape_cast %34 : vector<1x64x128xbf16> to vector<64x128xbf16>
    %36 = vector.shape_cast %33 : vector<64x128xbf16> to vector<1x64x128xbf16>
    tpu.vector_store %arg6[%c0_19, %c0_20, %c0_21], %36 {strides = array<i32>} : memref<1x64x128xbf16, #tpu.memory_space<vmem>>, vector<1x64x128xbf16>,
    return
  }
  func.func @transform_0(%arg0: i32) -> (i32, i32, i32) {
    %c0_i32 = arith.constant 0 : i32
    %c0_i32_0 = arith.constant 0 : i32
    %c0_i32_1 = arith.constant 0 : i32
    return %arg0, %c0_i32, %c0_i32_0 : i32, i32, i32
  }
  func.func @transform_1(%arg0: i32) -> (i32, i32) {
    %c0_i32 = arith.constant 0 : i32
    %c0_i32_0 = arith.constant 0 : i32
    %c0_i32_1 = arith.constant 0 : i32
    return %c0_i32, %c0_i32_0 : i32, i32
  }
  func.func @transform_2(%arg0: i32) -> (i32, i32) {
    %c0_i32 = arith.constant 0 : i32
    %c0_i32_0 = arith.constant 0 : i32
    %c0_i32_1 = arith.constant 0 : i32
    return %c0_i32, %c0_i32_0 : i32, i32
  }
  func.func @transform_3(%arg0: i32) -> (i32, i32) {
    %c0_i32 = arith.constant 0 : i32
    %c0_i32_0 = arith.constant 0 : i32
    %c0_i32_1 = arith.constant 0 : i32
    return %c0_i32, %c0_i32_0 : i32, i32
  }
  func.func @transform_4(%arg0: i32) -> (i32, i32) {
    %c0_i32 = arith.constant 0 : i32
    %c0_i32_0 = arith.constant 0 : i32
    %c0_i32_1 = arith.constant 0 : i32
    return %c0_i32, %c0_i32_0 : i32, i32
  }
  func.func @transform_5(%arg0: i32) -> (i32, i32, i32) {
    %c0_i32 = arith.constant 0 : i32
    %c0_i32_0 = arith.constant 0 : i32
    %c0_i32_1 = arith.constant 0 : i32
    return %arg0, %c0_i32, %c0_i32_0 : i32, i32, i32
  }
}

module attributes {stable_mosaic.version = 11 : i64} {
  func.func @_ws_kernel(%arg0: i32, %arg1: memref<32x128xf32, #tpu.memory_space<vmem>>, %arg2: memref<32x128xbf16, #tpu.memory_space<vmem>>) attributes {dimension_semantics = [#tpu.dimension_semantics<parallel>], iteration_bounds = array<i64: 1>, scalar_prefetch = 0 : i64, scratch_operands = 0 : i64, tpu.core_type = #tpu.core_type<tc>, window_params = [{transform_indices = @transform_0, window_bounds = array<i64: 32, 128>}, {transform_indices = @transform_1, window_bounds = array<i64: 32, 128>}]} {
    %c0 = arith.constant 0 : index
    %c0_0 = arith.constant 0 : index
    %0 = vector.load %arg1[%c0, %c0_0] : memref<32x128xf32, #tpu.memory_space<vmem>>, vector<32x128xf32>
    %cst = arith.constant dense<0.000000e+00> : vector<32xf32>
    %1 = vector.multi_reduction <add>, %0, %cst [1] : vector<32x128xf32> to vector<32xf32>
    %2 = vector.shape_cast %1 : vector<32xf32> to vector<32x1xf32>
    %cst_1 = arith.constant 1.280000e+02 : f32
    %3 = vector.broadcast %cst_1 : f32 to vector<32x1xf32>
    %4 = arith.divf %2, %3 : vector<32x1xf32>
    %5 = vector.broadcast %4 : vector<32x1xf32> to vector<32x128xf32>
    %6 = arith.subf %0, %5 : vector<32x128xf32>
    %7 = arith.mulf %6, %6 : vector<32x128xf32>
    %cst_2 = arith.constant dense<0.000000e+00> : vector<32xf32>
    %8 = vector.multi_reduction <add>, %7, %cst_2 [1] : vector<32x128xf32> to vector<32xf32>
    %9 = vector.shape_cast %8 : vector<32xf32> to vector<32x1xf32>
    %cst_3 = arith.constant 1.280000e+02 : f32
    %10 = vector.broadcast %cst_3 : f32 to vector<32x1xf32>
    %11 = arith.divf %9, %10 : vector<32x1xf32>
    %cst_4 = arith.constant 9.99999997E-7 : f32
    %12 = vector.broadcast %cst_4 : f32 to vector<32x1xf32>
    %13 = arith.addf %11, %12 : vector<32x1xf32>
    %14 = math.rsqrt %13 : vector<32x1xf32>
    %15 = vector.broadcast %14 : vector<32x1xf32> to vector<32x128xf32>
    %16 = arith.mulf %6, %15 : vector<32x128xf32>
    %17 = arith.truncf %16 : vector<32x128xf32> to vector<32x128xbf16>
    %c0_5 = arith.constant 0 : index
    %c0_6 = arith.constant 0 : index
    %18 = vector.load %arg2[%c0_5, %c0_6] : memref<32x128xbf16, #tpu.memory_space<vmem>>, vector<32x128xbf16>
    tpu.vector_store %arg2[%c0_5, %c0_6], %17 {strides = array<i32>} : memref<32x128xbf16, #tpu.memory_space<vmem>>, vector<32x128xbf16>,
    return
  }
  func.func @transform_0(%arg0: i32) -> (i32, i32) {
    %c0_i32 = arith.constant 0 : i32
    %c0_i32_0 = arith.constant 0 : i32
    return %arg0, %c0_i32 : i32, i32
  }
  func.func @transform_1(%arg0: i32) -> (i32, i32) {
    %c0_i32 = arith.constant 0 : i32
    %c0_i32_0 = arith.constant 0 : i32
    return %arg0, %c0_i32 : i32, i32
  }
}

module attributes {stable_mosaic.version = 11 : i64} {
  func.func @_mm_kernel(%arg0: i32, %arg1: i32, %arg2: i32, %arg3: memref<128x128xbf16, #tpu.memory_space<vmem>>, %arg4: memref<128x32xbf16, #tpu.memory_space<vmem>>, %arg5: memref<128x32xbf16, #tpu.memory_space<vmem>>) attributes {dimension_semantics = [#tpu.dimension_semantics<parallel>, #tpu.dimension_semantics<parallel>, #tpu.dimension_semantics<arbitrary>], iteration_bounds = array<i64: 1, 1, 1>, scalar_prefetch = 0 : i64, scratch_operands = 0 : i64, tpu.core_type = #tpu.core_type<tc>, window_params = [{transform_indices = @transform_0, window_bounds = array<i64: 128, 128>}, {transform_indices = @transform_1, window_bounds = array<i64: 128, 32>}, {transform_indices = @transform_2, window_bounds = array<i64: 128, 32>}]} {
    %c0 = arith.constant 0 : index
    %c0_0 = arith.constant 0 : index
    %0 = vector.load %arg3[%c0, %c0_0] : memref<128x128xbf16, #tpu.memory_space<vmem>>, vector<128x128xbf16>
    %c0_1 = arith.constant 0 : index
    %c0_2 = arith.constant 0 : index
    %1 = vector.load %arg4[%c0_1, %c0_2] : memref<128x32xbf16, #tpu.memory_space<vmem>>, vector<128x32xbf16>
    %cst = arith.constant dense<0.000000e+00> : vector<128x32xf32>
    %2 = tpu.matmul %0, %1, %cst {dimension_numbers = #tpu.dot_dimension_numbers<[1], [0], [0], [1], [0, 0, 1, 1], [], []>} : vector<128x128xbf16>, vector<128x32xbf16>, vector<128x32xf32> -> vector<128x32xf32>
    %3 = arith.truncf %2 : vector<128x32xf32> to vector<128x32xbf16>
    %c0_3 = arith.constant 0 : index
    %c0_4 = arith.constant 0 : index
    %4 = vector.load %arg5[%c0_3, %c0_4] : memref<128x32xbf16, #tpu.memory_space<vmem>>, vector<128x32xbf16>
    tpu.vector_store %arg5[%c0_3, %c0_4], %3 {strides = array<i32>} : memref<128x32xbf16, #tpu.memory_space<vmem>>, vector<128x32xbf16>,
    return
  }
  func.func @transform_0(%arg0: i32, %arg1: i32, %arg2: i32) -> (i32, i32) {
    %c0_i32 = arith.constant 0 : i32
    return %arg0, %arg2 : i32, i32
  }
  func.func @transform_1(%arg0: i32, %arg1: i32, %arg2: i32) -> (i32, i32) {
    %c0_i32 = arith.constant 0 : i32
    return %arg2, %arg1 : i32, i32
  }
  func.func @transform_2(%arg0: i32, %arg1: i32, %arg2: i32) -> (i32, i32) {
    %c0_i32 = arith.constant 0 : i32
    return %arg0, %arg1 : i32, i32
  }
}

module attributes {stable_mosaic.version = 11 : i64} {
  func.func @_conv_s2_kernel(%arg0: i32, %arg1: memref<4x5x5x32xbf16, #tpu.memory_space<vmem>>, %arg2: memref<9x32x32xbf16, #tpu.memory_space<vmem>>, %arg3: memref<1x4x4x32xbf16, #tpu.memory_space<vmem>>, %arg4: memref<16x32xf32, #tpu.memory_space<vmem>>) attributes {dimension_semantics = [#tpu.dimension_semantics<parallel>], iteration_bounds = array<i64: 2>, scalar_prefetch = 0 : i64, scratch_operands = 1 : i64, tpu.core_type = #tpu.core_type<tc>, window_params = [{transform_indices = @transform_0, window_bounds = array<i64: 4, 5, 5, 32>}, {pipeline_mode = #tpu.pipeline_mode<synchronous>, transform_indices = @transform_1, window_bounds = array<i64: 9, 32, 32>}, {transform_indices = @transform_2, window_bounds = array<i64: 1, 4, 4, 32>}]} {
    %c0 = arith.constant 0 : index
    %c0_0 = arith.constant 0 : index
    %c0_1 = arith.constant 0 : index
    %c0_2 = arith.constant 0 : index
    %0 = vector.load %arg1[%c0, %c0_0, %c0_1, %c0_2] : memref<4x5x5x32xbf16, #tpu.memory_space<vmem>>, vector<4x5x5x32xbf16>
    %1 = vector.extract_strided_slice %0 {offsets = [0, 0, 0, 0], sizes = [1, 4, 4, 32], strides = [1, 1, 1, 1]} : vector<4x5x5x32xbf16> to vector<1x4x4x32xbf16>
    %2 = vector.shape_cast %1 : vector<1x4x4x32xbf16> to vector<4x4x32xbf16>
    %3 = vector.shape_cast %2 : vector<4x4x32xbf16> to vector<16x32xbf16>
    %c0_3 = arith.constant 0 : index
    %c0_4 = arith.constant 0 : index
    %c0_5 = arith.constant 0 : index
    %4 = vector.load %arg2[%c0_3, %c0_4, %c0_5] : memref<9x32x32xbf16, #tpu.memory_space<vmem>>, vector<1x32x32xbf16>
    %5 = vector.shape_cast %4 : vector<1x32x32xbf16> to vector<32x32xbf16>
    %cst = arith.constant dense<0.000000e+00> : vector<16x32xf32>
    %6 = tpu.matmul %3, %5, %cst {dimension_numbers = #tpu.dot_dimension_numbers<[1], [0], [0], [1], [0, 0, 1, 1], [], []>} : vector<16x32xbf16>, vector<32x32xbf16>, vector<16x32xf32> -> vector<16x32xf32>
    %c0_6 = arith.constant 0 : index
    %c0_7 = arith.constant 0 : index
    %7 = vector.load %arg4[%c0_6, %c0_7] : memref<16x32xf32, #tpu.memory_space<vmem>>, vector<16x32xf32>
    tpu.vector_store %arg4[%c0_6, %c0_7], %6 {strides = array<i32>} : memref<16x32xf32, #tpu.memory_space<vmem>>, vector<16x32xf32>,
    %8 = vector.extract_strided_slice %0 {offsets = [1, 0, 0, 0], sizes = [1, 4, 4, 32], strides = [1, 1, 1, 1]} : vector<4x5x5x32xbf16> to vector<1x4x4x32xbf16>
    %9 = vector.shape_cast %8 : vector<1x4x4x32xbf16> to vector<4x4x32xbf16>
    %10 = vector.shape_cast %9 : vector<4x4x32xbf16> to vector<16x32xbf16>
    %c1 = arith.constant 1 : index
    %c0_8 = arith.constant 0 : index
    %c0_9 = arith.constant 0 : index
    %11 = vector.load %arg2[%c1, %c0_8, %c0_9] : memref<9x32x32xbf16, #tpu.memory_space<vmem>>, vector<1x32x32xbf16>
    %12 = vector.shape_cast %11 : vector<1x32x32xbf16> to vector<32x32xbf16>
    %cst_10 = arith.constant dense<0.000000e+00> : vector<16x32xf32>
    %13 = tpu.matmul %10, %12, %cst_10 {dimension_numbers = #tpu.dot_dimension_numbers<[1], [0], [0], [1], [0, 0, 1, 1], [], []>} : vector<16x32xbf16>, vector<32x32xbf16>, vector<16x32xf32> -> vector<16x32xf32>
    %c0_11 = arith.constant 0 : index
    %c0_12 = arith.constant 0 : index
    %14 = vector.load %arg4[%c0_11, %c0_12] : memref<16x32xf32, #tpu.memory_space<vmem>>, vector<16x32xf32>
    %15 = arith.addf %14, %13 : vector<16x32xf32>
    %c0_13 = arith.constant 0 : index
    %c0_14 = arith.constant 0 : index
    %16 = vector.load %arg4[%c0_13, %c0_14] : memref<16x32xf32, #tpu.memory_space<vmem>>, vector<16x32xf32>
    tpu.vector_store %arg4[%c0_13, %c0_14], %15 {strides = array<i32>} : memref<16x32xf32, #tpu.memory_space<vmem>>, vector<16x32xf32>,
    %17 = vector.extract_strided_slice %0 {offsets = [0, 0, 1, 0], sizes = [1, 4, 4, 32], strides = [1, 1, 1, 1]} : vector<4x5x5x32xbf16> to vector<1x4x4x32xbf16>
    %18 = vector.shape_cast %17 : vector<1x4x4x32xbf16> to vector<4x4x32xbf16>
    %19 = vector.shape_cast %18 : vector<4x4x32xbf16> to vector<16x32xbf16>
    %c2 = arith.constant 2 : index
    %c0_15 = arith.constant 0 : index
    %c0_16 = arith.constant 0 : index
    %20 = vector.load %arg2[%c2, %c0_15, %c0_16] : memref<9x32x32xbf16, #tpu.memory_space<vmem>>, vector<1x32x32xbf16>
    %21 = vector.shape_cast %20 : vector<1x32x32xbf16> to vector<32x32xbf16>
    %cst_17 = arith.constant dense<0.000000e+00> : vector<16x32xf32>
    %22 = tpu.matmul %19, %21, %cst_17 {dimension_numbers = #tpu.dot_dimension_numbers<[1], [0], [0], [1], [0, 0, 1, 1], [], []>} : vector<16x32xbf16>, vector<32x32xbf16>, vector<16x32xf32> -> vector<16x32xf32>
    %c0_18 = arith.constant 0 : index
    %c0_19 = arith.constant 0 : index
    %23 = vector.load %arg4[%c0_18, %c0_19] : memref<16x32xf32, #tpu.memory_space<vmem>>, vector<16x32xf32>
    %24 = arith.addf %23, %22 : vector<16x32xf32>
    %c0_20 = arith.constant 0 : index
    %c0_21 = arith.constant 0 : index
    %25 = vector.load %arg4[%c0_20, %c0_21] : memref<16x32xf32, #tpu.memory_space<vmem>>, vector<16x32xf32>
    tpu.vector_store %arg4[%c0_20, %c0_21], %24 {strides = array<i32>} : memref<16x32xf32, #tpu.memory_space<vmem>>, vector<16x32xf32>,
    %26 = vector.extract_strided_slice %0 {offsets = [2, 0, 0, 0], sizes = [1, 4, 4, 32], strides = [1, 1, 1, 1]} : vector<4x5x5x32xbf16> to vector<1x4x4x32xbf16>
    %27 = vector.shape_cast %26 : vector<1x4x4x32xbf16> to vector<4x4x32xbf16>
    %28 = vector.shape_cast %27 : vector<4x4x32xbf16> to vector<16x32xbf16>
    %c3 = arith.constant 3 : index
    %c0_22 = arith.constant 0 : index
    %c0_23 = arith.constant 0 : index
    %29 = vector.load %arg2[%c3, %c0_22, %c0_23] : memref<9x32x32xbf16, #tpu.memory_space<vmem>>, vector<1x32x32xbf16>
    %30 = vector.shape_cast %29 : vector<1x32x32xbf16> to vector<32x32xbf16>
    %cst_24 = arith.constant dense<0.000000e+00> : vector<16x32xf32>
    %31 = tpu.matmul %28, %30, %cst_24 {dimension_numbers = #tpu.dot_dimension_numbers<[1], [0], [0], [1], [0, 0, 1, 1], [], []>} : vector<16x32xbf16>, vector<32x32xbf16>, vector<16x32xf32> -> vector<16x32xf32>
    %c0_25 = arith.constant 0 : index
    %c0_26 = arith.constant 0 : index
    %32 = vector.load %arg4[%c0_25, %c0_26] : memref<16x32xf32, #tpu.memory_space<vmem>>, vector<16x32xf32>
    %33 = arith.addf %32, %31 : vector<16x32xf32>
    %c0_27 = arith.constant 0 : index
    %c0_28 = arith.constant 0 : index
    %34 = vector.load %arg4[%c0_27, %c0_28] : memref<16x32xf32, #tpu.memory_space<vmem>>, vector<16x32xf32>
    tpu.vector_store %arg4[%c0_27, %c0_28], %33 {strides = array<i32>} : memref<16x32xf32, #tpu.memory_space<vmem>>, vector<16x32xf32>,
    %35 = vector.extract_strided_slice %0 {offsets = [3, 0, 0, 0], sizes = [1, 4, 4, 32], strides = [1, 1, 1, 1]} : vector<4x5x5x32xbf16> to vector<1x4x4x32xbf16>
    %36 = vector.shape_cast %35 : vector<1x4x4x32xbf16> to vector<4x4x32xbf16>
    %37 = vector.shape_cast %36 : vector<4x4x32xbf16> to vector<16x32xbf16>
    %c4 = arith.constant 4 : index
    %c0_29 = arith.constant 0 : index
    %c0_30 = arith.constant 0 : index
    %38 = vector.load %arg2[%c4, %c0_29, %c0_30] : memref<9x32x32xbf16, #tpu.memory_space<vmem>>, vector<1x32x32xbf16>
    %39 = vector.shape_cast %38 : vector<1x32x32xbf16> to vector<32x32xbf16>
    %cst_31 = arith.constant dense<0.000000e+00> : vector<16x32xf32>
    %40 = tpu.matmul %37, %39, %cst_31 {dimension_numbers = #tpu.dot_dimension_numbers<[1], [0], [0], [1], [0, 0, 1, 1], [], []>} : vector<16x32xbf16>, vector<32x32xbf16>, vector<16x32xf32> -> vector<16x32xf32>
    %c0_32 = arith.constant 0 : index
    %c0_33 = arith.constant 0 : index
    %41 = vector.load %arg4[%c0_32, %c0_33] : memref<16x32xf32, #tpu.memory_space<vmem>>, vector<16x32xf32>
    %42 = arith.addf %41, %40 : vector<16x32xf32>
    %c0_34 = arith.constant 0 : index
    %c0_35 = arith.constant 0 : index
    %43 = vector.load %arg4[%c0_34, %c0_35] : memref<16x32xf32, #tpu.memory_space<vmem>>, vector<16x32xf32>
    tpu.vector_store %arg4[%c0_34, %c0_35], %42 {strides = array<i32>} : memref<16x32xf32, #tpu.memory_space<vmem>>, vector<16x32xf32>,
    %44 = vector.extract_strided_slice %0 {offsets = [2, 0, 1, 0], sizes = [1, 4, 4, 32], strides = [1, 1, 1, 1]} : vector<4x5x5x32xbf16> to vector<1x4x4x32xbf16>
    %45 = vector.shape_cast %44 : vector<1x4x4x32xbf16> to vector<4x4x32xbf16>
    %46 = vector.shape_cast %45 : vector<4x4x32xbf16> to vector<16x32xbf16>
    %c5 = arith.constant 5 : index
    %c0_36 = arith.constant 0 : index
    %c0_37 = arith.constant 0 : index
    %47 = vector.load %arg2[%c5, %c0_36, %c0_37] : memref<9x32x32xbf16, #tpu.memory_space<vmem>>, vector<1x32x32xbf16>
    %48 = vector.shape_cast %47 : vector<1x32x32xbf16> to vector<32x32xbf16>
    %cst_38 = arith.constant dense<0.000000e+00> : vector<16x32xf32>
    %49 = tpu.matmul %46, %48, %cst_38 {dimension_numbers = #tpu.dot_dimension_numbers<[1], [0], [0], [1], [0, 0, 1, 1], [], []>} : vector<16x32xbf16>, vector<32x32xbf16>, vector<16x32xf32> -> vector<16x32xf32>
    %c0_39 = arith.constant 0 : index
    %c0_40 = arith.constant 0 : index
    %50 = vector.load %arg4[%c0_39, %c0_40] : memref<16x32xf32, #tpu.memory_space<vmem>>, vector<16x32xf32>
    %51 = arith.addf %50, %49 : vector<16x32xf32>
    %c0_41 = arith.constant 0 : index
    %c0_42 = arith.constant 0 : index
    %52 = vector.load %arg4[%c0_41, %c0_42] : memref<16x32xf32, #tpu.memory_space<vmem>>, vector<16x32xf32>
    tpu.vector_store %arg4[%c0_41, %c0_42], %51 {strides = array<i32>} : memref<16x32xf32, #tpu.memory_space<vmem>>, vector<16x32xf32>,
    %53 = vector.extract_strided_slice %0 {offsets = [0, 1, 0, 0], sizes = [1, 4, 4, 32], strides = [1, 1, 1, 1]} : vector<4x5x5x32xbf16> to vector<1x4x4x32xbf16>
    %54 = vector.shape_cast %53 : vector<1x4x4x32xbf16> to vector<4x4x32xbf16>
    %55 = vector.shape_cast %54 : vector<4x4x32xbf16> to vector<16x32xbf16>
    %c6 = arith.constant 6 : index
    %c0_43 = arith.constant 0 : index
    %c0_44 = arith.constant 0 : index
    %56 = vector.load %arg2[%c6, %c0_43, %c0_44] : memref<9x32x32xbf16, #tpu.memory_space<vmem>>, vector<1x32x32xbf16>
    %57 = vector.shape_cast %56 : vector<1x32x32xbf16> to vector<32x32xbf16>
    %cst_45 = arith.constant dense<0.000000e+00> : vector<16x32xf32>
    %58 = tpu.matmul %55, %57, %cst_45 {dimension_numbers = #tpu.dot_dimension_numbers<[1], [0], [0], [1], [0, 0, 1, 1], [], []>} : vector<16x32xbf16>, vector<32x32xbf16>, vector<16x32xf32> -> vector<16x32xf32>
    %c0_46 = arith.constant 0 : index
    %c0_47 = arith.constant 0 : index
    %59 = vector.load %arg4[%c0_46, %c0_47] : memref<16x32xf32, #tpu.memory_space<vmem>>, vector<16x32xf32>
    %60 = arith.addf %59, %58 : vector<16x32xf32>
    %c0_48 = arith.constant 0 : index
    %c0_49 = arith.constant 0 : index
    %61 = vector.load %arg4[%c0_48, %c0_49] : memref<16x32xf32, #tpu.memory_space<vmem>>, vector<16x32xf32>
    tpu.vector_store %arg4[%c0_48, %c0_49], %60 {strides = array<i32>} : memref<16x32xf32, #tpu.memory_space<vmem>>, vector<16x32xf32>,
    %62 = vector.extract_strided_slice %0 {offsets = [1, 1, 0, 0], sizes = [1, 4, 4, 32], strides = [1, 1, 1, 1]} : vector<4x5x5x32xbf16> to vector<1x4x4x32xbf16>
    %63 = vector.shape_cast %62 : vector<1x4x4x32xbf16> to vector<4x4x32xbf16>
    %64 = vector.shape_cast %63 : vector<4x4x32xbf16> to vector<16x32xbf16>
    %c7 = arith.constant 7 : index
    %c0_50 = arith.constant 0 : index
    %c0_51 = arith.constant 0 : index
    %65 = vector.load %arg2[%c7, %c0_50, %c0_51] : memref<9x32x32xbf16, #tpu.memory_space<vmem>>, vector<1x32x32xbf16>
    %66 = vector.shape_cast %65 : vector<1x32x32xbf16> to vector<32x32xbf16>
    %cst_52 = arith.constant dense<0.000000e+00> : vector<16x32xf32>
    %67 = tpu.matmul %64, %66, %cst_52 {dimension_numbers = #tpu.dot_dimension_numbers<[1], [0], [0], [1], [0, 0, 1, 1], [], []>} : vector<16x32xbf16>, vector<32x32xbf16>, vector<16x32xf32> -> vector<16x32xf32>
    %c0_53 = arith.constant 0 : index
    %c0_54 = arith.constant 0 : index
    %68 = vector.load %arg4[%c0_53, %c0_54] : memref<16x32xf32, #tpu.memory_space<vmem>>, vector<16x32xf32>
    %69 = arith.addf %68, %67 : vector<16x32xf32>
    %c0_55 = arith.constant 0 : index
    %c0_56 = arith.constant 0 : index
    %70 = vector.load %arg4[%c0_55, %c0_56] : memref<16x32xf32, #tpu.memory_space<vmem>>, vector<16x32xf32>
    tpu.vector_store %arg4[%c0_55, %c0_56], %69 {strides = array<i32>} : memref<16x32xf32, #tpu.memory_space<vmem>>, vector<16x32xf32>,
    %71 = vector.extract_strided_slice %0 {offsets = [0, 1, 1, 0], sizes = [1, 4, 4, 32], strides = [1, 1, 1, 1]} : vector<4x5x5x32xbf16> to vector<1x4x4x32xbf16>
    %72 = vector.shape_cast %71 : vector<1x4x4x32xbf16> to vector<4x4x32xbf16>
    %73 = vector.shape_cast %72 : vector<4x4x32xbf16> to vector<16x32xbf16>
    %c8 = arith.constant 8 : index
    %c0_57 = arith.constant 0 : index
    %c0_58 = arith.constant 0 : index
    %74 = vector.load %arg2[%c8, %c0_57, %c0_58] : memref<9x32x32xbf16, #tpu.memory_space<vmem>>, vector<1x32x32xbf16>
    %75 = vector.shape_cast %74 : vector<1x32x32xbf16> to vector<32x32xbf16>
    %cst_59 = arith.constant dense<0.000000e+00> : vector<16x32xf32>
    %76 = tpu.matmul %73, %75, %cst_59 {dimension_numbers = #tpu.dot_dimension_numbers<[1], [0], [0], [1], [0, 0, 1, 1], [], []>} : vector<16x32xbf16>, vector<32x32xbf16>, vector<16x32xf32> -> vector<16x32xf32>
    %c0_60 = arith.constant 0 : index
    %c0_61 = arith.constant 0 : index
    %77 = vector.load %arg4[%c0_60, %c0_61] : memref<16x32xf32, #tpu.memory_space<vmem>>, vector<16x32xf32>
    %78 = arith.addf %77, %76 : vector<16x32xf32>
    %c0_62 = arith.constant 0 : index
    %c0_63 = arith.constant 0 : index
    %79 = vector.load %arg4[%c0_62, %c0_63] : memref<16x32xf32, #tpu.memory_space<vmem>>, vector<16x32xf32>
    tpu.vector_store %arg4[%c0_62, %c0_63], %78 {strides = array<i32>} : memref<16x32xf32, #tpu.memory_space<vmem>>, vector<16x32xf32>,
    %c0_64 = arith.constant 0 : index
    %c0_65 = arith.constant 0 : index
    %80 = vector.load %arg4[%c0_64, %c0_65] : memref<16x32xf32, #tpu.memory_space<vmem>>, vector<16x32xf32>
    %81 = vector.shape_cast %80 : vector<16x32xf32> to vector<4x4x32xf32>
    %82 = arith.truncf %81 : vector<4x4x32xf32> to vector<4x4x32xbf16>
    %c0_66 = arith.constant 0 : index
    %c0_67 = arith.constant 0 : index
    %c0_68 = arith.constant 0 : index
    %c0_69 = arith.constant 0 : index
    %83 = vector.load %arg3[%c0_66, %c0_67, %c0_68, %c0_69] : memref<1x4x4x32xbf16, #tpu.memory_space<vmem>>, vector<1x4x4x32xbf16>
    %84 = vector.shape_cast %83 : vector<1x4x4x32xbf16> to vector<4x4x32xbf16>
    %85 = vector.shape_cast %82 : vector<4x4x32xbf16> to vector<1x4x4x32xbf16>
    tpu.vector_store %arg3[%c0_66, %c0_67, %c0_68, %c0_69], %85 {strides = array<i32>} : memref<1x4x4x32xbf16, #tpu.memory_space<vmem>>, vector<1x4x4x32xbf16>,
    return
  }
  func.func @transform_0(%arg0: i32) -> (i32, i32, i32, i32) {
    %c0_i32 = arith.constant 0 : i32
    %c0_i32_0 = arith.constant 0 : i32
    %c0_i32_1 = arith.constant 0 : i32
    %c0_i32_2 = arith.constant 0 : i32
    return %arg0, %c0_i32, %c0_i32_0, %c0_i32_1 : i32, i32, i32, i32
  }
  func.func @transform_1(%arg0: i32) -> (i32, i32, i32) {
    %c0_i32 = arith.constant 0 : i32
    %c0_i32_0 = arith.constant 0 : i32
    %c0_i32_1 = arith.constant 0 : i32
    %c0_i32_2 = arith.constant 0 : i32
    return %c0_i32, %c0_i32_0, %c0_i32_1 : i32, i32, i32
  }
  func.func @transform_2(%arg0: i32) -> (i32, i32, i32, i32) {
    %c0_i32 = arith.constant 0 : i32
    %c0_i32_0 = arith.constant 0 : i32
    %c0_i32_1 = arith.constant 0 : i32
    %c0_i32_2 = arith.constant 0 : i32
    return %arg0, %c0_i32, %c0_i32_0, %c0_i32_1 : i32, i32, i32, i32
  }
}

module attributes {stable_mosaic.version = 11 : i64} {
  func.func @_gn_kernel(%arg0: i32, %arg1: memref<1x16x32xbf16, #tpu.memory_space<vmem>>, %arg2: memref<32x32xf32, #tpu.memory_space<vmem>>, %arg3: memref<32x32xf32, #tpu.memory_space<vmem>>, %arg4: memref<1x32xf32, #tpu.memory_space<vmem>>, %arg5: memref<1x32xf32, #tpu.memory_space<vmem>>, %arg6: memref<1x16x32xbf16, #tpu.memory_space<vmem>>) attributes {dimension_semantics = [#tpu.dimension_semantics<parallel>], iteration_bounds = array<i64: 2>, scalar_prefetch = 0 : i64, scratch_operands = 0 : i64, tpu.core_type = #tpu.core_type<tc>, window_params = [{transform_indices = @transform_0, window_bounds = array<i64: 1, 16, 32>}, {pipeline_mode = #tpu.pipeline_mode<synchronous>, transform_indices = @transform_1, window_bounds = array<i64: 32, 32>}, {pipeline_mode = #tpu.pipeline_mode<synchronous>, transform_indices = @transform_2, window_bounds = array<i64: 32, 32>}, {pipeline_mode = #tpu.pipeline_mode<synchronous>, transform_indices = @transform_3, window_bounds = array<i64: 1, 32>}, {pipeline_mode = #tpu.pipeline_mode<synchronous>, transform_indices = @transform_4, window_bounds = array<i64: 1, 32>}, {transform_indices = @transform_5, window_bounds = array<i64: 1, 16, 32>}]} {
    %c0 = arith.constant 0 : index
    %c0_0 = arith.constant 0 : index
    %c0_1 = arith.constant 0 : index
    %0 = vector.load %arg1[%c0, %c0_0, %c0_1] : memref<1x16x32xbf16, #tpu.memory_space<vmem>>, vector<1x16x32xbf16>
    %1 = vector.shape_cast %0 : vector<1x16x32xbf16> to vector<16x32xbf16>
    %2 = arith.extf %1 : vector<16x32xbf16> to vector<16x32xf32>
    %c0_2 = arith.constant 0 : index
    %c0_3 = arith.constant 0 : index
    %3 = vector.load %arg2[%c0_2, %c0_3] : memref<32x32xf32, #tpu.memory_space<vmem>>, vector<32x32xf32>
    %c0_4 = arith.constant 0 : index
    %c0_5 = arith.constant 0 : index
    %4 = vector.load %arg3[%c0_4, %c0_5] : memref<32x32xf32, #tpu.memory_space<vmem>>, vector<32x32xf32>
    %c0_6 = arith.constant 0 : index
    %c0_7 = arith.constant 0 : index
    %5 = vector.load %arg4[%c0_6, %c0_7] : memref<1x32xf32, #tpu.memory_space<vmem>>, vector<1x32xf32>
    %c0_8 = arith.constant 0 : index
    %c0_9 = arith.constant 0 : index
    %6 = vector.load %arg5[%c0_8, %c0_9] : memref<1x32xf32, #tpu.memory_space<vmem>>, vector<1x32xf32>
    %cst = arith.constant dense<0.000000e+00> : vector<32xf32>
    %7 = vector.multi_reduction <add>, %2, %cst [0] : vector<16x32xf32> to vector<32xf32>
    %8 = vector.shape_cast %7 : vector<32xf32> to vector<1x32xf32>
    %cst_10 = arith.constant dense<0.000000e+00> : vector<1x32xf32>
    %9 = tpu.matmul %8, %3, %cst_10 {dimension_numbers = #tpu.dot_dimension_numbers<[1], [0], [0], [1], [0, 0, 1, 1], [], []>} : vector<1x32xf32>, vector<32x32xf32>, vector<1x32xf32> -> vector<1x32xf32>
    %cst_11 = arith.constant 6.250000e-02 : f32
    %10 = vector.broadcast %cst_11 : f32 to vector<1x32xf32>
    %11 = arith.mulf %9, %10 : vector<1x32xf32>
    %cst_12 = arith.constant dense<0.000000e+00> : vector<1x32xf32>
    %12 = tpu.matmul %11, %4, %cst_12 {dimension_numbers = #tpu.dot_dimension_numbers<[1], [0], [0], [1], [0, 0, 1, 1], [], []>} : vector<1x32xf32>, vector<32x32xf32>, vector<1x32xf32> -> vector<1x32xf32>
    %13 = vector.broadcast %12 : vector<1x32xf32> to vector<16x32xf32>
    %14 = arith.subf %2, %13 : vector<16x32xf32>
    %15 = arith.mulf %14, %14 : vector<16x32xf32>
    %cst_13 = arith.constant dense<0.000000e+00> : vector<32xf32>
    %16 = vector.multi_reduction <add>, %15, %cst_13 [0] : vector<16x32xf32> to vector<32xf32>
    %17 = vector.shape_cast %16 : vector<32xf32> to vector<1x32xf32>
    %cst_14 = arith.constant dense<0.000000e+00> : vector<1x32xf32>
    %18 = tpu.matmul %17, %3, %cst_14 {dimension_numbers = #tpu.dot_dimension_numbers<[1], [0], [0], [1], [0, 0, 1, 1], [], []>} : vector<1x32xf32>, vector<32x32xf32>, vector<1x32xf32> -> vector<1x32xf32>
    %cst_15 = arith.constant 6.250000e-02 : f32
    %19 = vector.broadcast %cst_15 : f32 to vector<1x32xf32>
    %20 = arith.mulf %18, %19 : vector<1x32xf32>
    %cst_16 = arith.constant 9.99999974E-6 : f32
    %21 = vector.broadcast %cst_16 : f32 to vector<1x32xf32>
    %22 = arith.addf %20, %21 : vector<1x32xf32>
    %23 = math.rsqrt %22 : vector<1x32xf32>
    %cst_17 = arith.constant dense<0.000000e+00> : vector<1x32xf32>
    %24 = tpu.matmul %23, %4, %cst_17 {dimension_numbers = #tpu.dot_dimension_numbers<[1], [0], [0], [1], [0, 0, 1, 1], [], []>} : vector<1x32xf32>, vector<32x32xf32>, vector<1x32xf32> -> vector<1x32xf32>
    %25 = vector.broadcast %24 : vector<1x32xf32> to vector<16x32xf32>
    %26 = arith.mulf %14, %25 : vector<16x32xf32>
    %27 = vector.broadcast %5 : vector<1x32xf32> to vector<16x32xf32>
    %28 = arith.mulf %26, %27 : vector<16x32xf32>
    %29 = vector.broadcast %6 : vector<1x32xf32> to vector<16x32xf32>
    %30 = arith.addf %28, %29 : vector<16x32xf32>
    %cst_18 = arith.constant 0.000000e+00 : f32
    %31 = vector.broadcast %cst_18 : f32 to vector<16x32xf32>
    %32 = arith.maximumf %30, %31 : vector<16x32xf32>
    %33 = arith.truncf %32 : vector<16x32xf32> to vector<16x32xbf16>
    %c0_19 = arith.constant 0 : index
    %c0_20 = arith.constant 0 : index
    %c0_21 = arith.constant 0 : index
    %34 = vector.load %arg6[%c0_19, %c0_20, %c0_21] : memref<1x16x32xbf16, #tpu.memory_space<vmem>>, vector<1x16x32xbf16>
    %35 = vector.shape_cast %34 : vector<1x16x32xbf16> to vector<16x32xbf16>
    %36 = vector.shape_cast %33 : vector<16x32xbf16> to vector<1x16x32xbf16>
    tpu.vector_store %arg6[%c0_19, %c0_20, %c0_21], %36 {strides = array<i32>} : memref<1x16x32xbf16, #tpu.memory_space<vmem>>, vector<1x16x32xbf16>,
    return
  }
  func.func @transform_0(%arg0: i32) -> (i32, i32, i32) {
    %c0_i32 = arith.constant 0 : i32
    %c0_i32_0 = arith.constant 0 : i32
    %c0_i32_1 = arith.constant 0 : i32
    return %arg0, %c0_i32, %c0_i32_0 : i32, i32, i32
  }
  func.func @transform_1(%arg0: i32) -> (i32, i32) {
    %c0_i32 = arith.constant 0 : i32
    %c0_i32_0 = arith.constant 0 : i32
    %c0_i32_1 = arith.constant 0 : i32
    return %c0_i32, %c0_i32_0 : i32, i32
  }
  func.func @transform_2(%arg0: i32) -> (i32, i32) {
    %c0_i32 = arith.constant 0 : i32
    %c0_i32_0 = arith.constant 0 : i32
    %c0_i32_1 = arith.constant 0 : i32
    return %c0_i32, %c0_i32_0 : i32, i32
  }
  func.func @transform_3(%arg0: i32) -> (i32, i32) {
    %c0_i32 = arith.constant 0 : i32
    %c0_i32_0 = arith.constant 0 : i32
    %c0_i32_1 = arith.constant 0 : i32
    return %c0_i32, %c0_i32_0 : i32, i32
  }
  func.func @transform_4(%arg0: i32) -> (i32, i32) {
    %c0_i32 = arith.constant 0 : i32
    %c0_i32_0 = arith.constant 0 : i32
    %c0_i32_1 = arith.constant 0 : i32
    return %c0_i32, %c0_i32_0 : i32, i32
  }
  func.func @transform_5(%arg0: i32) -> (i32, i32, i32) {
    %c0_i32 = arith.constant 0 : i32
    %c0_i32_0 = arith.constant 0 : i32
    %c0_i32_1 = arith.constant 0 : i32
    return %arg0, %c0_i32, %c0_i32_0 : i32, i32, i32
  }
}

module attributes {stable_mosaic.version = 11 : i64} {
  func.func @_ws_kernel(%arg0: i32, %arg1: memref<128x128xf32, #tpu.memory_space<vmem>>, %arg2: memref<128x128xbf16, #tpu.memory_space<vmem>>) attributes {dimension_semantics = [#tpu.dimension_semantics<parallel>], iteration_bounds = array<i64: 1>, scalar_prefetch = 0 : i64, scratch_operands = 0 : i64, tpu.core_type = #tpu.core_type<tc>, window_params = [{transform_indices = @transform_0, window_bounds = array<i64: 128, 128>}, {transform_indices = @transform_1, window_bounds = array<i64: 128, 128>}]} {
    %c0 = arith.constant 0 : index
    %c0_0 = arith.constant 0 : index
    %0 = vector.load %arg1[%c0, %c0_0] : memref<128x128xf32, #tpu.memory_space<vmem>>, vector<128x128xf32>
    %cst = arith.constant dense<0.000000e+00> : vector<128xf32>
    %1 = vector.multi_reduction <add>, %0, %cst [1] : vector<128x128xf32> to vector<128xf32>
    %2 = vector.shape_cast %1 : vector<128xf32> to vector<128x1xf32>
    %cst_1 = arith.constant 1.280000e+02 : f32
    %3 = vector.broadcast %cst_1 : f32 to vector<128x1xf32>
    %4 = arith.divf %2, %3 : vector<128x1xf32>
    %5 = vector.broadcast %4 : vector<128x1xf32> to vector<128x128xf32>
    %6 = arith.subf %0, %5 : vector<128x128xf32>
    %7 = arith.mulf %6, %6 : vector<128x128xf32>
    %cst_2 = arith.constant dense<0.000000e+00> : vector<128xf32>
    %8 = vector.multi_reduction <add>, %7, %cst_2 [1] : vector<128x128xf32> to vector<128xf32>
    %9 = vector.shape_cast %8 : vector<128xf32> to vector<128x1xf32>
    %cst_3 = arith.constant 1.280000e+02 : f32
    %10 = vector.broadcast %cst_3 : f32 to vector<128x1xf32>
    %11 = arith.divf %9, %10 : vector<128x1xf32>
    %cst_4 = arith.constant 9.99999997E-7 : f32
    %12 = vector.broadcast %cst_4 : f32 to vector<128x1xf32>
    %13 = arith.addf %11, %12 : vector<128x1xf32>
    %14 = math.rsqrt %13 : vector<128x1xf32>
    %15 = vector.broadcast %14 : vector<128x1xf32> to vector<128x128xf32>
    %16 = arith.mulf %6, %15 : vector<128x128xf32>
    %17 = arith.truncf %16 : vector<128x128xf32> to vector<128x128xbf16>
    %c0_5 = arith.constant 0 : index
    %c0_6 = arith.constant 0 : index
    %18 = vector.load %arg2[%c0_5, %c0_6] : memref<128x128xbf16, #tpu.memory_space<vmem>>, vector<128x128xbf16>
    tpu.vector_store %arg2[%c0_5, %c0_6], %17 {strides = array<i32>} : memref<128x128xbf16, #tpu.memory_space<vmem>>, vector<128x128xbf16>,
    return
  }
  func.func @transform_0(%arg0: i32) -> (i32, i32) {
    %c0_i32 = arith.constant 0 : i32
    %c0_i32_0 = arith.constant 0 : i32
    return %arg0, %c0_i32 : i32, i32
  }
  func.func @transform_1(%arg0: i32) -> (i32, i32) {
    %c0_i32 = arith.constant 0 : i32
    %c0_i32_0 = arith.constant 0 : i32
    return %arg0, %c0_i32 : i32, i32
  }
}

module attributes {stable_mosaic.version = 11 : i64} {
  func.func @_mm_kernel(%arg0: i32, %arg1: i32, %arg2: i32, %arg3: memref<32x128xbf16, #tpu.memory_space<vmem>>, %arg4: memref<128x128xbf16, #tpu.memory_space<vmem>>, %arg5: memref<32x128xbf16, #tpu.memory_space<vmem>>) attributes {dimension_semantics = [#tpu.dimension_semantics<parallel>, #tpu.dimension_semantics<parallel>, #tpu.dimension_semantics<arbitrary>], iteration_bounds = array<i64: 1, 1, 1>, scalar_prefetch = 0 : i64, scratch_operands = 0 : i64, tpu.core_type = #tpu.core_type<tc>, window_params = [{transform_indices = @transform_0, window_bounds = array<i64: 32, 128>}, {transform_indices = @transform_1, window_bounds = array<i64: 128, 128>}, {transform_indices = @transform_2, window_bounds = array<i64: 32, 128>}]} {
    %c0 = arith.constant 0 : index
    %c0_0 = arith.constant 0 : index
    %0 = vector.load %arg3[%c0, %c0_0] : memref<32x128xbf16, #tpu.memory_space<vmem>>, vector<32x128xbf16>
    %c0_1 = arith.constant 0 : index
    %c0_2 = arith.constant 0 : index
    %1 = vector.load %arg4[%c0_1, %c0_2] : memref<128x128xbf16, #tpu.memory_space<vmem>>, vector<128x128xbf16>
    %cst = arith.constant dense<0.000000e+00> : vector<32x128xf32>
    %2 = tpu.matmul %0, %1, %cst {dimension_numbers = #tpu.dot_dimension_numbers<[1], [0], [0], [1], [0, 0, 1, 1], [], []>} : vector<32x128xbf16>, vector<128x128xbf16>, vector<32x128xf32> -> vector<32x128xf32>
    %3 = arith.truncf %2 : vector<32x128xf32> to vector<32x128xbf16>
    %c0_3 = arith.constant 0 : index
    %c0_4 = arith.constant 0 : index
    %4 = vector.load %arg5[%c0_3, %c0_4] : memref<32x128xbf16, #tpu.memory_space<vmem>>, vector<32x128xbf16>
    tpu.vector_store %arg5[%c0_3, %c0_4], %3 {strides = array<i32>} : memref<32x128xbf16, #tpu.memory_space<vmem>>, vector<32x128xbf16>,
    return
  }
  func.func @transform_0(%arg0: i32, %arg1: i32, %arg2: i32) -> (i32, i32) {
    %c0_i32 = arith.constant 0 : i32
    return %arg0, %arg2 : i32, i32
  }
  func.func @transform_1(%arg0: i32, %arg1: i32, %arg2: i32) -> (i32, i32) {
    %c0_i32 = arith.constant 0 : i32
    return %arg2, %arg1 : i32, i32
  }
  func.func @transform_2(%arg0: i32, %arg1: i32, %arg2: i32) -> (i32, i32) {
    %c0_i32 = arith.constant 0 : i32
    return %arg0, %arg1 : i32, i32
  }
}

module attributes {stable_mosaic.version = 11 : i64} {
  func.func @_mm_kernel(%arg0: i32, %arg1: i32, %arg2: i32, %arg3: memref<32x32xbf16, #tpu.memory_space<vmem>>, %arg4: memref<32x128xbf16, #tpu.memory_space<vmem>>, %arg5: memref<32x128xbf16, #tpu.memory_space<vmem>>, %arg6: memref<32x128xbf16, #tpu.memory_space<vmem>>) attributes {dimension_semantics = [#tpu.dimension_semantics<parallel>, #tpu.dimension_semantics<parallel>, #tpu.dimension_semantics<arbitrary>], iteration_bounds = array<i64: 1, 1, 1>, scalar_prefetch = 0 : i64, scratch_operands = 0 : i64, tpu.core_type = #tpu.core_type<tc>, window_params = [{transform_indices = @transform_0, window_bounds = array<i64: 32, 32>}, {transform_indices = @transform_1, window_bounds = array<i64: 32, 128>}, {transform_indices = @transform_2, window_bounds = array<i64: 32, 128>}, {transform_indices = @transform_3, window_bounds = array<i64: 32, 128>}]} {
    %c0 = arith.constant 0 : index
    %c0_0 = arith.constant 0 : index
    %0 = vector.load %arg3[%c0, %c0_0] : memref<32x32xbf16, #tpu.memory_space<vmem>>, vector<32x32xbf16>
    %c0_1 = arith.constant 0 : index
    %c0_2 = arith.constant 0 : index
    %1 = vector.load %arg4[%c0_1, %c0_2] : memref<32x128xbf16, #tpu.memory_space<vmem>>, vector<32x128xbf16>
    %cst = arith.constant dense<0.000000e+00> : vector<32x128xf32>
    %2 = tpu.matmul %0, %1, %cst {dimension_numbers = #tpu.dot_dimension_numbers<[1], [0], [0], [1], [0, 0, 1, 1], [], []>} : vector<32x32xbf16>, vector<32x128xbf16>, vector<32x128xf32> -> vector<32x128xf32>
    %c0_3 = arith.constant 0 : index
    %c0_4 = arith.constant 0 : index
    %3 = vector.load %arg5[%c0_3, %c0_4] : memref<32x128xbf16, #tpu.memory_space<vmem>>, vector<32x128xbf16>
    %4 = arith.extf %3 : vector<32x128xbf16> to vector<32x128xf32>
    %5 = arith.addf %2, %4 : vector<32x128xf32>
    %6 = arith.truncf %5 : vector<32x128xf32> to vector<32x128xbf16>
    %c0_5 = arith.constant 0 : index
    %c0_6 = arith.constant 0 : index
    %7 = vector.load %arg6[%c0_5, %c0_6] : memref<32x128xbf16, #tpu.memory_space<vmem>>, vector<32x128xbf16>
    tpu.vector_store %arg6[%c0_5, %c0_6], %6 {strides = array<i32>} : memref<32x128xbf16, #tpu.memory_space<vmem>>, vector<32x128xbf16>,
    return
  }
  func.func @transform_0(%arg0: i32, %arg1: i32, %arg2: i32) -> (i32, i32) {
    %c0_i32 = arith.constant 0 : i32
    return %arg0, %arg2 : i32, i32
  }
  func.func @transform_1(%arg0: i32, %arg1: i32, %arg2: i32) -> (i32, i32) {
    %c0_i32 = arith.constant 0 : i32
    return %arg2, %arg1 : i32, i32
  }
  func.func @transform_2(%arg0: i32, %arg1: i32, %arg2: i32) -> (i32, i32) {
    %c0_i32 = arith.constant 0 : i32
    return %arg0, %arg1 : i32, i32
  }
  func.func @transform_3(%arg0: i32, %arg1: i32, %arg2: i32) -> (i32, i32) {
    %c0_i32 = arith.constant 0 : i32
    return %arg0, %arg1 : i32, i32
  }
}

module attributes {stable_mosaic.version = 11 : i64} {
  func.func @_gn_pool_kernel(%arg0: i32, %arg1: memref<1x16x128xbf16, #tpu.memory_space<vmem>>, %arg2: memref<128x32xf32, #tpu.memory_space<vmem>>, %arg3: memref<32x128xf32, #tpu.memory_space<vmem>>, %arg4: memref<1x128xf32, #tpu.memory_space<vmem>>, %arg5: memref<1x128xf32, #tpu.memory_space<vmem>>, %arg6: memref<1x1x128xf32, #tpu.memory_space<vmem>>) attributes {dimension_semantics = [#tpu.dimension_semantics<parallel>], iteration_bounds = array<i64: 2>, scalar_prefetch = 0 : i64, scratch_operands = 0 : i64, tpu.core_type = #tpu.core_type<tc>, window_params = [{transform_indices = @transform_0, window_bounds = array<i64: 1, 16, 128>}, {pipeline_mode = #tpu.pipeline_mode<synchronous>, transform_indices = @transform_1, window_bounds = array<i64: 128, 32>}, {pipeline_mode = #tpu.pipeline_mode<synchronous>, transform_indices = @transform_2, window_bounds = array<i64: 32, 128>}, {pipeline_mode = #tpu.pipeline_mode<synchronous>, transform_indices = @transform_3, window_bounds = array<i64: 1, 128>}, {pipeline_mode = #tpu.pipeline_mode<synchronous>, transform_indices = @transform_4, window_bounds = array<i64: 1, 128>}, {transform_indices = @transform_5, window_bounds = array<i64: 1, 1, 128>}]} {
    %c0 = arith.constant 0 : index
    %c0_0 = arith.constant 0 : index
    %c0_1 = arith.constant 0 : index
    %0 = vector.load %arg1[%c0, %c0_0, %c0_1] : memref<1x16x128xbf16, #tpu.memory_space<vmem>>, vector<1x16x128xbf16>
    %1 = vector.shape_cast %0 : vector<1x16x128xbf16> to vector<16x128xbf16>
    %2 = arith.extf %1 : vector<16x128xbf16> to vector<16x128xf32>
    %c0_2 = arith.constant 0 : index
    %c0_3 = arith.constant 0 : index
    %3 = vector.load %arg2[%c0_2, %c0_3] : memref<128x32xf32, #tpu.memory_space<vmem>>, vector<128x32xf32>
    %c0_4 = arith.constant 0 : index
    %c0_5 = arith.constant 0 : index
    %4 = vector.load %arg3[%c0_4, %c0_5] : memref<32x128xf32, #tpu.memory_space<vmem>>, vector<32x128xf32>
    %c0_6 = arith.constant 0 : index
    %c0_7 = arith.constant 0 : index
    %5 = vector.load %arg4[%c0_6, %c0_7] : memref<1x128xf32, #tpu.memory_space<vmem>>, vector<1x128xf32>
    %c0_8 = arith.constant 0 : index
    %c0_9 = arith.constant 0 : index
    %6 = vector.load %arg5[%c0_8, %c0_9] : memref<1x128xf32, #tpu.memory_space<vmem>>, vector<1x128xf32>
    %cst = arith.constant dense<0.000000e+00> : vector<128xf32>
    %7 = vector.multi_reduction <add>, %2, %cst [0] : vector<16x128xf32> to vector<128xf32>
    %8 = vector.shape_cast %7 : vector<128xf32> to vector<1x128xf32>
    %cst_10 = arith.constant dense<0.000000e+00> : vector<1x32xf32>
    %9 = tpu.matmul %8, %3, %cst_10 {dimension_numbers = #tpu.dot_dimension_numbers<[1], [0], [0], [1], [0, 0, 1, 1], [], []>} : vector<1x128xf32>, vector<128x32xf32>, vector<1x32xf32> -> vector<1x32xf32>
    %cst_11 = arith.constant 1.562500e-02 : f32
    %10 = vector.broadcast %cst_11 : f32 to vector<1x32xf32>
    %11 = arith.mulf %9, %10 : vector<1x32xf32>
    %cst_12 = arith.constant dense<0.000000e+00> : vector<1x128xf32>
    %12 = tpu.matmul %11, %4, %cst_12 {dimension_numbers = #tpu.dot_dimension_numbers<[1], [0], [0], [1], [0, 0, 1, 1], [], []>} : vector<1x32xf32>, vector<32x128xf32>, vector<1x128xf32> -> vector<1x128xf32>
    %13 = vector.broadcast %12 : vector<1x128xf32> to vector<16x128xf32>
    %14 = arith.subf %2, %13 : vector<16x128xf32>
    %15 = arith.mulf %14, %14 : vector<16x128xf32>
    %cst_13 = arith.constant dense<0.000000e+00> : vector<128xf32>
    %16 = vector.multi_reduction <add>, %15, %cst_13 [0] : vector<16x128xf32> to vector<128xf32>
    %17 = vector.shape_cast %16 : vector<128xf32> to vector<1x128xf32>
    %cst_14 = arith.constant dense<0.000000e+00> : vector<1x32xf32>
    %18 = tpu.matmul %17, %3, %cst_14 {dimension_numbers = #tpu.dot_dimension_numbers<[1], [0], [0], [1], [0, 0, 1, 1], [], []>} : vector<1x128xf32>, vector<128x32xf32>, vector<1x32xf32> -> vector<1x32xf32>
    %cst_15 = arith.constant 1.562500e-02 : f32
    %19 = vector.broadcast %cst_15 : f32 to vector<1x32xf32>
    %20 = arith.mulf %18, %19 : vector<1x32xf32>
    %cst_16 = arith.constant 9.99999974E-6 : f32
    %21 = vector.broadcast %cst_16 : f32 to vector<1x32xf32>
    %22 = arith.addf %20, %21 : vector<1x32xf32>
    %23 = math.rsqrt %22 : vector<1x32xf32>
    %cst_17 = arith.constant dense<0.000000e+00> : vector<1x128xf32>
    %24 = tpu.matmul %23, %4, %cst_17 {dimension_numbers = #tpu.dot_dimension_numbers<[1], [0], [0], [1], [0, 0, 1, 1], [], []>} : vector<1x32xf32>, vector<32x128xf32>, vector<1x128xf32> -> vector<1x128xf32>
    %25 = vector.broadcast %24 : vector<1x128xf32> to vector<16x128xf32>
    %26 = arith.mulf %14, %25 : vector<16x128xf32>
    %27 = vector.broadcast %5 : vector<1x128xf32> to vector<16x128xf32>
    %28 = arith.mulf %26, %27 : vector<16x128xf32>
    %29 = vector.broadcast %6 : vector<1x128xf32> to vector<16x128xf32>
    %30 = arith.addf %28, %29 : vector<16x128xf32>
    %cst_18 = arith.constant 0.000000e+00 : f32
    %31 = vector.broadcast %cst_18 : f32 to vector<16x128xf32>
    %32 = arith.maximumf %30, %31 : vector<16x128xf32>
    %cst_19 = arith.constant dense<0.000000e+00> : vector<128xf32>
    %33 = vector.multi_reduction <add>, %32, %cst_19 [0] : vector<16x128xf32> to vector<128xf32>
    %34 = vector.shape_cast %33 : vector<128xf32> to vector<1x128xf32>
    %cst_20 = arith.constant 6.250000e-02 : f32
    %35 = vector.broadcast %cst_20 : f32 to vector<1x128xf32>
    %36 = arith.mulf %34, %35 : vector<1x128xf32>
    %c0_21 = arith.constant 0 : index
    %c0_22 = arith.constant 0 : index
    %c0_23 = arith.constant 0 : index
    %37 = vector.load %arg6[%c0_21, %c0_22, %c0_23] : memref<1x1x128xf32, #tpu.memory_space<vmem>>, vector<1x1x128xf32>
    %38 = vector.shape_cast %37 : vector<1x1x128xf32> to vector<1x128xf32>
    %39 = vector.shape_cast %36 : vector<1x128xf32> to vector<1x1x128xf32>
    tpu.vector_store %arg6[%c0_21, %c0_22, %c0_23], %39 {strides = array<i32>} : memref<1x1x128xf32, #tpu.memory_space<vmem>>, vector<1x1x128xf32>,
    return
  }
  func.func @transform_0(%arg0: i32) -> (i32, i32, i32) {
    %c0_i32 = arith.constant 0 : i32
    %c0_i32_0 = arith.constant 0 : i32
    %c0_i32_1 = arith.constant 0 : i32
    return %arg0, %c0_i32, %c0_i32_0 : i32, i32, i32
  }
  func.func @transform_1(%arg0: i32) -> (i32, i32) {
    %c0_i32 = arith.constant 0 : i32
    %c0_i32_0 = arith.constant 0 : i32
    %c0_i32_1 = arith.constant 0 : i32
    return %c0_i32, %c0_i32_0 : i32, i32
  }
  func.func @transform_2(%arg0: i32) -> (i32, i32) {
    %c0_i32 = arith.constant 0 : i32
    %c0_i32_0 = arith.constant 0 : i32
    %c0_i32_1 = arith.constant 0 : i32
    return %c0_i32, %c0_i32_0 : i32, i32
  }
  func.func @transform_3(%arg0: i32) -> (i32, i32) {
    %c0_i32 = arith.constant 0 : i32
    %c0_i32_0 = arith.constant 0 : i32
    %c0_i32_1 = arith.constant 0 : i32
    return %c0_i32, %c0_i32_0 : i32, i32
  }
  func.func @transform_4(%arg0: i32) -> (i32, i32) {
    %c0_i32 = arith.constant 0 : i32
    %c0_i32_0 = arith.constant 0 : i32
    %c0_i32_1 = arith.constant 0 : i32
    return %c0_i32, %c0_i32_0 : i32, i32
  }
  func.func @transform_5(%arg0: i32) -> (i32, i32, i32) {
    %c0_i32 = arith.constant 0 : i32
    %c0_i32_0 = arith.constant 0 : i32
    %c0_i32_1 = arith.constant 0 : i32
    return %arg0, %c0_i32, %c0_i32_0 : i32, i32, i32
  }
}

module attributes {stable_mosaic.version = 11 : i64} {
  func.func @_mm_kernel(%arg0: i32, %arg1: i32, %arg2: i32, %arg3: memref<2x128xbf16, #tpu.memory_space<vmem>>, %arg4: memref<128x10xbf16, #tpu.memory_space<vmem>>, %arg5: memref<1x10xf32, #tpu.memory_space<vmem>>, %arg6: memref<2x10xf32, #tpu.memory_space<vmem>>) attributes {dimension_semantics = [#tpu.dimension_semantics<parallel>, #tpu.dimension_semantics<parallel>, #tpu.dimension_semantics<arbitrary>], iteration_bounds = array<i64: 1, 1, 1>, scalar_prefetch = 0 : i64, scratch_operands = 0 : i64, tpu.core_type = #tpu.core_type<tc>, window_params = [{transform_indices = @transform_0, window_bounds = array<i64: 2, 128>}, {transform_indices = @transform_1, window_bounds = array<i64: 128, 10>}, {transform_indices = @transform_2, window_bounds = array<i64: 1, 10>}, {transform_indices = @transform_3, window_bounds = array<i64: 2, 10>}]} {
    %c0 = arith.constant 0 : index
    %c0_0 = arith.constant 0 : index
    %0 = vector.load %arg3[%c0, %c0_0] : memref<2x128xbf16, #tpu.memory_space<vmem>>, vector<2x128xbf16>
    %c0_1 = arith.constant 0 : index
    %c0_2 = arith.constant 0 : index
    %1 = vector.load %arg4[%c0_1, %c0_2] : memref<128x10xbf16, #tpu.memory_space<vmem>>, vector<128x10xbf16>
    %cst = arith.constant dense<0.000000e+00> : vector<2x10xf32>
    %2 = tpu.matmul %0, %1, %cst {dimension_numbers = #tpu.dot_dimension_numbers<[1], [0], [0], [1], [0, 0, 1, 1], [], []>} : vector<2x128xbf16>, vector<128x10xbf16>, vector<2x10xf32> -> vector<2x10xf32>
    %c0_3 = arith.constant 0 : index
    %c0_4 = arith.constant 0 : index
    %3 = vector.load %arg5[%c0_3, %c0_4] : memref<1x10xf32, #tpu.memory_space<vmem>>, vector<1x10xf32>
    %4 = vector.broadcast %3 : vector<1x10xf32> to vector<2x10xf32>
    %5 = arith.addf %2, %4 : vector<2x10xf32>
    %c0_5 = arith.constant 0 : index
    %c0_6 = arith.constant 0 : index
    %6 = vector.load %arg6[%c0_5, %c0_6] : memref<2x10xf32, #tpu.memory_space<vmem>>, vector<2x10xf32>
    tpu.vector_store %arg6[%c0_5, %c0_6], %5 {strides = array<i32>} : memref<2x10xf32, #tpu.memory_space<vmem>>, vector<2x10xf32>,
    return
  }
  func.func @transform_0(%arg0: i32, %arg1: i32, %arg2: i32) -> (i32, i32) {
    %c0_i32 = arith.constant 0 : i32
    return %arg0, %arg2 : i32, i32
  }
  func.func @transform_1(%arg0: i32, %arg1: i32, %arg2: i32) -> (i32, i32) {
    %c0_i32 = arith.constant 0 : i32
    return %arg2, %arg1 : i32, i32
  }
  func.func @transform_2(%arg0: i32, %arg1: i32, %arg2: i32) -> (i32, i32) {
    %c0_i32 = arith.constant 0 : i32
    %c0_i32_0 = arith.constant 0 : i32
    return %c0_i32, %arg1 : i32, i32
  }
  func.func @transform_3(%arg0: i32, %arg1: i32, %arg2: i32) -> (i32, i32) {
    %c0_i32 = arith.constant 0 : i32
    return %arg0, %arg1 : i32, i32
  }
}

</mosaic_0001>

<bundles_post_ra>
// kernel: _lambda_.27
= control target key start
LH: loop header
LB: loop body
LE: loop exit
PB: predicated region body
PF: predicated region fallthrough
CT: control target
= control target key end

     0   :  { %vm16_vm0 = vcmask 154624   ;;  %vm114_vm1 = vcmask 1043456   ;;  %vm115_vm2 = vcmask 154628   ;;  %s207_s0 = inlined_call_operand.vmem [shape: f32[32,147], index: 0, kind: input, shape index: {}]   ;;  %s208_s1 = inlined_call_operand.vmem [shape: bf16[32,147], index: 1, kind: output, shape index: {}]  }
   0x1   :  { %v8_v0 = vld [vmem:[%s207_s0] sm:$0xff]  ;;  %v9_v1 = vld [vmem:[%s207_s0 + $0x8] sm:$0xff]  ;;  %v10_v5 = vld [vmem:[%s207_s0 + $0x10] sm:$0xff] }
   0x2   :  { %v12_v2 = vld [vmem:[%s207_s0 + $0x20] sm:$0xff]  ;;  %v17_v3 = vsel %vm16_vm0, %v9_v1, 0.0  ;;  %v13_v4 = vld [vmem:[%s207_s0 + $0x28] sm:$0xff]  ;;  %v11_v6 = vld [vmem:[%s207_s0 + $0x18] sm:$0xff] }
   0x3   :  { %v18_v7 = vadd.f32 %v17_v3, %v8_v0  ;;  %v25_v8 = vsel %vm16_vm0, %v13_v4, 0.0  ;;  %v21_v9 = vsel %vm16_vm0, %v11_v6, 0.0  ;;  %v14_v10 = vld [vmem:[%s207_s0 + $0x30] sm:$0xff]  ;;  %v15_v11 = vld [vmem:[%s207_s0 + $0x38] sm:$0xff]  ;;  %vm183_vm3 = vmor %vm115_vm2, %vm114_vm1 }
   0x4   :  { %v26_v12 = vadd.f32 %v25_v8, %v12_v2  ;;  %v29_v13 = vsel %vm16_vm0, %v15_v11, 0.0  ;;  %v22_v14 = vadd.f32 %v21_v9, %v10_v5 }
   0x5   :  { %19 = vadd.xlane.f32.xlu0 %v18_v7  ;;  %v30_v15 = vadd.f32 %v29_v13, %v14_v10 }
   0x6   :  { %27 = vadd.xlane.f32.xlu1 %v26_v12 }
   0x9   :  { %23 = vadd.xlane.f32.xlu0 %v22_v14 }
   0xa   :  { %31 = vadd.xlane.f32.xlu1 %v30_v15 }
  0x92   :  { %v20_v16 = vpop.xlane.xlu0 %19 }
  0x93   :  { %v34_v17 = vmul.f32 0.006802721, %v20_v16  ;;  %v28_v18 = vpop.xlane.xlu1 %27 }
  0x94   :  { %v36_v19 = vmul.f32 0.006802721, %v28_v18 }
  0x95   :  { %v38_v20 = vsub.f32 %v8_v0, %v34_v17  ;;  %v39_v21 = vsub.f32 %v9_v1, %v34_v17 }
  0x96   :  { %v42_v22 = vsub.f32 %v12_v2, %v36_v19  ;;  %v43_v23 = vsub.f32 %v13_v4, %v36_v19  ;;  %v24_v24 = vpop.xlane.xlu0 %23 }
  0x97   :  { %v35_v25 = vmul.f32 0.006802721, %v24_v24  ;;  %v32_v26 = vpop.xlane.xlu1 %31  ;;  %v46_v27 = vmul.f32 %v38_v20, %v38_v20  ;;  %v47_v28 = vmul.f32 %v39_v21, %v39_v21 }
  0x98   :  { %v37_v29 = vmul.f32 0.006802721, %v32_v26  ;;  %v50_v30 = vmul.f32 %v42_v22, %v42_v22  ;;  %v51_v31 = vmul.f32 %v43_v23, %v43_v23 }
  0x99   :  { %v40_v32 = vsub.f32 %v10_v5, %v35_v25  ;;  %v41_v33 = vsub.f32 %v11_v6, %v35_v25  ;;  %v54_v34 = vsel %vm16_vm0, %v47_v28, 0.0 }
  0x9a   :  { %v44_v35 = vsub.f32 %v14_v10, %v37_v29  ;;  %v45_v36 = vsub.f32 %v15_v11, %v37_v29  ;;  %v55_v37 = vadd.f32 %v54_v34, %v46_v27  ;;  %v62_v38 = vsel %vm16_vm0, %v51_v31, 0.0 }
  0x9b   :  { %v48_v39 = vmul.f32 %v40_v32, %v40_v32  ;;  %v49_v40 = vmul.f32 %v41_v33, %v41_v33  ;;  %v63_v41 = vadd.f32 %v62_v38, %v50_v30 }
  0x9c   :  { %56 = vadd.xlane.f32.xlu0 %v55_v37  ;;  %v52_v42 = vmul.f32 %v44_v35, %v44_v35  ;;  %v53_v43 = vmul.f32 %v45_v36, %v45_v36 }
  0x9d   :  { %v58_v44 = vsel %vm16_vm0, %v49_v40, 0.0 }
  0x9e   :  { %v59_v45 = vadd.f32 %v58_v44, %v48_v39  ;;  %v66_v46 = vsel %vm16_vm0, %v53_v43, 0.0 }
  0x9f   :  { %v67_v47 = vadd.f32 %v66_v46, %v52_v42 }
  0xa0   :  { %64 = vadd.xlane.f32.xlu0 %v63_v41  ;;  %60 = vadd.xlane.f32.xlu1 %v59_v45 }
  0xa4   :  { %68 = vadd.xlane.f32.xlu1 %v67_v47 }
 0x129   :  { %v57_v48 = vpop.xlane.xlu0 %56 }
 0x12a   :  { %v70_v49 = vmul.f32 0.006802721, %v57_v48 }
 0x12c   :  { %v74_v50 = vadd.f32 1e-06, %v70_v49 }
 0x12d   :  { %v61_v51 = vpop.xlane.xlu1 %60  ;;  %v65_v52 = vpop.xlane.xlu0 %64 }
 0x12e   :  { %133 = vrsqrt.f32 %v74_v50  ;;  %v71_v53 = vmul.f32 0.006802721, %v61_v51  ;;  %v72_v54 = vmul.f32 0.006802721, %v65_v52 }
 0x130   :  { %v75_v55 = vadd.f32 1e-06, %v71_v53  ;;  %v76_v56 = vadd.f32 1e-06, %v72_v54 }
 0x131   :  { %v69_v57 = vpop.xlane.xlu1 %68 }
 0x132   :  { %135 = vrsqrt.f32 %v75_v55  ;;  %v73_v58 = vmul.f32 0.006802721, %v69_v57 }
 0x133   :  { %137 = vrsqrt.f32 %v76_v56 }
 0x134   :  { %v77_v59 = vadd.f32 1e-06, %v73_v58 }
 0x136   :  { %139 = vrsqrt.f32 %v77_v59 }
 0x138   :  { %v134_v60 = vpop.eup %133 }
 0x139   :  { %v82_v61 = vmul.f32 %v134_v60, %v38_v20  ;;  %v83_v62 = vmul.f32 %v134_v60, %v39_v21 }
 0x13b   :  { %v129_v0 = vpack.c.bf16 %v83_v62, %v82_v61 }
 0x13c   :  { %v136_v1 = vpop.eup %135 }
 0x13d   :  { %v138_v2 = vpop.eup %137  ;;  %117 = vst.msk [vmem:[%s208_s1] sm:$0xff] %vm183_vm3, %v129_v0  ;;  %v84_v3 = vmul.f32 %v136_v1, %v40_v32  ;;  %v85_v4 = vmul.f32 %v136_v1, %v41_v33 }
 0x13e   :  { %v86_v5 = vmul.f32 %v138_v2, %v42_v22  ;;  %v87_v6 = vmul.f32 %v138_v2, %v43_v23 }
 0x13f   :  { %v130_v7 = vpack.c.bf16 %v85_v4, %v84_v3 }
 0x140   :  { %v140_v8 = vpop.eup %139  ;;  %v131_v9 = vpack.c.bf16 %v87_v6, %v86_v5 }
 0x141   :  { %118 = vst.msk [vmem:[%s208_s1 + $0x8] sm:$0xff] %vm183_vm3, %v130_v7  ;;  %v88_v10 = vmul.f32 %v140_v8, %v44_v35  ;;  %v89_v11 = vmul.f32 %v140_v8, %v45_v36 }
 0x142   :  { %119 = vst.msk [vmem:[%s208_s1 + $0x10] sm:$0xff] %vm183_vm3, %v131_v9 }
 0x143   :  { %v132_v12 = vpack.c.bf16 %v89_v11, %v88_v10 }
 0x145   :  { %120 = vst.msk [vmem:[%s208_s1 + $0x18] sm:$0xff] %vm183_vm3, %v132_v12 }

// kernel: _lambda_.28
= control target key start
LH: loop header
LB: loop body
LE: loop exit
PB: predicated region body
PF: predicated region fallthrough
CT: control target
= control target key end

     0   :  { %s1240_s9 = smov 0   ;;  %s1242_s10 = smov 0   ;;  %s1423_s0 = inlined_call_operand.vmem [shape: bf16[512,147], index: 0, kind: input, shape index: {}]   ;;  %s1424_s1 = inlined_call_operand.vmem [shape: bf16[147,32], index: 1, kind: input, shape index: {}]   ;;  %s1425_s2 = inlined_call_operand.vmem [shape: bf16[512,32], index: 2, kind: output, shape index: {}]  }
   0x1   :  { %s1244_s11 = smov 0  }
   0x2 LB: > { %s31_s12 = sadd.s32 1, %s1217_s10  ;;  %p964_p0 = scmp.ge.s32.totalorder %s1221_s11, 1  ;;  %s1221_s11 = sphi %s1244_s11, %s12_s11   ;;  %s1217_s10 = sphi %s1242_s10, %s1427_s10   ;;  %s1213_s9 = sphi %s1240_s9, %s1426_s9  }
   0x3   : > { %p33_p1 = scmp.ge.s32.totalorder %s31_s12, 2  ;;  %p158_p2 = scmp.lt.s32.totalorder %s1221_s11, 3 }
   0x5   : > { %s1429_s12 = smov (%p33_p1, %s31_s12), 0  ;;  %p159_p3 = pnand %p964_p0, %p158_p2 }
   0x6   : > { %v1141_v0 = vld [vmem:[%s1424_s1] sm:$0xff] (!%p159_p3)   ;;  %v1223_v1 = vmov (!%p159_p3), 0   ;;  %v1142_v2 = vld [vmem:[%s1424_s1 + $0x8] sm:$0xff] (!%p159_p3)   ;;  %v1143_v3 = vld [vmem:[%s1424_s1 + $0x10] sm:$0xff] (!%p159_p3)   ;;  %s965_s19 = sshll.u32 (!%p159_p3), %s1213_s9, 5  ;;  %vm479_vm0 = vcmask (!%p159_p3), 154624  }
   0x7   : > { %162 = sbr.rel (%p159_p3) target bundleno = 320 (0x140), region = 28  ;;  %535 = vmatprep.subr.bf16.mxu0 (!%p159_p3), %v1223_v1  ;;  %1095 = vmatprep.subr.bf16.mxu1 (!%p159_p3), %v1223_v1  ;;  %p198_p4 = scmp.lt.s32.totalorder (!%p159_p3), %s965_s19, 63  ;;  %v1144_v4 = vld [vmem:[%s1424_s1 + $0x18] sm:$0xff] (!%p159_p3)   ;;  %v1145_v5 = vld [vmem:[%s1424_s1 + $0x20] sm:$0xff] (!%p159_p3)   ;;  %v1146_v8 = vld [vmem:[%s1424_s1 + $0x28] sm:$0xff] (!%p159_p3)   ;;  %vm528_vm1 = vcmask (!%p159_p3), 1040384  }
   0x8   : > { %536 = vmatpush1.bf16.msra.mxu0 (!%p159_p3), %v1141_v0  ;;  %1105 = vmatpush1.bf16.msra.mxu1 (!%p159_p3), %v1141_v0  ;;  %v1147_v9 = vld [vmem:[%s1424_s1 + $0x30] sm:$0xff] (!%p159_p3)   ;;  %v1148_v10 = vld [vmem:[%s1424_s1 + $0x38] sm:$0xff] (!%p159_p3)   ;;  %vm529_vm2 = vcmask (!%p159_p3), 1041408   ;;  %v1224_v11 = vmov (!%p159_p3), 65535   ;;  %v1149_v13 = vld [vmem:[%s1424_s1 + $0x40] sm:$0xff] (!%p159_p3)   ;;  %vm824_vm3 = vcmask (!%p159_p3), 257024  }
   0x9   : > { %537 = vmatprep.subr.bf16.mxu0 (!%p159_p3), %v1223_v1  ;;  %1096 = vmatprep.subr.bf16.mxu1 (!%p159_p3), %v1223_v1  ;;  %v530_v12 = vsel (!%p159_p3), %vm528_vm1, 4294967295, %v1224_v11  ;;  %v1150_v14 = vld [vmem:[%s1424_s1 + $0x48] ss:$0 sps:$4 sm:$0x33] (!%p159_p3)  }
   0xa   : > { %v531_v15 = vsel (!%p159_p3), %vm529_vm2, %v530_v12, 0 }
   0xb   : > { %v533_v16 = vand.u32 (!%p159_p3), %v1150_v14, %v531_v15 }
   0xc   : > { %538 = vmatpush1.bf16.msra.mxu0 (!%p159_p3), %v1142_v2  ;;  %1106 = vmatpush1.bf16.msra.mxu1 (!%p159_p3), %v1142_v2 }
   0xd   : > { %539 = vmatprep.subr.bf16.mxu0 (!%p159_p3), %v1223_v1  ;;  %1097 = vmatprep.subr.bf16.mxu1 (!%p159_p3), %v1223_v1 }
   0xe   : > { %s1431_s19 = smov (!%p198_p4, %s965_s19), 63 }
   0xf   : > { %s1062_s22 = sshll.u32 %s1431_s19, 3  ;;  %s969_s13 = sshll.u32 %s1431_s19, 2 }
  0x10   : > { %540 = vmatpush1.bf16.msra.mxu0 %v1143_v3  ;;  %1107 = vmatpush1.bf16.msra.mxu1 %v1143_v3  ;;  %s1276_s25 = scalar_lea.vmem %s1423_s0, %s1062_s22  ;;  %s1348_s16 = scalar_lea.vmem %s1425_s2, %s969_s13 }
  0x11   : > { %541 = vmatprep.subr.bf16.mxu0 %v1223_v1  ;;  %1098 = vmatprep.subr.bf16.mxu1 %v1223_v1  ;;  %v1153_v6 = vld [vmem:[%s1276_s25 + $0x4] ss:$8 sps:$4 sm:$0xff]   ;;  %v1151_v17 = vld [vmem:[%s1276_s25] ss:$8 sps:$4 sm:$0xff]   ;;  %v1157_v19 = vld [vmem:[%s1276_s25 + $0x14] ss:$8 sps:$4 sm:$0xff]  }
  0x12   : > { %v1156_v7 = vld [vmem:[%s1276_s25 + $0x84] ss:$8 sps:$4 sm:$0xff]   ;;  %1012 = vmatprep.mubr.msk.bf16.mxu0 %vm479_vm0, %v1153_v6  ;;  %v1154_v18 = vld [vmem:[%s1276_s25 + $0x80] ss:$8 sps:$4 sm:$0xff]   ;;  %v1159_v20 = vld [vmem:[%s1276_s25 + $0x94] ss:$8 sps:$4 sm:$0xff]  }
  0x13   : > { %1020 = vmatprep.mubr.msk.bf16.mxu1 %vm479_vm0, %v1156_v7  ;;  %v1161_v21 = vld [vmem:[%s1276_s25 + $0x10] ss:$8 sps:$4 sm:$0xff]   ;;  %v1163_v23 = vld [vmem:[%s1276_s25 + $0x24] ss:$8 sps:$4 sm:$0xff]   ;;  %v1167_v25 = vld [vmem:[%s1276_s25 + $0x20] ss:$8 sps:$4 sm:$0xff]  }
  0x14   : > { %542 = vmatpush1.bf16.msra.mxu0 %v1144_v4  ;;  %1108 = vmatpush1.bf16.msra.mxu1 %v1144_v4  ;;  %v1162_v22 = vld [vmem:[%s1276_s25 + $0x90] ss:$8 sps:$4 sm:$0xff]   ;;  %v1165_v24 = vld [vmem:[%s1276_s25 + $0xa4] ss:$8 sps:$4 sm:$0xff]   ;;  %v1168_v26 = vld [vmem:[%s1276_s25 + $0xa0] ss:$8 sps:$4 sm:$0xff]  }
  0x15   : > { %543 = vmatprep.subr.bf16.mxu0 %v1223_v1  ;;  %1099 = vmatprep.subr.bf16.mxu1 %v1223_v1  ;;  %v1169_v27 = vld [vmem:[%s1276_s25 + $0x34] ss:$8 sps:$4 sm:$0xff]   ;;  %v1173_v29 = vld [vmem:[%s1276_s25 + $0x30] ss:$8 sps:$4 sm:$0xff]   ;;  %v1175_v31 = vld [vmem:[%s1276_s25 + $0x44] ss:$8 sps:$4 sm:$0xff]  }
  0x16   : > { %v1171_v28 = vld [vmem:[%s1276_s25 + $0xb4] ss:$8 sps:$4 sm:$0xff]   ;;  %v1174_v30 = vld [vmem:[%s1276_s25 + $0xb0] ss:$8 sps:$4 sm:$0xff]   ;;  %v1177_v32 = vld [vmem:[%s1276_s25 + $0xc4] ss:$8 sps:$4 sm:$0xff]  }
  0x17   : > { %v1179_v33 = vld [vmem:[%s1276_s25 + $0x40] ss:$8 sps:$4 sm:$0xff]   ;;  %v1181_v35 = vld [vmem:[%s1276_s25 + $0x54] ss:$8 sps:$4 sm:$0xff]   ;;  %v1185_v37 = vld [vmem:[%s1276_s25 + $0x50] ss:$8 sps:$4 sm:$0xff]  }
  0x18   : > { %544 = vmatpush1.bf16.msra.mxu0 %v1145_v5  ;;  %1109 = vmatpush1.bf16.msra.mxu1 %v1145_v5  ;;  %v1180_v34 = vld [vmem:[%s1276_s25 + $0xc0] ss:$8 sps:$4 sm:$0xff]   ;;  %v1183_v36 = vld [vmem:[%s1276_s25 + $0xd4] ss:$8 sps:$4 sm:$0xff]   ;;  %v1186_v38 = vld [vmem:[%s1276_s25 + $0xd0] ss:$8 sps:$4 sm:$0xff]  }
  0x19   : > { %545 = vmatprep.subr.bf16.mxu0 %v1223_v1  ;;  %1100 = vmatprep.subr.bf16.mxu1 %v1223_v1  ;;  %v1187_v39 = vld [vmem:[%s1276_s25 + $0x64] ss:$8 sps:$4 sm:$0xff]   ;;  %v1191_v41 = vld [vmem:[%s1276_s25 + $0x60] ss:$8 sps:$4 sm:$0xff]   ;;  %v1193_v43 = vld [vmem:[%s1276_s25 + $0x74] ss:$8 sps:$4 sm:$0xff]  }
  0x1a   : > { %v1189_v40 = vld [vmem:[%s1276_s25 + $0xe4] ss:$8 sps:$4 sm:$0xff]   ;;  %v1192_v42 = vld [vmem:[%s1276_s25 + $0xe0] ss:$8 sps:$4 sm:$0xff]   ;;  %v1195_v44 = vld [vmem:[%s1276_s25 + $0xf4] ss:$8 sps:$4 sm:$0xff]  }
  0x1b   : > { %v1197_v45 = vld [vmem:[%s1276_s25 + $0x70] ss:$8 sps:$4 sm:$0xff]  }
  0x1c   : > { %546 = vmatpush1.bf16.msra.mxu0 %v1146_v8  ;;  %1110 = vmatpush1.bf16.msra.mxu1 %v1146_v8  ;;  %v1198_v46 = vld [vmem:[%s1276_s25 + $0xf0] ss:$8 sps:$4 sm:$0xff]  }
  0x1d   : > { %547 = vmatprep.subr.bf16.mxu0 %v1223_v1  ;;  %1101 = vmatprep.subr.bf16.mxu1 %v1223_v1 }
  0x20   : > { %548 = vmatpush1.bf16.msra.mxu0 %v1147_v9  ;;  %1111 = vmatpush1.bf16.msra.mxu1 %v1147_v9 }
  0x21   : > { %549 = vmatprep.subr.bf16.mxu0 %v1223_v1  ;;  %1102 = vmatprep.subr.bf16.mxu1 %v1223_v1 }
  0x24   : > { %550 = vmatpush1.bf16.msra.mxu0 %v1148_v10  ;;  %1112 = vmatpush1.bf16.msra.mxu1 %v1148_v10 }
  0x25   : > { %551 = vmatprep.subr.bf16.mxu0 %v1223_v1  ;;  %1103 = vmatprep.subr.bf16.mxu1 %v1223_v1 }
  0x28   : > { %552 = vmatpush1.bf16.msra.mxu0 %v1149_v13  ;;  %1113 = vmatpush1.bf16.msra.mxu1 %v1149_v13 }
  0x29   : > { %553 = vmatprep.subr.bf16.mxu0 %v1223_v1  ;;  %1104 = vmatprep.subr.bf16.mxu1 %v1223_v1 }
  0x2c   : > { %554 = vmatpush1.bf16.msra.mxu0 %v533_v16  ;;  %1114 = vmatpush1.bf16.msra.mxu1 %v533_v16 }
  0x2f   : > { %568 = vmatmul.mubr.bf16.vlgmr.msra.gmra.mrb[0].mxu0 %v1151_v17  ;;  %632 = vmatmul.mubr.bf16.vlgmr.msra.gmra.mrb[0].mxu1 %v1154_v18 }
  0x30   : > { %1013 = vmatprep.mubr.msk.bf16.mxu0 %vm479_vm0, %v1157_v19  ;;  %1021 = vmatprep.mubr.msk.bf16.mxu1 %vm479_vm0, %v1159_v20 }
  0x37   : > { %576 = vmatmul.mubr.bf16.gmra.mrb[4].mxu0 %v1161_v21  ;;  %640 = vmatmul.mubr.bf16.gmra.mrb[4].mxu1 %v1162_v22 }
  0x38   : > { %1014 = vmatprep.mubr.msk.bf16.mxu0 %vm479_vm0, %v1163_v23  ;;  %1022 = vmatprep.mubr.msk.bf16.mxu1 %vm479_vm0, %v1165_v24 }
  0x3f   : > { %584 = vmatmul.mubr.bf16.gmra.mrb[8].mxu0 %v1167_v25  ;;  %648 = vmatmul.mubr.bf16.gmra.mrb[8].mxu1 %v1168_v26 }
  0x40   : > { %1015 = vmatprep.mubr.msk.bf16.mxu0 %vm479_vm0, %v1169_v27  ;;  %1023 = vmatprep.mubr.msk.bf16.mxu1 %vm479_vm0, %v1171_v28 }
  0x47   : > { %592 = vmatmul.mubr.bf16.gmra.mrb[12].mxu0 %v1173_v29  ;;  %656 = vmatmul.mubr.bf16.gmra.mrb[12].mxu1 %v1174_v30 }
  0x48   : > { %1016 = vmatprep.mubr.msk.bf16.mxu0 %vm479_vm0, %v1175_v31  ;;  %1024 = vmatprep.mubr.msk.bf16.mxu1 %vm479_vm0, %v1177_v32 }
  0x4f   : > { %600 = vmatmul.mubr.bf16.gmra.mrb[16].mxu0 %v1179_v33  ;;  %664 = vmatmul.mubr.bf16.gmra.mrb[16].mxu1 %v1180_v34 }
  0x50   : > { %1017 = vmatprep.mubr.msk.bf16.mxu0 %vm479_vm0, %v1181_v35  ;;  %1025 = vmatprep.mubr.msk.bf16.mxu1 %vm479_vm0, %v1183_v36 }
  0x57   : > { %608 = vmatmul.mubr.bf16.gmra.mrb[20].mxu0 %v1185_v37  ;;  %672 = vmatmul.mubr.bf16.gmra.mrb[20].mxu1 %v1186_v38 }
  0x58   : > { %1018 = vmatprep.mubr.msk.bf16.mxu0 %vm479_vm0, %v1187_v39  ;;  %1026 = vmatprep.mubr.msk.bf16.mxu1 %vm479_vm0, %v1189_v40 }
  0x5f   : > { %616 = vmatmul.mubr.bf16.gmra.mrb[24].mxu0 %v1191_v41  ;;  %680 = vmatmul.mubr.bf16.gmra.mrb[24].mxu1 %v1192_v42 }
  0x60   : > { %1019 = vmatprep.mubr.msk.bf16.mxu0 %vm479_vm0, %v1193_v43  ;;  %1027 = vmatprep.mubr.msk.bf16.mxu1 %vm479_vm0, %v1195_v44 }
  0x67   : > { %624 = vmatmul.mubr.bf16.gmra.mrb[28].mxu0 %v1197_v45  ;;  %688 = vmatmul.mubr.bf16.gmra.mrb[28].mxu1 %v1198_v46 }
 0x102   : > { %v569_v47 = vpop.f32.mrb[0].mxu0  ;;  %v633_v48 = vpop.f32.mrb[0].mxu1 }
 0x103   : > { %v1063_v49 = vpack.c.bf16 %v569_v47, %v569_v47  ;;  %v1079_v50 = vpack.c.bf16 %v633_v48, %v633_v48  ;;  %v571_v51 = vpop.f32.mrb[1].mxu0  ;;  %v635_v52 = vpop.f32.mrb[1].mxu1 }
 0x104   : > { %v572_v53 = vpop.f32.mrb[2].mxu0  ;;  %v636_v54 = vpop.f32.mrb[2].mxu1 }
 0x105   : > { %825 = vst.msk [vmem:[%s1348_s16] sm:$0xf] %vm824_vm3, %v1063_v49  ;;  %841 = vst.msk [vmem:[%s1348_s16 + $0x40] sm:$0xf] %vm824_vm3, %v1079_v50  ;;  %v1064_v55 = vpack.c.bf16 %v572_v53, %v572_v53  ;;  %v1080_v56 = vpack.c.bf16 %v636_v54, %v636_v54  ;;  %v574_v57 = vpop.f32.mrb[3].mxu0  ;;  %v638_v58 = vpop.f32.mrb[3].mxu1 }
 0x107   : > { %826 = vst.msk [vmem:[%s1348_s16 + $0x4] sm:$0xf] %vm824_vm3, %v1064_v55  ;;  %842 = vst.msk [vmem:[%s1348_s16 + $0x44] sm:$0xf] %vm824_vm3, %v1080_v56 }
 0x10a   : > { %v577_v59 = vpop.f32.mrb[4].mxu0  ;;  %v641_v60 = vpop.f32.mrb[4].mxu1 }
 0x10b   : > { %v1065_v61 = vpack.c.bf16 %v577_v59, %v577_v59  ;;  %v1081_v62 = vpack.c.bf16 %v641_v60, %v641_v60  ;;  %v579_v63 = vpop.f32.mrb[5].mxu0  ;;  %v643_v0 = vpop.f32.mrb[5].mxu1 }
 0x10c   : > { %v580_v1 = vpop.f32.mrb[6].mxu0  ;;  %v644_v2 = vpop.f32.mrb[6].mxu1 }
 0x10d   : > { %827 = vst.msk [vmem:[%s1348_s16 + $0x8] sm:$0xf] %vm824_vm3, %v1065_v61  ;;  %843 = vst.msk [vmem:[%s1348_s16 + $0x48] sm:$0xf] %vm824_vm3, %v1081_v62  ;;  %v1066_v3 = vpack.c.bf16 %v580_v1, %v580_v1  ;;  %v1082_v4 = vpack.c.bf16 %v644_v2, %v644_v2  ;;  %v582_v5 = vpop.f32.mrb[7].mxu0  ;;  %v646_v6 = vpop.f32.mrb[7].mxu1 }
 0x10f   : > { %828 = vst.msk [vmem:[%s1348_s16 + $0xc] sm:$0xf] %vm824_vm3, %v1066_v3  ;;  %844 = vst.msk [vmem:[%s1348_s16 + $0x4c] sm:$0xf] %vm824_vm3, %v1082_v4 }
 0x112   : > { %v585_v7 = vpop.f32.mrb[8].mxu0  ;;  %v649_v8 = vpop.f32.mrb[8].mxu1 }
 0x113   : > { %v1067_v9 = vpack.c.bf16 %v585_v7, %v585_v7  ;;  %v1083_v10 = vpack.c.bf16 %v649_v8, %v649_v8  ;;  %v587_v11 = vpop.f32.mrb[9].mxu0  ;;  %v651_v12 = vpop.f32.mrb[9].mxu1 }
 0x114   : > { %v588_v13 = vpop.f32.mrb[10].mxu0  ;;  %v652_v14 = vpop.f32.mrb[10].mxu1 }
 0x115   : > { %829 = vst.msk [vmem:[%s1348_s16 + $0x10] sm:$0xf] %vm824_vm3, %v1067_v9  ;;  %845 = vst.msk [vmem:[%s1348_s16 + $0x50] sm:$0xf] %vm824_vm3, %v1083_v10  ;;  %v1068_v15 = vpack.c.bf16 %v588_v13, %v588_v13  ;;  %v1084_v16 = vpack.c.bf16 %v652_v14, %v652_v14  ;;  %v590_v17 = vpop.f32.mrb[11].mxu0  ;;  %v654_v18 = vpop.f32.mrb[11].mxu1 }
 0x117   : > { %830 = vst.msk [vmem:[%s1348_s16 + $0x14] sm:$0xf] %vm824_vm3, %v1068_v15  ;;  %846 = vst.msk [vmem:[%s1348_s16 + $0x54] sm:$0xf] %vm824_vm3, %v1084_v16 }
 0x11a   : > { %v593_v19 = vpop.f32.mrb[12].mxu0  ;;  %v657_v20 = vpop.f32.mrb[12].mxu1 }
 0x11b   : > { %v1069_v21 = vpack.c.bf16 %v593_v19, %v593_v19  ;;  %v1085_v22 = vpack.c.bf16 %v657_v20, %v657_v20  ;;  %v595_v23 = vpop.f32.mrb[13].mxu0  ;;  %v659_v24 = vpop.f32.mrb[13].mxu1 }
 0x11c   : > { %v596_v25 = vpop.f32.mrb[14].mxu0  ;;  %v660_v26 = vpop.f32.mrb[14].mxu1 }
 0x11d   : > { %831 = vst.msk [vmem:[%s1348_s16 + $0x18] sm:$0xf] %vm824_vm3, %v1069_v21  ;;  %847 = vst.msk [vmem:[%s1348_s16 + $0x58] sm:$0xf] %vm824_vm3, %v1085_v22  ;;  %v1070_v27 = vpack.c.bf16 %v596_v25, %v596_v25  ;;  %v1086_v28 = vpack.c.bf16 %v660_v26, %v660_v26  ;;  %v598_v29 = vpop.f32.mrb[15].mxu0  ;;  %v662_v30 = vpop.f32.mrb[15].mxu1 }
 0x11f   : > { %832 = vst.msk [vmem:[%s1348_s16 + $0x1c] sm:$0xf] %vm824_vm3, %v1070_v27  ;;  %848 = vst.msk [vmem:[%s1348_s16 + $0x5c] sm:$0xf] %vm824_vm3, %v1086_v28 }
 0x122   : > { %v601_v31 = vpop.f32.mrb[16].mxu0  ;;  %v665_v32 = vpop.f32.mrb[16].mxu1 }
 0x123   : > { %v1071_v33 = vpack.c.bf16 %v601_v31, %v601_v31  ;;  %v1087_v34 = vpack.c.bf16 %v665_v32, %v665_v32  ;;  %v603_v35 = vpop.f32.mrb[17].mxu0  ;;  %v667_v36 = vpop.f32.mrb[17].mxu1 }
 0x124   : > { %v604_v37 = vpop.f32.mrb[18].mxu0  ;;  %v668_v38 = vpop.f32.mrb[18].mxu1 }
 0x125   : > { %833 = vst.msk [vmem:[%s1348_s16 + $0x20] sm:$0xf] %vm824_vm3, %v1071_v33  ;;  %849 = vst.msk [vmem:[%s1348_s16 + $0x60] sm:$0xf] %vm824_vm3, %v1087_v34  ;;  %v1072_v39 = vpack.c.bf16 %v604_v37, %v604_v37  ;;  %v1088_v40 = vpack.c.bf16 %v668_v38, %v668_v38  ;;  %v606_v41 = vpop.f32.mrb[19].mxu0  ;;  %v670_v42 = vpop.f32.mrb[19].mxu1 }
 0x127   : > { %834 = vst.msk [vmem:[%s1348_s16 + $0x24] sm:$0xf] %vm824_vm3, %v1072_v39  ;;  %850 = vst.msk [vmem:[%s1348_s16 + $0x64] sm:$0xf] %vm824_vm3, %v1088_v40 }
 0x12a   : > { %v609_v43 = vpop.f32.mrb[20].mxu0  ;;  %v673_v44 = vpop.f32.mrb[20].mxu1 }
 0x12b   : > { %v1073_v45 = vpack.c.bf16 %v609_v43, %v609_v43  ;;  %v1089_v46 = vpack.c.bf16 %v673_v44, %v673_v44  ;;  %v611_v47 = vpop.f32.mrb[21].mxu0  ;;  %v675_v48 = vpop.f32.mrb[21].mxu1 }
 0x12c   : > { %v612_v49 = vpop.f32.mrb[22].mxu0  ;;  %v676_v50 = vpop.f32.mrb[22].mxu1 }
 0x12d   : > { %835 = vst.msk [vmem:[%s1348_s16 + $0x28] sm:$0xf] %vm824_vm3, %v1073_v45  ;;  %851 = vst.msk [vmem:[%s1348_s16 + $0x68] sm:$0xf] %vm824_vm3, %v1089_v46  ;;  %v1074_v51 = vpack.c.bf16 %v612_v49, %v612_v49  ;;  %v1090_v52 = vpack.c.bf16 %v676_v50, %v676_v50  ;;  %v614_v53 = vpop.f32.mrb[23].mxu0  ;;  %v678_v54 = vpop.f32.mrb[23].mxu1 }
 0x12f   : > { %836 = vst.msk [vmem:[%s1348_s16 + $0x2c] sm:$0xf] %vm824_vm3, %v1074_v51  ;;  %852 = vst.msk [vmem:[%s1348_s16 + $0x6c] sm:$0xf] %vm824_vm3, %v1090_v52 }
 0x132   : > { %v617_v55 = vpop.f32.mrb[24].mxu0  ;;  %v681_v56 = vpop.f32.mrb[24].mxu1 }
 0x133   : > { %v1075_v57 = vpack.c.bf16 %v617_v55, %v617_v55  ;;  %v1091_v58 = vpack.c.bf16 %v681_v56, %v681_v56  ;;  %v619_v59 = vpop.f32.mrb[25].mxu0  ;;  %v683_v60 = vpop.f32.mrb[25].mxu1 }
 0x134   : > { %v620_v61 = vpop.f32.mrb[26].mxu0  ;;  %v684_v62 = vpop.f32.mrb[26].mxu1 }
 0x135   : > { %837 = vst.msk [vmem:[%s1348_s16 + $0x30] sm:$0xf] %vm824_vm3, %v1075_v57  ;;  %853 = vst.msk [vmem:[%s1348_s16 + $0x70] sm:$0xf] %vm824_vm3, %v1091_v58  ;;  %v1076_v63 = vpack.c.bf16 %v620_v61, %v620_v61  ;;  %v1092_v0 = vpack.c.bf16 %v684_v62, %v684_v62  ;;  %v622_v1 = vpop.f32.mrb[27].mxu0  ;;  %v686_v2 = vpop.f32.mrb[27].mxu1 }
 0x137   : > { %838 = vst.msk [vmem:[%s1348_s16 + $0x34] sm:$0xf] %vm824_vm3, %v1076_v63  ;;  %854 = vst.msk [vmem:[%s1348_s16 + $0x74] sm:$0xf] %vm824_vm3, %v1092_v0 }
 0x13a   : > { %v625_v3 = vpop.f32.mrb[28].mxu0  ;;  %v689_v4 = vpop.f32.mrb[28].mxu1 }
 0x13b   : > { %v1077_v5 = vpack.c.bf16 %v625_v3, %v625_v3  ;;  %v1093_v6 = vpack.c.bf16 %v689_v4, %v689_v4  ;;  %v627_v7 = vpop.f32.mrb[29].mxu0  ;;  %v691_v8 = vpop.f32.mrb[29].mxu1 }
 0x13c   : > { %v628_v9 = vpop.f32.mrb[30].mxu0  ;;  %v692_v10 = vpop.f32.mrb[30].mxu1 }
 0x13d   : > { %839 = vst.msk [vmem:[%s1348_s16 + $0x38] sm:$0xf] %vm824_vm3, %v1077_v5  ;;  %855 = vst.msk [vmem:[%s1348_s16 + $0x78] sm:$0xf] %vm824_vm3, %v1093_v6  ;;  %v1078_v11 = vpack.c.bf16 %v628_v9, %v628_v9  ;;  %v1094_v12 = vpack.c.bf16 %v692_v10, %v692_v10  ;;  %v630_v13 = vpop.f32.mrb[31].mxu0  ;;  %v694_v14 = vpop.f32.mrb[31].mxu1 }
 0x13f   : > { %840 = vst.msk [vmem:[%s1348_s16 + $0x3c] sm:$0xf] %vm824_vm3, %v1078_v11  ;;  %856 = vst.msk [vmem:[%s1348_s16 + $0x7c] sm:$0xf] %vm824_vm3, %v1094_v12 }
 0x140 PF: > { %s12_s11 = sadd.s32 1, %s1221_s11   ;;  %s1426_s9 = smov %s1217_s10 }
 0x141   : > { %p9_p5 = scmp.ge.s32.totalorder %s12_s11, 4   ;;  %s1427_s10 = smov %s1429_s12 }
 0x143   :  { %11 = sbr.rel (!%p9_p5) target bundleno = 2 (0x2), region = 61 }

// kernel: _lambda_.29
= control target key start
LH: loop header
LB: loop body
LE: loop exit
PB: predicated region body
PF: predicated region fallthrough
CT: control target
= control target key end

     0   :  { %s598_s6 = smov 0   ;;  %s840_s0 = inlined_call_operand.vmem [shape: bf16[8,9,9,32], index: 0, kind: input, shape index: {}]   ;;  %s841_s1 = inlined_call_operand.vmem [shape: bf16[2,8,8,32], index: 1, kind: output, shape index: {}]  }
   0x1 LB: > { %s604_s7 = sadd.s32 4294967295, %s586_s6   ;;  %p563_p0 = scmp.ge.s32.totalorder %s586_s6, 1  ;;  %s586_s6 = sphi %s598_s6, %s11_s6  }
   0x2   : > { %p89_p1 = scmp.lt.s32.totalorder %s586_s6, 3 }
   0x4   : > { %p90_p2 = pnand %p563_p0, %p89_p1 }
   0x5   : > { %s564_s8 = sshll.u32 (!%p90_p2), %s604_s7, 2  ;;  %vm181_vm0 = vsmask.f32 (!%p90_p2), 3328  ;;  %vm182_vm1 = vsmask.f32 (!%p90_p2), 7440  ;;  %p117_p4 = scmp.lt.s32.totalorder (!%p90_p2), %s604_s7, 1 }
   0x6   : > { %93 = sbr.rel (%p90_p2) target bundleno = 84 (0x54), region = 24  ;;  %p111_p3 = scmp.lt.s32.totalorder (!%p90_p2), %s564_s8, 7  ;;  %vm645_vm2 = vmor (!%p90_p2), %vm181_vm0, %vm182_vm1  ;;  %vm495_vm3 = vcmask (!%p90_p2), 257024  }
   0xd   : > { %s845_s8 = smov (!%p111_p3, %s564_s8), 7  ;;  %s847_s7 = smov (!%p117_p4, %s604_s7), 1 }
   0xe   : > { %s571_s9 = smul.u32 72, %s845_s8  ;;  %s570_s13 = sshll.u32 %s847_s7, 5 }
   0xf   : > { %s717_s16 = scalar_lea.vmem %s841_s1, %s570_s13 }
  0x10   : > { %s612_s12 = scalar_lea.vmem %s840_s0, %s571_s9 }
  0x11   : > { %v122_v0 = vld [vmem:[%s612_s12] sm:$0xf]  ;;  %v123_v1 = vld [vmem:[%s612_s12 + $0x4] sm:$0x1]  ;;  %v617_v2 = vld [vmem:[%s612_s12 + $0x8] sm:$0xf] }
  0x12   : > { %v125_v3 = vld [vmem:[%s612_s12 + $0xc] sm:$0x1]  ;;  %v140_v4 = vld [vmem:[%s612_s12 + $0x48] sm:$0xf]  ;;  %v622_v5 = vld [vmem:[%s612_s12 + $0x50] sm:$0xf] }
  0x13   : > { %v625_v6 = vld [vmem:[%s612_s12 + $0x90] sm:$0xf]  ;;  %v150_v7 = vld [vmem:[%s612_s12 + $0x94] sm:$0x1]  ;;  %v173_v8 = vmax.bf16 %v140_v4, %v122_v0  ;;  %v174_v9 = vmax.bf16 %v622_v5, %v617_v2  ;;  %v185_v10 = vshrl.u32 %v122_v0, 16  ;;  %v188_v11 = vshll.u32 %v122_v0, 16 }
  0x14   : > { %v631_v12 = vld [vmem:[%s612_s12 + $0x98] sm:$0xf]  ;;  %v194_v13 = vshll.u32 %v123_v1, 16  ;;  %v199_v14 = vshrl.u32 %v617_v2, 16  ;;  %v202_v15 = vshll.u32 %v617_v2, 16  ;;  %v208_v16 = vshll.u32 %v125_v3, 16 }
  0x15   : > { %v187_v17 = vrot.slane %v185_v10, 4  ;;  %v190_v18 = vrot.slane %v188_v11, 5  ;;  %v329_v19 = vshrl.u32 %v625_v6, 16  ;;  %v332_v20 = vshll.u32 %v625_v6, 16  ;;  %v638_v21 = vld [vmem:[%s612_s12 + $0x10] sm:$0xf] }
  0x16   : > { %v196_v22 = vrot.slane %v194_v13, 5  ;;  %v201_v23 = vrot.slane %v199_v14, 4  ;;  %v204_v24 = vrot.slane %v202_v15, 5  ;;  %v210_v25 = vrot.slane %v208_v16, 5  ;;  %v641_v26 = vld [vmem:[%s612_s12 + $0x58] sm:$0xf] }
  0x17   : > { %v191_v27 = vor.u32 %v190_v18, %v187_v17  ;;  %v331_v28 = vrot.slane %v329_v19, 4  ;;  %v334_v29 = vrot.slane %v332_v20, 5  ;;  %v338_v30 = vshll.u32 %v150_v7, 16  ;;  %v127_v35 = vld [vmem:[%s612_s12 + $0x14] sm:$0x1] }
  0x18   : > { %v205_v32 = vor.u32 %v204_v24, %v201_v23  ;;  %v343_v33 = vshrl.u32 %v631_v12, 16  ;;  %v346_v34 = vshll.u32 %v631_v12, 16  ;;  %v175_v36 = vmax.bf16 %v641_v26, %v638_v21  ;;  %v152_v44 = vld [vmem:[%s612_s12 + $0x9c] sm:$0x1]  ;;  %v660_v48 = vld [vmem:[%s612_s12 + $0xa0] sm:$0xf] }
  0x19   : > { %v192_v37 = vrot.slane %v191_v27, 4  ;;  %v335_v38 = vor.u32 %v334_v29, %v331_v28  ;;  %v340_v39 = vrot.slane %v338_v30, 5  ;;  %v213_v40 = vshrl.u32 %v638_v21, 16  ;;  %v668_v55 = vld [vmem:[%s612_s12 + $0x60] sm:$0xf] }
  0x1a   : > { %v206_v41 = vrot.slane %v205_v32, 4  ;;  %v345_v42 = vrot.slane %v343_v33, 4  ;;  %v348_v43 = vrot.slane %v346_v34, 5  ;;  %v216_v45 = vshll.u32 %v638_v21, 16  ;;  %v165_v56 = vld [vmem:[%s612_s12 + $0xd8] sm:$0xf] }
  0x1b   : > { %v197_v46 = vsel %vm645_vm2, %v192_v37, %v196_v22  ;;  %v336_v47 = vrot.slane %v335_v38, 4  ;;  %v215_v49 = vrot.slane %v213_v40, 4  ;;  %v222_v50 = vshll.u32 %v127_v35, 16  ;;  %v675_v61 = vld [vmem:[%s612_s12 + $0x18] sm:$0xf] }
  0x1c   : > { %v665_v51 = vsel %vm645_vm2, %v206_v41, %v210_v25  ;;  %v304_v52 = vmax.bf16 %v197_v46, %v173_v8  ;;  %v349_v53 = vor.u32 %v348_v43, %v345_v42  ;;  %v218_v54 = vrot.slane %v216_v45, 5  ;;  %v166_v62 = vld [vmem:[%s612_s12 + $0xe0] sm:$0xf]  ;;  %v154_v17 = vld [vmem:[%s612_s12 + $0xa4] sm:$0x1] }
  0x1d   : > { %v305_v57 = vmax.bf16 %v665_v51, %v174_v9  ;;  %v341_v58 = vsel %vm645_vm2, %v336_v47, %v340_v39  ;;  %v224_v59 = vrot.slane %v222_v50, 5  ;;  %v352_v60 = vshll.u32 %v152_v44, 16  ;;  %v129_v9 = vld [vmem:[%s612_s12 + $0x1c] sm:$0x1]  ;;  %v695_v18 = vld [vmem:[%s612_s12 + $0xa8] sm:$0xf] }
  0x1e   : > { %v312_v63 = vmax.bf16 %v304_v52, %v625_v6  ;;  %v219_v0 = vor.u32 %v218_v54, %v215_v49  ;;  %v350_v1 = vrot.slane %v349_v53, 4  ;;  %v357_v3 = vshrl.u32 %v660_v48, 16  ;;  %v167_v25 = vld [vmem:[%s612_s12 + $0xe8] sm:$0xf]  ;;  %v710_v41 = vld [vmem:[%s612_s12 + $0x20] sm:$0xf] }
  0x1f   : > { %v313_v4 = vmax.bf16 %v305_v57, %v631_v12  ;;  %v354_v7 = vrot.slane %v352_v60, 5  ;;  %v360_v8 = vshll.u32 %v660_v48, 16  ;;  %v176_v10 = vmax.bf16 %v668_v55, %v675_v61  ;;  %v705_v37 = vld [vmem:[%s612_s12 + $0x68] sm:$0xf]  ;;  %v131_v47 = vld [vmem:[%s612_s12 + $0x24] sm:$0x1] }
  0x20   : > { %v320_v6 = vmax.bf16 %v312_v63, %v165_v56  ;;  %v220_v11 = vrot.slane %v219_v0, 4  ;;  %v359_v13 = vrot.slane %v357_v3, 4  ;;  %v227_v14 = vshrl.u32 %v675_v61, 16  ;;  %v156_v52 = vld [vmem:[%s612_s12 + $0xac] sm:$0x1] }
  0x21   : > { %v321_v15 = vmax.bf16 %v313_v4, %v166_v62  ;;  %v355_v12 = vsel %vm645_vm2, %v350_v1, %v354_v7  ;;  %v362_v16 = vrot.slane %v360_v8, 5  ;;  %v230_v19 = vshll.u32 %v675_v61, 16  ;;  %v728_v53 = vld [vmem:[%s612_s12 + $0xb0] sm:$0xf]  ;;  %v738_v0 = vld [vmem:[%s612_s12 + $0x28] sm:$0xf] }
  0x22   : > { %v448_v20 = vmax.bf16 %v341_v58, %v320_v6  ;;  %v225_v22 = vsel %vm645_vm2, %v220_v11, %v224_v59  ;;  %v229_v23 = vrot.slane %v227_v14, 4  ;;  %v236_v24 = vshll.u32 %v129_v9, 16  ;;  %v745_v8 = vld [vmem:[%s612_s12 + $0x70] sm:$0xf] }
  0x23   : > { %v306_v27 = vmax.bf16 %v225_v22, %v175_v36  ;;  %v363_v28 = vor.u32 %v362_v16, %v359_v13  ;;  %v449_v29 = vmax.bf16 %v355_v12, %v321_v15  ;;  %v232_v30 = vrot.slane %v230_v19, 5  ;;  %v158_v19 = vld [vmem:[%s612_s12 + $0xb4] sm:$0x1] }
  0x24   : > { %v456_v32 = vmax.bf16 %v448_v20, %v617_v2  ;;  %v238_v33 = vrot.slane %v236_v24, 5  ;;  %v366_v34 = vshll.u32 %v154_v17, 16  ;;  %v371_v35 = vshrl.u32 %v695_v18, 16  ;;  %v753_v20 = vld [vmem:[%s612_s12 + $0xb8] sm:$0xf] }
  0x25   : > { %v314_v38 = vmax.bf16 %v306_v27, %v660_v48  ;;  %v457_v39 = vmax.bf16 %v449_v29, %v638_v21  ;;  %v233_v40 = vor.u32 %v232_v30, %v229_v23  ;;  %v364_v36 = vrot.slane %v363_v28, 4 }
  0x26   : > { %v464_v42 = vmax.bf16 %v456_v32, %v622_v5  ;;  %v368_v2 = vrot.slane %v366_v34, 5  ;;  %v373_v43 = vrot.slane %v371_v35, 4  ;;  %v374_v44 = vshll.u32 %v695_v18, 16  ;;  %v762_v32 = vld [vmem:[%s612_s12 + $0x30] sm:$0xf] }
  0x27   : > { %v322_v45 = vmax.bf16 %v314_v38, %v167_v25  ;;  %v465_v21 = vmax.bf16 %v457_v39, %v641_v26  ;;  %v234_v46 = vrot.slane %v233_v40, 4  ;;  %v177_v48 = vmax.bf16 %v705_v37, %v710_v41  ;;  %v770_v39 = vld [vmem:[%s612_s12 + $0x78] sm:$0xf] }
  0x28   : > { %v487_v5 = vmax.bf16 %v464_v42, %v665_v51  ;;  %v369_v49 = vsel %vm645_vm2, %v364_v36, %v368_v2  ;;  %v376_v50 = vrot.slane %v374_v44, 5  ;;  %v241_v54 = vshrl.u32 %v710_v41, 16  ;;  %v168_v51 = vld [vmem:[%s612_s12 + $0xf0] sm:$0xf]  ;;  %v169_v40 = vld [vmem:[%s612_s12 + $0xf8] sm:$0xf] }
  0x29   : > { %v488_v56 = vmax.bf16 %v465_v21, %v225_v22  ;;  %v239_v26 = vsel %vm645_vm2, %v234_v46, %v238_v33  ;;  %v450_v57 = vmax.bf16 %v369_v49, %v322_v45  ;;  %v244_v58 = vshll.u32 %v710_v41, 16 }
  0x2a   : > { %496 = vst.msk [vmem:[%s717_s16] sm:$0xf] %vm495_vm3, %v487_v5  ;;  %v307_v59 = vmax.bf16 %v239_v26, %v176_v10  ;;  %v377_v60 = vor.u32 %v376_v50, %v373_v43  ;;  %v243_v62 = vrot.slane %v241_v54, 4  ;;  %v250_v63 = vshll.u32 %v131_v47, 16  ;;  %v135_v47 = vld [vmem:[%s612_s12 + $0x34] sm:$0x1] }
  0x2b   : > { %497 = vst.msk [vmem:[%s717_s16 + $0x4] sm:$0xf] %vm495_vm3, %v488_v56  ;;  %v458_v1 = vmax.bf16 %v450_v57, %v675_v61  ;;  %v246_v3 = vrot.slane %v244_v58, 5  ;;  %v380_v4 = vshll.u32 %v156_v52, 16  ;;  %v385_v7 = vshrl.u32 %v728_v53, 16 }
  0x2c   : > { %v315_v9 = vmax.bf16 %v307_v59, %v695_v18  ;;  %v252_v10 = vrot.slane %v250_v63, 5  ;;  %v378_v6 = vrot.slane %v377_v60, 4  ;;  %v388_v11 = vshll.u32 %v728_v53, 16  ;;  %v133_v61 = vld [vmem:[%s612_s12 + $0x2c] sm:$0x1] }
  0x2d   : > { %v466_v13 = vmax.bf16 %v458_v1, %v668_v55  ;;  %v247_v14 = vor.u32 %v246_v3, %v243_v62  ;;  %v382_v15 = vrot.slane %v380_v4, 5  ;;  %v387_v12 = vrot.slane %v385_v7, 4  ;;  %v160_v50 = vld [vmem:[%s612_s12 + $0xbc] sm:$0x1]  ;;  %v789_v1 = vld [vmem:[%s612_s12 + $0x80] sm:$0xf] }
  0x2e   : > { %v323_v16 = vmax.bf16 %v315_v9, %v168_v51  ;;  %v390_v17 = vrot.slane %v388_v11, 5  ;;  %v178_v18 = vmax.bf16 %v745_v8, %v738_v0  ;;  %v255_v22 = vshrl.u32 %v738_v0, 16  ;;  %v170_v3 = vld [vmem:[%s612_s12 + $0x100] sm:$0xf] }
  0x2f   : > { %v489_v23 = vmax.bf16 %v466_v13, %v239_v26  ;;  %v248_v55 = vrot.slane %v247_v14, 4  ;;  %v383_v24 = vsel %vm645_vm2, %v378_v6, %v382_v15  ;;  %v258_v25 = vshll.u32 %v738_v0, 16  ;;  %v161_v26 = vld [vmem:[%s612_s12 + $0xc0] sm:$0xf]  ;;  %v795_v6 = vld [vmem:[%s612_s12 + $0x38] sm:$0xf] }
  0x30   : > { %v391_v27 = vor.u32 %v390_v17, %v387_v12  ;;  %v451_v28 = vmax.bf16 %v383_v24, %v323_v16  ;;  %v257_v29 = vrot.slane %v255_v22, 4  ;;  %v264_v30 = vshll.u32 %v133_v61, 16  ;;  %v137_v12 = vld [vmem:[%s612_s12 + $0x3c] sm:$0x1] }
  0x31   : > { %498 = vst.msk [vmem:[%s717_s16 + $0x8] sm:$0xf] %vm495_vm3, %v489_v23  ;;  %v253_v33 = vsel %vm645_vm2, %v248_v55, %v252_v10  ;;  %v260_v34 = vrot.slane %v258_v25, 5  ;;  %v394_v35 = vshll.u32 %v158_v19, 16  ;;  %v399_v38 = vshrl.u32 %v753_v20, 16 }
  0x32   : > { %v308_v36 = vmax.bf16 %v253_v33, %v177_v48  ;;  %v459_v42 = vmax.bf16 %v451_v28, %v710_v41  ;;  %v266_v2 = vrot.slane %v264_v30, 5  ;;  %v392_v43 = vrot.slane %v391_v27, 4  ;;  %v162_v19 = vld [vmem:[%s612_s12 + $0xc4] sm:$0x1]  ;;  %v163_v27 = vld [vmem:[%s612_s12 + $0xc8] sm:$0xf] }
  0x33   : > { %v261_v44 = vor.u32 %v260_v34, %v257_v29  ;;  %v396_v45 = vrot.slane %v394_v35, 5  ;;  %v401_v21 = vrot.slane %v399_v38, 4  ;;  %v402_v46 = vshll.u32 %v753_v20, 16 }
  0x34   : > { %v316_v5 = vmax.bf16 %v308_v36, %v728_v53  ;;  %v467_v49 = vmax.bf16 %v459_v42, %v705_v37  ;;  %v179_v48 = vmax.bf16 %v770_v39, %v762_v32  ;;  %v269_v41 = vshrl.u32 %v762_v32, 16  ;;  %v138_v42 = vld [vmem:[%s612_s12 + $0x40] sm:$0xf] }
  0x35   : > { %v262_v52 = vrot.slane %v261_v44, 4  ;;  %v397_v54 = vsel %vm645_vm2, %v392_v43, %v396_v45  ;;  %v404_v56 = vrot.slane %v402_v46, 5  ;;  %v272_v57 = vshll.u32 %v762_v32, 16  ;;  %v171_v43 = vld [vmem:[%s612_s12 + $0x108] sm:$0xf] }
  0x36   : > { %v324_v53 = vmax.bf16 %v316_v5, %v169_v40  ;;  %v490_v37 = vmax.bf16 %v467_v49, %v253_v33  ;;  %v271_v58 = vrot.slane %v269_v41, 4  ;;  %v278_v51 = vshll.u32 %v135_v47, 16 }
  0x37   : > { %v267_v59 = vsel %vm645_vm2, %v262_v52, %v266_v2  ;;  %v405_v60 = vor.u32 %v404_v56, %v401_v21  ;;  %v274_v62 = vrot.slane %v272_v57, 5  ;;  %v408_v63 = vshll.u32 %v160_v50, 16  ;;  %v164_v2 = vld [vmem:[%s612_s12 + $0xcc] sm:$0x1] }
  0x38   : > { %499 = vst.msk [vmem:[%s717_s16 + $0xc] sm:$0xf] %vm495_vm3, %v490_v37  ;;  %v309_v4 = vmax.bf16 %v267_v59, %v178_v18  ;;  %v452_v7 = vmax.bf16 %v397_v54, %v324_v53  ;;  %v280_v9 = vrot.slane %v278_v51, 5  ;;  %v413_v10 = vshrl.u32 %v161_v26, 16  ;;  %v139_v37 = vld [vmem:[%s612_s12 + $0x44] sm:$0x1] }
  0x39   : > { %v275_v11 = vor.u32 %v274_v62, %v271_v58  ;;  %v406_v13 = vrot.slane %v405_v60, 4  ;;  %v410_v14 = vrot.slane %v408_v63, 5  ;;  %v416_v15 = vshll.u32 %v161_v26, 16 }
  0x3a   : > { %v317_v61 = vmax.bf16 %v309_v4, %v753_v20  ;;  %v460_v16 = vmax.bf16 %v452_v7, %v738_v0  ;;  %v415_v17 = vrot.slane %v413_v10, 4  ;;  %v180_v18 = vmax.bf16 %v789_v1, %v795_v6  ;;  %v172_v4 = vld [vmem:[%s612_s12 + $0x110] sm:$0xf] }
  0x3b   : > { %v276_v22 = vrot.slane %v275_v11, 4  ;;  %v411_v23 = vsel %vm645_vm2, %v406_v13, %v410_v14  ;;  %v418_v55 = vrot.slane %v416_v15, 5  ;;  %v283_v24 = vshrl.u32 %v795_v6, 16 }
  0x3c   : > { %v325_v25 = vmax.bf16 %v317_v61, %v170_v3  ;;  %v468_v20 = vmax.bf16 %v460_v16, %v745_v8  ;;  %v286_v0 = vshll.u32 %v795_v6, 16  ;;  %v292_v28 = vshll.u32 %v137_v12, 16 }
  0x3d   : > { %v281_v29 = vsel %vm645_vm2, %v276_v22, %v280_v9  ;;  %v419_v30 = vor.u32 %v418_v55, %v415_v17  ;;  %v285_v33 = vrot.slane %v283_v24, 4  ;;  %v422_v34 = vshll.u32 %v162_v19, 16  ;;  %v148_v19 = vld [vmem:[%s612_s12 + $0x88] sm:$0xf] }
  0x3e   : > { %v491_v35 = vmax.bf16 %v468_v20, %v267_v59  ;;  %v310_v38 = vmax.bf16 %v281_v29, %v179_v48  ;;  %v453_v40 = vmax.bf16 %v411_v23, %v325_v25  ;;  %v288_v36 = vrot.slane %v286_v0, 5 }
  0x3f   : > { %v294_v44 = vrot.slane %v292_v28, 5  ;;  %v420_v8 = vrot.slane %v419_v30, 4  ;;  %v424_v45 = vrot.slane %v422_v34, 5  ;;  %v427_v21 = vshrl.u32 %v163_v27, 16 }
  0x40   : > { %500 = vst.msk [vmem:[%s717_s16 + $0x10] sm:$0xf] %vm495_vm3, %v491_v35  ;;  %v318_v46 = vmax.bf16 %v310_v38, %v161_v26  ;;  %v461_v47 = vmax.bf16 %v453_v40, %v762_v32  ;;  %v289_v5 = vor.u32 %v288_v36, %v285_v33  ;;  %v430_v49 = vshll.u32 %v163_v27, 16 }
  0x41   : > { %v425_v50 = vsel %vm645_vm2, %v420_v8, %v424_v45  ;;  %v429_v48 = vrot.slane %v427_v21, 4  ;;  %v436_v41 = vshll.u32 %v164_v2, 16  ;;  %v473_v52 = vshrl.u32 %v138_v42, 16 }
  0x42   : > { %v326_v54 = vmax.bf16 %v318_v46, %v171_v43  ;;  %v469_v56 = vmax.bf16 %v461_v47, %v770_v39  ;;  %v290_v57 = vrot.slane %v289_v5, 4  ;;  %v432_v53 = vrot.slane %v430_v49, 5 }
  0x43   : > { %v438_v58 = vrot.slane %v436_v41, 5  ;;  %v475_v26 = vrot.slane %v473_v52, 4  ;;  %v476_v51 = vshll.u32 %v138_v42, 16  ;;  %v482_v9 = vshll.u32 %v139_v37, 16 }
  0x44   : > { %v492_v32 = vmax.bf16 %v469_v56, %v281_v29  ;;  %v295_v59 = vsel %vm645_vm2, %v290_v57, %v294_v44  ;;  %v433_v60 = vor.u32 %v432_v53, %v429_v48  ;;  %v454_v62 = vmax.bf16 %v425_v50, %v326_v54 }
  0x45   : > { %v311_v63 = vmax.bf16 %v295_v59, %v180_v18  ;;  %v478_v3 = vrot.slane %v476_v51, 5  ;;  %v484_v16 = vrot.slane %v482_v9, 5 }
  0x46   : > { %501 = vst.msk [vmem:[%s717_s16 + $0x14] sm:$0xf] %vm495_vm3, %v492_v32  ;;  %v462_v39 = vmax.bf16 %v454_v62, %v795_v6  ;;  %v434_v7 = vrot.slane %v433_v60, 4 }
  0x47   : > { %v319_v10 = vmax.bf16 %v311_v63, %v163_v27  ;;  %v479_v11 = vor.u32 %v478_v3, %v475_v26 }
  0x48   : > { %v470_v13 = vmax.bf16 %v462_v39, %v789_v1  ;;  %v439_v14 = vsel %vm645_vm2, %v434_v7, %v438_v58 }
  0x49   : > { %v327_v15 = vmax.bf16 %v319_v10, %v172_v4  ;;  %v480_v61 = vrot.slane %v479_v11, 4 }
  0x4a   : > { %v493_v12 = vmax.bf16 %v470_v13, %v295_v59 }
  0x4b   : > { %v455_v17 = vmax.bf16 %v439_v14, %v327_v15  ;;  %v485_v6 = vsel %vm645_vm2, %v480_v61, %v484_v16 }
  0x4c   : > { %502 = vst.msk [vmem:[%s717_s16 + $0x18] sm:$0xf] %vm495_vm3, %v493_v12 }
  0x4d   : > { %v463_v18 = vmax.bf16 %v455_v17, %v138_v42 }
  0x4f   : > { %v471_v22 = vmax.bf16 %v463_v18, %v148_v19 }
  0x51   : > { %v494_v23 = vmax.bf16 %v485_v6, %v471_v22 }
  0x53   : > { %503 = vst.msk [vmem:[%s717_s16 + $0x1c] sm:$0xf] %vm495_vm3, %v494_v23 }
  0x54 PF: > { %s11_s6 = sadd.s32 1, %s586_s6  }
  0x55   : > { %p8_p5 = scmp.ge.s32.totalorder %s11_s6, 4  }
  0x57   :  { %10 = sbr.rel (!%p8_p5) target bundleno = 1 (0x1), region = 54 }

// kernel: _lambda_.33
= control target key start
LH: loop header
LB: loop body
LE: loop exit
PB: predicated region body
PF: predicated region fallthrough
CT: control target
= control target key end

     0   :  { %vm12_vm0 = vcmask 261120   ;;  %vm82_vm1 = vcmask 257024   ;;  %s149_s0 = inlined_call_operand.vmem [shape: f32[32,32], index: 0, kind: input, shape index: {}]   ;;  %s150_s1 = inlined_call_operand.vmem [shape: bf16[32,32], index: 1, kind: output, shape index: {}]  }
   0x1   :  { %v8_v0 = vld [vmem:[%s149_s0] sm:$0xff]  ;;  %v10_v1 = vld [vmem:[%s149_s0 + $0x10] sm:$0xff]  ;;  %v9_v2 = vld [vmem:[%s149_s0 + $0x8] sm:$0xff] }
   0x2   :  { %v13_v3 = vsel %vm12_vm0, %v8_v0, 0.0  ;;  %v19_v4 = vsel %vm12_vm0, %v10_v1, 0.0  ;;  %v11_v5 = vld [vmem:[%s149_s0 + $0x18] sm:$0xff]  ;;  %v16_v6 = vsel %vm12_vm0, %v9_v2, 0.0 }
   0x3   :  { %14 = vadd.xlane.f32.xlu0 %v13_v3  ;;  %20 = vadd.xlane.f32.xlu1 %v19_v4  ;;  %v22_v7 = vsel %vm12_vm0, %v11_v5, 0.0 }
   0x7   :  { %17 = vadd.xlane.f32.xlu0 %v16_v6  ;;  %23 = vadd.xlane.f32.xlu1 %v22_v7 }
  0x90   :  { %v15_v8 = vpop.xlane.xlu0 %14  ;;  %v21_v9 = vpop.xlane.xlu1 %20 }
  0x91   :  { %v26_v10 = vmul.f32 0.03125, %v15_v8  ;;  %v28_v11 = vmul.f32 0.03125, %v21_v9 }
  0x93   :  { %v30_v12 = vsub.f32 %v8_v0, %v26_v10  ;;  %v32_v13 = vsub.f32 %v10_v1, %v28_v11 }
  0x94   :  { %v18_v14 = vpop.xlane.xlu0 %17  ;;  %v24_v15 = vpop.xlane.xlu1 %23 }
  0x95   :  { %v27_v16 = vmul.f32 0.03125, %v18_v14  ;;  %v29_v17 = vmul.f32 0.03125, %v24_v15  ;;  %v34_v18 = vmul.f32 %v30_v12, %v30_v12  ;;  %v36_v19 = vmul.f32 %v32_v13, %v32_v13 }
  0x97   :  { %v31_v20 = vsub.f32 %v9_v2, %v27_v16  ;;  %v33_v21 = vsub.f32 %v11_v5, %v29_v17  ;;  %v38_v22 = vsel %vm12_vm0, %v34_v18, 0.0  ;;  %v44_v23 = vsel %vm12_vm0, %v36_v19, 0.0 }
  0x98   :  { %39 = vadd.xlane.f32.xlu0 %v38_v22 }
  0x99   :  { %v35_v24 = vmul.f32 %v31_v20, %v31_v20  ;;  %v37_v25 = vmul.f32 %v33_v21, %v33_v21 }
  0x9b   :  { %v41_v26 = vsel %vm12_vm0, %v35_v24, 0.0  ;;  %v47_v27 = vsel %vm12_vm0, %v37_v25, 0.0 }
  0x9c   :  { %45 = vadd.xlane.f32.xlu0 %v44_v23  ;;  %42 = vadd.xlane.f32.xlu1 %v41_v26 }
  0xa0   :  { %48 = vadd.xlane.f32.xlu1 %v47_v27 }
 0x125   :  { %v40_v28 = vpop.xlane.xlu0 %39 }
 0x126   :  { %v50_v29 = vmul.f32 0.03125, %v40_v28 }
 0x128   :  { %v54_v30 = vadd.f32 1e-06, %v50_v29 }
 0x129   :  { %v43_v31 = vpop.xlane.xlu1 %42  ;;  %v46_v32 = vpop.xlane.xlu0 %45 }
 0x12a   :  { %99 = vrsqrt.f32 %v54_v30  ;;  %v51_v33 = vmul.f32 0.03125, %v43_v31  ;;  %v52_v34 = vmul.f32 0.03125, %v46_v32 }
 0x12c   :  { %v55_v35 = vadd.f32 1e-06, %v51_v33  ;;  %v56_v36 = vadd.f32 1e-06, %v52_v34 }
 0x12d   :  { %v49_v37 = vpop.xlane.xlu1 %48 }
 0x12e   :  { %101 = vrsqrt.f32 %v55_v35  ;;  %v53_v38 = vmul.f32 0.03125, %v49_v37 }
 0x12f   :  { %103 = vrsqrt.f32 %v56_v36 }
 0x130   :  { %v57_v39 = vadd.f32 1e-06, %v53_v38 }
 0x132   :  { %105 = vrsqrt.f32 %v57_v39 }
 0x134   :  { %v100_v40 = vpop.eup %99 }
 0x135   :  { %v62_v41 = vmul.f32 %v100_v40, %v30_v12 }
 0x137   :  { %v95_v42 = vpack.c.bf16 %v62_v41, %v62_v41 }
 0x138   :  { %v102_v43 = vpop.eup %101 }
 0x139   :  { %v104_v44 = vpop.eup %103  ;;  %83 = vst.msk [vmem:[%s150_s1] sm:$0xf] %vm82_vm1, %v95_v42  ;;  %v63_v45 = vmul.f32 %v102_v43, %v31_v20 }
 0x13a   :  { %v64_v46 = vmul.f32 %v104_v44, %v32_v13 }
 0x13b   :  { %v96_v47 = vpack.c.bf16 %v63_v45, %v63_v45 }
 0x13c   :  { %v106_v48 = vpop.eup %105  ;;  %v97_v49 = vpack.c.bf16 %v64_v46, %v64_v46 }
 0x13d   :  { %84 = vst.msk [vmem:[%s150_s1 + $0x4] sm:$0xf] %vm82_vm1, %v96_v47  ;;  %v65_v50 = vmul.f32 %v106_v48, %v33_v21 }
 0x13e   :  { %85 = vst.msk [vmem:[%s150_s1 + $0x8] sm:$0xf] %vm82_vm1, %v97_v49 }
 0x13f   :  { %v98_v51 = vpack.c.bf16 %v65_v50, %v65_v50 }
 0x141   :  { %86 = vst.msk [vmem:[%s150_s1 + $0xc] sm:$0xf] %vm82_vm1, %v98_v51 }

// kernel: _lambda_.30
= control target key start
LH: loop header
LB: loop body
LE: loop exit
PB: predicated region body
PF: predicated region fallthrough
CT: control target
= control target key end

     0   :  { %s950_s18 = smov 0   ;;  %s1056_s0 = inlined_call_operand.vmem [shape: bf16[2,64,32], index: 0, kind: input, shape index: {}]   ;;  %s1057_s1 = inlined_call_operand.vmem [shape: f32[32,32], index: 1, kind: input, shape index: {}]   ;;  %s1058_s2 = inlined_call_operand.vmem [shape: f32[32,32], index: 2, kind: input, shape index: {}]   ;;  %s1059_s3 = inlined_call_operand.vmem [shape: f32[1,32], index: 3, kind: input, shape index: {}]   ;;  %s1060_s4 = inlined_call_operand.vmem [shape: f32[1,32], index: 4, kind: input, shape index: {}]   ;;  %s1061_s5 = inlined_call_operand.vmem [shape: bf16[2,64,32], index: 5, kind: output, shape index: {}]  }
   0x1 LB: > { %s754_s19 = sadd.s32 4294967295, %s915_s18   ;;  %p758_p0 = scmp.ge.s32.totalorder %s915_s18, 1  ;;  %s915_s18 = sphi %s950_s18, %s15_s18  }
   0x2   : > { %p187_p1 = scmp.lt.s32.totalorder %s915_s18, 3 }
   0x4   : > { %p188_p2 = pnand %p758_p0, %p187_p1 }
   0x5   : > { %v241_v0 = vld [vmem:[%s1057_s1] sm:$0xff] (!%p188_p2)  ;;  %v242_v1 = vld [vmem:[%s1057_s1 + $0x8] sm:$0xff] (!%p188_p2)  ;;  %v243_v2 = vld [vmem:[%s1057_s1 + $0x10] sm:$0xff] (!%p188_p2)  ;;  %v917_v3 = vmov (!%p188_p2), 0.0|0.0   ;;  %vm918_vm0 = vmmov (!%p188_p2), 0   ;;  %v919_v6 = vmov (!%p188_p2), 0.0   ;;  %v420_v50 = vlaneseq (!%p188_p2) }
   0x6   : > { %191 = sbr.rel (%p188_p2) target bundleno = 960 (0x3c0), region = 40  ;;  %872 = vmatprep.subr.bf16.mxu0 (!%p188_p2), %v917_v3  ;;  %v873_v4 = vpack.c.bf16 (!%p188_p2), %v242_v1, %v241_v0  ;;  %v244_v5 = vld [vmem:[%s1057_s1 + $0x18] sm:$0xff] (!%p188_p2)  ;;  %836 = vmatprep.mubr.msk.f32.mxu0 (!%p188_p2), %vm918_vm0, %v919_v6  ;;  %p215_p3 = scmp.lt.s32.totalorder (!%p188_p2), %s754_s19, 1  ;;  %v245_v7 = vld [vmem:[%s1058_s2] sm:$0xff] (!%p188_p2)  ;;  %v246_v8 = vld [vmem:[%s1058_s2 + $0x8] sm:$0xff] (!%p188_p2)  ;;  %vm251_vm1 = vcmask (!%p188_p2), 261120  }
   0x7   : > { %878 = vmatprep.subr.bf16.mxu1 (!%p188_p2), %v917_v3  ;;  %v879_v9 = vpack.c.bf16 (!%p188_p2), %v246_v8, %v245_v7  ;;  %847 = vmatprep.mubr.msk.f32.mxu1 (!%p188_p2), %vm918_vm0, %v919_v6  ;;  %v876_v10 = vpack.c.bf16 (!%p188_p2), %v244_v5, %v243_v2  ;;  %v247_v44 = vld [vmem:[%s1058_s2 + $0x10] sm:$0xff] (!%p188_p2)  ;;  %v248_v45 = vld [vmem:[%s1058_s2 + $0x18] sm:$0xff] (!%p188_p2)  ;;  %v421_v51 = vshrl.u32 (!%p188_p2), %v420_v50, 7  ;;  %vm690_vm2 = vcmask (!%p188_p2), 257024  }
   0x8   : > { %874 = vmatpush3.bf16.msra.mxu0 (!%p188_p2), %v873_v4  ;;  %v882_v46 = vpack.c.bf16 (!%p188_p2), %v248_v45, %v247_v44 }
   0x9   : > { %875 = vmatprep.subr.bf16.mxu0 (!%p188_p2), %v917_v3  ;;  %880 = vmatpush3.bf16.msra.mxu1 (!%p188_p2), %v879_v9  ;;  %v422_v52 = vsub.s32 (!%p188_p2), 0, %v421_v51 }
   0xa   : > { %881 = vmatprep.subr.bf16.mxu1 (!%p188_p2), %v917_v3 }
   0xc   : > { %877 = vmatpush3.bf16.msra.mxu0 (!%p188_p2), %v876_v10 }
   0xd   : > { %s1063_s19 = smov (!%p215_p3, %s754_s19), 1  ;;  %884 = vmatprep.subr.bf16.mxu0 %v917_v3  ;;  %883 = vmatpush3.bf16.msra.mxu1 %v882_v46 }
   0xe   : > { %s779_s7 = sshll.u32 %s1063_s19, 5  ;;  %890 = vmatprep.subr.bf16.mxu1 %v917_v3 }
   0xf   : > { %s219_s10 = scalar_lea.vmem %s1056_s0, %s779_s7  ;;  %s224_s23 = scalar_lea.vmem %s1061_s5, %s779_s7 }
  0x10   : > { %v790_v11 = vld [vmem:[%s219_s10] sm:$0xff]   ;;  %v805_v12 = vld [vmem:[%s219_s10 + $0x8] sm:$0xff]   ;;  %v992_v13 = vld [vmem:[%s219_s10 + $0x10] sm:$0xff]  }
  0x11   : > { %v791_v14 = vunpack.c.l.bf16 %v790_v11  ;;  %v792_v15 = vunpack.c.h.bf16 %v790_v11  ;;  %v795_v16 = vunpack.c.l.bf16 %v805_v12  ;;  %v796_v17 = vunpack.c.h.bf16 %v805_v12  ;;  %v999_v22 = vld [vmem:[%s219_s10 + $0x18] sm:$0xff]  }
  0x12   : > { %v799_v18 = vunpack.c.l.bf16 %v992_v13  ;;  %v800_v24 = vunpack.c.h.bf16 %v992_v13  ;;  %v803_v27 = vunpack.c.l.bf16 %v999_v22  ;;  %v804_v30 = vunpack.c.h.bf16 %v999_v22 }
  0x13   : > { %v252_v19 = vsel %vm251_vm1, %v791_v14, 0.0  ;;  %v253_v20 = vsel %vm251_vm1, %v792_v15, 0.0  ;;  %v255_v21 = vsel %vm251_vm1, %v795_v16, 0.0  ;;  %v257_v25 = vsel %vm251_vm1, %v796_v17, 0.0 }
  0x14   : > { %v254_v23 = vadd.f32 %v253_v20, %v252_v19  ;;  %v259_v28 = vsel %vm251_vm1, %v799_v18, 0.0  ;;  %v261_v31 = vsel %vm251_vm1, %v800_v24, 0.0  ;;  %v263_v33 = vsel %vm251_vm1, %v803_v27, 0.0 }
  0x15   : > { %v265_v35 = vsel %vm251_vm1, %v804_v30, 0.0 }
  0x16   : > { %v256_v26 = vadd.f32 %v255_v21, %v254_v23 }
  0x18   : > { %v258_v29 = vadd.f32 %v257_v25, %v256_v26 }
  0x1a   : > { %v260_v32 = vadd.f32 %v259_v28, %v258_v29 }
  0x1c   : > { %v262_v34 = vadd.f32 %v261_v31, %v260_v32 }
  0x1e   : > { %v264_v36 = vadd.f32 %v263_v33, %v262_v34 }
  0x20   : > { %v266_v37 = vadd.f32 %v265_v35, %v264_v36 }
  0x22   : > { %v267_v38 = vrot.slane %v266_v37, 4 }
  0x24   : > { %v268_v39 = vadd.f32 %v267_v38, %v266_v37  ;;  %v767_v37 = vld [vmem:[%s1059_s3] ss:$0 sm:$0xff] }
  0x26   : > { %v269_v40 = vrot.slane %v268_v39, 2 }
  0x28   : > { %v270_v41 = vadd.f32 %v269_v40, %v268_v39 }
  0x2a   : > { %v271_v42 = vrot.slane %v270_v41, 1 }
  0x2c   : > { %v272_v43 = vadd.f32 %v271_v42, %v270_v41  ;;  %v768_v42 = vld [vmem:[%s1060_s4] ss:$0 sm:$0xff] }
  0x2e   : > { %837 = vmatmul.mubr.msk.f32.vlgmr.msra.gmra.mrb[0].mxu0 %vm251_vm1, %v272_v43 }
  0x2f   : > { %886 = vmatpush3.bf16.msra.mxu0 %v873_v4  ;;  %858 = vmatprep.mubr.msk.f32.mxu0 %vm918_vm0, %v919_v6 }
  0x30   : > { %887 = vmatprep.subr.bf16.mxu0 %v917_v3 }
  0x33   : > { %889 = vmatpush3.bf16.msra.mxu0 %v876_v10 }
 0x101   : > { %v342_v47 = vpop.f32.mrb[0].mxu0 }
 0x102   : > { %v346_v48 = vmul.f32 0.015625, %v342_v47  ;;  %v838_v49 = vpop.f32.mrb[1].mxu0 }
 0x104   : > { %848 = vmatmul.mubr.msk.f32.vlgmr.msra.gmra.mrb[0].mxu1 %vm251_vm1, %v346_v48 }
 0x105   : > { %892 = vmatpush3.bf16.msra.mxu1 %v879_v9  ;;  %869 = vmatprep.mubr.msk.f32.mxu1 %vm918_vm0, %v919_v6 }
 0x106   : > { %893 = vmatprep.subr.bf16.mxu1 %v917_v3 }
 0x109   : > { %895 = vmatpush3.bf16.msra.mxu1 %v882_v46 }
 0x1d7   : > { %v416_v53 = vpop.f32.mrb[0].mxu1 }
 0x1d8   : > { %v423_v54 = vrot.slane %v416_v53, %v422_v52  ;;  %v849_v55 = vpop.f32.mrb[1].mxu1 }
 0x1da   : > { %v424_v56 = vsub.f32 %v791_v14, %v423_v54  ;;  %v425_v57 = vsub.f32 %v792_v15, %v423_v54  ;;  %v426_v58 = vsub.f32 %v795_v16, %v423_v54  ;;  %v427_v59 = vsub.f32 %v796_v17, %v423_v54 }
 0x1db   : > { %v428_v60 = vsub.f32 %v799_v18, %v423_v54  ;;  %v429_v0 = vsub.f32 %v800_v24, %v423_v54  ;;  %v430_v5 = vsub.f32 %v803_v27, %v423_v54  ;;  %v431_v9 = vsub.f32 %v804_v30, %v423_v54 }
 0x1dc   : > { %v432_v61 = vmul.f32 %v424_v56, %v424_v56  ;;  %v433_v62 = vmul.f32 %v425_v57, %v425_v57  ;;  %v434_v63 = vmul.f32 %v426_v58, %v426_v58  ;;  %v435_v1 = vmul.f32 %v427_v59, %v427_v59 }
 0x1dd   : > { %v436_v6 = vmul.f32 %v428_v60, %v428_v60  ;;  %v437_v10 = vmul.f32 %v429_v0, %v429_v0  ;;  %v438_v13 = vmul.f32 %v430_v5, %v430_v5  ;;  %v439_v16 = vmul.f32 %v431_v9, %v431_v9 }
 0x1de   : > { %v440_v2 = vsel %vm251_vm1, %v432_v61, 0.0  ;;  %v441_v3 = vsel %vm251_vm1, %v433_v62, 0.0  ;;  %v443_v7 = vsel %vm251_vm1, %v434_v63, 0.0  ;;  %v445_v11 = vsel %vm251_vm1, %v435_v1, 0.0 }
 0x1df   : > { %v442_v4 = vadd.f32 %v441_v3, %v440_v2  ;;  %v447_v14 = vsel %vm251_vm1, %v436_v6, 0.0  ;;  %v449_v17 = vsel %vm251_vm1, %v437_v10, 0.0  ;;  %v451_v19 = vsel %vm251_vm1, %v438_v13, 0.0 }
 0x1e0   : > { %v453_v21 = vsel %vm251_vm1, %v439_v16, 0.0 }
 0x1e1   : > { %v444_v8 = vadd.f32 %v443_v7, %v442_v4 }
 0x1e3   : > { %v446_v12 = vadd.f32 %v445_v11, %v444_v8 }
 0x1e5   : > { %v448_v15 = vadd.f32 %v447_v14, %v446_v12 }
 0x1e7   : > { %v450_v18 = vadd.f32 %v449_v17, %v448_v15 }
 0x1e9   : > { %v452_v20 = vadd.f32 %v451_v19, %v450_v18 }
 0x1eb   : > { %v454_v22 = vadd.f32 %v453_v21, %v452_v20 }
 0x1ed   : > { %v455_v23 = vrot.slane %v454_v22, 4 }
 0x1ef   : > { %v456_v24 = vadd.f32 %v455_v23, %v454_v22 }
 0x1f1   : > { %v457_v25 = vrot.slane %v456_v24, 2 }
 0x1f3   : > { %v458_v26 = vadd.f32 %v457_v25, %v456_v24 }
 0x1f5   : > { %v459_v27 = vrot.slane %v458_v26, 1 }
 0x1f7   : > { %v460_v28 = vadd.f32 %v459_v27, %v458_v26 }
 0x1f9   : > { %859 = vmatmul.mubr.msk.f32.vlgmr.msra.gmra.mrb[2].mxu0 %vm251_vm1, %v460_v28 }
 0x2cc   : > { %v530_v29 = vpop.f32.mrb[2].mxu0 }
 0x2cd   : > { %v534_v30 = vmul.f32 0.015625, %v530_v29  ;;  %v860_v31 = vpop.f32.mrb[3].mxu0 }
 0x2cf   : > { %v535_v32 = vadd.f32 1e-05, %v534_v30 }
 0x2d1   : > { %907 = vrsqrt.f32 %v535_v32 }
 0x2db   : > { %v908_v33 = vpop.eup %907 }
 0x2dc   : > { %870 = vmatmul.mubr.msk.f32.vlgmr.msra.gmra.mrb[2].mxu1 %vm251_vm1, %v908_v33 }
 0x3af   : > { %v606_v34 = vpop.f32.mrb[2].mxu1 }
 0x3b0   : > { %v613_v35 = vrot.slane %v606_v34, %v422_v52  ;;  %v871_v36 = vpop.f32.mrb[3].mxu1 }
 0x3b2   : > { %v614_v38 = vmul.f32 %v613_v35, %v424_v56  ;;  %v615_v39 = vmul.f32 %v613_v35, %v425_v57  ;;  %v616_v40 = vmul.f32 %v613_v35, %v426_v58  ;;  %v617_v41 = vmul.f32 %v613_v35, %v427_v59 }
 0x3b3   : > { %v618_v43 = vmul.f32 %v613_v35, %v428_v60  ;;  %v619_v44 = vmul.f32 %v613_v35, %v429_v0  ;;  %v620_v45 = vmul.f32 %v613_v35, %v430_v5  ;;  %v621_v46 = vmul.f32 %v613_v35, %v431_v9 }
 0x3b4   : > { %v628_v47 = vmul.f32 %v767_v37, %v614_v38  ;;  %v629_v48 = vmul.f32 %v767_v37, %v615_v39  ;;  %v630_v49 = vmul.f32 %v767_v37, %v616_v40  ;;  %v631_v50 = vmul.f32 %v767_v37, %v617_v41 }
 0x3b5   : > { %v632_v51 = vmul.f32 %v767_v37, %v618_v43  ;;  %v633_v52 = vmul.f32 %v767_v37, %v619_v44  ;;  %v634_v53 = vmul.f32 %v767_v37, %v620_v45  ;;  %v635_v54 = vmul.f32 %v767_v37, %v621_v46 }
 0x3b6   : > { %v642_v55 = vadd.f32 %v768_v42, %v628_v47  ;;  %v643_v56 = vadd.f32 %v768_v42, %v629_v48  ;;  %v644_v57 = vadd.f32 %v768_v42, %v630_v49  ;;  %v645_v58 = vadd.f32 %v768_v42, %v631_v50 }
 0x3b7   : > { %v646_v59 = vadd.f32 %v768_v42, %v632_v51  ;;  %v647_v61 = vadd.f32 %v768_v42, %v633_v52  ;;  %v648_v62 = vadd.f32 %v768_v42, %v634_v53  ;;  %v649_v60 = vadd.f32 %v768_v42, %v635_v54 }
 0x3b8   : > { %v650_v63 = vmax.f32 %v642_v55, 0.0  ;;  %v651_v0 = vmax.f32 %v643_v56, 0.0  ;;  %v652_v1 = vmax.f32 %v644_v57, 0.0  ;;  %v653_v2 = vmax.f32 %v645_v58, 0.0 }
 0x3b9   : > { %v654_v3 = vmax.f32 %v646_v59, 0.0  ;;  %v655_v4 = vmax.f32 %v647_v61, 0.0  ;;  %v656_v5 = vmax.f32 %v648_v62, 0.0  ;;  %v657_v6 = vmax.f32 %v649_v60, 0.0 }
 0x3ba   : > { %v781_v7 = vpack.c.bf16 %v650_v63, %v650_v63  ;;  %v782_v8 = vpack.c.bf16 %v651_v0, %v651_v0  ;;  %v783_v9 = vpack.c.bf16 %v652_v1, %v652_v1  ;;  %v784_v10 = vpack.c.bf16 %v653_v2, %v653_v2 }
 0x3bb   : > { %v785_v11 = vpack.c.bf16 %v654_v3, %v654_v3  ;;  %v786_v12 = vpack.c.bf16 %v655_v4, %v655_v4  ;;  %v787_v13 = vpack.c.bf16 %v656_v5, %v656_v5  ;;  %v788_v14 = vpack.c.bf16 %v657_v6, %v657_v6 }
 0x3bc   : > { %691 = vst.msk [vmem:[%s224_s23] sm:$0xf] %vm690_vm2, %v781_v7  ;;  %692 = vst.msk [vmem:[%s224_s23 + $0x4] sm:$0xf] %vm690_vm2, %v782_v8 }
 0x3bd   : > { %693 = vst.msk [vmem:[%s224_s23 + $0x8] sm:$0xf] %vm690_vm2, %v783_v9  ;;  %694 = vst.msk [vmem:[%s224_s23 + $0xc] sm:$0xf] %vm690_vm2, %v784_v10 }
 0x3be   : > { %695 = vst.msk [vmem:[%s224_s23 + $0x10] sm:$0xf] %vm690_vm2, %v785_v11  ;;  %696 = vst.msk [vmem:[%s224_s23 + $0x14] sm:$0xf] %vm690_vm2, %v786_v12 }
 0x3bf   : > { %697 = vst.msk [vmem:[%s224_s23 + $0x18] sm:$0xf] %vm690_vm2, %v787_v13  ;;  %698 = vst.msk [vmem:[%s224_s23 + $0x1c] sm:$0xf] %vm690_vm2, %v788_v14 }
 0x3c0 PF: > { %s15_s18 = sadd.s32 1, %s915_s18  }
 0x3c1   : > { %p12_p4 = scmp.ge.s32.totalorder %s15_s18, 4  }
 0x3c3   :  { %14 = sbr.rel (!%p12_p4) target bundleno = 1 (0x1), region = 70 }

// kernel: _lambda_.34
= control target key start
LH: loop header
LB: loop body
LE: loop exit
PB: predicated region body
PF: predicated region fallthrough
CT: control target
= control target key end

     0   :  { %vm84_vm0 = vcmask 261120   ;;  %vm270_vm1 = vcmask 257024   ;;  %s502_s1 = inlined_call_operand.vmem [shape: bf16[32,32], index: 1, kind: input, shape index: {}]   ;;  %s503_s0 = inlined_call_operand.vmem [shape: bf16[128,32], index: 0, kind: input, shape index: {}]   ;;  %s504_s2 = inlined_call_operand.vmem [shape: bf16[128,32], index: 2, kind: output, shape index: {}]  }
   0x1   :  { %v375_v0 = vld [vmem:[%s502_s1] sm:$0xff]   ;;  %v376_v1 = vld [vmem:[%s502_s1 + $0x8] sm:$0xff]   ;;  %v381_v6 = vld [vmem:[%s503_s0 + $0x10] sm:$0xff]  }
   0x2   :  { %351 = vmatprep.subr.bf16.mxu0 %v375_v0  ;;  %371 = vmatprep.subr.bf16.mxu1 %v375_v0  ;;  %v377_v2 = vld [vmem:[%s503_s0] sm:$0xff]   ;;  %v379_v4 = vld [vmem:[%s503_s0 + $0x8] sm:$0xff]   ;;  %v382_v7 = vld [vmem:[%s503_s0 + $0x30] sm:$0xff]  }
   0x3   :  { %352 = vmatpush3.bf16.msra.mxu0 %v375_v0  ;;  %373 = vmatpush3.bf16.msra.mxu1 %v375_v0  ;;  %v378_v3 = vld [vmem:[%s503_s0 + $0x20] sm:$0xff]   ;;  %v380_v5 = vld [vmem:[%s503_s0 + $0x28] sm:$0xff]   ;;  %v383_v8 = vld [vmem:[%s503_s0 + $0x18] sm:$0xff]  }
   0x4   :  { %353 = vmatprep.subr.bf16.mxu0 %v376_v1  ;;  %372 = vmatprep.subr.bf16.mxu1 %v376_v1  ;;  %v384_v9 = vld [vmem:[%s503_s0 + $0x38] sm:$0xff]  }
   0x5   :  { %355 = vmatprep.mubr.msk.bf16.mxu0 %vm84_vm0, %v377_v2  ;;  %363 = vmatprep.mubr.msk.bf16.mxu1 %vm84_vm0, %v378_v3 }
   0x7   :  { %354 = vmatpush3.bf16.msra.mxu0 %v376_v1  ;;  %374 = vmatpush3.bf16.msra.mxu1 %v376_v1 }
   0xa   :  { %356 = vmatmul.mubr.msk.bf16.vlgmr.msra.gmra.mrb[0].mxu0 %vm84_vm0, %v379_v4  ;;  %364 = vmatmul.mubr.msk.bf16.vlgmr.msra.gmra.mrb[0].mxu1 %vm84_vm0, %v380_v5 }
   0xb   :  { %359 = vmatprep.mubr.msk.bf16.mxu0 %vm84_vm0, %v381_v6  ;;  %367 = vmatprep.mubr.msk.bf16.mxu1 %vm84_vm0, %v382_v7 }
  0x12   :  { %360 = vmatmul.mubr.msk.bf16.gmra.mrb[4].mxu0 %vm84_vm0, %v383_v8  ;;  %368 = vmatmul.mubr.msk.bf16.gmra.mrb[4].mxu1 %vm84_vm0, %v384_v9 }
  0xdd   :  { %v357_v10 = vpop.f32.mrb[0].mxu0  ;;  %v365_v11 = vpop.f32.mrb[0].mxu1 }
  0xde   :  { %v327_v12 = vpack.c.bf16 %v357_v10, %v357_v10  ;;  %v335_v13 = vpack.c.bf16 %v365_v11, %v365_v11  ;;  %v143_v14 = vpop.f32.mrb[1].mxu0  ;;  %v175_v15 = vpop.f32.mrb[1].mxu1 }
  0xdf   :  { %v325_v16 = vpack.c.bf16 %v143_v14, %v143_v14  ;;  %v333_v17 = vpack.c.bf16 %v175_v15, %v175_v15  ;;  %v358_v18 = vpop.f32.mrb[2].mxu0  ;;  %v366_v19 = vpop.f32.mrb[2].mxu1 }
  0xe0   :  { %273 = vst.msk [vmem:[%s504_s2 + $0x8] sm:$0xf] %vm270_vm1, %v327_v12  ;;  %281 = vst.msk [vmem:[%s504_s2 + $0x28] sm:$0xf] %vm270_vm1, %v335_v13  ;;  %v328_v20 = vpack.c.bf16 %v358_v18, %v358_v18  ;;  %v336_v21 = vpack.c.bf16 %v366_v19, %v366_v19  ;;  %v146_v22 = vpop.f32.mrb[3].mxu0  ;;  %v178_v23 = vpop.f32.mrb[3].mxu1 }
  0xe1   :  { %271 = vst.msk [vmem:[%s504_s2] sm:$0xf] %vm270_vm1, %v325_v16  ;;  %279 = vst.msk [vmem:[%s504_s2 + $0x20] sm:$0xf] %vm270_vm1, %v333_v17  ;;  %v326_v24 = vpack.c.bf16 %v146_v22, %v146_v22  ;;  %v334_v25 = vpack.c.bf16 %v178_v23, %v178_v23 }
  0xe2   :  { %274 = vst.msk [vmem:[%s504_s2 + $0xc] sm:$0xf] %vm270_vm1, %v328_v20  ;;  %282 = vst.msk [vmem:[%s504_s2 + $0x2c] sm:$0xf] %vm270_vm1, %v336_v21 }
  0xe3   :  { %272 = vst.msk [vmem:[%s504_s2 + $0x4] sm:$0xf] %vm270_vm1, %v326_v24  ;;  %280 = vst.msk [vmem:[%s504_s2 + $0x24] sm:$0xf] %vm270_vm1, %v334_v25 }
  0xe5   :  { %v361_v26 = vpop.f32.mrb[4].mxu0  ;;  %v369_v27 = vpop.f32.mrb[4].mxu1 }
  0xe6   :  { %v331_v28 = vpack.c.bf16 %v361_v26, %v361_v26  ;;  %v339_v29 = vpack.c.bf16 %v369_v27, %v369_v27  ;;  %v159_v30 = vpop.f32.mrb[5].mxu0  ;;  %v191_v31 = vpop.f32.mrb[5].mxu1 }
  0xe7   :  { %v329_v32 = vpack.c.bf16 %v159_v30, %v159_v30  ;;  %v337_v33 = vpack.c.bf16 %v191_v31, %v191_v31  ;;  %v362_v34 = vpop.f32.mrb[6].mxu0  ;;  %v370_v35 = vpop.f32.mrb[6].mxu1 }
  0xe8   :  { %277 = vst.msk [vmem:[%s504_s2 + $0x18] sm:$0xf] %vm270_vm1, %v331_v28  ;;  %285 = vst.msk [vmem:[%s504_s2 + $0x38] sm:$0xf] %vm270_vm1, %v339_v29  ;;  %v332_v36 = vpack.c.bf16 %v362_v34, %v362_v34  ;;  %v340_v37 = vpack.c.bf16 %v370_v35, %v370_v35  ;;  %v162_v38 = vpop.f32.mrb[7].mxu0  ;;  %v194_v39 = vpop.f32.mrb[7].mxu1 }
  0xe9   :  { %275 = vst.msk [vmem:[%s504_s2 + $0x10] sm:$0xf] %vm270_vm1, %v329_v32  ;;  %283 = vst.msk [vmem:[%s504_s2 + $0x30] sm:$0xf] %vm270_vm1, %v337_v33  ;;  %v330_v40 = vpack.c.bf16 %v162_v38, %v162_v38  ;;  %v338_v41 = vpack.c.bf16 %v194_v39, %v194_v39 }
  0xea   :  { %278 = vst.msk [vmem:[%s504_s2 + $0x1c] sm:$0xf] %vm270_vm1, %v332_v36  ;;  %286 = vst.msk [vmem:[%s504_s2 + $0x3c] sm:$0xf] %vm270_vm1, %v340_v37 }
  0xeb   :  { %276 = vst.msk [vmem:[%s504_s2 + $0x14] sm:$0xf] %vm270_vm1, %v330_v40  ;;  %284 = vst.msk [vmem:[%s504_s2 + $0x34] sm:$0xf] %vm270_vm1, %v338_v41 }

// kernel: _lambda_.36
= control target key start
LH: loop header
LB: loop body
LE: loop exit
PB: predicated region body
PF: predicated region fallthrough
CT: control target
= control target key end

     0   :  { %vm21_vm0 = vcmask 261120   ;;  %vm155_vm1 = vcmask 257024   ;;  %s303_s0 = inlined_call_operand.vmem [shape: f32[32,288], index: 0, kind: input, shape index: {}]   ;;  %s304_s1 = inlined_call_operand.vmem [shape: bf16[32,288], index: 1, kind: output, shape index: {}]  }
   0x1   :  { %v8_v0 = vld [vmem:[%s303_s0] sm:$0xff]  ;;  %v9_v1 = vld [vmem:[%s303_s0 + $0x8] sm:$0xff]  ;;  %v10_v2 = vld [vmem:[%s303_s0 + $0x10] sm:$0xff] }
   0x2   :  { %v20_v3 = vadd.f32 %v9_v1, %v8_v0  ;;  %v22_v4 = vsel %vm21_vm0, %v10_v2, 0.0  ;;  %v14_v5 = vld [vmem:[%s303_s0 + $0x30] sm:$0xff]  ;;  %v15_v6 = vld [vmem:[%s303_s0 + $0x38] sm:$0xff]  ;;  %v16_v7 = vld [vmem:[%s303_s0 + $0x40] sm:$0xff] }
   0x3   :  { %v31_v8 = vadd.f32 %v15_v6, %v14_v5  ;;  %v32_v9 = vsel %vm21_vm0, %v16_v7, 0.0  ;;  %v11_v10 = vld [vmem:[%s303_s0 + $0x18] sm:$0xff]  ;;  %v12_v11 = vld [vmem:[%s303_s0 + $0x20] sm:$0xff]  ;;  %v13_v12 = vld [vmem:[%s303_s0 + $0x28] sm:$0xff] }
   0x4   :  { %v23_v13 = vadd.f32 %v22_v4, %v20_v3  ;;  %v26_v14 = vadd.f32 %v12_v11, %v11_v10  ;;  %v27_v15 = vsel %vm21_vm0, %v13_v12, 0.0  ;;  %v17_v16 = vld [vmem:[%s303_s0 + $0x48] sm:$0xff]  ;;  %v18_v17 = vld [vmem:[%s303_s0 + $0x50] sm:$0xff]  ;;  %v19_v18 = vld [vmem:[%s303_s0 + $0x58] sm:$0xff] }
   0x5   :  { %v33_v19 = vadd.f32 %v32_v9, %v31_v8  ;;  %v36_v20 = vadd.f32 %v18_v17, %v17_v16  ;;  %v37_v21 = vsel %vm21_vm0, %v19_v18, 0.0 }
   0x6   :  { %24 = vadd.xlane.f32.xlu0 %v23_v13  ;;  %v28_v22 = vadd.f32 %v27_v15, %v26_v14 }
   0x7   :  { %34 = vadd.xlane.f32.xlu1 %v33_v19  ;;  %v38_v23 = vadd.f32 %v37_v21, %v36_v20 }
   0xa   :  { %29 = vadd.xlane.f32.xlu0 %v28_v22 }
   0xb   :  { %39 = vadd.xlane.f32.xlu1 %v38_v23 }
  0x93   :  { %v25_v24 = vpop.xlane.xlu0 %24 }
  0x94   :  { %v42_v25 = vmul.f32 0.0034722222, %v25_v24  ;;  %v35_v26 = vpop.xlane.xlu1 %34 }
  0x95   :  { %v44_v27 = vmul.f32 0.0034722222, %v35_v26 }
  0x96   :  { %v46_v28 = vsub.f32 %v8_v0, %v42_v25  ;;  %v47_v29 = vsub.f32 %v9_v1, %v42_v25  ;;  %v48_v30 = vsub.f32 %v10_v2, %v42_v25 }
  0x97   :  { %v241_v31 = vsub.f32 %v14_v5, %v44_v27  ;;  %v243_v32 = vsub.f32 %v15_v6, %v44_v27  ;;  %v245_v33 = vsub.f32 %v16_v7, %v44_v27  ;;  %v30_v34 = vpop.xlane.xlu0 %29 }
  0x98   :  { %v43_v35 = vmul.f32 0.0034722222, %v30_v34  ;;  %v40_v36 = vpop.xlane.xlu1 %39  ;;  %v58_v37 = vmul.f32 %v46_v28, %v46_v28  ;;  %v59_v38 = vmul.f32 %v47_v29, %v47_v29  ;;  %v60_v39 = vmul.f32 %v48_v30, %v48_v30 }
  0x99   :  { %v45_v40 = vmul.f32 0.0034722222, %v40_v36  ;;  %v64_v41 = vmul.f32 %v241_v31, %v241_v31  ;;  %v65_v42 = vmul.f32 %v243_v32, %v243_v32  ;;  %v66_v43 = vmul.f32 %v245_v33, %v245_v33 }
  0x9a   :  { %v49_v44 = vsub.f32 %v11_v10, %v43_v35  ;;  %v50_v45 = vsub.f32 %v12_v11, %v43_v35  ;;  %v51_v46 = vsub.f32 %v13_v12, %v43_v35  ;;  %v70_v47 = vadd.f32 %v59_v38, %v58_v37 }
  0x9b   :  { %v253_v48 = vsub.f32 %v17_v16, %v45_v40  ;;  %v255_v49 = vsub.f32 %v18_v17, %v45_v40  ;;  %v257_v50 = vsub.f32 %v19_v18, %v45_v40  ;;  %v71_v51 = vsel %vm21_vm0, %v60_v39, 0.0 }
  0x9c   :  { %v72_v52 = vadd.f32 %v71_v51, %v70_v47  ;;  %v80_v53 = vadd.f32 %v65_v42, %v64_v41  ;;  %v81_v54 = vsel %vm21_vm0, %v66_v43, 0.0  ;;  %v61_v55 = vmul.f32 %v49_v44, %v49_v44 }
  0x9d   :  { %v62_v56 = vmul.f32 %v50_v45, %v50_v45  ;;  %v63_v57 = vmul.f32 %v51_v46, %v51_v46  ;;  %v67_v58 = vmul.f32 %v253_v48, %v253_v48  ;;  %v68_v59 = vmul.f32 %v255_v49, %v255_v49 }
  0x9e   :  { %73 = vadd.xlane.f32.xlu0 %v72_v52  ;;  %v82_v60 = vadd.f32 %v81_v54, %v80_v53  ;;  %v69_v61 = vmul.f32 %v257_v50, %v257_v50 }
  0x9f   :  { %v75_v62 = vadd.f32 %v62_v56, %v61_v55  ;;  %v76_v63 = vsel %vm21_vm0, %v63_v57, 0.0  ;;  %v85_v0 = vadd.f32 %v68_v59, %v67_v58 }
  0xa0   :  { %v86_v1 = vsel %vm21_vm0, %v69_v61, 0.0 }
  0xa1   :  { %v77_v2 = vadd.f32 %v76_v63, %v75_v62  ;;  %v87_v3 = vadd.f32 %v86_v1, %v85_v0 }
  0xa2   :  { %83 = vadd.xlane.f32.xlu0 %v82_v60 }
  0xa3   :  { %78 = vadd.xlane.f32.xlu1 %v77_v2 }
  0xa7   :  { %88 = vadd.xlane.f32.xlu1 %v87_v3 }
 0x12b   :  { %v74_v4 = vpop.xlane.xlu0 %73 }
 0x12c   :  { %v90_v5 = vmul.f32 0.0034722222, %v74_v4 }
 0x12e   :  { %v94_v6 = vadd.f32 1e-06, %v90_v5 }
 0x12f   :  { %v84_v7 = vpop.xlane.xlu0 %83 }
 0x130   :  { %183 = vrsqrt.f32 %v94_v6  ;;  %v79_v8 = vpop.xlane.xlu1 %78  ;;  %v92_v9 = vmul.f32 0.0034722222, %v84_v7 }
 0x131   :  { %v91_v10 = vmul.f32 0.0034722222, %v79_v8 }
 0x132   :  { %v96_v11 = vadd.f32 1e-06, %v92_v9 }
 0x133   :  { %v95_v12 = vadd.f32 1e-06, %v91_v10 }
 0x134   :  { %185 = vrsqrt.f32 %v96_v11  ;;  %v89_v13 = vpop.xlane.xlu1 %88 }
 0x135   :  { %187 = vrsqrt.f32 %v95_v12  ;;  %v93_v14 = vmul.f32 0.0034722222, %v89_v13 }
 0x137   :  { %v97_v15 = vadd.f32 1e-06, %v93_v14 }
 0x139   :  { %189 = vrsqrt.f32 %v97_v15 }
 0x13a   :  { %v184_v16 = vpop.eup %183 }
 0x13b   :  { %v102_v17 = vmul.f32 %v184_v16, %v46_v28  ;;  %v103_v18 = vmul.f32 %v184_v16, %v47_v29  ;;  %v104_v19 = vmul.f32 %v184_v16, %v48_v30 }
 0x13d   :  { %v175_v20 = vpack.c.bf16 %v103_v18, %v102_v17  ;;  %v176_v21 = vpack.c.bf16 %v104_v19, %v104_v19 }
 0x13e   :  { %v186_v22 = vpop.eup %185 }
 0x13f   :  { %v188_v23 = vpop.eup %187  ;;  %154 = vst [vmem:[%s304_s1] sm:$0xff] %v175_v20  ;;  %156 = vst.msk [vmem:[%s304_s1 + $0x8] sm:$0xf] %vm155_vm1, %v176_v21  ;;  %v108_v24 = vmul.f32 %v186_v22, %v241_v31  ;;  %v109_v25 = vmul.f32 %v186_v22, %v243_v32  ;;  %v110_v26 = vmul.f32 %v186_v22, %v245_v33 }
 0x140   :  { %v105_v27 = vmul.f32 %v188_v23, %v49_v44  ;;  %v106_v28 = vmul.f32 %v188_v23, %v50_v45  ;;  %v107_v29 = vmul.f32 %v188_v23, %v51_v46 }
 0x141   :  { %v179_v30 = vpack.c.bf16 %v109_v25, %v108_v24  ;;  %v180_v34 = vpack.c.bf16 %v110_v26, %v110_v26 }
 0x142   :  { %v177_v35 = vpack.c.bf16 %v106_v28, %v105_v27  ;;  %v178_v36 = vpack.c.bf16 %v107_v29, %v107_v29 }
 0x143   :  { %v190_v37 = vpop.eup %189  ;;  %159 = vst [vmem:[%s304_s1 + $0x18] sm:$0xff] %v179_v30  ;;  %160 = vst.msk [vmem:[%s304_s1 + $0x20] sm:$0xf] %vm155_vm1, %v180_v34 }
 0x144   :  { %157 = vst [vmem:[%s304_s1 + $0xc] sm:$0xff] %v177_v35  ;;  %158 = vst.msk [vmem:[%s304_s1 + $0x14] sm:$0xf] %vm155_vm1, %v178_v36  ;;  %v111_v31 = vmul.f32 %v190_v37, %v253_v48  ;;  %v112_v32 = vmul.f32 %v190_v37, %v255_v49  ;;  %v113_v33 = vmul.f32 %v190_v37, %v257_v50 }
 0x146   :  { %v181_v38 = vpack.c.bf16 %v112_v32, %v111_v31  ;;  %v182_v39 = vpack.c.bf16 %v113_v33, %v113_v33 }
 0x148   :  { %161 = vst [vmem:[%s304_s1 + $0x24] sm:$0xff] %v181_v38  ;;  %162 = vst.msk [vmem:[%s304_s1 + $0x2c] sm:$0xf] %vm155_vm1, %v182_v39 }

// kernel: _lambda_.31
= control target key start
LH: loop header
LB: loop body
LE: loop exit
PB: predicated region body
PF: predicated region fallthrough
CT: control target
= control target key end

     0   :  { %vm24_vm0 = vcmask 261120   ;;  %vm298_vm1 = vcmask 257024   ;;  %s657_s0 = inlined_call_operand.vmem [shape: f32[128,32], index: 0, kind: input, shape index: {}]   ;;  %s658_s1 = inlined_call_operand.vmem [shape: bf16[128,32], index: 1, kind: output, shape index: {}]  }
   0x1   :  { %v8_v0 = vld [vmem:[%s657_s0] sm:$0xff]  ;;  %v10_v1 = vld [vmem:[%s657_s0 + $0x10] sm:$0xff]  ;;  %v9_v2 = vld [vmem:[%s657_s0 + $0x8] sm:$0xff] }
   0x2   :  { %v25_v3 = vsel %vm24_vm0, %v8_v0, 0.0  ;;  %v31_v4 = vsel %vm24_vm0, %v10_v1, 0.0  ;;  %v11_v5 = vld [vmem:[%s657_s0 + $0x18] sm:$0xff]  ;;  %v28_v6 = vsel %vm24_vm0, %v9_v2, 0.0  ;;  %v12_v8 = vld [vmem:[%s657_s0 + $0x20] sm:$0xff]  ;;  %v13_v9 = vld [vmem:[%s657_s0 + $0x28] sm:$0xff] }
   0x3   :  { %26 = vadd.xlane.f32.xlu0 %v25_v3  ;;  %32 = vadd.xlane.f32.xlu1 %v31_v4  ;;  %v34_v7 = vsel %vm24_vm0, %v11_v5, 0.0  ;;  %v37_v10 = vsel %vm24_vm0, %v12_v8, 0.0  ;;  %v40_v11 = vsel %vm24_vm0, %v13_v9, 0.0  ;;  %v420_v12 = vld [vmem:[%s657_s0 + $0x30] sm:$0xff]  ;;  %v425_v13 = vld [vmem:[%s657_s0 + $0x38] sm:$0xff]  ;;  %v434_v16 = vld [vmem:[%s657_s0 + $0x40] sm:$0xff] }
   0x4   :  { %v43_v14 = vsel %vm24_vm0, %v420_v12, 0.0  ;;  %v46_v15 = vsel %vm24_vm0, %v425_v13, 0.0  ;;  %v439_v17 = vld [vmem:[%s657_s0 + $0x48] sm:$0xff]  ;;  %v49_v18 = vsel %vm24_vm0, %v434_v16, 0.0  ;;  %v448_v20 = vld [vmem:[%s657_s0 + $0x50] sm:$0xff]  ;;  %v453_v21 = vld [vmem:[%s657_s0 + $0x58] sm:$0xff] }
   0x5   :  { %v52_v19 = vsel %vm24_vm0, %v439_v17, 0.0  ;;  %v55_v22 = vsel %vm24_vm0, %v448_v20, 0.0  ;;  %v58_v23 = vsel %vm24_vm0, %v453_v21, 0.0  ;;  %v462_v24 = vld [vmem:[%s657_s0 + $0x60] sm:$0xff]  ;;  %v467_v25 = vld [vmem:[%s657_s0 + $0x68] sm:$0xff]  ;;  %v476_v28 = vld [vmem:[%s657_s0 + $0x70] sm:$0xff] }
   0x6   :  { %v61_v26 = vsel %vm24_vm0, %v462_v24, 0.0  ;;  %v64_v27 = vsel %vm24_vm0, %v467_v25, 0.0  ;;  %v481_v29 = vld [vmem:[%s657_s0 + $0x78] sm:$0xff]  ;;  %v67_v30 = vsel %vm24_vm0, %v476_v28, 0.0 }
   0x7   :  { %29 = vadd.xlane.f32.xlu0 %v28_v6  ;;  %35 = vadd.xlane.f32.xlu1 %v34_v7  ;;  %v70_v31 = vsel %vm24_vm0, %v481_v29, 0.0 }
   0xb   :  { %38 = vadd.xlane.f32.xlu0 %v37_v10  ;;  %41 = vadd.xlane.f32.xlu1 %v40_v11 }
   0xf   :  { %44 = vadd.xlane.f32.xlu0 %v43_v14  ;;  %47 = vadd.xlane.f32.xlu1 %v46_v15 }
  0x13   :  { %50 = vadd.xlane.f32.xlu0 %v49_v18  ;;  %53 = vadd.xlane.f32.xlu1 %v52_v19 }
  0x17   :  { %56 = vadd.xlane.f32.xlu0 %v55_v22  ;;  %59 = vadd.xlane.f32.xlu1 %v58_v23 }
  0x1b   :  { %62 = vadd.xlane.f32.xlu0 %v61_v26  ;;  %65 = vadd.xlane.f32.xlu1 %v64_v27 }
  0x1f   :  { %68 = vadd.xlane.f32.xlu0 %v67_v30  ;;  %71 = vadd.xlane.f32.xlu1 %v70_v31 }
  0x90   :  { %v27_v32 = vpop.xlane.xlu0 %26  ;;  %v33_v33 = vpop.xlane.xlu1 %32 }
  0x91   :  { %v74_v34 = vmul.f32 0.03125, %v27_v32  ;;  %v76_v35 = vmul.f32 0.03125, %v33_v33 }
  0x93   :  { %v487_v36 = vsub.f32 %v8_v0, %v74_v34  ;;  %v489_v37 = vsub.f32 %v10_v1, %v76_v35 }
  0x94   :  { %v30_v38 = vpop.xlane.xlu0 %29  ;;  %v36_v39 = vpop.xlane.xlu1 %35 }
  0x95   :  { %v75_v40 = vmul.f32 0.03125, %v30_v38  ;;  %v77_v41 = vmul.f32 0.03125, %v36_v39  ;;  %v106_v42 = vmul.f32 %v487_v36, %v487_v36  ;;  %v108_v43 = vmul.f32 %v489_v37, %v489_v37 }
  0x97   :  { %v495_v44 = vsub.f32 %v9_v2, %v75_v40  ;;  %v497_v45 = vsub.f32 %v11_v5, %v77_v41  ;;  %v122_v46 = vsel %vm24_vm0, %v106_v42, 0.0  ;;  %v128_v49 = vsel %vm24_vm0, %v108_v43, 0.0 }
  0x98   :  { %123 = vadd.xlane.f32.xlu0 %v122_v46  ;;  %v39_v47 = vpop.xlane.xlu0 %38  ;;  %v42_v48 = vpop.xlane.xlu1 %41 }
  0x99   :  { %v78_v50 = vmul.f32 0.03125, %v39_v47  ;;  %v79_v51 = vmul.f32 0.03125, %v42_v48  ;;  %v107_v52 = vmul.f32 %v495_v44, %v495_v44  ;;  %v109_v53 = vmul.f32 %v497_v45, %v497_v45 }
  0x9b   :  { %v505_v54 = vsub.f32 %v12_v8, %v78_v50  ;;  %v507_v55 = vsub.f32 %v13_v9, %v79_v51  ;;  %v125_v56 = vsel %vm24_vm0, %v107_v52, 0.0  ;;  %v131_v59 = vsel %vm24_vm0, %v109_v53, 0.0 }
  0x9c   :  { %129 = vadd.xlane.f32.xlu0 %v128_v49  ;;  %126 = vadd.xlane.f32.xlu1 %v125_v56  ;;  %v45_v57 = vpop.xlane.xlu0 %44  ;;  %v48_v58 = vpop.xlane.xlu1 %47 }
  0x9d   :  { %v80_v60 = vmul.f32 0.03125, %v45_v57  ;;  %v81_v61 = vmul.f32 0.03125, %v48_v58  ;;  %v110_v62 = vmul.f32 %v505_v54, %v505_v54  ;;  %v111_v63 = vmul.f32 %v507_v55, %v507_v55 }
  0x9f   :  { %v516_v0 = vsub.f32 %v420_v12, %v80_v60  ;;  %v519_v1 = vsub.f32 %v425_v13, %v81_v61  ;;  %v134_v2 = vsel %vm24_vm0, %v110_v62, 0.0  ;;  %v137_v5 = vsel %vm24_vm0, %v111_v63, 0.0 }
  0xa0   :  { %132 = vadd.xlane.f32.xlu1 %v131_v59  ;;  %135 = vadd.xlane.f32.xlu0 %v134_v2  ;;  %v51_v3 = vpop.xlane.xlu0 %50  ;;  %v54_v4 = vpop.xlane.xlu1 %53 }
  0xa1   :  { %v82_v6 = vmul.f32 0.03125, %v51_v3  ;;  %v83_v7 = vmul.f32 0.03125, %v54_v4  ;;  %v112_v8 = vmul.f32 %v516_v0, %v516_v0  ;;  %v113_v9 = vmul.f32 %v519_v1, %v519_v1 }
  0xa3   :  { %v528_v10 = vsub.f32 %v434_v16, %v82_v6  ;;  %v531_v11 = vsub.f32 %v439_v17, %v83_v7  ;;  %v140_v12 = vsel %vm24_vm0, %v112_v8, 0.0  ;;  %v143_v15 = vsel %vm24_vm0, %v113_v9, 0.0 }
  0xa4   :  { %138 = vadd.xlane.f32.xlu1 %v137_v5  ;;  %141 = vadd.xlane.f32.xlu0 %v140_v12  ;;  %v57_v13 = vpop.xlane.xlu0 %56  ;;  %v60_v14 = vpop.xlane.xlu1 %59 }
  0xa5   :  { %v84_v18 = vmul.f32 0.03125, %v57_v13  ;;  %v85_v19 = vmul.f32 0.03125, %v60_v14  ;;  %v114_v22 = vmul.f32 %v528_v10, %v528_v10  ;;  %v115_v16 = vmul.f32 %v531_v11, %v531_v11 }
  0xa7   :  { %v540_v23 = vsub.f32 %v448_v20, %v84_v18  ;;  %v543_v17 = vsub.f32 %v453_v21, %v85_v19  ;;  %v146_v26 = vsel %vm24_vm0, %v114_v22, 0.0  ;;  %v149_v31 = vsel %vm24_vm0, %v115_v16, 0.0 }
  0xa8   :  { %144 = vadd.xlane.f32.xlu1 %v143_v15  ;;  %147 = vadd.xlane.f32.xlu0 %v146_v26  ;;  %v63_v27 = vpop.xlane.xlu0 %62  ;;  %v66_v30 = vpop.xlane.xlu1 %65 }
  0xa9   :  { %v86_v32 = vmul.f32 0.03125, %v63_v27  ;;  %v87_v33 = vmul.f32 0.03125, %v66_v30  ;;  %v116_v34 = vmul.f32 %v540_v23, %v540_v23  ;;  %v117_v20 = vmul.f32 %v543_v17, %v543_v17 }
  0xab   :  { %v552_v35 = vsub.f32 %v462_v24, %v86_v32  ;;  %v555_v21 = vsub.f32 %v467_v25, %v87_v33  ;;  %v152_v38 = vsel %vm24_vm0, %v116_v34, 0.0  ;;  %v155_v41 = vsel %vm24_vm0, %v117_v20, 0.0 }
  0xac   :  { %150 = vadd.xlane.f32.xlu1 %v149_v31  ;;  %153 = vadd.xlane.f32.xlu0 %v152_v38  ;;  %v69_v39 = vpop.xlane.xlu0 %68  ;;  %v72_v40 = vpop.xlane.xlu1 %71 }
  0xad   :  { %v88_v42 = vmul.f32 0.03125, %v69_v39  ;;  %v89_v43 = vmul.f32 0.03125, %v72_v40  ;;  %v118_v46 = vmul.f32 %v552_v35, %v552_v35  ;;  %v119_v24 = vmul.f32 %v555_v21, %v555_v21 }
  0xaf   :  { %v564_v47 = vsub.f32 %v476_v28, %v88_v42  ;;  %v567_v25 = vsub.f32 %v481_v29, %v89_v43  ;;  %v158_v48 = vsel %vm24_vm0, %v118_v46, 0.0  ;;  %v161_v49 = vsel %vm24_vm0, %v119_v24, 0.0 }
  0xb0   :  { %156 = vadd.xlane.f32.xlu1 %v155_v41  ;;  %159 = vadd.xlane.f32.xlu0 %v158_v48 }
  0xb1   :  { %v120_v50 = vmul.f32 %v564_v47, %v564_v47  ;;  %v121_v51 = vmul.f32 %v567_v25, %v567_v25 }
  0xb3   :  { %v164_v52 = vsel %vm24_vm0, %v120_v50, 0.0  ;;  %v167_v28 = vsel %vm24_vm0, %v121_v51, 0.0 }
  0xb4   :  { %162 = vadd.xlane.f32.xlu1 %v161_v49  ;;  %165 = vadd.xlane.f32.xlu0 %v164_v52 }
  0xb8   :  { %168 = vadd.xlane.f32.xlu1 %v167_v28 }
 0x125   :  { %v124_v29 = vpop.xlane.xlu0 %123 }
 0x126   :  { %v170_v53 = vmul.f32 0.03125, %v124_v29 }
 0x128   :  { %v186_v56 = vadd.f32 1e-06, %v170_v53 }
 0x129   :  { %v127_v57 = vpop.xlane.xlu1 %126  ;;  %v130_v58 = vpop.xlane.xlu0 %129 }
 0x12a   :  { %351 = vrsqrt.f32 %v186_v56  ;;  %v171_v59 = vmul.f32 0.03125, %v127_v57  ;;  %v172_v60 = vmul.f32 0.03125, %v130_v58 }
 0x12c   :  { %v187_v61 = vadd.f32 1e-06, %v171_v59  ;;  %v188_v62 = vadd.f32 1e-06, %v172_v60 }
 0x12d   :  { %v133_v63 = vpop.xlane.xlu1 %132  ;;  %v136_v2 = vpop.xlane.xlu0 %135 }
 0x12e   :  { %353 = vrsqrt.f32 %v187_v61  ;;  %v173_v3 = vmul.f32 0.03125, %v133_v63  ;;  %v174_v4 = vmul.f32 0.03125, %v136_v2 }
 0x12f   :  { %355 = vrsqrt.f32 %v188_v62 }
 0x130   :  { %v189_v5 = vadd.f32 1e-06, %v173_v3  ;;  %v190_v6 = vadd.f32 1e-06, %v174_v4 }
 0x131   :  { %v139_v7 = vpop.xlane.xlu1 %138  ;;  %v142_v8 = vpop.xlane.xlu0 %141 }
 0x132   :  { %357 = vrsqrt.f32 %v189_v5  ;;  %v175_v9 = vmul.f32 0.03125, %v139_v7  ;;  %v176_v12 = vmul.f32 0.03125, %v142_v8 }
 0x133   :  { %359 = vrsqrt.f32 %v190_v6 }
 0x134   :  { %v352_v13 = vpop.eup %351  ;;  %v191_v14 = vadd.f32 1e-06, %v175_v9  ;;  %v192_v15 = vadd.f32 1e-06, %v176_v12 }
 0x135   :  { %v218_v18 = vmul.f32 %v352_v13, %v487_v36  ;;  %v145_v19 = vpop.xlane.xlu1 %144  ;;  %v148_v22 = vpop.xlane.xlu0 %147 }
 0x136   :  { %361 = vrsqrt.f32 %v191_v14  ;;  %v177_v16 = vmul.f32 0.03125, %v145_v19  ;;  %v178_v26 = vmul.f32 0.03125, %v148_v22 }
 0x137   :  { %v335_v27 = vpack.c.bf16 %v218_v18, %v218_v18  ;;  %363 = vrsqrt.f32 %v192_v15 }
 0x138   :  { %v354_v30 = vpop.eup %353  ;;  %v193_v31 = vadd.f32 1e-06, %v177_v16  ;;  %v194_v32 = vadd.f32 1e-06, %v178_v26 }
 0x139   :  { %v356_v33 = vpop.eup %355  ;;  %299 = vst.msk [vmem:[%s658_s1] sm:$0xf] %vm298_vm1, %v335_v27  ;;  %v219_v34 = vmul.f32 %v354_v30, %v495_v44  ;;  %v151_v36 = vpop.xlane.xlu1 %150 }
 0x13a   :  { %v154_v20 = vpop.xlane.xlu0 %153  ;;  %v220_v38 = vmul.f32 %v356_v33, %v489_v37  ;;  %365 = vrsqrt.f32 %v193_v31  ;;  %v179_v39 = vmul.f32 0.03125, %v151_v36 }
 0x13b   :  { %v180_v40 = vmul.f32 0.03125, %v154_v20  ;;  %v336_v41 = vpack.c.bf16 %v219_v34, %v219_v34  ;;  %367 = vrsqrt.f32 %v194_v32 }
 0x13c   :  { %v358_v42 = vpop.eup %357  ;;  %v337_v43 = vpack.c.bf16 %v220_v38, %v220_v38  ;;  %v195_v46 = vadd.f32 1e-06, %v179_v39 }
 0x13d   :  { %v196_v24 = vadd.f32 1e-06, %v180_v40  ;;  %v360_v48 = vpop.eup %359  ;;  %300 = vst.msk [vmem:[%s658_s1 + $0x4] sm:$0xf] %vm298_vm1, %v336_v41  ;;  %v221_v44 = vmul.f32 %v358_v42, %v497_v45  ;;  %v157_v49 = vpop.xlane.xlu1 %156 }
 0x13e   :  { %v160_v50 = vpop.xlane.xlu0 %159  ;;  %301 = vst.msk [vmem:[%s658_s1 + $0x8] sm:$0xf] %vm298_vm1, %v337_v43  ;;  %v222_v37 = vmul.f32 %v360_v48, %v505_v54  ;;  %369 = vrsqrt.f32 %v195_v46  ;;  %v181_v51 = vmul.f32 0.03125, %v157_v49 }
 0x13f   :  { %v182_v52 = vmul.f32 0.03125, %v160_v50  ;;  %v338_v28 = vpack.c.bf16 %v221_v44, %v221_v44  ;;  %371 = vrsqrt.f32 %v196_v24 }
 0x140   :  { %v362_v29 = vpop.eup %361  ;;  %v339_v53 = vpack.c.bf16 %v222_v37, %v222_v37  ;;  %v197_v56 = vadd.f32 1e-06, %v181_v51 }
 0x141   :  { %v198_v57 = vadd.f32 1e-06, %v182_v52  ;;  %v364_v58 = vpop.eup %363  ;;  %302 = vst.msk [vmem:[%s658_s1 + $0xc] sm:$0xf] %vm298_vm1, %v338_v28  ;;  %v223_v45 = vmul.f32 %v362_v29, %v507_v55  ;;  %v163_v59 = vpop.xlane.xlu1 %162 }
 0x142   :  { %v166_v60 = vpop.xlane.xlu0 %165  ;;  %303 = vst.msk [vmem:[%s658_s1 + $0x10] sm:$0xf] %vm298_vm1, %v339_v53  ;;  %v224_v54 = vmul.f32 %v364_v58, %v516_v0  ;;  %373 = vrsqrt.f32 %v197_v56  ;;  %v183_v61 = vmul.f32 0.03125, %v163_v59 }
 0x143   :  { %v184_v62 = vmul.f32 0.03125, %v166_v60  ;;  %v340_v63 = vpack.c.bf16 %v223_v45, %v223_v45  ;;  %375 = vrsqrt.f32 %v198_v57 }
 0x144   :  { %v366_v2 = vpop.eup %365  ;;  %v341_v3 = vpack.c.bf16 %v224_v54, %v224_v54  ;;  %v199_v4 = vadd.f32 1e-06, %v183_v61 }
 0x145   :  { %v200_v5 = vadd.f32 1e-06, %v184_v62  ;;  %v368_v6 = vpop.eup %367  ;;  %304 = vst.msk [vmem:[%s658_s1 + $0x14] sm:$0xf] %vm298_vm1, %v340_v63  ;;  %v225_v55 = vmul.f32 %v366_v2, %v519_v1  ;;  %v169_v7 = vpop.xlane.xlu1 %168 }
 0x146   :  { %305 = vst.msk [vmem:[%s658_s1 + $0x18] sm:$0xf] %vm298_vm1, %v341_v3  ;;  %v226_v0 = vmul.f32 %v368_v6, %v528_v10  ;;  %377 = vrsqrt.f32 %v199_v4  ;;  %v185_v8 = vmul.f32 0.03125, %v169_v7 }
 0x147   :  { %v342_v9 = vpack.c.bf16 %v225_v55, %v225_v55  ;;  %379 = vrsqrt.f32 %v200_v5 }
 0x148   :  { %v370_v12 = vpop.eup %369  ;;  %v343_v13 = vpack.c.bf16 %v226_v0, %v226_v0  ;;  %v201_v14 = vadd.f32 1e-06, %v185_v8 }
 0x149   :  { %v372_v15 = vpop.eup %371  ;;  %306 = vst.msk [vmem:[%s658_s1 + $0x1c] sm:$0xf] %vm298_vm1, %v342_v9  ;;  %v227_v1 = vmul.f32 %v370_v12, %v531_v11 }
 0x14a   :  { %307 = vst.msk [vmem:[%s658_s1 + $0x20] sm:$0xf] %vm298_vm1, %v343_v13  ;;  %v228_v10 = vmul.f32 %v372_v15, %v540_v23  ;;  %381 = vrsqrt.f32 %v201_v14 }
 0x14b   :  { %v344_v18 = vpack.c.bf16 %v227_v1, %v227_v1 }
 0x14c   :  { %v374_v19 = vpop.eup %373  ;;  %v345_v22 = vpack.c.bf16 %v228_v10, %v228_v10 }
 0x14d   :  { %v376_v16 = vpop.eup %375  ;;  %308 = vst.msk [vmem:[%s658_s1 + $0x24] sm:$0xf] %vm298_vm1, %v344_v18  ;;  %v229_v26 = vmul.f32 %v374_v19, %v543_v17 }
 0x14e   :  { %309 = vst.msk [vmem:[%s658_s1 + $0x28] sm:$0xf] %vm298_vm1, %v345_v22  ;;  %v230_v11 = vmul.f32 %v376_v16, %v552_v35 }
 0x14f   :  { %v346_v23 = vpack.c.bf16 %v229_v26, %v229_v26 }
 0x150   :  { %v378_v27 = vpop.eup %377  ;;  %v347_v30 = vpack.c.bf16 %v230_v11, %v230_v11 }
 0x151   :  { %v380_v31 = vpop.eup %379  ;;  %310 = vst.msk [vmem:[%s658_s1 + $0x2c] sm:$0xf] %vm298_vm1, %v346_v23  ;;  %v231_v32 = vmul.f32 %v378_v27, %v555_v21 }
 0x152   :  { %311 = vst.msk [vmem:[%s658_s1 + $0x30] sm:$0xf] %vm298_vm1, %v347_v30  ;;  %v232_v17 = vmul.f32 %v380_v31, %v564_v47 }
 0x153   :  { %v348_v33 = vpack.c.bf16 %v231_v32, %v231_v32 }
 0x154   :  { %v382_v35 = vpop.eup %381  ;;  %v349_v34 = vpack.c.bf16 %v232_v17, %v232_v17 }
 0x155   :  { %312 = vst.msk [vmem:[%s658_s1 + $0x34] sm:$0xf] %vm298_vm1, %v348_v33  ;;  %v233_v36 = vmul.f32 %v382_v35, %v567_v25 }
 0x156   :  { %313 = vst.msk [vmem:[%s658_s1 + $0x38] sm:$0xf] %vm298_vm1, %v349_v34 }
 0x157   :  { %v350_v21 = vpack.c.bf16 %v233_v36, %v233_v36 }
 0x159   :  { %314 = vst.msk [vmem:[%s658_s1 + $0x3c] sm:$0xf] %vm298_vm1, %v350_v21 }

// kernel: _lambda_.32
= control target key start
LH: loop header
LB: loop body
LE: loop exit
PB: predicated region body
PF: predicated region fallthrough
CT: control target
= control target key end

     0   :  { %vm84_vm0 = vcmask 261120   ;;  %s508_s1 = inlined_call_operand.vmem [shape: bf16[32,128], index: 1, kind: input, shape index: {}]   ;;  %s509_s0 = inlined_call_operand.vmem [shape: bf16[128,32], index: 0, kind: input, shape index: {}]   ;;  %s510_s2 = inlined_call_operand.vmem [shape: bf16[128,128], index: 2, kind: output, shape index: {}]  }
   0x1   :  { %v421_v0 = vld [vmem:[%s508_s1] sm:$0xff]   ;;  %v422_v1 = vld [vmem:[%s508_s1 + $0x8] sm:$0xff]   ;;  %v427_v6 = vld [vmem:[%s509_s0 + $0x10] sm:$0xff]  }
   0x2   :  { %397 = vmatprep.subr.bf16.mxu0 %v421_v0  ;;  %417 = vmatprep.subr.bf16.mxu1 %v421_v0  ;;  %v423_v2 = vld [vmem:[%s509_s0] sm:$0xff]   ;;  %v425_v4 = vld [vmem:[%s509_s0 + $0x8] sm:$0xff]   ;;  %v428_v7 = vld [vmem:[%s509_s0 + $0x30] sm:$0xff]  }
   0x3   :  { %398 = vmatpush3.bf16.msra.mxu0 %v421_v0  ;;  %419 = vmatpush3.bf16.msra.mxu1 %v421_v0  ;;  %v424_v3 = vld [vmem:[%s509_s0 + $0x20] sm:$0xff]   ;;  %v426_v5 = vld [vmem:[%s509_s0 + $0x28] sm:$0xff]   ;;  %v429_v8 = vld [vmem:[%s509_s0 + $0x18] sm:$0xff]  }
   0x4   :  { %399 = vmatprep.subr.bf16.mxu0 %v422_v1  ;;  %418 = vmatprep.subr.bf16.mxu1 %v422_v1  ;;  %v430_v9 = vld [vmem:[%s509_s0 + $0x38] sm:$0xff]  }
   0x5   :  { %401 = vmatprep.mubr.msk.bf16.mxu0 %vm84_vm0, %v423_v2  ;;  %409 = vmatprep.mubr.msk.bf16.mxu1 %vm84_vm0, %v424_v3 }
   0x7   :  { %400 = vmatpush3.bf16.msra.mxu0 %v422_v1  ;;  %420 = vmatpush3.bf16.msra.mxu1 %v422_v1 }
   0xa   :  { %402 = vmatmul.mubr.msk.bf16.vlgmr.msra.gmra.mrb[0].mxu0 %vm84_vm0, %v425_v4  ;;  %410 = vmatmul.mubr.msk.bf16.vlgmr.msra.gmra.mrb[0].mxu1 %vm84_vm0, %v426_v5 }
   0xb   :  { %405 = vmatprep.mubr.msk.bf16.mxu0 %vm84_vm0, %v427_v6  ;;  %413 = vmatprep.mubr.msk.bf16.mxu1 %vm84_vm0, %v428_v7 }
  0x12   :  { %406 = vmatmul.mubr.msk.bf16.gmra.mrb[4].mxu0 %vm84_vm0, %v429_v8  ;;  %414 = vmatmul.mubr.msk.bf16.gmra.mrb[4].mxu1 %vm84_vm0, %v430_v9 }
  0xdd   :  { %v403_v10 = vpop.f32.mrb[0].mxu0  ;;  %v411_v11 = vpop.f32.mrb[0].mxu1 }
  0xde   :  { %v143_v12 = vpop.f32.mrb[1].mxu0  ;;  %v175_v13 = vpop.f32.mrb[1].mxu1 }
  0xdf   :  { %v404_v14 = vpop.f32.mrb[2].mxu0  ;;  %v412_v15 = vpop.f32.mrb[2].mxu1 }
  0xe0   :  { %v348_v16 = vpack.c.bf16 %v404_v14, %v403_v10  ;;  %v368_v17 = vpack.c.bf16 %v412_v15, %v411_v11  ;;  %v146_v18 = vpop.f32.mrb[3].mxu0  ;;  %v178_v19 = vpop.f32.mrb[3].mxu1 }
  0xe1   :  { %v343_v20 = vpack.c.bf16 %v146_v18, %v143_v12  ;;  %v363_v21 = vpack.c.bf16 %v178_v19, %v175_v13 }
  0xe2   :  { %380 = vst [vmem:[%s510_s2 + $0x8] sm:$0xff] %v348_v16   ;;  %384 = vst [vmem:[%s510_s2 + $0x28] sm:$0xff] %v368_v17  }
  0xe3   :  { %344 = vst [vmem:[%s510_s2] sm:$0xff] %v343_v20   ;;  %383 = vst [vmem:[%s510_s2 + $0x20] sm:$0xff] %v363_v21  }
  0xe5   :  { %v407_v22 = vpop.f32.mrb[4].mxu0  ;;  %v415_v23 = vpop.f32.mrb[4].mxu1 }
  0xe6   :  { %v159_v24 = vpop.f32.mrb[5].mxu0  ;;  %v191_v25 = vpop.f32.mrb[5].mxu1 }
  0xe7   :  { %v408_v26 = vpop.f32.mrb[6].mxu0  ;;  %v416_v27 = vpop.f32.mrb[6].mxu1 }
  0xe8   :  { %v358_v28 = vpack.c.bf16 %v408_v26, %v407_v22  ;;  %v378_v29 = vpack.c.bf16 %v416_v27, %v415_v23  ;;  %v162_v30 = vpop.f32.mrb[7].mxu0  ;;  %v194_v31 = vpop.f32.mrb[7].mxu1 }
  0xe9   :  { %v353_v32 = vpack.c.bf16 %v162_v30, %v159_v24  ;;  %v373_v33 = vpack.c.bf16 %v194_v31, %v191_v25 }
  0xea   :  { %382 = vst [vmem:[%s510_s2 + $0x18] sm:$0xff] %v358_v28   ;;  %386 = vst [vmem:[%s510_s2 + $0x38] sm:$0xff] %v378_v29  }
  0xeb   :  { %381 = vst [vmem:[%s510_s2 + $0x10] sm:$0xff] %v353_v32   ;;  %385 = vst [vmem:[%s510_s2 + $0x30] sm:$0xff] %v373_v33  }

// kernel: _lambda_.37
= control target key start
LH: loop header
LB: loop body
LE: loop exit
PB: predicated region body
PF: predicated region fallthrough
CT: control target
= control target key end

     0   :  { %s1886_s9 = smov 0   ;;  %s2393_s0 = inlined_call_operand.vmem [shape: bf16[2,10,10,32], index: 0, kind: input, shape index: {}]   ;;  %s2394_s1 = inlined_call_operand.vmem [shape: bf16[9,32,32], index: 1, kind: input, shape index: {}]   ;;  %s2395_s2 = inlined_call_operand.vmem [shape: bf16[2,8,8,32], index: 2, kind: output, shape index: {}]  }
   0x1 LB: > { %s1527_s10 = sadd.s32 4294967295, %s1869_s9   ;;  %p1531_p0 = scmp.ge.s32.totalorder %s1869_s9, 1  ;;  %s1869_s9 = sphi %s1886_s9, %s12_s9  }
   0x2   : > { %p112_p1 = scmp.lt.s32.totalorder %s1869_s9, 3 }
   0x4   : > { %p113_p2 = pnand %p1531_p0, %p112_p1 }
   0x5   : > { %v1836_v0 = vld [vmem:[%s2394_s1] sm:$0xff] (!%p113_p2)   ;;  %p134_p3 = scmp.lt.s32.totalorder (!%p113_p2), %s1527_s10, 1  ;;  %v1837_v1 = vld [vmem:[%s2394_s1 + $0x8] sm:$0xff] (!%p113_p2)   ;;  %vm201_vm0 = vcmask (!%p113_p2), 261120   ;;  %v1841_v2 = vld [vmem:[%s2394_s1 + $0x10] sm:$0xff] (!%p113_p2)   ;;  %vm540_vm3 = vcmask (!%p113_p2), 1042432  }
   0x6   : > { %116 = sbr.rel (%p113_p2) target bundleno = 347 (0x15b), region = 28  ;;  %1823 = vmatprep.subr.bf16.mxu1 (!%p113_p2), %v1836_v0  ;;  %1715 = vmatprep.subr.bf16.mxu0 (!%p113_p2), %v1836_v0  ;;  %vm287_vm1 = vsmask.f32 (!%p113_p2), 3328  ;;  %v1909_v3 = vld [vmem:[%s2394_s1 + $0x20] sm:$0xff] (!%p113_p2)   ;;  %vm288_vm2 = vsmask.f32 (!%p113_p2), 7440 }
   0x7   : > { %1825 = vmatpush3.bf16.msra.mxu1 (!%p113_p2), %v1836_v0  ;;  %1716 = vmatpush3.bf16.msra.mxu0 (!%p113_p2), %v1836_v0  ;;  %vm541_vm4 = vcmask (!%p113_p2), 1046532   ;;  %v1843_v22 = vld [vmem:[%s2394_s1 + $0x18] sm:$0xff] (!%p113_p2)   ;;  %v1845_v33 = vld [vmem:[%s2394_s1 + $0x28] sm:$0xff] (!%p113_p2)   ;;  %vm1996_vm5 = vmor (!%p113_p2), %vm287_vm1, %vm288_vm2  ;;  %vm1463_vm7 = vcmask (!%p113_p2), 257024  }
   0x8   : > { %1824 = vmatprep.subr.bf16.mxu1 (!%p113_p2), %v1837_v1  ;;  %1717 = vmatprep.subr.bf16.mxu0 (!%p113_p2), %v1837_v1  ;;  %v1846_v51 = vld [vmem:[%s2394_s1 + $0x30] sm:$0xff] (!%p113_p2)   ;;  %vm2011_vm6 = vmor (!%p113_p2), %vm540_vm3, %vm541_vm4  ;;  %v2018_v61 = vld [vmem:[%s2394_s1 + $0x40] sm:$0xff] (!%p113_p2)  }
   0xb   : > { %1826 = vmatpush3.bf16.msra.mxu1 (!%p113_p2), %v1837_v1  ;;  %1718 = vmatpush3.bf16.msra.mxu0 (!%p113_p2), %v1837_v1 }
   0xc   : > { %1727 = vmatprep.subr.bf16.mxu1 (!%p113_p2), %v1841_v2  ;;  %1739 = vmatprep.subr.bf16.mxu0 (!%p113_p2), %v1909_v3 }
   0xd   : > { %s2401_s10 = smov (!%p134_p3, %s1527_s10), 1 }
   0xe   : > { %s1827_s15 = smul.u32 80, %s2401_s10  ;;  %s1660_s25 = sshll.u32 %s2401_s10, 5 }
   0xf   : > { %s2364_s28 = scalar_lea.vmem %s2395_s2, %s1660_s25 }
  0x10   : > { %s1914_s22 = scalar_lea.vmem %s2393_s0, %s1827_s15 }
  0x11   : > { %v1917_v4 = vld [vmem:[%s1914_s22 + $0x20] sm:$0xf]  ;;  %v1920_v5 = vld [vmem:[%s1914_s22 + $0x28] sm:$0xf]  ;;  %v1942_v16 = vld [vmem:[%s1914_s22 + $0x30] sm:$0xf] }
  0x12   : > { %v1923_v6 = vld [vmem:[%s1914_s22] sm:$0xf]  ;;  %v1927_v7 = vcombine.low %v1917_v4, %v1920_v5  ;;  %v347_v8 = vshrl.u32 %v1917_v4, 16  ;;  %v350_v9 = vshll.u32 %v1917_v4, 16  ;;  %v361_v10 = vshrl.u32 %v1920_v5, 16 }
  0x13   : > { %v1933_v11 = vld [vmem:[%s1914_s22 + $0x8] sm:$0xf]  ;;  %v364_v12 = vshll.u32 %v1920_v5, 16  ;;  %v291_v14 = vshrl.u32 %v1923_v6, 16  ;;  %v294_v15 = vshll.u32 %v1923_v6, 16  ;;  %v1559_v29 = vrot.slane %v1923_v6, 9 }
  0x14   : > { %v1535_v13 = vcombine.low %v1923_v6, %v1933_v11  ;;  %1723 = vmatprep.mubr.msk.bf16.mxu1 %vm201_vm0, %v1927_v7  ;;  %v1946_v17 = vrot.slane %v347_v8, 4  ;;  %v1948_v18 = vrot.slane %v350_v9, 5  ;;  %v1950_v19 = vrot.slane %v361_v10, 4  ;;  %v1954_v21 = vld [vmem:[%s1914_s22 + $0x38] sm:$0xf] }
  0x15   : > { %v305_v20 = vshrl.u32 %v1933_v11, 16  ;;  %v1959_v23 = vrot.slane %v364_v12, 5  ;;  %v293_v24 = vrot.slane %v291_v14, 4  ;;  %v296_v25 = vrot.slane %v294_v15, 5  ;;  %v1964_v27 = vld [vmem:[%s1914_s22 + $0x10] sm:$0xf] }
  0x16   : > { %1719 = vmatprep.mubr.msk.bf16.mxu0 %vm201_vm0, %v1535_v13  ;;  %v308_v26 = vshll.u32 %v1933_v11, 16  ;;  %v1969_v30 = vcombine.low %v1942_v16, %v1954_v21  ;;  %v1972_v31 = vld [vmem:[%s1914_s22 + $0x18] sm:$0xf]  ;;  %v319_v32 = vshrl.u32 %v1964_v27, 16  ;;  %v322_v37 = vshll.u32 %v1964_v27, 16 }
  0x17   : > { %v307_v28 = vrot.slane %v305_v20, 4  ;;  %v297_v34 = vor.u32 %v296_v25, %v293_v24  ;;  %v1980_v36 = vcombine.low %v1964_v27, %v1972_v31  ;;  %v146_v38 = vld [vmem:[%s1914_s22 + $0x4] sm:$0x1]  ;;  %v148_v39 = vld [vmem:[%s1914_s22 + $0xc] sm:$0x1]  ;;  %v333_v40 = vshrl.u32 %v1972_v31, 16 }
  0x18   : > { %v310_v35 = vrot.slane %v308_v26, 5  ;;  %1724 = vmatmul.mubr.msk.bf16.vlgmr.msra.gmra.mrb[0].mxu1 %vm201_vm0, %v1969_v30  ;;  %v336_v41 = vshll.u32 %v1972_v31, 16  ;;  %v300_v42 = vshll.u32 %v146_v38, 16  ;;  %v314_v43 = vshll.u32 %v148_v39, 16  ;;  %v1990_v44 = vld [vmem:[%s1914_s22 + $0x14] sm:$0x1] }
  0x19   : > { %v298_v45 = vrot.slane %v297_v34, 4  ;;  %1720 = vmatmul.mubr.msk.bf16.vlgmr.msra.gmra.mrb[0].mxu0 %vm201_vm0, %v1980_v36  ;;  %1728 = vmatpush3.bf16.msra.mxu1 %v1841_v2  ;;  %v2001_v48 = vld [vmem:[%s1914_s22 + $0x1c] sm:$0x1]  ;;  %v321_v49 = vrot.slane %v319_v32, 4  ;;  %v324_v50 = vrot.slane %v322_v37, 5  ;;  %v328_v54 = vshll.u32 %v1990_v44, 16 }
  0x1a   : > { %v311_v47 = vor.u32 %v310_v35, %v307_v28  ;;  %1729 = vmatprep.subr.bf16.mxu1 %v1843_v22  ;;  %v302_v52 = vrot.slane %v300_v42, 5  ;;  %v316_v53 = vrot.slane %v314_v43, 5  ;;  %v335_v55 = vrot.slane %v333_v40, 4  ;;  %1740 = vmatpush3.bf16.msra.mxu0 %v1909_v3  ;;  %v2024_v2 = vld [vmem:[%s1914_s22 + $0x24] sm:$0x1] }
  0x1b   : > { %v325_v57 = vor.u32 %v324_v50, %v321_v49  ;;  %v338_v58 = vrot.slane %v336_v41, 5  ;;  %v342_v59 = vshll.u32 %v2001_v48, 16  ;;  %1741 = vmatprep.subr.bf16.mxu0 %v1845_v33  ;;  %v330_v63 = vrot.slane %v328_v54, 5  ;;  %v2031_v10 = vld [vmem:[%s1914_s22 + $0x2c] sm:$0x1] }
  0x1c   : > { %v312_v56 = vrot.slane %v311_v47, 4  ;;  %v303_v62 = vsel %vm1996_vm5, %v298_v45, %v302_v52  ;;  %v545_v0 = vrot.slane %v146_v38, 5  ;;  %v1560_v1 = vrot.slane %v1933_v11, 9  ;;  %v2046_v26 = vld [vmem:[%s1914_s22 + $0x34] sm:$0x1] }
  0x1d   : > { %1730 = vmatpush3.bf16.msra.mxu1 %v1843_v22  ;;  %v326_v6 = vrot.slane %v325_v57, 4  ;;  %v339_v8 = vor.u32 %v338_v58, %v335_v55  ;;  %v344_v9 = vrot.slane %v342_v59, 5  ;;  %v549_v14 = vrot.slane %v148_v39, 5  ;;  %v1847_v39 = vld [vmem:[%s2394_s1 + $0x38] sm:$0xff]  }
  0x1e   : > { %v2028_v3 = vsel %vm1996_vm5, %v312_v56, %v316_v53  ;;  %1751 = vmatprep.subr.bf16.mxu1 %v1846_v51  ;;  %1742 = vmatpush3.bf16.msra.mxu0 %v1845_v33  ;;  %v546_v13 = vsel %vm2011_vm6, %v1559_v29, %v545_v0  ;;  %v353_v15 = vor.u32 %v1948_v18, %v1946_v17  ;;  %v356_v24 = vshll.u32 %v2024_v2, 16  ;;  %v160_v47 = vld [vmem:[%s1914_s22 + $0x3c] sm:$0x1] }
  0x1f   : > { %v1549_v12 = vcombine.low %v303_v62, %v2028_v3  ;;  %v2040_v20 = vsel %vm1996_vm5, %v326_v6, %v330_v63  ;;  %v340_v22 = vrot.slane %v339_v8, 4  ;;  %v367_v25 = vor.u32 %v1959_v23, %v1950_v19  ;;  %1763 = vmatprep.subr.bf16.mxu0 %v2018_v61 }
  0x20   : > { %v2052_v28 = vsel %vm2011_vm6, %v1560_v1, %v549_v14  ;;  %v354_v17 = vrot.slane %v353_v15, 4  ;;  %v370_v18 = vshll.u32 %v2031_v10, 16  ;;  %v1561_v29 = vrot.slane %v1964_v27, 9  ;;  %v2132_v15 = vld [vmem:[%s1914_s22 + $0x40] sm:$0xf] }
  0x21   : > { %1731 = vmatprep.mubr.msk.bf16.mxu1 %vm201_vm0, %v1549_v12  ;;  %v2058_v32 = vsel %vm1996_vm5, %v340_v22, %v344_v9  ;;  %v1571_v19 = vcombine.low %v546_v13, %v2052_v28  ;;  %v358_v23 = vrot.slane %v356_v24, 5  ;;  %v368_v33 = vrot.slane %v367_v25, 4  ;;  %v2123_v12 = vld [vmem:[%s2394_s1 + $0x60] sm:$0xff]  }
  0x22   : > { %v2063_v34 = vcombine.low %v2040_v20, %v2058_v32  ;;  %v372_v35 = vrot.slane %v370_v18, 5  ;;  %v553_v37 = vrot.slane %v1990_v44, 5  ;;  %v1562_v38 = vrot.slane %v1972_v31, 9 }
  0x23   : > { %1743 = vmatprep.mubr.msk.bf16.mxu0 %vm201_vm0, %v1571_v19  ;;  %v2073_v40 = vsel %vm1996_vm5, %v354_v17, %v358_v23  ;;  %v557_v41 = vrot.slane %v2001_v48, 5  ;;  %v375_v42 = vshrl.u32 %v1942_v16, 16  ;;  %v378_v43 = vshll.u32 %v1942_v16, 16  ;;  %v1851_v48 = vld [vmem:[%s2394_s1 + $0x48] sm:$0xff]  }
  0x24   : > { %1732 = vmatmul.mubr.msk.bf16.vlgmr.msra.gmra.mrb[4].mxu1 %vm201_vm0, %v2063_v34  ;;  %v2082_v44 = vsel %vm1996_vm5, %v368_v33, %v372_v35  ;;  %v2086_v45 = vsel %vm2011_vm6, %v1561_v29, %v553_v37  ;;  %v384_v49 = vshll.u32 %v2046_v26, 16  ;;  %v389_v57 = vshrl.u32 %v1954_v21, 16 }
  0x25   : > { %1752 = vmatpush3.bf16.msra.mxu1 %v1846_v51  ;;  %v2095_v50 = vcombine.low %v2073_v40, %v2082_v44  ;;  %v2099_v52 = vsel %vm2011_vm6, %v1562_v38, %v557_v41  ;;  %v377_v53 = vrot.slane %v375_v42, 4  ;;  %v380_v54 = vrot.slane %v378_v43, 5  ;;  %v2110_v51 = vld [vmem:[%s2394_s1 + $0x50] sm:$0xff]   ;;  %v2170_v41 = vld [vmem:[%s1914_s22 + $0x44] sm:$0x1] }
  0x26   : > { %v2103_v55 = vcombine.low %v2086_v45, %v2099_v52  ;;  %v386_v56 = vrot.slane %v384_v49, 5  ;;  %v392_v58 = vshll.u32 %v1954_v21, 16  ;;  %1753 = vmatprep.subr.bf16.mxu1 %v1847_v39  ;;  %v398_v62 = vshll.u32 %v160_v47, 16  ;;  %v2173_v42 = vld [vmem:[%s1914_s22 + $0x48] sm:$0xf] }
  0x27   : > { %1735 = vmatprep.mubr.msk.bf16.mxu1 %vm201_vm0, %v2095_v50  ;;  %v381_v59 = vor.u32 %v380_v54, %v377_v53  ;;  %v1563_v63 = vrot.slane %v1917_v4, 9  ;;  %v561_v0 = vrot.slane %v2024_v2, 5  ;;  %v391_v1 = vrot.slane %v389_v57, 4 }
  0x28   : > { %1744 = vmatmul.mubr.msk.bf16.vlgmr.msra.gmra.mrb[4].mxu0 %vm201_vm0, %v2103_v55  ;;  %v394_v6 = vrot.slane %v392_v58, 5  ;;  %v1564_v8 = vrot.slane %v1920_v5, 9  ;;  %v565_v9 = vrot.slane %v2031_v10, 5  ;;  %v1565_v2 = vrot.slane %v1942_v16, 9 }
  0x29   : > { %v382_v13 = vrot.slane %v381_v59, 4  ;;  %1754 = vmatpush3.bf16.msra.mxu1 %v1847_v39  ;;  %v2127_v14 = vsel %vm2011_vm6, %v1563_v63, %v561_v0  ;;  %1764 = vmatpush3.bf16.msra.mxu0 %v2018_v61  ;;  %v400_v24 = vrot.slane %v398_v62, 5  ;;  %v569_v25 = vrot.slane %v2046_v26, 5 }
  0x2a   : > { %v395_v22 = vor.u32 %v394_v6, %v391_v1  ;;  %v2136_v10 = vsel %vm2011_vm6, %v1564_v8, %v565_v9  ;;  %1765 = vmatprep.subr.bf16.mxu0 %v1851_v48  ;;  %1775 = vmatprep.subr.bf16.mxu1 %v2110_v51  ;;  %v1566_v61 = vrot.slane %v1954_v21, 9  ;;  %v573_v18 = vrot.slane %v160_v47, 5  ;;  %v1855_v9 = vld [vmem:[%s2394_s1 + $0x58] sm:$0xff]  }
  0x2b   : > { %v2142_v17 = vcombine.low %v2127_v14, %v2136_v10  ;;  %v387_v29 = vsel %vm1996_vm5, %v382_v13, %v386_v56  ;;  %v2149_v26 = vsel %vm2011_vm6, %v1565_v2, %v569_v25  ;;  %v830_v33 = vshrl.u32 %v2132_v15, 16 }
  0x2c   : > { %v396_v19 = vrot.slane %v395_v22, 4  ;;  %v2155_v23 = vsel %vm2011_vm6, %v1566_v61, %v573_v18  ;;  %v1585_v38 = vcombine.low %v1933_v11, %v1964_v27  ;;  %v1599_v39 = vcombine.low %v2028_v3, %v2040_v20 }
  0x2d   : > { %1747 = vmatprep.mubr.msk.bf16.mxu0 %vm201_vm0, %v2142_v17  ;;  %1766 = vmatpush3.bf16.msra.mxu0 %v1851_v48  ;;  %v2162_v37 = vcombine.low %v2149_v26, %v2155_v23  ;;  %v832_v47 = vrot.slane %v830_v33, 4  ;;  %v833_v49 = vshll.u32 %v2132_v15, 16  ;;  %v2179_v48 = vld [vmem:[%s1914_s22 + $0x4c] sm:$0x1]  ;;  %v839_v27 = vshll.u32 %v2170_v41, 16 }
  0x2e   : > { %v401_v35 = vsel %vm1996_vm5, %v396_v19, %v400_v24  ;;  %1787 = vmatprep.subr.bf16.mxu0 %v2123_v12  ;;  %v1207_v3 = vshrl.u32 %v2173_v42, 16  ;;  %v1210_v20 = vshll.u32 %v2173_v42, 16  ;;  %v1216_v53 = vshll.u32 %v2179_v48, 16 }
  0x2f   : > { %v2175_v43 = vcombine.low %v387_v29, %v401_v35  ;;  %v835_v11 = vrot.slane %v833_v49, 5  ;;  %v1600_v57 = vcombine.low %v2058_v32, %v2073_v40  ;;  %v1586_v59 = vcombine.low %v1972_v31, %v1917_v4  ;;  %v1857_v32 = vld [vmem:[%s2394_s1 + $0x68] sm:$0xff]   ;;  %v1858_v31 = vld [vmem:[%s2394_s1 + $0x70] sm:$0xff]  }
  0x30   : > { %1748 = vmatmul.mubr.msk.bf16.gmra.mrb[8].mxu0 %vm201_vm0, %v2162_v37  ;;  %v1209_v56 = vrot.slane %v1207_v3, 4  ;;  %v1212_v58 = vrot.slane %v1210_v20, 5  ;;  %v1601_v62 = vcombine.low %v2082_v44, %v387_v29  ;;  %v841_v0 = vrot.slane %v839_v27, 5  ;;  %v1860_v44 = vld [vmem:[%s2394_s1 + $0x80] sm:$0xff]  }
  0x31   : > { %1736 = vmatmul.mubr.msk.bf16.gmra.mrb[8].mxu1 %vm201_vm0, %v2175_v43  ;;  %1767 = vmatprep.mubr.msk.bf16.mxu0 %vm201_vm0, %v1599_v39  ;;  %v836_v54 = vor.u32 %v835_v11, %v832_v47  ;;  %v1587_v1 = vcombine.low %v1920_v5, %v1942_v16  ;;  %v1218_v8 = vrot.slane %v1216_v53, 5  ;;  %v1588_v13 = vcombine.low %v1954_v21, %v2132_v15 }
  0x32   : > { %1755 = vmatprep.mubr.msk.bf16.mxu1 %vm201_vm0, %v1585_v38  ;;  %v1213_v6 = vor.u32 %v1212_v58, %v1209_v56  ;;  %v1614_v46 = vcombine.low %v2052_v28, %v2086_v45  ;;  %v1616_v21 = vcombine.low %v2136_v10, %v2149_v26  ;;  %v1609_v28 = vrot.slane %v2132_v15, 9 }
  0x33   : > { %v837_v63 = vrot.slane %v836_v54, 4  ;;  %v969_v45 = vrot.slane %v2170_v41, 5  ;;  %v1334_v2 = vrot.slane %v2179_v48, 5 }
  0x34   : > { %v1214_v4 = vrot.slane %v1213_v6, 4 }
  0x35   : > { %v842_v5 = vsel %vm1996_vm5, %v837_v63, %v841_v0 }
  0x36   : > { %v1219_v16 = vsel %vm1996_vm5, %v1214_v4, %v1218_v8  ;;  %v1602_v40 = vcombine.low %v401_v35, %v842_v5 }
  0x38   : > { %1768 = vmatmul.mubr.msk.bf16.vlgmr.msra.gmra.mrb[12].mxu0 %vm201_vm0, %v1600_v57 }
  0x39   : > { %1756 = vmatmul.mubr.msk.bf16.vlgmr.msra.gmra.mrb[12].mxu1 %vm201_vm0, %v1586_v59  ;;  %1771 = vmatprep.mubr.msk.bf16.mxu0 %vm201_vm0, %v1601_v62 }
  0x3a   : > { %1759 = vmatprep.mubr.msk.bf16.mxu1 %vm201_vm0, %v1587_v1  ;;  %1776 = vmatpush3.bf16.msra.mxu1 %v2110_v51  ;;  %v1615_v51 = vcombine.low %v2099_v52, %v2127_v14  ;;  %v970_v52 = vsel %vm2011_vm6, %v1609_v28, %v969_v45 }
  0x3b   : > { %1777 = vmatprep.subr.bf16.mxu1 %v1855_v9  ;;  %1788 = vmatpush3.bf16.msra.mxu0 %v2123_v12  ;;  %v1859_v12 = vld [vmem:[%s2394_s1 + $0x78] sm:$0xff]   ;;  %v1617_v14 = vcombine.low %v2155_v23, %v970_v52 }
  0x3c   : > { %1789 = vmatprep.subr.bf16.mxu0 %v1857_v32 }
  0x3e   : > { %1778 = vmatpush3.bf16.msra.mxu1 %v1855_v9 }
  0x3f   : > { %1790 = vmatpush3.bf16.msra.mxu0 %v1857_v32  ;;  %1799 = vmatprep.subr.bf16.mxu1 %v1858_v31 }
  0x40   : > { %1772 = vmatmul.mubr.msk.bf16.gmra.mrb[16].mxu0 %vm201_vm0, %v1602_v40  ;;  %1811 = vmatprep.subr.bf16.mxu0 %v1860_v44 }
  0x41   : > { %1760 = vmatmul.mubr.msk.bf16.gmra.mrb[16].mxu1 %vm201_vm0, %v1588_v13  ;;  %1791 = vmatprep.mubr.msk.bf16.mxu0 %vm201_vm0, %v1980_v36  ;;  %v1862_v36 = vld [vmem:[%s2394_s1 + $0x88] sm:$0xff]  }
  0x42   : > { %1779 = vmatprep.mubr.msk.bf16.mxu1 %vm201_vm0, %v1614_v46 }
  0x48   : > { %1792 = vmatmul.mubr.msk.bf16.vlgmr.msra.gmra.mrb[20].mxu0 %vm201_vm0, %v1927_v7  ;;  %v1628_v7 = vcombine.low %v2132_v15, %v2173_v42 }
  0x49   : > { %1780 = vmatmul.mubr.msk.bf16.vlgmr.msra.gmra.mrb[20].mxu1 %vm201_vm0, %v1615_v51  ;;  %1795 = vmatprep.mubr.msk.bf16.mxu0 %vm201_vm0, %v1969_v30  ;;  %v1646_v30 = vrot.slane %v2173_v42, 9 }
  0x4a   : > { %1783 = vmatprep.mubr.msk.bf16.mxu1 %vm201_vm0, %v1616_v21  ;;  %1800 = vmatpush3.bf16.msra.mxu1 %v1858_v31 }
  0x4b   : > { %1801 = vmatprep.subr.bf16.mxu1 %v1859_v12  ;;  %1812 = vmatpush3.bf16.msra.mxu0 %v1860_v44  ;;  %v1335_v15 = vsel %vm2011_vm6, %v1646_v30, %v1334_v2 }
  0x4c   : > { %1813 = vmatprep.subr.bf16.mxu0 %v1862_v36 }
  0x4e   : > { %1802 = vmatpush3.bf16.msra.mxu1 %v1859_v12 }
  0x4f   : > { %1814 = vmatpush3.bf16.msra.mxu0 %v1862_v36 }
  0x50   : > { %1796 = vmatmul.mubr.msk.bf16.gmra.mrb[24].mxu0 %vm201_vm0, %v1628_v7 }
  0x51   : > { %1784 = vmatmul.mubr.msk.bf16.gmra.mrb[24].mxu1 %vm201_vm0, %v1617_v14  ;;  %1815 = vmatprep.mubr.msk.bf16.mxu0 %vm201_vm0, %v2103_v55  ;;  %v1639_v55 = vcombine.low %v842_v5, %v1219_v16 }
  0x52   : > { %1803 = vmatprep.mubr.msk.bf16.mxu1 %vm201_vm0, %v2063_v34  ;;  %v1651_v34 = vcombine.low %v970_v52, %v1335_v15 }
  0x58   : > { %1816 = vmatmul.mubr.msk.bf16.vlgmr.msra.gmra.mrb[28].mxu0 %vm201_vm0, %v2142_v17 }
  0x59   : > { %1804 = vmatmul.mubr.msk.bf16.vlgmr.msra.gmra.mrb[28].mxu1 %vm201_vm0, %v2095_v50  ;;  %1819 = vmatprep.mubr.msk.bf16.mxu0 %vm201_vm0, %v2162_v37 }
  0x5a   : > { %1807 = vmatprep.mubr.msk.bf16.mxu1 %vm201_vm0, %v2175_v43 }
  0x60   : > { %1820 = vmatmul.mubr.msk.bf16.gmra.mrb[32].mxu0 %vm201_vm0, %v1651_v34 }
  0x61   : > { %1808 = vmatmul.mubr.msk.bf16.gmra.mrb[32].mxu1 %vm201_vm0, %v1639_v55 }
  0xeb   : > { %v1725_v22 = vpop.f32.mrb[0].mxu1 }
  0xec   : > { %285 = vst.msk [vmem:[#allocation2 + $0x30] sm:$0xff] %vm201_vm0, %v1725_v22  ;;  %v1721_v24 = vpop.f32.mrb[0].mxu0  ;;  %v264_v50 = vpop.f32.mrb[1].mxu1 }
  0xed   : > { %281 = vst.msk [vmem:[#allocation2 + $0x10] sm:$0xff] %vm201_vm0, %v1721_v24  ;;  %283 = vst.msk [vmem:[#allocation2 + $0x20] sm:$0xff] %vm201_vm0, %v264_v50  ;;  %v248_v60 = vpop.f32.mrb[1].mxu0  ;;  %v1726_v10 = vpop.f32.mrb[2].mxu1 }
  0xee   : > { %279 = vst.msk [vmem:[#allocation2] sm:$0xff] %vm201_vm0, %v248_v60  ;;  %286 = vst.msk [vmem:[#allocation2 + $0x38] sm:$0xff] %vm201_vm0, %v1726_v10  ;;  %v1722_v25 = vpop.f32.mrb[2].mxu0  ;;  %v267_v17 = vpop.f32.mrb[3].mxu1 }
  0xef   : > { %282 = vst.msk [vmem:[#allocation2 + $0x18] sm:$0xff] %vm201_vm0, %v1722_v25  ;;  %284 = vst.msk [vmem:[#allocation2 + $0x28] sm:$0xff] %vm201_vm0, %v267_v17  ;;  %v251_v61 = vpop.f32.mrb[3].mxu0 }
  0xf0   : > { %280 = vst.msk [vmem:[#allocation2 + $0x8] sm:$0xff] %vm201_vm0, %v251_v61 }
  0xf3   : > { %v514_v57 = vld [vmem:[#allocation2 + $0x30] sm:$0xff] }
  0xf4   : > { %v510_v18 = vld [vmem:[#allocation2 + $0x10] sm:$0xff]  ;;  %v512_v1 = vld [vmem:[#allocation2 + $0x20] sm:$0xff] }
  0xf5   : > { %v508_v29 = vld [vmem:[#allocation2] sm:$0xff]  ;;  %v515_v4 = vld [vmem:[#allocation2 + $0x38] sm:$0xff] }
  0xf6   : > { %v511_v26 = vld [vmem:[#allocation2 + $0x18] sm:$0xff]  ;;  %v513_v40 = vld [vmem:[#allocation2 + $0x28] sm:$0xff] }
  0xf7   : > { %v1733_v19 = vpop.f32.mrb[4].mxu1  ;;  %v509_v35 = vld [vmem:[#allocation2 + $0x8] sm:$0xff] }
  0xf8   : > { %v518_v23 = vadd.f32 %v1733_v19, %v510_v18  ;;  %v477_v33 = vpop.f32.mrb[5].mxu1 }
  0xf9   : > { %v516_v37 = vadd.f32 %v508_v29, %v477_v33  ;;  %v1734_v38 = vpop.f32.mrb[6].mxu1 }
  0xfa   : > { %526 = vst.msk [vmem:[#allocation2 + $0x10] sm:$0xff] %vm201_vm0, %v518_v23  ;;  %v519_v39 = vadd.f32 %v1734_v38, %v511_v26  ;;  %v480_v41 = vpop.f32.mrb[7].mxu1 }
  0xfb   : > { %524 = vst.msk [vmem:[#allocation2] sm:$0xff] %vm201_vm0, %v516_v37  ;;  %v517_v42 = vadd.f32 %v509_v35, %v480_v41  ;;  %v1745_v43 = vpop.f32.mrb[4].mxu0 }
  0xfc   : > { %527 = vst.msk [vmem:[#allocation2 + $0x18] sm:$0xff] %vm201_vm0, %v519_v39  ;;  %v650_v47 = vpop.f32.mrb[5].mxu0 }
  0xfd   : > { %525 = vst.msk [vmem:[#allocation2 + $0x8] sm:$0xff] %vm201_vm0, %v517_v42  ;;  %v1746_v49 = vpop.f32.mrb[6].mxu0 }
  0xfe   : > { %v653_v48 = vpop.f32.mrb[7].mxu0 }
 0x101   : > { %v683_v11 = vld [vmem:[#allocation2 + $0x10] sm:$0xff] }
 0x102   : > { %v691_v27 = vadd.f32 %v1745_v43, %v683_v11  ;;  %v681_v3 = vld [vmem:[#allocation2] sm:$0xff] }
 0x103   : > { %v689_v20 = vadd.f32 %v681_v3, %v650_v47  ;;  %v684_v53 = vld [vmem:[#allocation2 + $0x18] sm:$0xff]  ;;  %v1749_v54 = vpop.f32.mrb[8].mxu0 }
 0x104   : > { %699 = vst.msk [vmem:[#allocation2 + $0x10] sm:$0xff] %vm201_vm0, %v691_v27  ;;  %v1737_v56 = vpop.f32.mrb[8].mxu1  ;;  %v692_v58 = vadd.f32 %v1746_v49, %v684_v53  ;;  %v682_v59 = vld [vmem:[#allocation2 + $0x8] sm:$0xff]  ;;  %v666_v62 = vpop.f32.mrb[9].mxu0 }
 0x105   : > { %v522_v63 = vadd.f32 %v1737_v56, %v514_v57  ;;  %697 = vst.msk [vmem:[#allocation2] sm:$0xff] %vm201_vm0, %v689_v20  ;;  %v493_v0 = vpop.f32.mrb[9].mxu1  ;;  %v690_v6 = vadd.f32 %v682_v59, %v653_v48  ;;  %v1750_v8 = vpop.f32.mrb[10].mxu0 }
 0x106   : > { %v520_v9 = vadd.f32 %v512_v1, %v493_v0  ;;  %700 = vst.msk [vmem:[#allocation2 + $0x18] sm:$0xff] %vm201_vm0, %v692_v58  ;;  %v1738_v32 = vpop.f32.mrb[10].mxu1  ;;  %v669_v5 = vpop.f32.mrb[11].mxu0 }
 0x107   : > { %530 = vst.msk [vmem:[#allocation2 + $0x30] sm:$0xff] %vm201_vm0, %v522_v63  ;;  %v523_v16 = vadd.f32 %v1738_v32, %v515_v4  ;;  %698 = vst.msk [vmem:[#allocation2 + $0x8] sm:$0xff] %vm201_vm0, %v690_v6  ;;  %v496_v31 = vpop.f32.mrb[11].mxu1 }
 0x108   : > { %528 = vst.msk [vmem:[#allocation2 + $0x20] sm:$0xff] %vm201_vm0, %v520_v9  ;;  %v521_v44 = vadd.f32 %v513_v40, %v496_v31 }
 0x109   : > { %531 = vst.msk [vmem:[#allocation2 + $0x38] sm:$0xff] %vm201_vm0, %v523_v16 }
 0x10a   : > { %529 = vst.msk [vmem:[#allocation2 + $0x28] sm:$0xff] %vm201_vm0, %v521_v44 }
 0x10b   : > { %v807_v13 = vld [vmem:[#allocation2 + $0x10] sm:$0xff]  ;;  %v1769_v46 = vpop.f32.mrb[12].mxu0 }
 0x10c   : > { %v1757_v51 = vpop.f32.mrb[12].mxu1  ;;  %v805_v21 = vld [vmem:[#allocation2] sm:$0xff]  ;;  %v911_v28 = vpop.f32.mrb[13].mxu0 }
 0x10d   : > { %v815_v45 = vadd.f32 %v1757_v51, %v807_v13  ;;  %v774_v12 = vpop.f32.mrb[13].mxu1  ;;  %v808_v36 = vld [vmem:[#allocation2 + $0x18] sm:$0xff]  ;;  %v1770_v52 = vpop.f32.mrb[14].mxu0 }
 0x10e   : > { %v687_v7 = vld [vmem:[#allocation2 + $0x30] sm:$0xff]  ;;  %v813_v14 = vadd.f32 %v805_v21, %v774_v12  ;;  %v1758_v30 = vpop.f32.mrb[14].mxu1  ;;  %v806_v2 = vld [vmem:[#allocation2 + $0x8] sm:$0xff]  ;;  %v914_v15 = vpop.f32.mrb[15].mxu0 }
 0x10f   : > { %v695_v34 = vadd.f32 %v1749_v54, %v687_v7  ;;  %v685_v55 = vld [vmem:[#allocation2 + $0x20] sm:$0xff]  ;;  %823 = vst.msk [vmem:[#allocation2 + $0x10] sm:$0xff] %vm201_vm0, %v815_v45  ;;  %v816_v22 = vadd.f32 %v1758_v30, %v808_v36  ;;  %v777_v24 = vpop.f32.mrb[15].mxu1 }
 0x110   : > { %v693_v50 = vadd.f32 %v685_v55, %v666_v62  ;;  %v688_v60 = vld [vmem:[#allocation2 + $0x38] sm:$0xff]  ;;  %821 = vst.msk [vmem:[#allocation2] sm:$0xff] %vm201_vm0, %v813_v14  ;;  %v814_v10 = vadd.f32 %v806_v2, %v777_v24 }
 0x111   : > { %703 = vst.msk [vmem:[#allocation2 + $0x30] sm:$0xff] %vm201_vm0, %v695_v34  ;;  %v696_v25 = vadd.f32 %v1750_v8, %v688_v60  ;;  %v686_v17 = vld [vmem:[#allocation2 + $0x28] sm:$0xff]  ;;  %824 = vst.msk [vmem:[#allocation2 + $0x18] sm:$0xff] %vm201_vm0, %v816_v22 }
 0x112   : > { %701 = vst.msk [vmem:[#allocation2 + $0x20] sm:$0xff] %vm201_vm0, %v693_v50  ;;  %v694_v61 = vadd.f32 %v686_v17, %v669_v5  ;;  %822 = vst.msk [vmem:[#allocation2 + $0x8] sm:$0xff] %vm201_vm0, %v814_v10 }
 0x113   : > { %704 = vst.msk [vmem:[#allocation2 + $0x38] sm:$0xff] %vm201_vm0, %v696_v25  ;;  %v1773_v18 = vpop.f32.mrb[16].mxu0 }
 0x114   : > { %702 = vst.msk [vmem:[#allocation2 + $0x28] sm:$0xff] %vm201_vm0, %v694_v61  ;;  %v1761_v29 = vpop.f32.mrb[16].mxu1  ;;  %v927_v19 = vpop.f32.mrb[17].mxu0 }
 0x115   : > { %v790_v26 = vpop.f32.mrb[17].mxu1  ;;  %v1774_v23 = vpop.f32.mrb[18].mxu0 }
 0x116   : > { %v1762_v33 = vpop.f32.mrb[18].mxu1  ;;  %v944_v35 = vld [vmem:[#allocation2 + $0x10] sm:$0xff]  ;;  %v930_v37 = vpop.f32.mrb[19].mxu0 }
 0x117   : > { %v952_v38 = vadd.f32 %v1769_v46, %v944_v35  ;;  %v793_v39 = vpop.f32.mrb[19].mxu1  ;;  %v942_v41 = vld [vmem:[#allocation2] sm:$0xff] }
 0x118   : > { %v811_v42 = vld [vmem:[#allocation2 + $0x30] sm:$0xff]  ;;  %v950_v43 = vadd.f32 %v942_v41, %v911_v28  ;;  %v945_v47 = vld [vmem:[#allocation2 + $0x18] sm:$0xff] }
 0x119   : > { %v819_v49 = vadd.f32 %v1761_v29, %v811_v42  ;;  %v809_v48 = vld [vmem:[#allocation2 + $0x20] sm:$0xff]  ;;  %960 = vst.msk [vmem:[#allocation2 + $0x10] sm:$0xff] %vm201_vm0, %v952_v38  ;;  %v953_v11 = vadd.f32 %v1770_v52, %v945_v47  ;;  %v943_v27 = vld [vmem:[#allocation2 + $0x8] sm:$0xff] }
 0x11a   : > { %v817_v3 = vadd.f32 %v809_v48, %v790_v26  ;;  %v812_v20 = vld [vmem:[#allocation2 + $0x38] sm:$0xff]  ;;  %958 = vst.msk [vmem:[#allocation2] sm:$0xff] %vm201_vm0, %v950_v43  ;;  %v951_v53 = vadd.f32 %v943_v27, %v914_v15 }
 0x11b   : > { %827 = vst.msk [vmem:[#allocation2 + $0x30] sm:$0xff] %vm201_vm0, %v819_v49  ;;  %v820_v54 = vadd.f32 %v1762_v33, %v812_v20  ;;  %v810_v56 = vld [vmem:[#allocation2 + $0x28] sm:$0xff]  ;;  %961 = vst.msk [vmem:[#allocation2 + $0x18] sm:$0xff] %vm201_vm0, %v953_v11  ;;  %v1793_v57 = vpop.f32.mrb[20].mxu0 }
 0x11c   : > { %825 = vst.msk [vmem:[#allocation2 + $0x20] sm:$0xff] %vm201_vm0, %v817_v3  ;;  %v818_v58 = vadd.f32 %v810_v56, %v793_v39  ;;  %959 = vst.msk [vmem:[#allocation2 + $0x8] sm:$0xff] %vm201_vm0, %v951_v53  ;;  %v1781_v59 = vpop.f32.mrb[20].mxu1  ;;  %v1151_v62 = vpop.f32.mrb[21].mxu0 }
 0x11d   : > { %828 = vst.msk [vmem:[#allocation2 + $0x38] sm:$0xff] %vm201_vm0, %v820_v54  ;;  %v1039_v63 = vpop.f32.mrb[21].mxu1  ;;  %v1794_v0 = vpop.f32.mrb[22].mxu0 }
 0x11e   : > { %826 = vst.msk [vmem:[#allocation2 + $0x28] sm:$0xff] %vm201_vm0, %v818_v58  ;;  %v1782_v1 = vpop.f32.mrb[22].mxu1  ;;  %v1154_v6 = vpop.f32.mrb[23].mxu0 }
 0x11f   : > { %v1042_v8 = vpop.f32.mrb[23].mxu1 }
 0x120   : > { %v1072_v9 = vld [vmem:[#allocation2 + $0x10] sm:$0xff] }
 0x121   : > { %v1080_v32 = vadd.f32 %v1781_v59, %v1072_v9  ;;  %v1070_v4 = vld [vmem:[#allocation2] sm:$0xff] }
 0x122   : > { %v948_v5 = vld [vmem:[#allocation2 + $0x30] sm:$0xff]  ;;  %v1078_v16 = vadd.f32 %v1070_v4, %v1039_v63  ;;  %v1073_v31 = vld [vmem:[#allocation2 + $0x18] sm:$0xff] }
 0x123   : > { %v956_v40 = vadd.f32 %v1773_v18, %v948_v5  ;;  %v946_v44 = vld [vmem:[#allocation2 + $0x20] sm:$0xff]  ;;  %1088 = vst.msk [vmem:[#allocation2 + $0x10] sm:$0xff] %vm201_vm0, %v1080_v32  ;;  %v1081_v13 = vadd.f32 %v1782_v1, %v1073_v31  ;;  %v1071_v46 = vld [vmem:[#allocation2 + $0x8] sm:$0xff]  ;;  %v2309_v51 = vpop.f32.mrb[24].mxu0 }
 0x124   : > { %v954_v21 = vadd.f32 %v946_v44, %v927_v19  ;;  %v949_v28 = vld [vmem:[#allocation2 + $0x38] sm:$0xff]  ;;  %1086 = vst.msk [vmem:[#allocation2] sm:$0xff] %vm201_vm0, %v1078_v16  ;;  %v1079_v45 = vadd.f32 %v1071_v46, %v1042_v8  ;;  %v1785_v12 = vpop.f32.mrb[24].mxu1  ;;  %v2312_v36 = vpop.f32.mrb[25].mxu0 }
 0x125   : > { %964 = vst.msk [vmem:[#allocation2 + $0x30] sm:$0xff] %vm201_vm0, %v956_v40  ;;  %v957_v52 = vadd.f32 %v1774_v23, %v949_v28  ;;  %v947_v7 = vld [vmem:[#allocation2 + $0x28] sm:$0xff]  ;;  %1089 = vst.msk [vmem:[#allocation2 + $0x18] sm:$0xff] %vm201_vm0, %v1081_v13  ;;  %v1055_v14 = vpop.f32.mrb[25].mxu1  ;;  %v2316_v30 = vpop.f32.mrb[26].mxu0 }
 0x126   : > { %962 = vst.msk [vmem:[#allocation2 + $0x20] sm:$0xff] %vm201_vm0, %v954_v21  ;;  %v955_v2 = vadd.f32 %v947_v7, %v930_v37  ;;  %1087 = vst.msk [vmem:[#allocation2 + $0x8] sm:$0xff] %vm201_vm0, %v1079_v45  ;;  %v1786_v15 = vpop.f32.mrb[26].mxu1  ;;  %v2320_v34 = vpop.f32.mrb[27].mxu0 }
 0x127   : > { %965 = vst.msk [vmem:[#allocation2 + $0x38] sm:$0xff] %vm201_vm0, %v957_v52  ;;  %v1058_v55 = vpop.f32.mrb[27].mxu1 }
 0x128   : > { %963 = vst.msk [vmem:[#allocation2 + $0x28] sm:$0xff] %vm201_vm0, %v955_v2 }
 0x12a   : > { %v1184_v22 = vld [vmem:[#allocation2 + $0x10] sm:$0xff] }
 0x12b   : > { %v1192_v24 = vadd.f32 %v1793_v57, %v1184_v22  ;;  %v1182_v50 = vld [vmem:[#allocation2] sm:$0xff]  ;;  %v1817_v60 = vpop.f32.mrb[28].mxu0 }
 0x12c   : > { %v1076_v10 = vld [vmem:[#allocation2 + $0x30] sm:$0xff]  ;;  %v1190_v25 = vadd.f32 %v1182_v50, %v1151_v62  ;;  %v1185_v17 = vld [vmem:[#allocation2 + $0x18] sm:$0xff]  ;;  %v1805_v61 = vpop.f32.mrb[28].mxu1  ;;  %v1392_v18 = vpop.f32.mrb[29].mxu0 }
 0x12d   : > { %v1084_v29 = vadd.f32 %v1785_v12, %v1076_v10  ;;  %v1074_v19 = vld [vmem:[#allocation2 + $0x20] sm:$0xff]  ;;  %1200 = vst.msk [vmem:[#allocation2 + $0x10] sm:$0xff] %vm201_vm0, %v1192_v24  ;;  %v1193_v26 = vadd.f32 %v1794_v0, %v1185_v17  ;;  %v1183_v23 = vld [vmem:[#allocation2 + $0x8] sm:$0xff]  ;;  %v1276_v33 = vpop.f32.mrb[29].mxu1  ;;  %v1818_v35 = vpop.f32.mrb[30].mxu0 }
 0x12e   : > { %v1082_v37 = vadd.f32 %v1074_v19, %v1055_v14  ;;  %v1077_v38 = vld [vmem:[#allocation2 + $0x38] sm:$0xff]  ;;  %1198 = vst.msk [vmem:[#allocation2] sm:$0xff] %vm201_vm0, %v1190_v25  ;;  %v1191_v39 = vadd.f32 %v1183_v23, %v1154_v6  ;;  %v1806_v41 = vpop.f32.mrb[30].mxu1  ;;  %v1395_v42 = vpop.f32.mrb[31].mxu0 }
 0x12f   : > { %1092 = vst.msk [vmem:[#allocation2 + $0x30] sm:$0xff] %vm201_vm0, %v1084_v29  ;;  %v1085_v43 = vadd.f32 %v1786_v15, %v1077_v38  ;;  %v1075_v47 = vld [vmem:[#allocation2 + $0x28] sm:$0xff]  ;;  %1201 = vst.msk [vmem:[#allocation2 + $0x18] sm:$0xff] %vm201_vm0, %v1193_v26  ;;  %v1279_v49 = vpop.f32.mrb[31].mxu1 }
 0x130   : > { %1090 = vst.msk [vmem:[#allocation2 + $0x20] sm:$0xff] %vm201_vm0, %v1082_v37  ;;  %v1083_v48 = vadd.f32 %v1075_v47, %v1058_v55  ;;  %1199 = vst.msk [vmem:[#allocation2 + $0x8] sm:$0xff] %vm201_vm0, %v1191_v39 }
 0x131   : > { %1093 = vst.msk [vmem:[#allocation2 + $0x38] sm:$0xff] %vm201_vm0, %v1085_v43 }
 0x132   : > { %1091 = vst.msk [vmem:[#allocation2 + $0x28] sm:$0xff] %vm201_vm0, %v1083_v48 }
 0x133   : > { %v2332_v11 = vpop.f32.mrb[32].mxu0 }
 0x134   : > { %v1309_v27 = vld [vmem:[#allocation2 + $0x10] sm:$0xff]  ;;  %v1809_v3 = vpop.f32.mrb[32].mxu1  ;;  %v2334_v20 = vpop.f32.mrb[33].mxu0 }
 0x135   : > { %v1317_v53 = vadd.f32 %v1805_v61, %v1309_v27  ;;  %v1307_v54 = vld [vmem:[#allocation2] sm:$0xff]  ;;  %v1292_v56 = vpop.f32.mrb[33].mxu1  ;;  %v2336_v57 = vpop.f32.mrb[34].mxu0 }
 0x136   : > { %v1188_v58 = vld [vmem:[#allocation2 + $0x30] sm:$0xff]  ;;  %v1315_v59 = vadd.f32 %v1307_v54, %v1276_v33  ;;  %v1310_v62 = vld [vmem:[#allocation2 + $0x18] sm:$0xff]  ;;  %v1810_v63 = vpop.f32.mrb[34].mxu1  ;;  %v2338_v0 = vpop.f32.mrb[35].mxu0 }
 0x137   : > { %v1196_v1 = vadd.f32 %v2309_v51, %v1188_v58  ;;  %v1186_v6 = vld [vmem:[#allocation2 + $0x20] sm:$0xff]  ;;  %1325 = vst.msk [vmem:[#allocation2 + $0x10] sm:$0xff] %vm201_vm0, %v1317_v53  ;;  %v1318_v8 = vadd.f32 %v1806_v41, %v1310_v62  ;;  %v1308_v9 = vld [vmem:[#allocation2 + $0x8] sm:$0xff]  ;;  %v1295_v32 = vpop.f32.mrb[35].mxu1 }
 0x138   : > { %v1194_v4 = vadd.f32 %v1186_v6, %v2312_v36  ;;  %v1189_v5 = vld [vmem:[#allocation2 + $0x38] sm:$0xff]  ;;  %1323 = vst.msk [vmem:[#allocation2] sm:$0xff] %vm201_vm0, %v1315_v59  ;;  %v1316_v16 = vadd.f32 %v1308_v9, %v1279_v49 }
 0x139   : > { %1204 = vst.msk [vmem:[#allocation2 + $0x30] sm:$0xff] %vm201_vm0, %v1196_v1  ;;  %v1197_v31 = vadd.f32 %v2316_v30, %v1189_v5  ;;  %v1187_v40 = vld [vmem:[#allocation2 + $0x28] sm:$0xff]  ;;  %1326 = vst.msk [vmem:[#allocation2 + $0x18] sm:$0xff] %vm201_vm0, %v1318_v8 }
 0x13a   : > { %1202 = vst.msk [vmem:[#allocation2 + $0x20] sm:$0xff] %vm201_vm0, %v1194_v4  ;;  %v1195_v44 = vadd.f32 %v1187_v40, %v2320_v34  ;;  %1324 = vst.msk [vmem:[#allocation2 + $0x8] sm:$0xff] %vm201_vm0, %v1316_v16 }
 0x13b   : > { %1205 = vst.msk [vmem:[#allocation2 + $0x38] sm:$0xff] %vm201_vm0, %v1197_v31 }
 0x13c   : > { %1203 = vst.msk [vmem:[#allocation2 + $0x28] sm:$0xff] %vm201_vm0, %v1195_v44 }
 0x13e   : > { %v1425_v13 = vld [vmem:[#allocation2 + $0x10] sm:$0xff] }
 0x13f   : > { %v1433_v46 = vadd.f32 %v1817_v60, %v1425_v13  ;;  %v1423_v51 = vld [vmem:[#allocation2] sm:$0xff] }
 0x140   : > { %v1313_v21 = vld [vmem:[#allocation2 + $0x30] sm:$0xff]  ;;  %v1431_v28 = vadd.f32 %v1423_v51, %v1392_v18  ;;  %v1426_v45 = vld [vmem:[#allocation2 + $0x18] sm:$0xff] }
 0x141   : > { %v1321_v12 = vadd.f32 %v1809_v3, %v1313_v21  ;;  %v1311_v36 = vld [vmem:[#allocation2 + $0x20] sm:$0xff]  ;;  %1441 = vst.msk [vmem:[#allocation2 + $0x10] sm:$0xff] %vm201_vm0, %v1433_v46  ;;  %v1434_v52 = vadd.f32 %v1818_v35, %v1426_v45  ;;  %v1424_v7 = vld [vmem:[#allocation2 + $0x8] sm:$0xff] }
 0x142   : > { %v1319_v14 = vadd.f32 %v1311_v36, %v1292_v56  ;;  %v1314_v30 = vld [vmem:[#allocation2 + $0x38] sm:$0xff]  ;;  %1439 = vst.msk [vmem:[#allocation2] sm:$0xff] %vm201_vm0, %v1431_v28  ;;  %v1432_v2 = vadd.f32 %v1424_v7, %v1395_v42 }
 0x143   : > { %1329 = vst.msk [vmem:[#allocation2 + $0x30] sm:$0xff] %vm201_vm0, %v1321_v12  ;;  %v1322_v15 = vadd.f32 %v1810_v63, %v1314_v30  ;;  %v1312_v34 = vld [vmem:[#allocation2 + $0x28] sm:$0xff]  ;;  %1442 = vst.msk [vmem:[#allocation2 + $0x18] sm:$0xff] %vm201_vm0, %v1434_v52 }
 0x144   : > { %1327 = vst.msk [vmem:[#allocation2 + $0x20] sm:$0xff] %vm201_vm0, %v1319_v14  ;;  %v1320_v55 = vadd.f32 %v1312_v34, %v1295_v32  ;;  %1440 = vst.msk [vmem:[#allocation2 + $0x8] sm:$0xff] %vm201_vm0, %v1432_v2 }
 0x145   : > { %1330 = vst.msk [vmem:[#allocation2 + $0x38] sm:$0xff] %vm201_vm0, %v1322_v15 }
 0x146   : > { %1328 = vst.msk [vmem:[#allocation2 + $0x28] sm:$0xff] %vm201_vm0, %v1320_v55 }
 0x148   : > { %v1449_v22 = vld [vmem:[#allocation2 + $0x10] sm:$0xff] }
 0x149   : > { %v1457_v24 = vpack.c.bf16 %v1449_v22, %v1449_v22  ;;  %v1447_v50 = vld [vmem:[#allocation2] sm:$0xff] }
 0x14a   : > { %v1455_v60 = vpack.c.bf16 %v1447_v50, %v1447_v50  ;;  %v1450_v10 = vld [vmem:[#allocation2 + $0x18] sm:$0xff]  ;;  %v1429_v25 = vld [vmem:[#allocation2 + $0x30] sm:$0xff] }
 0x14b   : > { %1466 = vst.msk [vmem:[%s2364_s28 + $0x8] sm:$0xf] %vm1463_vm7, %v1457_v24  ;;  %v1458_v17 = vpack.c.bf16 %v1450_v10, %v1450_v10  ;;  %v1448_v61 = vld [vmem:[#allocation2 + $0x8] sm:$0xff]  ;;  %v1437_v18 = vadd.f32 %v2332_v11, %v1429_v25  ;;  %v1427_v29 = vld [vmem:[#allocation2 + $0x20] sm:$0xff] }
 0x14c   : > { %1464 = vst.msk [vmem:[%s2364_s28] sm:$0xf] %vm1463_vm7, %v1455_v60  ;;  %v1456_v19 = vpack.c.bf16 %v1448_v61, %v1448_v61  ;;  %v1435_v26 = vadd.f32 %v1427_v29, %v2334_v20  ;;  %v1430_v23 = vld [vmem:[#allocation2 + $0x38] sm:$0xff] }
 0x14d   : > { %1467 = vst.msk [vmem:[%s2364_s28 + $0xc] sm:$0xf] %vm1463_vm7, %v1458_v17  ;;  %v1438_v33 = vadd.f32 %v2336_v57, %v1430_v23  ;;  %v1428_v35 = vld [vmem:[#allocation2 + $0x28] sm:$0xff] }
 0x14e   : > { %1445 = vst.msk [vmem:[#allocation2 + $0x30] sm:$0xff] %vm201_vm0, %v1437_v18  ;;  %1443 = vst.msk [vmem:[#allocation2 + $0x20] sm:$0xff] %vm201_vm0, %v1435_v26  ;;  %v1436_v37 = vadd.f32 %v1428_v35, %v2338_v0 }
 0x14f   : > { %1465 = vst.msk [vmem:[%s2364_s28 + $0x4] sm:$0xf] %vm1463_vm7, %v1456_v19 }
 0x150   : > { %1446 = vst.msk [vmem:[#allocation2 + $0x38] sm:$0xff] %vm201_vm0, %v1438_v33  ;;  %1444 = vst.msk [vmem:[#allocation2 + $0x28] sm:$0xff] %vm201_vm0, %v1436_v37 }
 0x155   : > { %v1453_v38 = vld [vmem:[#allocation2 + $0x30] sm:$0xff]  ;;  %v1451_v41 = vld [vmem:[#allocation2 + $0x20] sm:$0xff] }
 0x156   : > { %v1461_v39 = vpack.c.bf16 %v1453_v38, %v1453_v38  ;;  %v1459_v42 = vpack.c.bf16 %v1451_v41, %v1451_v41 }
 0x157   : > { %v1454_v43 = vld [vmem:[#allocation2 + $0x38] sm:$0xff]  ;;  %v1452_v49 = vld [vmem:[#allocation2 + $0x28] sm:$0xff] }
 0x158   : > { %1470 = vst.msk [vmem:[%s2364_s28 + $0x18] sm:$0xf] %vm1463_vm7, %v1461_v39  ;;  %v1462_v47 = vpack.c.bf16 %v1454_v43, %v1454_v43  ;;  %1468 = vst.msk [vmem:[%s2364_s28 + $0x10] sm:$0xf] %vm1463_vm7, %v1459_v42  ;;  %v1460_v48 = vpack.c.bf16 %v1452_v49, %v1452_v49 }
 0x15a   : > { %1471 = vst.msk [vmem:[%s2364_s28 + $0x1c] sm:$0xf] %vm1463_vm7, %v1462_v47  ;;  %1469 = vst.msk [vmem:[%s2364_s28 + $0x14] sm:$0xf] %vm1463_vm7, %v1460_v48 }
 0x15b PF: > { %s12_s9 = sadd.s32 1, %s1869_s9  }
 0x15c   : > { %p9_p4 = scmp.ge.s32.totalorder %s12_s9, 4  }
 0x15e   :  { %11 = sbr.rel (!%p9_p4) target bundleno = 1 (0x1), region = 66 }

// kernel: _lambda_.40
= control target key start
LH: loop header
LB: loop body
LE: loop exit
PB: predicated region body
PF: predicated region fallthrough
CT: control target
= control target key end

     0   :  { %vm119_vm0 = vcmask 261120   ;;  %s611_s1 = inlined_call_operand.vmem [shape: bf16[32,128], index: 1, kind: input, shape index: {}]   ;;  %s612_s0 = inlined_call_operand.vmem [shape: bf16[128,32], index: 0, kind: input, shape index: {}]   ;;  %s613_s2 = inlined_call_operand.vmem [shape: bf16[128,128], index: 2, kind: input, shape index: {}]   ;;  %s614_s3 = inlined_call_operand.vmem [shape: bf16[128,128], index: 3, kind: output, shape index: {}]  }
   0x1   :  { %v495_v0 = vld [vmem:[%s611_s1] sm:$0xff]   ;;  %v496_v1 = vld [vmem:[%s611_s1 + $0x8] sm:$0xff]   ;;  %v501_v6 = vld [vmem:[%s612_s0 + $0x10] sm:$0xff]  }
   0x2   :  { %471 = vmatprep.subr.bf16.mxu0 %v495_v0  ;;  %491 = vmatprep.subr.bf16.mxu1 %v495_v0  ;;  %v497_v2 = vld [vmem:[%s612_s0] sm:$0xff]   ;;  %v499_v4 = vld [vmem:[%s612_s0 + $0x8] sm:$0xff]   ;;  %v502_v7 = vld [vmem:[%s612_s0 + $0x30] sm:$0xff]  }
   0x3   :  { %472 = vmatpush3.bf16.msra.mxu0 %v495_v0  ;;  %493 = vmatpush3.bf16.msra.mxu1 %v495_v0  ;;  %v498_v3 = vld [vmem:[%s612_s0 + $0x20] sm:$0xff]   ;;  %v500_v5 = vld [vmem:[%s612_s0 + $0x28] sm:$0xff]   ;;  %v503_v8 = vld [vmem:[%s612_s0 + $0x18] sm:$0xff]  }
   0x4   :  { %473 = vmatprep.subr.bf16.mxu0 %v496_v1  ;;  %492 = vmatprep.subr.bf16.mxu1 %v496_v1  ;;  %v504_v9 = vld [vmem:[%s612_s0 + $0x38] sm:$0xff]   ;;  %v447_v10 = vld [vmem:[%s613_s2 + $0x8] sm:$0xff]   ;;  %v376_v12 = vld [vmem:[%s613_s2] sm:$0xff]  }
   0x5   :  { %475 = vmatprep.mubr.msk.bf16.mxu0 %vm119_vm0, %v497_v2  ;;  %483 = vmatprep.mubr.msk.bf16.mxu1 %vm119_vm0, %v498_v3  ;;  %v451_v11 = vld [vmem:[%s613_s2 + $0x28] sm:$0xff]   ;;  %v450_v13 = vld [vmem:[%s613_s2 + $0x20] sm:$0xff]   ;;  %v381_v14 = vunpack.c.l.bf16 %v447_v10  ;;  %v382_v16 = vunpack.c.h.bf16 %v447_v10  ;;  %v377_v20 = vunpack.c.l.bf16 %v376_v12  ;;  %v378_v22 = vunpack.c.h.bf16 %v376_v12  ;;  %v449_v38 = vld [vmem:[%s613_s2 + $0x18] sm:$0xff]  }
   0x6   :  { %v397_v15 = vunpack.c.l.bf16 %v451_v11  ;;  %v398_v17 = vunpack.c.h.bf16 %v451_v11  ;;  %v393_v21 = vunpack.c.l.bf16 %v450_v13  ;;  %v394_v23 = vunpack.c.h.bf16 %v450_v13  ;;  %v453_v39 = vld [vmem:[%s613_s2 + $0x38] sm:$0xff]   ;;  %v448_v42 = vld [vmem:[%s613_s2 + $0x10] sm:$0xff]  }
   0x7   :  { %474 = vmatpush3.bf16.msra.mxu0 %v496_v1  ;;  %494 = vmatpush3.bf16.msra.mxu1 %v496_v1  ;;  %v452_v43 = vld [vmem:[%s613_s2 + $0x30] sm:$0xff]   ;;  %v389_v46 = vunpack.c.l.bf16 %v449_v38  ;;  %v405_v47 = vunpack.c.l.bf16 %v453_v39  ;;  %v390_v48 = vunpack.c.h.bf16 %v449_v38  ;;  %v406_v49 = vunpack.c.h.bf16 %v453_v39 }
   0x8   :  { %v385_v52 = vunpack.c.l.bf16 %v448_v42  ;;  %v401_v53 = vunpack.c.l.bf16 %v452_v43  ;;  %v386_v54 = vunpack.c.h.bf16 %v448_v42  ;;  %v402_v55 = vunpack.c.h.bf16 %v452_v43 }
   0xa   :  { %476 = vmatmul.mubr.msk.bf16.vlgmr.msra.gmra.mrb[0].mxu0 %vm119_vm0, %v499_v4  ;;  %484 = vmatmul.mubr.msk.bf16.vlgmr.msra.gmra.mrb[0].mxu1 %vm119_vm0, %v500_v5 }
   0xb   :  { %479 = vmatprep.mubr.msk.bf16.mxu0 %vm119_vm0, %v501_v6  ;;  %487 = vmatprep.mubr.msk.bf16.mxu1 %vm119_vm0, %v502_v7 }
  0x12   :  { %480 = vmatmul.mubr.msk.bf16.gmra.mrb[4].mxu0 %vm119_vm0, %v503_v8  ;;  %488 = vmatmul.mubr.msk.bf16.gmra.mrb[4].mxu1 %vm119_vm0, %v504_v9 }
  0xdd   :  { %v477_v18 = vpop.f32.mrb[0].mxu0  ;;  %v485_v19 = vpop.f32.mrb[0].mxu1 }
  0xde   :  { %v178_v24 = vpop.f32.mrb[1].mxu0  ;;  %v210_v25 = vpop.f32.mrb[1].mxu1  ;;  %v187_v28 = vadd.f32 %v477_v18, %v381_v14  ;;  %v219_v29 = vadd.f32 %v485_v19, %v397_v15 }
  0xdf   :  { %v478_v26 = vpop.f32.mrb[2].mxu0  ;;  %v486_v27 = vpop.f32.mrb[2].mxu1  ;;  %v179_v34 = vadd.f32 %v377_v20, %v178_v24  ;;  %v211_v35 = vadd.f32 %v393_v21, %v210_v25 }
  0xe0   :  { %v190_v30 = vadd.f32 %v478_v26, %v382_v16  ;;  %v222_v31 = vadd.f32 %v486_v27, %v398_v17  ;;  %v181_v32 = vpop.f32.mrb[3].mxu0  ;;  %v213_v33 = vpop.f32.mrb[3].mxu1 }
  0xe1   :  { %v182_v36 = vadd.f32 %v378_v22, %v181_v32  ;;  %v214_v37 = vadd.f32 %v394_v23, %v213_v33 }
  0xe2   :  { %v415_v40 = vpack.c.bf16 %v190_v30, %v187_v28  ;;  %v435_v41 = vpack.c.bf16 %v222_v31, %v219_v29 }
  0xe3   :  { %v410_v44 = vpack.c.bf16 %v182_v36, %v179_v34  ;;  %v430_v45 = vpack.c.bf16 %v214_v37, %v211_v35 }
  0xe4   :  { %454 = vst [vmem:[%s614_s3 + $0x8] sm:$0xff] %v415_v40   ;;  %458 = vst [vmem:[%s614_s3 + $0x28] sm:$0xff] %v435_v41  }
  0xe5   :  { %411 = vst [vmem:[%s614_s3] sm:$0xff] %v410_v44   ;;  %457 = vst [vmem:[%s614_s3 + $0x20] sm:$0xff] %v430_v45   ;;  %v481_v50 = vpop.f32.mrb[4].mxu0  ;;  %v489_v51 = vpop.f32.mrb[4].mxu1 }
  0xe6   :  { %v194_v56 = vpop.f32.mrb[5].mxu0  ;;  %v226_v57 = vpop.f32.mrb[5].mxu1  ;;  %v203_v60 = vadd.f32 %v481_v50, %v389_v46  ;;  %v235_v61 = vadd.f32 %v489_v51, %v405_v47 }
  0xe7   :  { %v482_v58 = vpop.f32.mrb[6].mxu0  ;;  %v490_v59 = vpop.f32.mrb[6].mxu1  ;;  %v195_v2 = vadd.f32 %v385_v52, %v194_v56  ;;  %v227_v3 = vadd.f32 %v401_v53, %v226_v57 }
  0xe8   :  { %v206_v62 = vadd.f32 %v482_v58, %v390_v48  ;;  %v238_v63 = vadd.f32 %v490_v59, %v406_v49  ;;  %v197_v0 = vpop.f32.mrb[7].mxu0  ;;  %v229_v1 = vpop.f32.mrb[7].mxu1 }
  0xe9   :  { %v198_v4 = vadd.f32 %v386_v54, %v197_v0  ;;  %v230_v5 = vadd.f32 %v402_v55, %v229_v1 }
  0xea   :  { %v425_v6 = vpack.c.bf16 %v206_v62, %v203_v60  ;;  %v445_v7 = vpack.c.bf16 %v238_v63, %v235_v61 }
  0xeb   :  { %v420_v8 = vpack.c.bf16 %v198_v4, %v195_v2  ;;  %v440_v9 = vpack.c.bf16 %v230_v5, %v227_v3 }
  0xec   :  { %456 = vst [vmem:[%s614_s3 + $0x18] sm:$0xff] %v425_v6   ;;  %460 = vst [vmem:[%s614_s3 + $0x38] sm:$0xff] %v445_v7  }
  0xed   :  { %455 = vst [vmem:[%s614_s3 + $0x10] sm:$0xff] %v420_v8   ;;  %459 = vst [vmem:[%s614_s3 + $0x30] sm:$0xff] %v440_v9  }

// kernel: _lambda_.41
= control target key start
LH: loop header
LB: loop body
LE: loop exit
PB: predicated region body
PF: predicated region fallthrough
CT: control target
= control target key end

     0   :  { %s1068_s18 = smov 0   ;;  %s1248_s0 = inlined_call_operand.vmem [shape: bf16[2,64,128], index: 0, kind: input, shape index: {}]   ;;  %s1249_s1 = inlined_call_operand.vmem [shape: f32[128,32], index: 1, kind: input, shape index: {}]   ;;  %s1250_s2 = inlined_call_operand.vmem [shape: f32[32,128], index: 2, kind: input, shape index: {}]   ;;  %s1251_s3 = inlined_call_operand.vmem [shape: f32[1,128], index: 3, kind: input, shape index: {}]   ;;  %s1252_s4 = inlined_call_operand.vmem [shape: f32[1,128], index: 4, kind: input, shape index: {}]   ;;  %s1253_s5 = inlined_call_operand.vmem [shape: bf16[2,64,128], index: 5, kind: output, shape index: {}]  }
   0x1 LB: > { %s743_s19 = sadd.s32 4294967295, %s1033_s18   ;;  %p747_p0 = scmp.ge.s32.totalorder %s1033_s18, 1  ;;  %s1033_s18 = sphi %s1068_s18, %s15_s18  }
   0x2   : > { %p187_p1 = scmp.lt.s32.totalorder %s1033_s18, 3 }
   0x4   : > { %p188_p2 = pnand %p747_p0, %p187_p1 }
   0x5   : > { %v241_v0 = vld [vmem:[%s1249_s1] sm:$0xff] (!%p188_p2)  ;;  %v242_v1 = vld [vmem:[%s1249_s1 + $0x8] sm:$0xff] (!%p188_p2)  ;;  %v243_v2 = vld [vmem:[%s1249_s1 + $0x10] sm:$0xff] (!%p188_p2)  ;;  %v1035_v3 = vmov (!%p188_p2), 0.0|0.0   ;;  %vm1036_vm0 = vmmov (!%p188_p2), 0   ;;  %v1037_v6 = vmov (!%p188_p2), 0.0   ;;  %v421_v60 = vlaneseq (!%p188_p2) }
   0x6   : > { %191 = sbr.rel (%p188_p2) target bundleno = 956 (0x3bc), region = 40  ;;  %954 = vmatprep.subr.bf16.mxu0 (!%p188_p2), %v1035_v3  ;;  %v1086_v4 = vpack.c.bf16 (!%p188_p2), %v242_v1, %v241_v0  ;;  %v244_v5 = vld [vmem:[%s1249_s1 + $0x18] sm:$0xff] (!%p188_p2)  ;;  %894 = vmatprep.mubr.msk.f32.mxu0 (!%p188_p2), %vm1036_vm0, %v1037_v6  ;;  %p215_p3 = scmp.lt.s32.totalorder (!%p188_p2), %s743_s19, 1  ;;  %v245_v8 = vld [vmem:[%s1249_s1 + $0x20] sm:$0xff] (!%p188_p2)  ;;  %v246_v9 = vld [vmem:[%s1249_s1 + $0x28] sm:$0xff] (!%p188_p2)  ;;  %vm347_vm1 = vcmask (!%p188_p2), 261120  }
   0x7   : > { %978 = vmatprep.subr.bf16.mxu1 (!%p188_p2), %v1035_v3  ;;  %905 = vmatprep.mubr.msk.f32.mxu1 (!%p188_p2), %vm1036_vm0, %v1037_v6  ;;  %v1097_v7 = vpack.c.bf16 (!%p188_p2), %v244_v5, %v243_v2  ;;  %v257_v10 = vld [vmem:[%s1250_s2] sm:$0xff] (!%p188_p2)  ;;  %v258_v11 = vld [vmem:[%s1250_s2 + $0x8] sm:$0xff] (!%p188_p2)  ;;  %v1121_v13 = vpack.c.bf16 (!%p188_p2), %v246_v9, %v245_v8  ;;  %v247_v16 = vld [vmem:[%s1249_s1 + $0x30] sm:$0xff] (!%p188_p2)  ;;  %v422_v61 = vshrl.u32 (!%p188_p2), %v421_v60, 7 }
   0x8   : > { %956 = vmatpush3.bf16.msra.mxu0 (!%p188_p2), %v1086_v4  ;;  %v979_v12 = vpack.c.bf16 (!%p188_p2), %v258_v11, %v257_v10  ;;  %v248_v17 = vld [vmem:[%s1249_s1 + $0x38] sm:$0xff] (!%p188_p2)  ;;  %v249_v25 = vld [vmem:[%s1249_s1 + $0x40] sm:$0xff] (!%p188_p2)  ;;  %v250_v26 = vld [vmem:[%s1249_s1 + $0x48] sm:$0xff] (!%p188_p2) }
   0x9   : > { %957 = vmatprep.subr.bf16.mxu0 (!%p188_p2), %v1035_v3  ;;  %v964_v24 = vpack.c.bf16 (!%p188_p2), %v248_v17, %v247_v16  ;;  %v967_v32 = vpack.c.bf16 (!%p188_p2), %v250_v26, %v249_v25  ;;  %v251_v33 = vld [vmem:[%s1249_s1 + $0x50] sm:$0xff] (!%p188_p2)  ;;  %v252_v34 = vld [vmem:[%s1249_s1 + $0x58] sm:$0xff] (!%p188_p2)  ;;  %v253_v40 = vld [vmem:[%s1249_s1 + $0x60] sm:$0xff] (!%p188_p2)  ;;  %v423_v62 = vsub.s32 (!%p188_p2), 0, %v422_v61 }
   0xa   : > { %980 = vmatpush3.bf16.msra.mxu1 (!%p188_p2), %v979_v12  ;;  %v970_v39 = vpack.c.bf16 (!%p188_p2), %v252_v34, %v251_v33  ;;  %v254_v41 = vld [vmem:[%s1249_s1 + $0x68] sm:$0xff] (!%p188_p2)  ;;  %v255_v45 = vld [vmem:[%s1249_s1 + $0x70] sm:$0xff] (!%p188_p2)  ;;  %v256_v46 = vld [vmem:[%s1249_s1 + $0x78] sm:$0xff] (!%p188_p2) }
   0xb   : > { %981 = vmatprep.subr.bf16.mxu1 (!%p188_p2), %v1035_v3  ;;  %v973_v44 = vpack.c.bf16 (!%p188_p2), %v254_v41, %v253_v40  ;;  %v976_v49 = vpack.c.bf16 (!%p188_p2), %v256_v46, %v255_v45  ;;  %v259_v54 = vld [vmem:[%s1250_s2 + $0x10] sm:$0xff] (!%p188_p2)  ;;  %v260_v55 = vld [vmem:[%s1250_s2 + $0x18] sm:$0xff] (!%p188_p2) }
   0xc   : > { %959 = vmatpush3.bf16.msra.mxu0 (!%p188_p2), %v1097_v7  ;;  %v982_v56 = vpack.c.bf16 (!%p188_p2), %v260_v55, %v259_v54 }
   0xd   : > { %s1255_s19 = smov (!%p215_p3, %s743_s19), 1  ;;  %960 = vmatprep.subr.bf16.mxu0 %v1035_v3 }
   0xe   : > { %s766_s7 = sshll.u32 %s1255_s19, 5  ;;  %983 = vmatpush3.bf16.msra.mxu1 %v982_v56 }
   0xf   : > { %s219_s14 = scalar_lea.vmem %s1248_s0, %s766_s7  ;;  %984 = vmatprep.subr.bf16.mxu1 %v1035_v3  ;;  %s224_s25 = scalar_lea.vmem %s1253_s5, %s766_s7 }
  0x10   : > { %v1123_v14 = vld [vmem:[%s219_s14] sm:$0xff]   ;;  %v1125_v15 = vld [vmem:[%s219_s14 + $0x8] sm:$0xff]   ;;  %v1137_v21 = vld [vmem:[%s219_s14 + $0x10] sm:$0xff]   ;;  %962 = vmatpush3.bf16.msra.mxu0 %v1121_v13 }
  0x11   : > { %v778_v18 = vunpack.c.l.bf16 %v1123_v14  ;;  %v779_v19 = vunpack.c.h.bf16 %v1123_v14  ;;  %v782_v20 = vunpack.c.l.bf16 %v1125_v15  ;;  %v783_v22 = vunpack.c.h.bf16 %v1125_v15  ;;  %963 = vmatprep.subr.bf16.mxu0 %v1035_v3  ;;  %v1156_v29 = vld [vmem:[%s219_s14 + $0x18] sm:$0xff]  }
  0x12   : > { %v786_v27 = vunpack.c.l.bf16 %v1137_v21  ;;  %v787_v30 = vunpack.c.h.bf16 %v1137_v21  ;;  %v790_v35 = vunpack.c.l.bf16 %v1156_v29  ;;  %v791_v37 = vunpack.c.h.bf16 %v1156_v29 }
  0x13   : > { %v263_v23 = vadd.f32 %v779_v19, %v778_v18 }
  0x14   : > { %965 = vmatpush3.bf16.msra.mxu0 %v964_v24 }
  0x15   : > { %v264_v28 = vadd.f32 %v782_v20, %v263_v23  ;;  %966 = vmatprep.subr.bf16.mxu0 %v1035_v3 }
  0x17   : > { %v265_v31 = vadd.f32 %v783_v22, %v264_v28 }
  0x18   : > { %968 = vmatpush3.bf16.msra.mxu0 %v967_v32 }
  0x19   : > { %v266_v36 = vadd.f32 %v786_v27, %v265_v31  ;;  %969 = vmatprep.subr.bf16.mxu0 %v1035_v3 }
  0x1b   : > { %v267_v38 = vadd.f32 %v787_v30, %v266_v36 }
  0x1c   : > { %971 = vmatpush3.bf16.msra.mxu0 %v970_v39 }
  0x1d   : > { %v268_v42 = vadd.f32 %v790_v35, %v267_v38  ;;  %972 = vmatprep.subr.bf16.mxu0 %v1035_v3 }
  0x1f   : > { %v269_v43 = vadd.f32 %v791_v37, %v268_v42 }
  0x20   : > { %974 = vmatpush3.bf16.msra.mxu0 %v973_v44 }
  0x21   : > { %v270_v47 = vrot.slane %v269_v43, 4  ;;  %975 = vmatprep.subr.bf16.mxu0 %v1035_v3 }
  0x23   : > { %v271_v48 = vadd.f32 %v270_v47, %v269_v43 }
  0x24   : > { %977 = vmatpush3.bf16.msra.mxu0 %v976_v49 }
  0x25   : > { %v272_v50 = vrot.slane %v271_v48, 2  ;;  %1008 = vmatprep.subr.bf16.mxu0 %v1035_v3 }
  0x27   : > { %v273_v51 = vadd.f32 %v272_v50, %v271_v48 }
  0x29   : > { %v274_v52 = vrot.slane %v273_v51, 1 }
  0x2b   : > { %v275_v53 = vadd.f32 %v274_v52, %v273_v51 }
  0x2d   : > { %895 = vmatmul.mubr.f32.vlgmr.msra.gmra.mrb[0].mxu0 %v275_v53 }
  0x2e   : > { %1010 = vmatpush3.bf16.msra.mxu0 %v979_v12  ;;  %951 = vmatprep.mubr.msk.f32.mxu0 %vm1036_vm0, %v1037_v6 }
  0x2f   : > { %1011 = vmatprep.subr.bf16.mxu0 %v1035_v3 }
  0x32   : > { %1013 = vmatpush3.bf16.msra.mxu0 %v982_v56 }
 0x100   : > { %v342_v57 = vpop.f32.mrb[0].mxu0 }
 0x101   : > { %v346_v58 = vmul.f32 0.00390625, %v342_v57  ;;  %v896_v59 = vpop.f32.mrb[1].mxu0 }
 0x103   : > { %906 = vmatmul.mubr.msk.f32.vlgmr.msra.gmra.mrb[0].mxu1 %vm347_vm1, %v346_v58 }
 0x104   : > { %986 = vmatpush3.bf16.msra.mxu1 %v1086_v4  ;;  %940 = vmatprep.mubr.msk.f32.mxu1 %vm1036_vm0, %v1037_v6 }
 0x105   : > { %987 = vmatprep.subr.bf16.mxu1 %v1035_v3 }
 0x108   : > { %989 = vmatpush3.bf16.msra.mxu1 %v1097_v7 }
 0x109   : > { %990 = vmatprep.subr.bf16.mxu1 %v1035_v3 }
 0x10c   : > { %992 = vmatpush3.bf16.msra.mxu1 %v1121_v13 }
 0x10d   : > { %993 = vmatprep.subr.bf16.mxu1 %v1035_v3 }
 0x110   : > { %995 = vmatpush3.bf16.msra.mxu1 %v964_v24 }
 0x111   : > { %996 = vmatprep.subr.bf16.mxu1 %v1035_v3 }
 0x114   : > { %998 = vmatpush3.bf16.msra.mxu1 %v967_v32 }
 0x115   : > { %999 = vmatprep.subr.bf16.mxu1 %v1035_v3 }
 0x118   : > { %1001 = vmatpush3.bf16.msra.mxu1 %v970_v39  ;;  %v754_v39 = vld [vmem:[%s1251_s3] ss:$0 sm:$0xff] }
 0x119   : > { %1002 = vmatprep.subr.bf16.mxu1 %v1035_v3 }
 0x11c   : > { %1004 = vmatpush3.bf16.msra.mxu1 %v973_v44  ;;  %v755_v44 = vld [vmem:[%s1252_s4] ss:$0 sm:$0xff] }
 0x11d   : > { %1005 = vmatprep.subr.bf16.mxu1 %v1035_v3 }
 0x120   : > { %1007 = vmatpush3.bf16.msra.mxu1 %v976_v49 }
 0x1d6   : > { %v417_v63 = vpop.f32.mrb[0].mxu1 }
 0x1d7   : > { %v424_v0 = vrot.slane %v417_v63, %v423_v62  ;;  %v907_v1 = vpop.f32.mrb[1].mxu1 }
 0x1d9   : > { %v425_v2 = vsub.f32 %v778_v18, %v424_v0  ;;  %v426_v4 = vsub.f32 %v779_v19, %v424_v0  ;;  %v427_v5 = vsub.f32 %v782_v20, %v424_v0  ;;  %v428_v6 = vsub.f32 %v783_v22, %v424_v0 }
 0x1da   : > { %v429_v8 = vsub.f32 %v786_v27, %v424_v0  ;;  %v430_v11 = vsub.f32 %v787_v30, %v424_v0  ;;  %v431_v14 = vsub.f32 %v790_v35, %v424_v0  ;;  %v432_v15 = vsub.f32 %v791_v37, %v424_v0 }
 0x1db   : > { %v433_v3 = vmul.f32 %v425_v2, %v425_v2  ;;  %v434_v7 = vmul.f32 %v426_v4, %v426_v4  ;;  %v435_v9 = vmul.f32 %v427_v5, %v427_v5  ;;  %v436_v12 = vmul.f32 %v428_v6, %v428_v6 }
 0x1dc   : > { %v437_v16 = vmul.f32 %v429_v8, %v429_v8  ;;  %v438_v18 = vmul.f32 %v430_v11, %v430_v11  ;;  %v439_v20 = vmul.f32 %v431_v14, %v431_v14  ;;  %v440_v23 = vmul.f32 %v432_v15, %v432_v15 }
 0x1dd   : > { %v441_v10 = vadd.f32 %v434_v7, %v433_v3 }
 0x1df   : > { %v442_v13 = vadd.f32 %v441_v10, %v435_v9 }
 0x1e1   : > { %v443_v17 = vadd.f32 %v442_v13, %v436_v12 }
 0x1e3   : > { %v444_v19 = vadd.f32 %v443_v17, %v437_v16 }
 0x1e5   : > { %v445_v22 = vadd.f32 %v444_v19, %v438_v18 }
 0x1e7   : > { %v446_v24 = vadd.f32 %v445_v22, %v439_v20 }
 0x1e9   : > { %v447_v25 = vadd.f32 %v446_v24, %v440_v23 }
 0x1eb   : > { %v448_v26 = vrot.slane %v447_v25, 4 }
 0x1ed   : > { %v449_v21 = vadd.f32 %v448_v26, %v447_v25 }
 0x1ef   : > { %v450_v27 = vrot.slane %v449_v21, 2 }
 0x1f1   : > { %v451_v28 = vadd.f32 %v450_v27, %v449_v21 }
 0x1f3   : > { %v452_v30 = vrot.slane %v451_v28, 1 }
 0x1f5   : > { %v453_v31 = vadd.f32 %v452_v30, %v451_v28 }
 0x1f7   : > { %941 = vmatmul.mubr.f32.vlgmr.msra.gmra.mrb[2].mxu1 %v453_v31 }
 0x2ca   : > { %v520_v32 = vpop.f32.mrb[2].mxu1 }
 0x2cb   : > { %v524_v33 = vmul.f32 0.00390625, %v520_v32  ;;  %v942_v34 = vpop.f32.mrb[3].mxu1 }
 0x2cd   : > { %v525_v35 = vadd.f32 1e-05, %v524_v33 }
 0x2cf   : > { %1025 = vrsqrt.f32 %v525_v35 }
 0x2d9   : > { %v1026_v29 = vpop.eup %1025 }
 0x2da   : > { %952 = vmatmul.mubr.msk.f32.vlgmr.msra.gmra.mrb[2].mxu0 %vm347_vm1, %v1026_v29 }
 0x3ad   : > { %v596_v36 = vpop.f32.mrb[2].mxu0 }
 0x3ae   : > { %v603_v37 = vrot.slane %v596_v36, %v423_v62  ;;  %v953_v38 = vpop.f32.mrb[3].mxu0 }
 0x3b0   : > { %v604_v40 = vmul.f32 %v603_v37, %v425_v2  ;;  %v605_v41 = vmul.f32 %v603_v37, %v426_v4  ;;  %v606_v42 = vmul.f32 %v603_v37, %v427_v5  ;;  %v607_v43 = vmul.f32 %v603_v37, %v428_v6 }
 0x3b1   : > { %v608_v45 = vmul.f32 %v603_v37, %v429_v8  ;;  %v609_v46 = vmul.f32 %v603_v37, %v430_v11  ;;  %v610_v47 = vmul.f32 %v603_v37, %v431_v14  ;;  %v611_v48 = vmul.f32 %v603_v37, %v432_v15 }
 0x3b2   : > { %v618_v49 = vmul.f32 %v754_v39, %v604_v40  ;;  %v619_v50 = vmul.f32 %v754_v39, %v605_v41  ;;  %v620_v51 = vmul.f32 %v754_v39, %v606_v42  ;;  %v621_v52 = vmul.f32 %v754_v39, %v607_v43 }
 0x3b3   : > { %v622_v53 = vmul.f32 %v754_v39, %v608_v45  ;;  %v623_v54 = vmul.f32 %v754_v39, %v609_v46  ;;  %v624_v55 = vmul.f32 %v754_v39, %v610_v47  ;;  %v625_v56 = vmul.f32 %v754_v39, %v611_v48 }
 0x3b4   : > { %v632_v57 = vadd.f32 %v755_v44, %v618_v49  ;;  %v633_v58 = vadd.f32 %v755_v44, %v619_v50  ;;  %v634_v59 = vadd.f32 %v755_v44, %v620_v51  ;;  %v635_v60 = vadd.f32 %v755_v44, %v621_v52 }
 0x3b5   : > { %v636_v61 = vadd.f32 %v755_v44, %v622_v53  ;;  %v637_v62 = vadd.f32 %v755_v44, %v623_v54  ;;  %v638_v63 = vadd.f32 %v755_v44, %v624_v55  ;;  %v639_v0 = vadd.f32 %v755_v44, %v625_v56 }
 0x3b6   : > { %v640_v1 = vmax.f32 %v632_v57, 0.0  ;;  %v641_v2 = vmax.f32 %v633_v58, 0.0  ;;  %v642_v4 = vmax.f32 %v634_v59, 0.0  ;;  %v643_v5 = vmax.f32 %v635_v60, 0.0 }
 0x3b7   : > { %v644_v6 = vmax.f32 %v636_v61, 0.0  ;;  %v645_v3 = vmax.f32 %v637_v62, 0.0  ;;  %v646_v7 = vmax.f32 %v638_v63, 0.0  ;;  %v647_v8 = vmax.f32 %v639_v0, 0.0 }
 0x3b8   : > { %v795_v9 = vpack.c.bf16 %v641_v2, %v640_v1  ;;  %v800_v10 = vpack.c.bf16 %v643_v5, %v642_v4 }
 0x3b9   : > { %v805_v11 = vpack.c.bf16 %v645_v3, %v644_v6  ;;  %v810_v12 = vpack.c.bf16 %v647_v8, %v646_v7 }
 0x3ba   : > { %796 = vst [vmem:[%s224_s25] sm:$0xff] %v795_v9   ;;  %815 = vst [vmem:[%s224_s25 + $0x8] sm:$0xff] %v800_v10  }
 0x3bb   : > { %816 = vst [vmem:[%s224_s25 + $0x10] sm:$0xff] %v805_v11   ;;  %817 = vst [vmem:[%s224_s25 + $0x18] sm:$0xff] %v810_v12  }
 0x3bc PF: > { %s15_s18 = sadd.s32 1, %s1033_s18  }
 0x3bd   : > { %p12_p4 = scmp.ge.s32.totalorder %s15_s18, 4  }
 0x3bf   :  { %14 = sbr.rel (!%p12_p4) target bundleno = 1 (0x1), region = 70 }

// kernel: _lambda_.44
= control target key start
LH: loop header
LB: loop body
LE: loop exit
PB: predicated region body
PF: predicated region fallthrough
CT: control target
= control target key end

     0   :  { %s136_s0 = inlined_call_operand.vmem [shape: f32[32,128], index: 0, kind: input, shape index: {}]   ;;  %s137_s1 = inlined_call_operand.vmem [shape: bf16[32,128], index: 1, kind: output, shape index: {}]  }
   0x1   :  { %v8_v0 = vld [vmem:[%s136_s0] sm:$0xff]  ;;  %v10_v1 = vld [vmem:[%s136_s0 + $0x10] sm:$0xff]  ;;  %v9_v2 = vld [vmem:[%s136_s0 + $0x8] sm:$0xff] }
   0x2   :  { %12 = vadd.xlane.f32.xlu0 %v8_v0  ;;  %16 = vadd.xlane.f32.xlu1 %v10_v1  ;;  %v11_v3 = vld [vmem:[%s136_s0 + $0x18] sm:$0xff] }
   0x6   :  { %14 = vadd.xlane.f32.xlu0 %v9_v2  ;;  %18 = vadd.xlane.f32.xlu1 %v11_v3 }
  0x8f   :  { %v13_v4 = vpop.xlane.xlu0 %12  ;;  %v17_v5 = vpop.xlane.xlu1 %16 }
  0x90   :  { %v21_v6 = vmul.f32 0.0078125, %v13_v4  ;;  %v23_v7 = vmul.f32 0.0078125, %v17_v5 }
  0x92   :  { %v25_v8 = vsub.f32 %v8_v0, %v21_v6  ;;  %v27_v9 = vsub.f32 %v10_v1, %v23_v7 }
  0x93   :  { %v15_v10 = vpop.xlane.xlu0 %14  ;;  %v19_v11 = vpop.xlane.xlu1 %18 }
  0x94   :  { %v22_v12 = vmul.f32 0.0078125, %v15_v10  ;;  %v29_v13 = vmul.f32 %v25_v8, %v25_v8  ;;  %v24_v14 = vmul.f32 0.0078125, %v19_v11  ;;  %v31_v17 = vmul.f32 %v27_v9, %v27_v9 }
  0x96   :  { %v26_v15 = vsub.f32 %v9_v2, %v22_v12  ;;  %33 = vadd.xlane.f32.xlu0 %v29_v13  ;;  %v28_v16 = vsub.f32 %v11_v3, %v24_v14 }
  0x98   :  { %v30_v18 = vmul.f32 %v26_v15, %v26_v15  ;;  %v32_v19 = vmul.f32 %v28_v16, %v28_v16 }
  0x9a   :  { %37 = vadd.xlane.f32.xlu0 %v31_v17  ;;  %35 = vadd.xlane.f32.xlu1 %v30_v18 }
  0x9e   :  { %39 = vadd.xlane.f32.xlu1 %v32_v19 }
 0x123   :  { %v34_v20 = vpop.xlane.xlu0 %33 }
 0x124   :  { %v41_v21 = vmul.f32 0.0078125, %v34_v20 }
 0x126   :  { %v45_v22 = vadd.f32 1e-06, %v41_v21 }
 0x127   :  { %v36_v23 = vpop.xlane.xlu1 %35  ;;  %v38_v24 = vpop.xlane.xlu0 %37 }
 0x128   :  { %v42_v25 = vmul.f32 0.0078125, %v36_v23  ;;  %v43_v26 = vmul.f32 0.0078125, %v38_v24  ;;  %100 = vrsqrt.f32 %v45_v22 }
 0x12a   :  { %v46_v27 = vadd.f32 1e-06, %v42_v25  ;;  %v47_v28 = vadd.f32 1e-06, %v43_v26 }
 0x12b   :  { %v40_v29 = vpop.xlane.xlu1 %39 }
 0x12c   :  { %102 = vrsqrt.f32 %v46_v27  ;;  %v44_v30 = vmul.f32 0.0078125, %v40_v29 }
 0x12d   :  { %104 = vrsqrt.f32 %v47_v28 }
 0x12e   :  { %v48_v31 = vadd.f32 1e-06, %v44_v30 }
 0x130   :  { %106 = vrsqrt.f32 %v48_v31 }
 0x132   :  { %v101_v32 = vpop.eup %100 }
 0x133   :  { %v53_v34 = vmul.f32 %v101_v32, %v25_v8 }
 0x136   :  { %v103_v33 = vpop.eup %102 }
 0x137   :  { %v54_v35 = vmul.f32 %v103_v33, %v26_v15  ;;  %v105_v36 = vpop.eup %104 }
 0x138   :  { %v55_v39 = vmul.f32 %v105_v36, %v27_v9 }
 0x139   :  { %v92_v37 = vpack.c.bf16 %v54_v35, %v53_v34 }
 0x13a   :  { %v107_v38 = vpop.eup %106 }
 0x13b   :  { %93 = vst [vmem:[%s137_s1] sm:$0xff] %v92_v37   ;;  %v56_v40 = vmul.f32 %v107_v38, %v28_v16 }
 0x13d   :  { %v97_v41 = vpack.c.bf16 %v56_v40, %v55_v39 }
 0x13f   :  { %99 = vst [vmem:[%s137_s1 + $0x8] sm:$0xff] %v97_v41  }

// kernel: _lambda_.45
= control target key start
LH: loop header
LB: loop body
LE: loop exit
PB: predicated region body
PF: predicated region fallthrough
CT: control target
= control target key end

     0   :  { %vm301_vm0 = vcmask 257024   ;;  %s577_s1 = inlined_call_operand.vmem [shape: bf16[128,32], index: 1, kind: input, shape index: {}]   ;;  %s578_s0 = inlined_call_operand.vmem [shape: bf16[128,128], index: 0, kind: input, shape index: {}]   ;;  %s579_s2 = inlined_call_operand.vmem [shape: bf16[128,32], index: 2, kind: output, shape index: {}]  }
   0x1   :  { %v434_v0 = vld [vmem:[%s577_s1] sm:$0xff]   ;;  %v435_v1 = vld [vmem:[%s577_s1 + $0x8] sm:$0xff]   ;;  %v436_v2 = vld [vmem:[%s577_s1 + $0x10] sm:$0xff]  }
   0x2   :  { %386 = vmatprep.subr.bf16.mxu0 %v434_v0  ;;  %418 = vmatprep.subr.bf16.mxu1 %v434_v0  ;;  %v437_v3 = vld [vmem:[%s577_s1 + $0x18] sm:$0xff]   ;;  %v442_v4 = vld [vmem:[%s578_s0] sm:$0xff]   ;;  %v439_v7 = vld [vmem:[%s577_s1 + $0x28] sm:$0xff]  }
   0x3   :  { %387 = vmatpush3.bf16.msra.mxu0 %v434_v0  ;;  %426 = vmatpush3.bf16.msra.mxu1 %v434_v0  ;;  %v443_v5 = vld [vmem:[%s578_s0 + $0x20] sm:$0xff]   ;;  %v440_v8 = vld [vmem:[%s577_s1 + $0x30] sm:$0xff]   ;;  %v441_v9 = vld [vmem:[%s577_s1 + $0x38] sm:$0xff]  }
   0x4   :  { %388 = vmatprep.subr.bf16.mxu0 %v435_v1  ;;  %419 = vmatprep.subr.bf16.mxu1 %v435_v1  ;;  %v438_v6 = vld [vmem:[%s577_s1 + $0x20] sm:$0xff]   ;;  %v444_v10 = vld [vmem:[%s578_s0 + $0x8] sm:$0xff]   ;;  %v446_v12 = vld [vmem:[%s578_s0 + $0x10] sm:$0xff]  }
   0x5   :  { %402 = vmatprep.mubr.bf16.mxu0 %v442_v4  ;;  %410 = vmatprep.mubr.bf16.mxu1 %v443_v5  ;;  %v445_v11 = vld [vmem:[%s578_s0 + $0x28] sm:$0xff]   ;;  %v447_v13 = vld [vmem:[%s578_s0 + $0x30] sm:$0xff]   ;;  %v448_v14 = vld [vmem:[%s578_s0 + $0x18] sm:$0xff]  }
   0x6   :  { %v449_v15 = vld [vmem:[%s578_s0 + $0x38] sm:$0xff]  }
   0x7   :  { %389 = vmatpush3.bf16.msra.mxu0 %v435_v1  ;;  %427 = vmatpush3.bf16.msra.mxu1 %v435_v1 }
   0x8   :  { %390 = vmatprep.subr.bf16.mxu0 %v436_v2  ;;  %420 = vmatprep.subr.bf16.mxu1 %v436_v2 }
   0xb   :  { %391 = vmatpush3.bf16.msra.mxu0 %v436_v2  ;;  %428 = vmatpush3.bf16.msra.mxu1 %v436_v2 }
   0xc   :  { %392 = vmatprep.subr.bf16.mxu0 %v437_v3  ;;  %421 = vmatprep.subr.bf16.mxu1 %v437_v3 }
   0xf   :  { %393 = vmatpush3.bf16.msra.mxu0 %v437_v3  ;;  %429 = vmatpush3.bf16.msra.mxu1 %v437_v3 }
  0x10   :  { %394 = vmatprep.subr.bf16.mxu0 %v438_v6  ;;  %422 = vmatprep.subr.bf16.mxu1 %v438_v6 }
  0x13   :  { %395 = vmatpush3.bf16.msra.mxu0 %v438_v6  ;;  %430 = vmatpush3.bf16.msra.mxu1 %v438_v6 }
  0x14   :  { %396 = vmatprep.subr.bf16.mxu0 %v439_v7  ;;  %423 = vmatprep.subr.bf16.mxu1 %v439_v7 }
  0x17   :  { %397 = vmatpush3.bf16.msra.mxu0 %v439_v7  ;;  %431 = vmatpush3.bf16.msra.mxu1 %v439_v7 }
  0x18   :  { %398 = vmatprep.subr.bf16.mxu0 %v440_v8  ;;  %424 = vmatprep.subr.bf16.mxu1 %v440_v8 }
  0x1b   :  { %399 = vmatpush3.bf16.msra.mxu0 %v440_v8  ;;  %432 = vmatpush3.bf16.msra.mxu1 %v440_v8 }
  0x1c   :  { %400 = vmatprep.subr.bf16.mxu0 %v441_v9  ;;  %425 = vmatprep.subr.bf16.mxu1 %v441_v9 }
  0x1f   :  { %401 = vmatpush3.bf16.msra.mxu0 %v441_v9  ;;  %433 = vmatpush3.bf16.msra.mxu1 %v441_v9 }
  0x22   :  { %403 = vmatmul.mubr.bf16.vlgmr.msra.gmra.mrb[0].mxu0 %v444_v10  ;;  %411 = vmatmul.mubr.bf16.vlgmr.msra.gmra.mrb[0].mxu1 %v445_v11 }
  0x23   :  { %406 = vmatprep.mubr.bf16.mxu0 %v446_v12  ;;  %414 = vmatprep.mubr.bf16.mxu1 %v447_v13 }
  0x2a   :  { %407 = vmatmul.mubr.bf16.gmra.mrb[4].mxu0 %v448_v14  ;;  %415 = vmatmul.mubr.bf16.gmra.mrb[4].mxu1 %v449_v15 }
  0xf5   :  { %v404_v16 = vpop.f32.mrb[0].mxu0  ;;  %v412_v17 = vpop.f32.mrb[0].mxu1 }
  0xf6   :  { %v356_v18 = vpack.c.bf16 %v404_v16, %v404_v16  ;;  %v364_v19 = vpack.c.bf16 %v412_v17, %v412_v17  ;;  %v174_v20 = vpop.f32.mrb[1].mxu0  ;;  %v206_v21 = vpop.f32.mrb[1].mxu1 }
  0xf7   :  { %v354_v22 = vpack.c.bf16 %v174_v20, %v174_v20  ;;  %v362_v23 = vpack.c.bf16 %v206_v21, %v206_v21  ;;  %v405_v24 = vpop.f32.mrb[2].mxu0  ;;  %v413_v25 = vpop.f32.mrb[2].mxu1 }
  0xf8   :  { %304 = vst.msk [vmem:[%s579_s2 + $0x8] sm:$0xf] %vm301_vm0, %v356_v18  ;;  %312 = vst.msk [vmem:[%s579_s2 + $0x28] sm:$0xf] %vm301_vm0, %v364_v19  ;;  %v357_v26 = vpack.c.bf16 %v405_v24, %v405_v24  ;;  %v365_v27 = vpack.c.bf16 %v413_v25, %v413_v25  ;;  %v177_v28 = vpop.f32.mrb[3].mxu0  ;;  %v209_v29 = vpop.f32.mrb[3].mxu1 }
  0xf9   :  { %302 = vst.msk [vmem:[%s579_s2] sm:$0xf] %vm301_vm0, %v354_v22  ;;  %310 = vst.msk [vmem:[%s579_s2 + $0x20] sm:$0xf] %vm301_vm0, %v362_v23  ;;  %v355_v30 = vpack.c.bf16 %v177_v28, %v177_v28  ;;  %v363_v31 = vpack.c.bf16 %v209_v29, %v209_v29 }
  0xfa   :  { %305 = vst.msk [vmem:[%s579_s2 + $0xc] sm:$0xf] %vm301_vm0, %v357_v26  ;;  %313 = vst.msk [vmem:[%s579_s2 + $0x2c] sm:$0xf] %vm301_vm0, %v365_v27 }
  0xfb   :  { %303 = vst.msk [vmem:[%s579_s2 + $0x4] sm:$0xf] %vm301_vm0, %v355_v30  ;;  %311 = vst.msk [vmem:[%s579_s2 + $0x24] sm:$0xf] %vm301_vm0, %v363_v31 }
  0xfd   :  { %v408_v32 = vpop.f32.mrb[4].mxu0  ;;  %v416_v33 = vpop.f32.mrb[4].mxu1 }
  0xfe   :  { %v360_v34 = vpack.c.bf16 %v408_v32, %v408_v32  ;;  %v368_v35 = vpack.c.bf16 %v416_v33, %v416_v33  ;;  %v190_v36 = vpop.f32.mrb[5].mxu0  ;;  %v222_v37 = vpop.f32.mrb[5].mxu1 }
  0xff   :  { %v358_v38 = vpack.c.bf16 %v190_v36, %v190_v36  ;;  %v366_v39 = vpack.c.bf16 %v222_v37, %v222_v37  ;;  %v409_v40 = vpop.f32.mrb[6].mxu0  ;;  %v417_v41 = vpop.f32.mrb[6].mxu1 }
 0x100   :  { %308 = vst.msk [vmem:[%s579_s2 + $0x18] sm:$0xf] %vm301_vm0, %v360_v34  ;;  %316 = vst.msk [vmem:[%s579_s2 + $0x38] sm:$0xf] %vm301_vm0, %v368_v35  ;;  %v361_v42 = vpack.c.bf16 %v409_v40, %v409_v40  ;;  %v369_v43 = vpack.c.bf16 %v417_v41, %v417_v41  ;;  %v193_v44 = vpop.f32.mrb[7].mxu0  ;;  %v225_v45 = vpop.f32.mrb[7].mxu1 }
 0x101   :  { %306 = vst.msk [vmem:[%s579_s2 + $0x10] sm:$0xf] %vm301_vm0, %v358_v38  ;;  %314 = vst.msk [vmem:[%s579_s2 + $0x30] sm:$0xf] %vm301_vm0, %v366_v39  ;;  %v359_v46 = vpack.c.bf16 %v193_v44, %v193_v44  ;;  %v367_v47 = vpack.c.bf16 %v225_v45, %v225_v45 }
 0x102   :  { %309 = vst.msk [vmem:[%s579_s2 + $0x1c] sm:$0xf] %vm301_vm0, %v361_v42  ;;  %317 = vst.msk [vmem:[%s579_s2 + $0x3c] sm:$0xf] %vm301_vm0, %v369_v43 }
 0x103   :  { %307 = vst.msk [vmem:[%s579_s2 + $0x14] sm:$0xf] %vm301_vm0, %v359_v46  ;;  %315 = vst.msk [vmem:[%s579_s2 + $0x34] sm:$0xf] %vm301_vm0, %v367_v47 }

// kernel: _lambda_.49
= control target key start
LH: loop header
LB: loop body
LE: loop exit
PB: predicated region body
PF: predicated region fallthrough
CT: control target
= control target key end

     0   :  { %s821_s18 = smov 0   ;;  %s887_s0 = inlined_call_operand.vmem [shape: bf16[2,16,32], index: 0, kind: input, shape index: {}]   ;;  %s888_s1 = inlined_call_operand.vmem [shape: f32[32,32], index: 1, kind: input, shape index: {}]   ;;  %s889_s2 = inlined_call_operand.vmem [shape: f32[32,32], index: 2, kind: input, shape index: {}]   ;;  %s890_s3 = inlined_call_operand.vmem [shape: f32[1,32], index: 3, kind: input, shape index: {}]   ;;  %s891_s4 = inlined_call_operand.vmem [shape: f32[1,32], index: 4, kind: input, shape index: {}]   ;;  %s892_s5 = inlined_call_operand.vmem [shape: bf16[2,16,32], index: 5, kind: output, shape index: {}]  }
   0x1 LB: > { %s652_s19 = sadd.s32 4294967295, %s786_s18   ;;  %p656_p0 = scmp.ge.s32.totalorder %s786_s18, 1  ;;  %s786_s18 = sphi %s821_s18, %s15_s18  }
   0x2   : > { %p187_p1 = scmp.lt.s32.totalorder %s786_s18, 3 }
   0x4   : > { %p188_p2 = pnand %p656_p0, %p187_p1 }
   0x5   : > { %v229_v0 = vld [vmem:[%s888_s1] sm:$0xff] (!%p188_p2)  ;;  %v230_v1 = vld [vmem:[%s888_s1 + $0x8] sm:$0xff] (!%p188_p2)  ;;  %v231_v2 = vld [vmem:[%s888_s1 + $0x10] sm:$0xff] (!%p188_p2)  ;;  %v788_v3 = vmov (!%p188_p2), 0.0|0.0   ;;  %vm789_vm0 = vmmov (!%p188_p2), 0   ;;  %v790_v6 = vmov (!%p188_p2), 0.0   ;;  %v396_v29 = vlaneseq (!%p188_p2) }
   0x6   : > { %191 = sbr.rel (%p188_p2) target bundleno = 933 (0x3a5), region = 40  ;;  %743 = vmatprep.subr.bf16.mxu0 (!%p188_p2), %v788_v3  ;;  %v744_v4 = vpack.c.bf16 (!%p188_p2), %v230_v1, %v229_v0  ;;  %v232_v5 = vld [vmem:[%s888_s1 + $0x18] sm:$0xff] (!%p188_p2)  ;;  %707 = vmatprep.mubr.msk.f32.mxu0 (!%p188_p2), %vm789_vm0, %v790_v6  ;;  %p215_p3 = scmp.lt.s32.totalorder (!%p188_p2), %s652_s19, 1  ;;  %v233_v7 = vld [vmem:[%s889_s2] sm:$0xff] (!%p188_p2)  ;;  %v234_v8 = vld [vmem:[%s889_s2 + $0x8] sm:$0xff] (!%p188_p2)  ;;  %vm239_vm1 = vcmask (!%p188_p2), 261120  }
   0x7   : > { %749 = vmatprep.subr.bf16.mxu1 (!%p188_p2), %v788_v3  ;;  %v750_v9 = vpack.c.bf16 (!%p188_p2), %v234_v8, %v233_v7  ;;  %718 = vmatprep.mubr.msk.f32.mxu1 (!%p188_p2), %vm789_vm0, %v790_v6  ;;  %v747_v10 = vpack.c.bf16 (!%p188_p2), %v232_v5, %v231_v2  ;;  %v235_v23 = vld [vmem:[%s889_s2 + $0x10] sm:$0xff] (!%p188_p2)  ;;  %v236_v24 = vld [vmem:[%s889_s2 + $0x18] sm:$0xff] (!%p188_p2)  ;;  %v397_v30 = vshrl.u32 (!%p188_p2), %v396_v29, 7  ;;  %v665_v56 = vld [vmem:[%s890_s3] ss:$0 sm:$0xff] (!%p188_p2)  ;;  %vm594_vm2 = vcmask (!%p188_p2), 257024  }
   0x8   : > { %745 = vmatpush3.bf16.msra.mxu0 (!%p188_p2), %v744_v4  ;;  %v753_v25 = vpack.c.bf16 (!%p188_p2), %v236_v24, %v235_v23  ;;  %v666_v59 = vld [vmem:[%s891_s4] ss:$0 sm:$0xff] (!%p188_p2) }
   0x9   : > { %746 = vmatprep.subr.bf16.mxu0 (!%p188_p2), %v788_v3  ;;  %751 = vmatpush3.bf16.msra.mxu1 (!%p188_p2), %v750_v9  ;;  %v398_v31 = vsub.s32 (!%p188_p2), 0, %v397_v30 }
   0xa   : > { %752 = vmatprep.subr.bf16.mxu1 (!%p188_p2), %v788_v3 }
   0xc   : > { %748 = vmatpush3.bf16.msra.mxu0 (!%p188_p2), %v747_v10 }
   0xd   : > { %s894_s19 = smov (!%p215_p3, %s652_s19), 1  ;;  %755 = vmatprep.subr.bf16.mxu0 %v788_v3  ;;  %754 = vmatpush3.bf16.msra.mxu1 %v753_v25 }
   0xe   : > { %s671_s7 = sshll.u32 %s894_s19, 3  ;;  %761 = vmatprep.subr.bf16.mxu1 %v788_v3 }
   0xf   : > { %s219_s10 = scalar_lea.vmem %s887_s0, %s671_s7  ;;  %s224_s23 = scalar_lea.vmem %s892_s5, %s671_s7 }
  0x10   : > { %v676_v11 = vld [vmem:[%s219_s10] sm:$0xff]  }
  0x11   : > { %v677_v12 = vunpack.c.l.bf16 %v676_v11  ;;  %v678_v13 = vunpack.c.h.bf16 %v676_v11 }
  0x13   : > { %v240_v14 = vsel %vm239_vm1, %v677_v12, 0.0  ;;  %v241_v15 = vsel %vm239_vm1, %v678_v13, 0.0 }
  0x14   : > { %v242_v16 = vadd.f32 %v241_v15, %v240_v14 }
  0x16   : > { %v243_v17 = vrot.slane %v242_v16, 4 }
  0x18   : > { %v244_v18 = vadd.f32 %v243_v17, %v242_v16 }
  0x1a   : > { %v245_v19 = vrot.slane %v244_v18, 2 }
  0x1c   : > { %v246_v20 = vadd.f32 %v245_v19, %v244_v18 }
  0x1e   : > { %v247_v21 = vrot.slane %v246_v20, 1 }
  0x20   : > { %v248_v22 = vadd.f32 %v247_v21, %v246_v20 }
  0x22   : > { %708 = vmatmul.mubr.msk.f32.vlgmr.msra.gmra.mrb[0].mxu0 %vm239_vm1, %v248_v22 }
  0x23   : > { %757 = vmatpush3.bf16.msra.mxu0 %v744_v4  ;;  %729 = vmatprep.mubr.msk.f32.mxu0 %vm789_vm0, %v790_v6 }
  0x24   : > { %758 = vmatprep.subr.bf16.mxu0 %v788_v3 }
  0x27   : > { %760 = vmatpush3.bf16.msra.mxu0 %v747_v10 }
  0xf5   : > { %v318_v26 = vpop.f32.mrb[0].mxu0 }
  0xf6   : > { %v322_v27 = vmul.f32 0.0625, %v318_v26  ;;  %v709_v28 = vpop.f32.mrb[1].mxu0 }
  0xf8   : > { %719 = vmatmul.mubr.msk.f32.vlgmr.msra.gmra.mrb[0].mxu1 %vm239_vm1, %v322_v27 }
  0xf9   : > { %763 = vmatpush3.bf16.msra.mxu1 %v750_v9  ;;  %740 = vmatprep.mubr.msk.f32.mxu1 %vm789_vm0, %v790_v6 }
  0xfa   : > { %764 = vmatprep.subr.bf16.mxu1 %v788_v3 }
  0xfd   : > { %766 = vmatpush3.bf16.msra.mxu1 %v753_v25 }
 0x1cb   : > { %v392_v32 = vpop.f32.mrb[0].mxu1 }
 0x1cc   : > { %v399_v33 = vrot.slane %v392_v32, %v398_v31  ;;  %v720_v34 = vpop.f32.mrb[1].mxu1 }
 0x1ce   : > { %v400_v35 = vsub.f32 %v677_v12, %v399_v33  ;;  %v401_v36 = vsub.f32 %v678_v13, %v399_v33 }
 0x1d0   : > { %v402_v37 = vmul.f32 %v400_v35, %v400_v35  ;;  %v403_v38 = vmul.f32 %v401_v36, %v401_v36 }
 0x1d2   : > { %v404_v39 = vsel %vm239_vm1, %v402_v37, 0.0  ;;  %v405_v40 = vsel %vm239_vm1, %v403_v38, 0.0 }
 0x1d3   : > { %v406_v41 = vadd.f32 %v405_v40, %v404_v39 }
 0x1d5   : > { %v407_v42 = vrot.slane %v406_v41, 4 }
 0x1d7   : > { %v408_v43 = vadd.f32 %v407_v42, %v406_v41 }
 0x1d9   : > { %v409_v44 = vrot.slane %v408_v43, 2 }
 0x1db   : > { %v410_v45 = vadd.f32 %v409_v44, %v408_v43 }
 0x1dd   : > { %v411_v46 = vrot.slane %v410_v45, 1 }
 0x1df   : > { %v412_v47 = vadd.f32 %v411_v46, %v410_v45 }
 0x1e1   : > { %730 = vmatmul.mubr.msk.f32.vlgmr.msra.gmra.mrb[2].mxu0 %vm239_vm1, %v412_v47 }
 0x2b4   : > { %v482_v48 = vpop.f32.mrb[2].mxu0 }
 0x2b5   : > { %v486_v49 = vmul.f32 0.0625, %v482_v48  ;;  %v731_v50 = vpop.f32.mrb[3].mxu0 }
 0x2b7   : > { %v487_v51 = vadd.f32 1e-05, %v486_v49 }
 0x2b9   : > { %778 = vrsqrt.f32 %v487_v51 }
 0x2c3   : > { %v779_v52 = vpop.eup %778 }
 0x2c4   : > { %741 = vmatmul.mubr.msk.f32.vlgmr.msra.gmra.mrb[2].mxu1 %vm239_vm1, %v779_v52 }
 0x397   : > { %v558_v53 = vpop.f32.mrb[2].mxu1 }
 0x398   : > { %v565_v54 = vrot.slane %v558_v53, %v398_v31  ;;  %v742_v55 = vpop.f32.mrb[3].mxu1 }
 0x39a   : > { %v566_v57 = vmul.f32 %v565_v54, %v400_v35  ;;  %v567_v58 = vmul.f32 %v565_v54, %v401_v36 }
 0x39c   : > { %v574_v60 = vmul.f32 %v665_v56, %v566_v57  ;;  %v575_v61 = vmul.f32 %v665_v56, %v567_v58 }
 0x39e   : > { %v582_v62 = vadd.f32 %v666_v59, %v574_v60  ;;  %v583_v63 = vadd.f32 %v666_v59, %v575_v61 }
 0x3a0   : > { %v584_v0 = vmax.f32 %v582_v62, 0.0  ;;  %v585_v1 = vmax.f32 %v583_v63, 0.0 }
 0x3a2   : > { %v673_v2 = vpack.c.bf16 %v584_v0, %v584_v0  ;;  %v674_v3 = vpack.c.bf16 %v585_v1, %v585_v1 }
 0x3a4   : > { %595 = vst.msk [vmem:[%s224_s23] sm:$0xf] %vm594_vm2, %v673_v2  ;;  %596 = vst.msk [vmem:[%s224_s23 + $0x4] sm:$0xf] %vm594_vm2, %v674_v3 }
 0x3a5 PF: > { %s15_s18 = sadd.s32 1, %s786_s18  }
 0x3a6   : > { %p12_p4 = scmp.ge.s32.totalorder %s15_s18, 4  }
 0x3a8   :  { %14 = sbr.rel (!%p12_p4) target bundleno = 1 (0x1), region = 70 }

// kernel: _lambda_.42
= control target key start
LH: loop header
LB: loop body
LE: loop exit
PB: predicated region body
PF: predicated region fallthrough
CT: control target
= control target key end

     0   :  { %s578_s0 = inlined_call_operand.vmem [shape: f32[128,128], index: 0, kind: input, shape index: {}]   ;;  %s579_s1 = inlined_call_operand.vmem [shape: bf16[128,128], index: 1, kind: output, shape index: {}]  }
   0x1   :  { %v8_v0 = vld [vmem:[%s578_s0] sm:$0xff]  ;;  %v10_v1 = vld [vmem:[%s578_s0 + $0x10] sm:$0xff]  ;;  %v9_v2 = vld [vmem:[%s578_s0 + $0x8] sm:$0xff] }
   0x2   :  { %24 = vadd.xlane.f32.xlu0 %v8_v0  ;;  %28 = vadd.xlane.f32.xlu1 %v10_v1  ;;  %v11_v3 = vld [vmem:[%s578_s0 + $0x18] sm:$0xff]  ;;  %v12_v4 = vld [vmem:[%s578_s0 + $0x20] sm:$0xff]  ;;  %v13_v5 = vld [vmem:[%s578_s0 + $0x28] sm:$0xff] }
   0x3   :  { %v14_v6 = vld [vmem:[%s578_s0 + $0x30] sm:$0xff]  ;;  %v15_v7 = vld [vmem:[%s578_s0 + $0x38] sm:$0xff]  ;;  %v16_v8 = vld [vmem:[%s578_s0 + $0x40] sm:$0xff] }
   0x4   :  { %v17_v9 = vld [vmem:[%s578_s0 + $0x48] sm:$0xff]  ;;  %v18_v10 = vld [vmem:[%s578_s0 + $0x50] sm:$0xff]  ;;  %v442_v11 = vld [vmem:[%s578_s0 + $0x58] sm:$0xff] }
   0x5   :  { %v448_v12 = vld [vmem:[%s578_s0 + $0x60] sm:$0xff]  ;;  %v453_v13 = vld [vmem:[%s578_s0 + $0x68] sm:$0xff]  ;;  %v460_v14 = vld [vmem:[%s578_s0 + $0x70] sm:$0xff] }
   0x6   :  { %26 = vadd.xlane.f32.xlu0 %v9_v2  ;;  %30 = vadd.xlane.f32.xlu1 %v11_v3  ;;  %v465_v15 = vld [vmem:[%s578_s0 + $0x78] sm:$0xff] }
   0xa   :  { %32 = vadd.xlane.f32.xlu0 %v12_v4  ;;  %34 = vadd.xlane.f32.xlu1 %v13_v5 }
   0xe   :  { %36 = vadd.xlane.f32.xlu0 %v14_v6  ;;  %38 = vadd.xlane.f32.xlu1 %v15_v7 }
  0x12   :  { %40 = vadd.xlane.f32.xlu0 %v16_v8  ;;  %42 = vadd.xlane.f32.xlu1 %v17_v9 }
  0x16   :  { %44 = vadd.xlane.f32.xlu0 %v18_v10  ;;  %46 = vadd.xlane.f32.xlu1 %v442_v11 }
  0x1a   :  { %48 = vadd.xlane.f32.xlu0 %v448_v12  ;;  %50 = vadd.xlane.f32.xlu1 %v453_v13 }
  0x1e   :  { %52 = vadd.xlane.f32.xlu0 %v460_v14  ;;  %54 = vadd.xlane.f32.xlu1 %v465_v15 }
  0x8f   :  { %v25_v16 = vpop.xlane.xlu0 %24  ;;  %v29_v17 = vpop.xlane.xlu1 %28 }
  0x90   :  { %v57_v18 = vmul.f32 0.0078125, %v25_v16  ;;  %v59_v19 = vmul.f32 0.0078125, %v29_v17 }
  0x92   :  { %v469_v20 = vsub.f32 %v8_v0, %v57_v18  ;;  %v471_v21 = vsub.f32 %v10_v1, %v59_v19 }
  0x93   :  { %v27_v22 = vpop.xlane.xlu0 %26  ;;  %v31_v23 = vpop.xlane.xlu1 %30 }
  0x94   :  { %v58_v24 = vmul.f32 0.0078125, %v27_v22  ;;  %v89_v25 = vmul.f32 %v469_v20, %v469_v20  ;;  %v60_v26 = vmul.f32 0.0078125, %v31_v23  ;;  %v91_v29 = vmul.f32 %v471_v21, %v471_v21 }
  0x96   :  { %v475_v27 = vsub.f32 %v9_v2, %v58_v24  ;;  %105 = vadd.xlane.f32.xlu0 %v89_v25  ;;  %v477_v28 = vsub.f32 %v11_v3, %v60_v26 }
  0x97   :  { %v33_v30 = vpop.xlane.xlu0 %32  ;;  %v35_v31 = vpop.xlane.xlu1 %34 }
  0x98   :  { %v61_v32 = vmul.f32 0.0078125, %v33_v30  ;;  %v90_v33 = vmul.f32 %v475_v27, %v475_v27  ;;  %v62_v34 = vmul.f32 0.0078125, %v35_v31  ;;  %v92_v37 = vmul.f32 %v477_v28, %v477_v28 }
  0x9a   :  { %v483_v35 = vsub.f32 %v12_v4, %v61_v32  ;;  %109 = vadd.xlane.f32.xlu0 %v91_v29  ;;  %107 = vadd.xlane.f32.xlu1 %v90_v33  ;;  %v485_v36 = vsub.f32 %v13_v5, %v62_v34 }
  0x9b   :  { %v37_v38 = vpop.xlane.xlu0 %36  ;;  %v39_v39 = vpop.xlane.xlu1 %38 }
  0x9c   :  { %v63_v40 = vmul.f32 0.0078125, %v37_v38  ;;  %v93_v41 = vmul.f32 %v483_v35, %v483_v35  ;;  %v64_v42 = vmul.f32 0.0078125, %v39_v39  ;;  %v94_v45 = vmul.f32 %v485_v36, %v485_v36 }
  0x9e   :  { %v491_v43 = vsub.f32 %v14_v6, %v63_v40  ;;  %111 = vadd.xlane.f32.xlu1 %v92_v37  ;;  %113 = vadd.xlane.f32.xlu0 %v93_v41  ;;  %v493_v44 = vsub.f32 %v15_v7, %v64_v42 }
  0x9f   :  { %v41_v46 = vpop.xlane.xlu0 %40  ;;  %v43_v47 = vpop.xlane.xlu1 %42 }
  0xa0   :  { %v65_v48 = vmul.f32 0.0078125, %v41_v46  ;;  %v95_v49 = vmul.f32 %v491_v43, %v491_v43  ;;  %v66_v50 = vmul.f32 0.0078125, %v43_v47  ;;  %v96_v53 = vmul.f32 %v493_v44, %v493_v44 }
  0xa2   :  { %v499_v51 = vsub.f32 %v16_v8, %v65_v48  ;;  %115 = vadd.xlane.f32.xlu1 %v94_v45  ;;  %117 = vadd.xlane.f32.xlu0 %v95_v49  ;;  %v501_v52 = vsub.f32 %v17_v9, %v66_v50 }
  0xa3   :  { %v45_v54 = vpop.xlane.xlu0 %44  ;;  %v47_v55 = vpop.xlane.xlu1 %46 }
  0xa4   :  { %v67_v56 = vmul.f32 0.0078125, %v45_v54  ;;  %v97_v57 = vmul.f32 %v499_v51, %v499_v51  ;;  %v68_v58 = vmul.f32 0.0078125, %v47_v55  ;;  %v98_v61 = vmul.f32 %v501_v52, %v501_v52 }
  0xa6   :  { %v507_v59 = vsub.f32 %v18_v10, %v67_v56  ;;  %119 = vadd.xlane.f32.xlu1 %v96_v53  ;;  %121 = vadd.xlane.f32.xlu0 %v97_v57  ;;  %v510_v60 = vsub.f32 %v442_v11, %v68_v58 }
  0xa7   :  { %v49_v62 = vpop.xlane.xlu0 %48  ;;  %v51_v63 = vpop.xlane.xlu1 %50 }
  0xa8   :  { %v69_v0 = vmul.f32 0.0078125, %v49_v62  ;;  %v99_v1 = vmul.f32 %v507_v59, %v507_v59  ;;  %v70_v2 = vmul.f32 0.0078125, %v51_v63  ;;  %v100_v5 = vmul.f32 %v510_v60, %v510_v60 }
  0xaa   :  { %v517_v3 = vsub.f32 %v448_v12, %v69_v0  ;;  %123 = vadd.xlane.f32.xlu1 %v98_v61  ;;  %125 = vadd.xlane.f32.xlu0 %v99_v1  ;;  %v520_v4 = vsub.f32 %v453_v13, %v70_v2 }
  0xab   :  { %v53_v6 = vpop.xlane.xlu0 %52  ;;  %v55_v7 = vpop.xlane.xlu1 %54 }
  0xac   :  { %v71_v8 = vmul.f32 0.0078125, %v53_v6  ;;  %v101_v9 = vmul.f32 %v517_v3, %v517_v3  ;;  %v72_v10 = vmul.f32 0.0078125, %v55_v7  ;;  %v102_v13 = vmul.f32 %v520_v4, %v520_v4 }
  0xae   :  { %v527_v11 = vsub.f32 %v460_v14, %v71_v8  ;;  %127 = vadd.xlane.f32.xlu1 %v100_v5  ;;  %129 = vadd.xlane.f32.xlu0 %v101_v9  ;;  %v530_v12 = vsub.f32 %v465_v15, %v72_v10 }
  0xb0   :  { %v103_v16 = vmul.f32 %v527_v11, %v527_v11  ;;  %v104_v17 = vmul.f32 %v530_v12, %v530_v12 }
  0xb2   :  { %131 = vadd.xlane.f32.xlu1 %v102_v13  ;;  %133 = vadd.xlane.f32.xlu0 %v103_v16 }
  0xb6   :  { %135 = vadd.xlane.f32.xlu1 %v104_v17 }
 0x123   :  { %v106_v18 = vpop.xlane.xlu0 %105 }
 0x124   :  { %v137_v14 = vmul.f32 0.0078125, %v106_v18 }
 0x126   :  { %v153_v19 = vadd.f32 1e-06, %v137_v14 }
 0x127   :  { %v108_v22 = vpop.xlane.xlu1 %107  ;;  %v110_v23 = vpop.xlane.xlu0 %109 }
 0x128   :  { %v138_v24 = vmul.f32 0.0078125, %v108_v22  ;;  %v139_v15 = vmul.f32 0.0078125, %v110_v23  ;;  %364 = vrsqrt.f32 %v153_v19 }
 0x12a   :  { %v154_v25 = vadd.f32 1e-06, %v138_v24  ;;  %v155_v26 = vadd.f32 1e-06, %v139_v15 }
 0x12b   :  { %v112_v29 = vpop.xlane.xlu1 %111  ;;  %v114_v30 = vpop.xlane.xlu0 %113 }
 0x12c   :  { %366 = vrsqrt.f32 %v154_v25  ;;  %v140_v31 = vmul.f32 0.0078125, %v112_v29  ;;  %v141_v32 = vmul.f32 0.0078125, %v114_v30 }
 0x12d   :  { %368 = vrsqrt.f32 %v155_v26 }
 0x12e   :  { %v156_v33 = vadd.f32 1e-06, %v140_v31  ;;  %v157_v34 = vadd.f32 1e-06, %v141_v32 }
 0x12f   :  { %v116_v37 = vpop.xlane.xlu1 %115  ;;  %v118_v38 = vpop.xlane.xlu0 %117 }
 0x130   :  { %370 = vrsqrt.f32 %v156_v33  ;;  %v142_v39 = vmul.f32 0.0078125, %v116_v37  ;;  %v143_v40 = vmul.f32 0.0078125, %v118_v38 }
 0x131   :  { %372 = vrsqrt.f32 %v157_v34 }
 0x132   :  { %v158_v41 = vadd.f32 1e-06, %v142_v39  ;;  %v159_v42 = vadd.f32 1e-06, %v143_v40  ;;  %v365_v47 = vpop.eup %364 }
 0x133   :  { %v120_v45 = vpop.xlane.xlu1 %119  ;;  %v122_v46 = vpop.xlane.xlu0 %121  ;;  %v185_v55 = vmul.f32 %v365_v47, %v469_v20 }
 0x134   :  { %374 = vrsqrt.f32 %v158_v41  ;;  %v144_v48 = vmul.f32 0.0078125, %v120_v45  ;;  %v145_v49 = vmul.f32 0.0078125, %v122_v46 }
 0x135   :  { %376 = vrsqrt.f32 %v159_v42 }
 0x136   :  { %v367_v50 = vpop.eup %366  ;;  %v160_v53 = vadd.f32 1e-06, %v144_v48  ;;  %v161_v54 = vadd.f32 1e-06, %v145_v49 }
 0x137   :  { %v186_v56 = vmul.f32 %v367_v50, %v475_v27  ;;  %v124_v57 = vpop.xlane.xlu1 %123  ;;  %v126_v58 = vpop.xlane.xlu0 %125 }
 0x138   :  { %v369_v61 = vpop.eup %368  ;;  %378 = vrsqrt.f32 %v160_v53  ;;  %v146_v62 = vmul.f32 0.0078125, %v124_v57  ;;  %v147_v63 = vmul.f32 0.0078125, %v126_v58 }
 0x139   :  { %v320_v0 = vpack.c.bf16 %v186_v56, %v185_v55  ;;  %380 = vrsqrt.f32 %v161_v54  ;;  %v187_v6 = vmul.f32 %v369_v61, %v471_v21 }
 0x13a   :  { %v371_v1 = vpop.eup %370  ;;  %v162_v2 = vadd.f32 1e-06, %v146_v62  ;;  %v163_v5 = vadd.f32 1e-06, %v147_v63 }
 0x13b   :  { %321 = vst [vmem:[%s579_s1] sm:$0xff] %v320_v0   ;;  %v188_v20 = vmul.f32 %v371_v1, %v477_v28  ;;  %v128_v27 = vpop.xlane.xlu1 %127  ;;  %v130_v7 = vpop.xlane.xlu0 %129 }
 0x13c   :  { %v373_v8 = vpop.eup %372  ;;  %382 = vrsqrt.f32 %v162_v2  ;;  %v148_v9 = vmul.f32 0.0078125, %v128_v27  ;;  %v149_v10 = vmul.f32 0.0078125, %v130_v7 }
 0x13d   :  { %v325_v13 = vpack.c.bf16 %v188_v20, %v187_v6  ;;  %384 = vrsqrt.f32 %v163_v5  ;;  %v189_v14 = vmul.f32 %v373_v8, %v483_v35 }
 0x13e   :  { %v375_v16 = vpop.eup %374  ;;  %v164_v17 = vadd.f32 1e-06, %v148_v9  ;;  %v165_v18 = vadd.f32 1e-06, %v149_v10 }
 0x13f   :  { %357 = vst [vmem:[%s579_s1 + $0x8] sm:$0xff] %v325_v13   ;;  %v190_v21 = vmul.f32 %v375_v16, %v485_v36  ;;  %v132_v28 = vpop.xlane.xlu1 %131  ;;  %v134_v19 = vpop.xlane.xlu0 %133 }
 0x140   :  { %v377_v22 = vpop.eup %376  ;;  %386 = vrsqrt.f32 %v164_v17  ;;  %v150_v23 = vmul.f32 0.0078125, %v132_v28  ;;  %v151_v24 = vmul.f32 0.0078125, %v134_v19 }
 0x141   :  { %v330_v15 = vpack.c.bf16 %v190_v21, %v189_v14  ;;  %388 = vrsqrt.f32 %v165_v18  ;;  %v191_v30 = vmul.f32 %v377_v22, %v491_v43 }
 0x142   :  { %v379_v25 = vpop.eup %378  ;;  %v166_v26 = vadd.f32 1e-06, %v150_v23  ;;  %v167_v29 = vadd.f32 1e-06, %v151_v24 }
 0x143   :  { %358 = vst [vmem:[%s579_s1 + $0x10] sm:$0xff] %v330_v15   ;;  %v192_v35 = vmul.f32 %v379_v25, %v493_v44  ;;  %v136_v36 = vpop.xlane.xlu1 %135  ;;  %v381_v31 = vpop.eup %380 }
 0x144   :  { %390 = vrsqrt.f32 %v166_v26  ;;  %v152_v32 = vmul.f32 0.0078125, %v136_v36  ;;  %v193_v38 = vmul.f32 %v381_v31, %v499_v51 }
 0x145   :  { %v335_v33 = vpack.c.bf16 %v192_v35, %v191_v30  ;;  %392 = vrsqrt.f32 %v167_v29 }
 0x146   :  { %v383_v34 = vpop.eup %382  ;;  %v168_v37 = vadd.f32 1e-06, %v152_v32 }
 0x147   :  { %359 = vst [vmem:[%s579_s1 + $0x18] sm:$0xff] %v335_v33   ;;  %v194_v39 = vmul.f32 %v383_v34, %v501_v52  ;;  %v385_v40 = vpop.eup %384 }
 0x148   :  { %394 = vrsqrt.f32 %v168_v37  ;;  %v195_v41 = vmul.f32 %v385_v40, %v507_v59 }
 0x149   :  { %v340_v43 = vpack.c.bf16 %v194_v39, %v193_v38 }
 0x14a   :  { %v387_v44 = vpop.eup %386 }
 0x14b   :  { %360 = vst [vmem:[%s579_s1 + $0x20] sm:$0xff] %v340_v43   ;;  %v196_v42 = vmul.f32 %v387_v44, %v510_v60  ;;  %v389_v45 = vpop.eup %388 }
 0x14c   :  { %v197_v51 = vmul.f32 %v389_v45, %v517_v3 }
 0x14d   :  { %v345_v46 = vpack.c.bf16 %v196_v42, %v195_v41 }
 0x14e   :  { %v391_v47 = vpop.eup %390 }
 0x14f   :  { %361 = vst [vmem:[%s579_s1 + $0x28] sm:$0xff] %v345_v46   ;;  %v198_v52 = vmul.f32 %v391_v47, %v520_v4  ;;  %v393_v48 = vpop.eup %392 }
 0x150   :  { %v199_v59 = vmul.f32 %v393_v48, %v527_v11 }
 0x151   :  { %v350_v49 = vpack.c.bf16 %v198_v52, %v197_v51 }
 0x152   :  { %v395_v50 = vpop.eup %394 }
 0x153   :  { %362 = vst [vmem:[%s579_s1 + $0x30] sm:$0xff] %v350_v49   ;;  %v200_v60 = vmul.f32 %v395_v50, %v530_v12 }
 0x155   :  { %v355_v53 = vpack.c.bf16 %v200_v60, %v199_v59 }
 0x157   :  { %363 = vst [vmem:[%s579_s1 + $0x38] sm:$0xff] %v355_v53  }

// kernel: _lambda_.48
= control target key start
LH: loop header
LB: loop body
LE: loop exit
PB: predicated region body
PF: predicated region fallthrough
CT: control target
= control target key end

     0   :  { %s1457_s9 = smov 0   ;;  %s1727_s0 = inlined_call_operand.vmem [shape: bf16[8,5,5,32], index: 0, kind: input, shape index: {}]   ;;  %s1728_s1 = inlined_call_operand.vmem [shape: bf16[9,32,32], index: 1, kind: input, shape index: {}]   ;;  %s1729_s2 = inlined_call_operand.vmem [shape: bf16[2,4,4,32], index: 2, kind: output, shape index: {}]  }
   0x1 LB: > { %s1463_s10 = sadd.s32 4294967295, %s1437_s9   ;;  %p1219_p0 = scmp.ge.s32.totalorder %s1437_s9, 1  ;;  %s1437_s9 = sphi %s1457_s9, %s12_s9  }
   0x2   : > { %p114_p1 = scmp.lt.s32.totalorder %s1437_s9, 3 }
   0x4   : > { %p115_p2 = pnand %p1219_p0, %p114_p1 }
   0x5   : > { %v1397_v0 = vld [vmem:[%s1728_s1] sm:$0xff] (!%p115_p2)   ;;  %v1439_v1 = vmov (!%p115_p2), 0.0   ;;  %v1398_v2 = vld [vmem:[%s1728_s1 + $0x8] sm:$0xff] (!%p115_p2)   ;;  %v181_v3 = vlaneseq (!%p115_p2)  ;;  %v1399_v4 = vld [vmem:[%s1728_s1 + $0x10] sm:$0xff] (!%p115_p2)   ;;  %vm1440_vm0 = vmmov (!%p115_p2), 0   ;;  %s1220_s17 = sshll.u32 (!%p115_p2), %s1463_s10, 2 }
   0x6   : > { %118 = sbr.rel (%p115_p2) target bundleno = 332 (0x14c), region = 28  ;;  %1313 = vmatprep.subr.bf16.mxu0 (!%p115_p2), %v1439_v1  ;;  %1321 = vmatprep.subr.bf16.mxu1 (!%p115_p2), %v1439_v1  ;;  %p138_p3 = scmp.lt.s32.totalorder (!%p115_p2), %s1220_s17, 7  ;;  %v1402_v5 = vld [vmem:[%s1728_s1 + $0x18] sm:$0xff] (!%p115_p2)   ;;  %v1441_v6 = vmov (!%p115_p2), 1983009808   ;;  %vm205_vm1 = vcmask (!%p115_p2), 261120  }
   0x7   : > { %1314 = vmatpush3.bf16.msra.mxu0 (!%p115_p2), %v1397_v0  ;;  %1317 = vmatprep.mubr.msk.bf16.mxu0 (!%p115_p2), %vm1440_vm0, %v1439_v1  ;;  %v179_v7 = vunpack.c.l.s4 (!%p115_p2), %v1441_v6  ;;  %v182_v8 = vshrl.u32 (!%p115_p2), %v181_v3, 7  ;;  %vm372_vm2 = vsmask.f32 (!%p115_p2), 1280  ;;  %vm373_vm3 = vsmask.f32 (!%p115_p2), 3336  ;;  %v1407_v28 = vld [vmem:[%s1728_s1 + $0x20] sm:$0xff] (!%p115_p2)  }
   0x8   : > { %1315 = vmatprep.subr.bf16.mxu0 (!%p115_p2), %v1439_v1  ;;  %1325 = vmatprep.mubr.msk.bf16.mxu1 (!%p115_p2), %vm1440_vm0, %v1439_v1  ;;  %vm375_vm4 = vsmask.f32 (!%p115_p2), 5392  ;;  %vm377_vm5 = vsmask.f32 (!%p115_p2), 7448  ;;  %vm1528_vm6 = vmor (!%p115_p2), %vm372_vm2, %vm373_vm3  ;;  %v1408_v57 = vld [vmem:[%s1728_s1 + $0x28] sm:$0xff] (!%p115_p2)   ;;  %p144_p4 = scmp.lt.s32.totalorder (!%p115_p2), %s1463_s10, 1 }
   0x9   : > { %1322 = vmatpush3.bf16.msra.mxu1 (!%p115_p2), %v1399_v4  ;;  %v180_v9 = vunpack.c.0.s8 (!%p115_p2), %v179_v7  ;;  %vm1542_vm7 = vmor (!%p115_p2), %vm1528_vm6, %vm375_vm4  ;;  %vm1155_vm9 = vcmask (!%p115_p2), 254976  }
   0xa   : > { %1323 = vmatprep.subr.bf16.mxu1 (!%p115_p2), %v1439_v1  ;;  %vm1557_vm8 = vmor (!%p115_p2), %vm1542_vm7, %vm377_vm5 }
   0xb   : > { %1316 = vmatpush3.bf16.msra.mxu0 (!%p115_p2), %v1398_v2  ;;  %v1494_v10 = vsub.s32 (!%p115_p2), %v180_v9, %v182_v8 }
   0xc   : > { %1329 = vmatprep.subr.bf16.mxu0 (!%p115_p2), %v1439_v1 }
   0xd   : > { %s1737_s17 = smov (!%p138_p3, %s1220_s17), 7  ;;  %1324 = vmatpush3.bf16.msra.mxu1 %v1402_v5  ;;  %s1739_s10 = smov (!%p144_p4, %s1463_s10), 1 }
   0xe   : > { %s1385_s20 = smul.u32 20, %s1737_s17  ;;  %1337 = vmatprep.subr.bf16.mxu1 %v1439_v1  ;;  %s1285_s26 = sshll.u32 %s1739_s10, 3 }
   0xf   : > { %s148_s29 = scalar_lea.vmem %s1729_s2, %s1285_s26 }
  0x10   : > { %s1492_s23 = scalar_lea.vmem %s1727_s0, %s1385_s20 }
  0x11   : > { %v150_v11 = vld [vmem:[%s1492_s23] sm:$0x7]  ;;  %v1499_v12 = vld [vmem:[%s1492_s23 + $0x4] sm:$0x7]  ;;  %v1502_v13 = vld [vmem:[%s1492_s23 + $0x8] sm:$0x7] }
  0x12   : > { %v1505_v14 = vld [vmem:[%s1492_s23 + $0xc] sm:$0x7]  ;;  %v176_v15 = vcombine.low %v150_v11, %v1499_v12  ;;  %v346_v16 = vrot.slane %v150_v11, %v1494_v10  ;;  %v354_v17 = vrot.slane %v1499_v12, %v1494_v10  ;;  %v362_v18 = vrot.slane %v1502_v13, %v1494_v10  ;;  %v155_v19 = vld [vmem:[%s1492_s23 + $0x14] sm:$0x7]  ;;  %v1515_v20 = vld [vmem:[%s1492_s23 + $0x18] sm:$0x7] }
  0x13   : > { %v177_v21 = vcombine.low %v1502_v13, %v1505_v14  ;;  %v370_v22 = vrot.slane %v1505_v14, %v1494_v10  ;;  %v261_v23 = vcombine.low %v155_v19, %v1515_v20  ;;  %v1534_v34 = vld [vmem:[%s1492_s23 + $0x1c] sm:$0x7]  ;;  %v1537_v35 = vld [vmem:[%s1492_s23 + $0x20] sm:$0x7]  ;;  %v160_v59 = vld [vmem:[%s1492_s23 + $0x28] sm:$0x7]  ;;  %v873_v6 = vcombine.low %v1499_v12, %v1502_v13 }
  0x14   : > { %v184_v24 = vrot.slane %v176_v15, %v1494_v10  ;;  %v347_v25 = vcombine.high %v346_v16, %v346_v16  ;;  %v355_v26 = vcombine.high %v354_v17, %v354_v17  ;;  %v363_v27 = vcombine.high %v362_v18, %v362_v18  ;;  %v161_v60 = vld [vmem:[%s1492_s23 + $0x2c] sm:$0x7]  ;;  %v162_v61 = vld [vmem:[%s1492_s23 + $0x30] sm:$0x7]  ;;  %v163_v5 = vld [vmem:[%s1492_s23 + $0x34] sm:$0x7] }
  0x15   : > { %v191_v30 = vrot.slane %v177_v21, %v1494_v10  ;;  %v371_v31 = vcombine.high %v370_v22, %v370_v22  ;;  %v380_v32 = vshrl.u32 %v346_v16, 16  ;;  %v383_v33 = vshll.u32 %v346_v16, 16  ;;  %v1409_v15 = vld [vmem:[%s1728_s1 + $0x30] sm:$0xff]  }
  0x16   : > { %v389_v36 = vshll.u32 %v347_v25, 16  ;;  %v394_v37 = vshrl.u32 %v354_v17, 16  ;;  %v397_v38 = vshll.u32 %v354_v17, 16  ;;  %v403_v39 = vshll.u32 %v355_v26, 16  ;;  %v1423_v12 = vld [vmem:[%s1728_s1 + $0x70] sm:$0xff]  }
  0x17   : > { %v192_v40 = vcombine.low %v184_v24, %v191_v30  ;;  %v382_v41 = vrot.slane %v380_v32, 6  ;;  %v385_v42 = vrot.slane %v383_v33, 7  ;;  %v408_v43 = vshrl.u32 %v362_v18, 16  ;;  %v1410_v32 = vld [vmem:[%s1728_s1 + $0x38] sm:$0xff]  }
  0x18   : > { %v391_v45 = vrot.slane %v389_v36, 7  ;;  %v396_v46 = vrot.slane %v394_v37, 6  ;;  %v399_v47 = vrot.slane %v397_v38, 7  ;;  %v411_v48 = vshll.u32 %v362_v18, 16 }
  0x19   : > { %1318 = vmatmul.mubr.msk.bf16.vlgmr.msra.gmra.mrb[0].mxu0 %vm205_vm1, %v192_v40  ;;  %v386_v49 = vor.u32 %v385_v42, %v382_v41  ;;  %v410_v50 = vrot.slane %v408_v43, 6  ;;  %v417_v51 = vshll.u32 %v363_v27, 16  ;;  %v422_v52 = vshrl.u32 %v370_v22, 16 }
  0x1a   : > { %v413_v53 = vrot.slane %v411_v48, 7  ;;  %v425_v54 = vshll.u32 %v370_v22, 16  ;;  %v431_v55 = vshll.u32 %v371_v31, 16  ;;  %v262_v56 = vcombine.low %v1534_v34, %v1537_v35  ;;  %1330 = vmatpush3.bf16.msra.mxu0 %v1407_v28  ;;  %1333 = vmatprep.mubr.msk.bf16.mxu0 %vm1440_vm0, %v1439_v1 }
  0x1b   : > { %v387_v62 = vrot.slane %v386_v49, 2  ;;  %v424_v63 = vrot.slane %v422_v52, 6  ;;  %v269_v0 = vrot.slane %v261_v23, %v1494_v10  ;;  %1331 = vmatprep.subr.bf16.mxu0 %v1439_v1  ;;  %v400_v4 = vor.u32 %v399_v47, %v396_v46  ;;  %v1585_v29 = vld.sshfl [vmem:[%s1492_s23 + $0x3c] sm:$0x5f pattern:$0x76325410] }
  0x1c   : > { %v427_v2 = vrot.slane %v425_v54, 7  ;;  %v276_v3 = vrot.slane %v262_v56, %v1494_v10  ;;  %v405_v8 = vrot.slane %v403_v39, 7  ;;  %v414_v9 = vor.u32 %v413_v53, %v410_v50  ;;  %v1599_v37 = vld.sshfl [vmem:[%s1492_s23 + $0x44] sm:$0x5f pattern:$0x76325410] }
  0x1d   : > { %v392_v7 = vsel %vm1557_vm8, %v387_v62, %v391_v45  ;;  %v419_v11 = vrot.slane %v417_v51, 7  ;;  %v401_v17 = vrot.slane %v400_v4, 2  ;;  %v433_v19 = vrot.slane %v431_v55, 7  ;;  %v1417_v54 = vld [vmem:[%s1728_s1 + $0x50] sm:$0xff]  }
  0x1e   : > { %v277_v16 = vcombine.low %v269_v0, %v276_v3  ;;  %1332 = vmatpush3.bf16.msra.mxu0 %v1408_v57  ;;  %v428_v18 = vor.u32 %v427_v2, %v424_v63  ;;  %v415_v21 = vrot.slane %v414_v9, 2  ;;  %v528_v22 = vcombine.low %v160_v59, %v161_v60  ;;  %v1414_v9 = vld [vmem:[%s1728_s1 + $0x48] sm:$0xff]  }
  0x1f   : > { %v529_v23 = vcombine.low %v162_v61, %v163_v5  ;;  %v701_v24 = vrot.slane %v160_v59, %v1494_v10  ;;  %1345 = vmatprep.subr.bf16.mxu0 %v1439_v1  ;;  %v1580_v25 = vsel %vm1557_vm8, %v401_v17, %v405_v8  ;;  %v709_v27 = vrot.slane %v161_v60, %v1494_v10  ;;  %v1413_v59 = vld [vmem:[%s1728_s1 + $0x40] sm:$0xff]  }
  0x20   : > { %1326 = vmatmul.mubr.msk.bf16.vlgmr.msra.gmra.mrb[0].mxu1 %vm205_vm1, %v277_v16  ;;  %v429_v26 = vrot.slane %v428_v18, 2  ;;  %v717_v28 = vrot.slane %v162_v61, %v1494_v10  ;;  %v1589_v30 = vsel %vm1557_vm8, %v415_v21, %v419_v11  ;;  %v440_v31 = vcombine.low %v392_v7, %v1580_v25  ;;  %v154_v18 = vld [vmem:[%s1492_s23 + $0x10] sm:$0x7] }
  0x21   : > { %1338 = vmatpush3.bf16.msra.mxu1 %v1409_v15  ;;  %1341 = vmatprep.mubr.msk.bf16.mxu1 %vm1440_vm0, %v1439_v1  ;;  %v536_v33 = vrot.slane %v528_v22, %v1494_v10  ;;  %v728_v36 = vshrl.u32 %v701_v24, 16  ;;  %v543_v39 = vrot.slane %v529_v23, %v1494_v10  ;;  %v725_v40 = vrot.slane %v163_v5, %v1494_v10  ;;  %v1418_v5 = vld [vmem:[%s1728_s1 + $0x58] sm:$0xff]  }
  0x22   : > { %v1603_v38 = vsel %vm1557_vm8, %v429_v26, %v433_v19  ;;  %1339 = vmatprep.subr.bf16.mxu1 %v1439_v1  ;;  %v731_v41 = vshll.u32 %v701_v24, 16  ;;  %v448_v43 = vrot.slane %v440_v31, %v1494_v10  ;;  %v742_v45 = vshrl.u32 %v709_v27, 16 }
  0x23   : > { %v441_v42 = vcombine.low %v1589_v30, %v1603_v38  ;;  %v730_v44 = vrot.slane %v728_v36, 6  ;;  %v544_v46 = vcombine.low %v536_v33, %v543_v39  ;;  %v745_v48 = vshll.u32 %v709_v27, 16  ;;  %v1419_v39 = vld [vmem:[%s1728_s1 + $0x60] sm:$0xff]  }
  0x24   : > { %v733_v47 = vrot.slane %v731_v41, 7  ;;  %v756_v49 = vshrl.u32 %v717_v28, 16  ;;  %v744_v51 = vrot.slane %v742_v45, 6  ;;  %v759_v52 = vshll.u32 %v717_v28, 16  ;;  %v159_v41 = vld [vmem:[%s1492_s23 + $0x24] sm:$0x7] }
  0x25   : > { %v455_v50 = vrot.slane %v441_v42, %v1494_v10  ;;  %1340 = vmatpush3.bf16.msra.mxu1 %v1410_v32  ;;  %v770_v53 = vshrl.u32 %v725_v40, 16  ;;  %v747_v55 = vrot.slane %v745_v48, 7  ;;  %v773_v57 = vshll.u32 %v725_v40, 16 }
  0x26   : > { %v758_v56 = vrot.slane %v756_v49, 6  ;;  %1353 = vmatprep.subr.bf16.mxu1 %v1439_v1  ;;  %v761_v61 = vrot.slane %v759_v52, 7  ;;  %v702_v0 = vcombine.high %v701_v24, %v701_v24  ;;  %v710_v2 = vcombine.high %v709_v27, %v709_v27 }
  0x27   : > { %v456_v60 = vcombine.low %v448_v43, %v455_v50  ;;  %v772_v62 = vrot.slane %v770_v53, 6  ;;  %v775_v63 = vrot.slane %v773_v57, 7  ;;  %v718_v3 = vcombine.high %v717_v28, %v717_v28 }
  0x28   : > { %1342 = vmatmul.mubr.msk.bf16.vlgmr.msra.gmra.mrb[4].mxu1 %vm205_vm1, %v544_v46  ;;  %v632_v4 = vcombine.low %v1585_v29, %v1599_v37  ;;  %v726_v7 = vcombine.high %v725_v40, %v725_v40  ;;  %v734_v8 = vor.u32 %v733_v47, %v730_v44  ;;  %v737_v11 = vshll.u32 %v702_v0, 16 }
  0x29   : > { %1334 = vmatmul.mubr.msk.bf16.vlgmr.msra.gmra.mrb[4].mxu0 %vm205_vm1, %v456_v60  ;;  %1354 = vmatpush3.bf16.msra.mxu1 %v1417_v54  ;;  %v748_v15 = vor.u32 %v747_v55, %v744_v51  ;;  %v751_v16 = vshll.u32 %v710_v2, 16  ;;  %v762_v17 = vor.u32 %v761_v61, %v758_v56  ;;  %v765_v21 = vshll.u32 %v718_v3, 16  ;;  %v1425_v61 = vld [vmem:[%s1728_s1 + $0x80] sm:$0xff]   ;;  %v1426_v3 = vld [vmem:[%s1728_s1 + $0x88] sm:$0xff]  }
  0x2a   : > { %1346 = vmatpush3.bf16.msra.mxu0 %v1413_v59  ;;  %1349 = vmatprep.mubr.msk.bf16.mxu0 %vm1440_vm0, %v1439_v1  ;;  %v735_v19 = vrot.slane %v734_v8, 2  ;;  %v776_v22 = vor.u32 %v775_v63, %v772_v62  ;;  %v779_v23 = vshll.u32 %v726_v7, 16  ;;  %v739_v24 = vrot.slane %v737_v11, 7  ;;  %v1424_v63 = vld [vmem:[%s1728_s1 + $0x78] sm:$0xff]  }
  0x2b   : > { %1347 = vmatprep.subr.bf16.mxu0 %v1439_v1  ;;  %1355 = vmatprep.subr.bf16.mxu1 %v1439_v1  ;;  %v749_v26 = vrot.slane %v748_v15, 2  ;;  %v753_v27 = vrot.slane %v751_v16, 7  ;;  %v763_v28 = vrot.slane %v762_v17, 2  ;;  %v767_v29 = vrot.slane %v765_v21, 7 }
  0x2c   : > { %1357 = vmatprep.mubr.msk.bf16.mxu1 %vm1440_vm0, %v1439_v1  ;;  %v777_v31 = vrot.slane %v776_v22, 2  ;;  %v781_v32 = vrot.slane %v779_v23, 7  ;;  %v874_v33 = vcombine.low %v1505_v14, %v154_v18  ;;  %v740_v36 = vsel %vm1557_vm8, %v735_v19, %v739_v24 }
  0x2d   : > { %1356 = vmatpush3.bf16.msra.mxu1 %v1418_v5  ;;  %v754_v37 = vsel %vm1557_vm8, %v749_v26, %v753_v27  ;;  %v1043_v40 = vrot.slane %v154_v18, %v1494_v10  ;;  %v768_v42 = vsel %vm1557_vm8, %v763_v28, %v767_v29  ;;  %v958_v44 = vcombine.low %v1515_v20, %v1534_v34  ;;  %v1420_v34 = vld [vmem:[%s1728_s1 + $0x68] sm:$0xff]  }
  0x2e   : > { %1348 = vmatpush3.bf16.msra.mxu0 %v1414_v9  ;;  %v782_v14 = vsel %vm1557_vm8, %v777_v31, %v781_v32  ;;  %v788_v43 = vcombine.low %v740_v36, %v754_v37  ;;  %1369 = vmatprep.subr.bf16.mxu1 %v1439_v1  ;;  %v881_v49 = vrot.slane %v873_v6, %v1494_v10 }
  0x2f   : > { %1361 = vmatprep.subr.bf16.mxu0 %v1439_v1  ;;  %v789_v45 = vcombine.low %v768_v42, %v782_v14  ;;  %v1046_v46 = vshrl.u32 %v1043_v40, 16  ;;  %v1049_v47 = vshll.u32 %v1043_v40, 16  ;;  %v888_v50 = vrot.slane %v874_v33, %v1494_v10 }
  0x30   : > { %v796_v48 = vrot.slane %v788_v43, %v1494_v10  ;;  %v1044_v51 = vcombine.high %v1043_v40, %v1043_v40  ;;  %v959_v52 = vcombine.low %v1537_v35, %v159_v41  ;;  %v1064_v57 = vcombine.low %v1580_v25, %v1589_v30 }
  0x31   : > { %1350 = vmatmul.mubr.msk.bf16.vlgmr.msra.gmra.mrb[8].mxu0 %vm205_vm1, %v632_v4  ;;  %v803_v20 = vrot.slane %v789_v45, %v1494_v10  ;;  %v1048_v53 = vrot.slane %v1046_v46, 6  ;;  %v1051_v54 = vrot.slane %v1049_v47, 7  ;;  %v889_v55 = vcombine.low %v881_v49, %v888_v50 }
  0x32   : > { %1362 = vmatpush3.bf16.msra.mxu0 %v1419_v39  ;;  %1365 = vmatprep.mubr.msk.bf16.mxu0 %vm1440_vm0, %v1439_v1  ;;  %v1055_v13 = vshll.u32 %v1044_v51, 16  ;;  %v966_v59 = vrot.slane %v958_v44, %v1494_v10  ;;  %v973_v60 = vrot.slane %v959_v52, %v1494_v10  ;;  %v1072_v0 = vrot.slane %v1064_v57, %v1494_v10 }
  0x33   : > { %1363 = vmatprep.subr.bf16.mxu0 %v1439_v1  ;;  %v804_v35 = vcombine.low %v796_v48, %v803_v20  ;;  %v1052_v6 = vor.u32 %v1051_v54, %v1048_v53 }
  0x34   : > { %v1057_v56 = vrot.slane %v1055_v13, 7  ;;  %v974_v2 = vcombine.low %v966_v59, %v973_v60 }
  0x35   : > { %1358 = vmatmul.mubr.msk.bf16.vlgmr.msra.gmra.mrb[8].mxu1 %vm205_vm1, %v804_v35  ;;  %v1053_v62 = vrot.slane %v1052_v6, 2 }
  0x36   : > { %1364 = vmatpush3.bf16.msra.mxu0 %v1420_v34  ;;  %1370 = vmatpush3.bf16.msra.mxu1 %v1423_v12 }
  0x37   : > { %1373 = vmatprep.mubr.msk.bf16.mxu1 %vm1440_vm0, %v1439_v1  ;;  %1371 = vmatprep.subr.bf16.mxu1 %v1439_v1  ;;  %v1058_v25 = vsel %vm1557_vm8, %v1053_v62, %v1057_v56 }
  0x38   : > { %1377 = vmatprep.subr.bf16.mxu0 %v1439_v1  ;;  %v1065_v30 = vcombine.low %v1603_v38, %v1058_v25 }
  0x39   : > { %1366 = vmatmul.mubr.msk.bf16.vlgmr.msra.gmra.mrb[12].mxu0 %vm205_vm1, %v889_v55 }
  0x3a   : > { %1378 = vmatpush3.bf16.msra.mxu0 %v1425_v61  ;;  %1381 = vmatprep.mubr.msk.bf16.mxu0 %vm1440_vm0, %v1439_v1  ;;  %v1079_v58 = vrot.slane %v1065_v30, %v1494_v10 }
  0x3b   : > { %1372 = vmatpush3.bf16.msra.mxu1 %v1424_v63  ;;  %1379 = vmatprep.subr.bf16.mxu0 %v1439_v1 }
  0x3c   : > { %v1080_v4 = vcombine.low %v1072_v0, %v1079_v58 }
  0x3e   : > { %1374 = vmatmul.mubr.msk.bf16.vlgmr.msra.gmra.mrb[12].mxu1 %vm205_vm1, %v974_v2  ;;  %1380 = vmatpush3.bf16.msra.mxu0 %v1426_v3 }
  0x41   : > { %1382 = vmatmul.mubr.msk.bf16.vlgmr.msra.gmra.mrb[16].mxu0 %vm205_vm1, %v1080_v4 }
  0xec   : > { %v243_v38 = vpop.f32.mrb[0].mxu0 }
  0xed   : > { %250 = vst.msk [vmem:[#allocation2] sm:$0xff] %vm205_vm1, %v243_v38  ;;  %v1319_v5 = vpop.f32.mrb[1].mxu0 }
  0xee   : > { %v246_v7 = vpop.f32.mrb[2].mxu0 }
  0xef   : > { %251 = vst.msk [vmem:[#allocation2 + $0x8] sm:$0xff] %vm205_vm1, %v246_v7  ;;  %v1320_v8 = vpop.f32.mrb[3].mxu0 }
  0xf3   : > { %v327_v9 = vpop.f32.mrb[0].mxu1 }
  0xf4   : > { %v334_v11 = vld [vmem:[#allocation2] sm:$0xff]  ;;  %v1327_v15 = vpop.f32.mrb[1].mxu1 }
  0xf5   : > { %v336_v1 = vadd.f32 %v334_v11, %v327_v9  ;;  %v330_v16 = vpop.f32.mrb[2].mxu1 }
  0xf6   : > { %v335_v10 = vld [vmem:[#allocation2 + $0x8] sm:$0xff]  ;;  %v1328_v17 = vpop.f32.mrb[3].mxu1 }
  0xf7   : > { %338 = vst.msk [vmem:[#allocation2] sm:$0xff] %vm205_vm1, %v336_v1  ;;  %v337_v18 = vadd.f32 %v335_v10, %v330_v16 }
  0xf9   : > { %339 = vst.msk [vmem:[#allocation2 + $0x8] sm:$0xff] %vm205_vm1, %v337_v18 }
  0xfb   : > { %v594_v19 = vpop.f32.mrb[4].mxu1 }
  0xfc   : > { %v506_v21 = vpop.f32.mrb[4].mxu0  ;;  %v1343_v22 = vpop.f32.mrb[5].mxu1 }
  0xfd   : > { %v1335_v23 = vpop.f32.mrb[5].mxu0  ;;  %v597_v24 = vpop.f32.mrb[6].mxu1 }
  0xfe   : > { %v513_v26 = vld [vmem:[#allocation2] sm:$0xff]  ;;  %v509_v27 = vpop.f32.mrb[6].mxu0  ;;  %v1344_v28 = vpop.f32.mrb[7].mxu1 }
  0xff   : > { %v515_v29 = vadd.f32 %v513_v26, %v506_v21  ;;  %v1336_v31 = vpop.f32.mrb[7].mxu0 }
 0x100   : > { %v514_v32 = vld [vmem:[#allocation2 + $0x8] sm:$0xff] }
 0x101   : > { %517 = vst.msk [vmem:[#allocation2] sm:$0xff] %vm205_vm1, %v515_v29  ;;  %v516_v33 = vadd.f32 %v514_v32, %v509_v27 }
 0x103   : > { %518 = vst.msk [vmem:[#allocation2 + $0x8] sm:$0xff] %vm205_vm1, %v516_v33 }
 0x104   : > { %v682_v36 = vpop.f32.mrb[8].mxu0 }
 0x105   : > { %v1351_v37 = vpop.f32.mrb[9].mxu0 }
 0x106   : > { %v685_v39 = vpop.f32.mrb[10].mxu0 }
 0x107   : > { %v1352_v40 = vpop.f32.mrb[11].mxu0 }
 0x108   : > { %v601_v41 = vld [vmem:[#allocation2] sm:$0xff]  ;;  %v854_v14 = vpop.f32.mrb[8].mxu1 }
 0x109   : > { %v603_v42 = vadd.f32 %v601_v41, %v594_v19  ;;  %v1359_v44 = vpop.f32.mrb[9].mxu1 }
 0x10a   : > { %v602_v43 = vld [vmem:[#allocation2 + $0x8] sm:$0xff]  ;;  %v857_v46 = vpop.f32.mrb[10].mxu1 }
 0x10b   : > { %605 = vst.msk [vmem:[#allocation2] sm:$0xff] %vm205_vm1, %v603_v42  ;;  %v604_v45 = vadd.f32 %v602_v43, %v597_v24  ;;  %v1360_v47 = vpop.f32.mrb[11].mxu1 }
 0x10c   : > { %v939_v48 = vpop.f32.mrb[12].mxu0 }
 0x10d   : > { %606 = vst.msk [vmem:[#allocation2 + $0x8] sm:$0xff] %vm205_vm1, %v604_v45  ;;  %v1367_v49 = vpop.f32.mrb[13].mxu0 }
 0x10e   : > { %v942_v50 = vpop.f32.mrb[14].mxu0 }
 0x10f   : > { %v1368_v51 = vpop.f32.mrb[15].mxu0 }
 0x111   : > { %v1024_v52 = vpop.f32.mrb[12].mxu1 }
 0x112   : > { %v689_v20 = vld [vmem:[#allocation2] sm:$0xff]  ;;  %v1375_v34 = vpop.f32.mrb[13].mxu1 }
 0x113   : > { %v691_v53 = vadd.f32 %v689_v20, %v682_v36  ;;  %v1027_v54 = vpop.f32.mrb[14].mxu1 }
 0x114   : > { %v690_v12 = vld [vmem:[#allocation2 + $0x8] sm:$0xff]  ;;  %v1376_v13 = vpop.f32.mrb[15].mxu1  ;;  %v1130_v35 = vpop.f32.mrb[16].mxu0 }
 0x115   : > { %693 = vst.msk [vmem:[#allocation2] sm:$0xff] %vm205_vm1, %v691_v53  ;;  %v692_v6 = vadd.f32 %v690_v12, %v685_v39  ;;  %v1383_v55 = vpop.f32.mrb[17].mxu0 }
 0x116   : > { %v1133_v56 = vpop.f32.mrb[18].mxu0 }
 0x117   : > { %694 = vst.msk [vmem:[#allocation2 + $0x8] sm:$0xff] %vm205_vm1, %v692_v6  ;;  %v1384_v57 = vpop.f32.mrb[19].mxu0 }
 0x11c   : > { %v861_v59 = vld [vmem:[#allocation2] sm:$0xff] }
 0x11d   : > { %v863_v60 = vadd.f32 %v861_v59, %v854_v14 }
 0x11e   : > { %v862_v61 = vld [vmem:[#allocation2 + $0x8] sm:$0xff] }
 0x11f   : > { %865 = vst.msk [vmem:[#allocation2] sm:$0xff] %vm205_vm1, %v863_v60  ;;  %v864_v62 = vadd.f32 %v862_v61, %v857_v46 }
 0x121   : > { %866 = vst.msk [vmem:[#allocation2 + $0x8] sm:$0xff] %vm205_vm1, %v864_v62 }
 0x126   : > { %v946_v63 = vld [vmem:[#allocation2] sm:$0xff] }
 0x127   : > { %v948_v25 = vadd.f32 %v946_v63, %v939_v48 }
 0x128   : > { %v947_v30 = vld [vmem:[#allocation2 + $0x8] sm:$0xff] }
 0x129   : > { %950 = vst.msk [vmem:[#allocation2] sm:$0xff] %vm205_vm1, %v948_v25  ;;  %v949_v0 = vadd.f32 %v947_v30, %v942_v50 }
 0x12b   : > { %951 = vst.msk [vmem:[#allocation2 + $0x8] sm:$0xff] %vm205_vm1, %v949_v0 }
 0x130   : > { %v1031_v2 = vld [vmem:[#allocation2] sm:$0xff] }
 0x131   : > { %v1033_v3 = vadd.f32 %v1031_v2, %v1024_v52 }
 0x132   : > { %v1032_v58 = vld [vmem:[#allocation2 + $0x8] sm:$0xff] }
 0x133   : > { %1035 = vst.msk [vmem:[#allocation2] sm:$0xff] %vm205_vm1, %v1033_v3  ;;  %v1034_v4 = vadd.f32 %v1032_v58, %v1027_v54 }
 0x135   : > { %1036 = vst.msk [vmem:[#allocation2 + $0x8] sm:$0xff] %vm205_vm1, %v1034_v4 }
 0x13a   : > { %v1137_v38 = vld [vmem:[#allocation2] sm:$0xff] }
 0x13b   : > { %v1139_v5 = vadd.f32 %v1137_v38, %v1130_v35 }
 0x13c   : > { %v1138_v7 = vld [vmem:[#allocation2 + $0x8] sm:$0xff] }
 0x13d   : > { %1141 = vst.msk [vmem:[#allocation2] sm:$0xff] %vm205_vm1, %v1139_v5  ;;  %v1140_v8 = vadd.f32 %v1138_v7, %v1133_v56 }
 0x13f   : > { %1142 = vst.msk [vmem:[#allocation2 + $0x8] sm:$0xff] %vm205_vm1, %v1140_v8 }
 0x144   : > { %v1143_v9 = vld [vmem:[#allocation2] sm:$0xff] }
 0x145   : > { %v1147_v11 = vcombine.high %v1143_v9, %v1143_v9  ;;  %v1151_v15 = vpack.c.bf16 %v1143_v9, %v1143_v9 }
 0x146   : > { %v1144_v1 = vld [vmem:[#allocation2 + $0x8] sm:$0xff] }
 0x147   : > { %v1152_v16 = vpack.c.bf16 %v1147_v11, %v1147_v11  ;;  %1156 = vst.msk [vmem:[%s148_s29] sm:$0x3] %vm1155_vm9, %v1151_v15  ;;  %v1148_v10 = vcombine.high %v1144_v1, %v1144_v1  ;;  %v1153_v17 = vpack.c.bf16 %v1144_v1, %v1144_v1 }
 0x149   : > { %1157 = vst.msk [vmem:[%s148_s29 + $0x2] sm:$0x3] %vm1155_vm9, %v1152_v16  ;;  %v1154_v18 = vpack.c.bf16 %v1148_v10, %v1148_v10  ;;  %1158 = vst.msk [vmem:[%s148_s29 + $0x4] sm:$0x3] %vm1155_vm9, %v1153_v17 }
 0x14b   : > { %1159 = vst.msk [vmem:[%s148_s29 + $0x6] sm:$0x3] %vm1155_vm9, %v1154_v18 }
 0x14c PF: > { %s12_s9 = sadd.s32 1, %s1437_s9  }
 0x14d   : > { %p9_p5 = scmp.ge.s32.totalorder %s12_s9, 4  }
 0x14f   :  { %11 = sbr.rel (!%p9_p5) target bundleno = 1 (0x1), region = 66 }

// kernel: _lambda_.43
= control target key start
LH: loop header
LB: loop body
LE: loop exit
PB: predicated region body
PF: predicated region fallthrough
CT: control target
= control target key end

     0   :  { %s285_s1 = inlined_call_operand.vmem [shape: bf16[128,128], index: 1, kind: input, shape index: {}]   ;;  %s286_s0 = inlined_call_operand.vmem [shape: bf16[32,128], index: 0, kind: input, shape index: {}]   ;;  %s287_s2 = inlined_call_operand.vmem [shape: bf16[32,128], index: 2, kind: output, shape index: {}]  }
   0x1   :  { %v224_v0 = vld [vmem:[%s285_s1] sm:$0xff]   ;;  %v225_v1 = vld [vmem:[%s285_s1 + $0x8] sm:$0xff]   ;;  %v226_v2 = vld [vmem:[%s285_s1 + $0x10] sm:$0xff]  }
   0x2   :  { %204 = vmatprep.subr.bf16.mxu0 %v224_v0  ;;  %v227_v3 = vld [vmem:[%s285_s1 + $0x18] sm:$0xff]   ;;  %v232_v4 = vld [vmem:[%s286_s0] sm:$0xff]   ;;  %v229_v6 = vld [vmem:[%s285_s1 + $0x28] sm:$0xff]  }
   0x3   :  { %205 = vmatpush3.bf16.msra.mxu0 %v224_v0  ;;  %220 = vmatprep.mubr.bf16.mxu0 %v232_v4  ;;  %v228_v5 = vld [vmem:[%s285_s1 + $0x20] sm:$0xff]   ;;  %v230_v7 = vld [vmem:[%s285_s1 + $0x30] sm:$0xff]   ;;  %v231_v8 = vld [vmem:[%s285_s1 + $0x38] sm:$0xff]  }
   0x4   :  { %206 = vmatprep.subr.bf16.mxu0 %v225_v1  ;;  %v233_v9 = vld [vmem:[%s286_s0 + $0x8] sm:$0xff]  }
   0x7   :  { %207 = vmatpush3.bf16.msra.mxu0 %v225_v1 }
   0x8   :  { %208 = vmatprep.subr.bf16.mxu0 %v226_v2 }
   0xb   :  { %209 = vmatpush3.bf16.msra.mxu0 %v226_v2 }
   0xc   :  { %210 = vmatprep.subr.bf16.mxu0 %v227_v3 }
   0xf   :  { %211 = vmatpush3.bf16.msra.mxu0 %v227_v3 }
  0x10   :  { %212 = vmatprep.subr.bf16.mxu0 %v228_v5 }
  0x13   :  { %213 = vmatpush3.bf16.msra.mxu0 %v228_v5 }
  0x14   :  { %214 = vmatprep.subr.bf16.mxu0 %v229_v6 }
  0x17   :  { %215 = vmatpush3.bf16.msra.mxu0 %v229_v6 }
  0x18   :  { %216 = vmatprep.subr.bf16.mxu0 %v230_v7 }
  0x1b   :  { %217 = vmatpush3.bf16.msra.mxu0 %v230_v7 }
  0x1c   :  { %218 = vmatprep.subr.bf16.mxu0 %v231_v8 }
  0x1f   :  { %219 = vmatpush3.bf16.msra.mxu0 %v231_v8 }
  0x22   :  { %221 = vmatmul.mubr.bf16.vlgmr.msra.gmra.mrb[0].mxu0 %v233_v9 }
  0xf5   :  { %v222_v10 = vpop.f32.mrb[0].mxu0 }
  0xf6   :  { %v126_v11 = vpop.f32.mrb[1].mxu0 }
  0xf7   :  { %v223_v12 = vpop.f32.mrb[2].mxu0 }
  0xf8   :  { %v191_v13 = vpack.c.bf16 %v223_v12, %v222_v10  ;;  %v129_v14 = vpop.f32.mrb[3].mxu0 }
  0xf9   :  { %v186_v15 = vpack.c.bf16 %v129_v14, %v126_v11 }
  0xfa   :  { %193 = vst [vmem:[%s287_s2 + $0x8] sm:$0xff] %v191_v13  }
  0xfb   :  { %187 = vst [vmem:[%s287_s2] sm:$0xff] %v186_v15  }

// kernel: _lambda_.51
= control target key start
LH: loop header
LB: loop body
LE: loop exit
PB: predicated region body
PF: predicated region fallthrough
CT: control target
= control target key end

     0   :  { %vm53_vm0 = vcmask 261120   ;;  %s227_s1 = inlined_call_operand.vmem [shape: bf16[32,128], index: 1, kind: input, shape index: {}]   ;;  %s228_s0 = inlined_call_operand.vmem [shape: bf16[32,32], index: 0, kind: input, shape index: {}]   ;;  %s229_s2 = inlined_call_operand.vmem [shape: bf16[32,128], index: 2, kind: input, shape index: {}]   ;;  %s230_s3 = inlined_call_operand.vmem [shape: bf16[32,128], index: 3, kind: output, shape index: {}]  }
   0x1   :  { %v179_v0 = vld [vmem:[%s227_s1] sm:$0xff]   ;;  %v180_v1 = vld [vmem:[%s227_s1 + $0x8] sm:$0xff]  }
   0x2   :  { %171 = vmatprep.subr.bf16.mxu0 %v179_v0  ;;  %v181_v2 = vld [vmem:[%s228_s0] sm:$0xff]   ;;  %v182_v3 = vld [vmem:[%s228_s0 + $0x8] sm:$0xff]  }
   0x3   :  { %172 = vmatpush3.bf16.msra.mxu0 %v179_v0  ;;  %175 = vmatprep.mubr.msk.bf16.mxu0 %vm53_vm0, %v181_v2  ;;  %v165_v4 = vld [vmem:[%s229_s2 + $0x8] sm:$0xff]   ;;  %v148_v5 = vld [vmem:[%s229_s2] sm:$0xff]  }
   0x4   :  { %173 = vmatprep.subr.bf16.mxu0 %v180_v1  ;;  %v153_v6 = vunpack.c.l.bf16 %v165_v4  ;;  %v154_v7 = vunpack.c.h.bf16 %v165_v4  ;;  %v149_v9 = vunpack.c.l.bf16 %v148_v5  ;;  %v150_v10 = vunpack.c.h.bf16 %v148_v5 }
   0x7   :  { %174 = vmatpush3.bf16.msra.mxu0 %v180_v1 }
   0xa   :  { %176 = vmatmul.mubr.msk.bf16.vlgmr.msra.gmra.mrb[0].mxu0 %vm53_vm0, %v182_v3 }
  0xdd   :  { %v177_v8 = vpop.f32.mrb[0].mxu0 }
  0xde   :  { %v94_v11 = vpop.f32.mrb[1].mxu0  ;;  %v103_v13 = vadd.f32 %v177_v8, %v153_v6 }
  0xdf   :  { %v178_v12 = vpop.f32.mrb[2].mxu0  ;;  %v95_v16 = vadd.f32 %v149_v9, %v94_v11 }
  0xe0   :  { %v106_v14 = vadd.f32 %v178_v12, %v154_v7  ;;  %v97_v15 = vpop.f32.mrb[3].mxu0 }
  0xe1   :  { %v98_v17 = vadd.f32 %v150_v10, %v97_v15 }
  0xe2   :  { %v163_v18 = vpack.c.bf16 %v106_v14, %v103_v13 }
  0xe3   :  { %v158_v19 = vpack.c.bf16 %v98_v17, %v95_v16 }
  0xe4   :  { %166 = vst [vmem:[%s230_s3 + $0x8] sm:$0xff] %v163_v18  }
  0xe5   :  { %159 = vst [vmem:[%s230_s3] sm:$0xff] %v158_v19  }

// kernel: _lambda_.52
= control target key start
LH: loop header
LB: loop body
LE: loop exit
PB: predicated region body
PF: predicated region fallthrough
CT: control target
= control target key end

     0   :  { %s908_s18 = smov 0   ;;  %s1045_s0 = inlined_call_operand.vmem [shape: bf16[2,16,128], index: 0, kind: input, shape index: {}]   ;;  %s1046_s1 = inlined_call_operand.vmem [shape: f32[128,32], index: 1, kind: input, shape index: {}]   ;;  %s1047_s2 = inlined_call_operand.vmem [shape: f32[32,128], index: 2, kind: input, shape index: {}]   ;;  %s1048_s3 = inlined_call_operand.vmem [shape: f32[1,128], index: 3, kind: input, shape index: {}]   ;;  %s1049_s4 = inlined_call_operand.vmem [shape: f32[1,128], index: 4, kind: input, shape index: {}]   ;;  %s1050_s5 = inlined_call_operand.vmem [shape: f32[2,1,128], index: 5, kind: output, shape index: {}]  }
   0x1 LB: > { %s640_s19 = sadd.s32 4294967295, %s873_s18   ;;  %p644_p0 = scmp.ge.s32.totalorder %s873_s18, 1  ;;  %s873_s18 = sphi %s908_s18, %s15_s18  }
   0x2   : > { %p187_p1 = scmp.lt.s32.totalorder %s873_s18, 3 }
   0x4   : > { %p188_p2 = pnand %p644_p0, %p187_p1 }
   0x5   : > { %v225_v0 = vld [vmem:[%s1046_s1] sm:$0xff] (!%p188_p2)  ;;  %v226_v1 = vld [vmem:[%s1046_s1 + $0x8] sm:$0xff] (!%p188_p2)  ;;  %v227_v2 = vld [vmem:[%s1046_s1 + $0x10] sm:$0xff] (!%p188_p2)  ;;  %v875_v3 = vmov (!%p188_p2), 0.0|0.0   ;;  %vm876_vm0 = vmmov (!%p188_p2), 0   ;;  %v877_v6 = vmov (!%p188_p2), 0.0   ;;  %v399_v45 = vlaneseq (!%p188_p2) }
   0x6   : > { %191 = sbr.rel (%p188_p2) target bundleno = 951 (0x3b7), region = 40  ;;  %794 = vmatprep.subr.bf16.mxu0 (!%p188_p2), %v875_v3  ;;  %v926_v4 = vpack.c.bf16 (!%p188_p2), %v226_v1, %v225_v0  ;;  %v228_v5 = vld [vmem:[%s1046_s1 + $0x18] sm:$0xff] (!%p188_p2)  ;;  %734 = vmatprep.mubr.msk.f32.mxu0 (!%p188_p2), %vm876_vm0, %v877_v6  ;;  %p213_p3 = scmp.lt.s32.totalorder (!%p188_p2), %s640_s19, 1  ;;  %v229_v8 = vld [vmem:[%s1046_s1 + $0x20] sm:$0xff] (!%p188_p2)  ;;  %v230_v9 = vld [vmem:[%s1046_s1 + $0x28] sm:$0xff] (!%p188_p2)  ;;  %vm325_vm1 = vcmask (!%p188_p2), 261120  }
   0x7   : > { %818 = vmatprep.subr.bf16.mxu1 (!%p188_p2), %v875_v3  ;;  %745 = vmatprep.mubr.msk.f32.mxu1 (!%p188_p2), %vm876_vm0, %v877_v6  ;;  %v937_v7 = vpack.c.bf16 (!%p188_p2), %v228_v5, %v227_v2  ;;  %v241_v10 = vld [vmem:[%s1047_s2] sm:$0xff] (!%p188_p2)  ;;  %v242_v11 = vld [vmem:[%s1047_s2 + $0x8] sm:$0xff] (!%p188_p2)  ;;  %v801_v13 = vpack.c.bf16 (!%p188_p2), %v230_v9, %v229_v8  ;;  %v231_v15 = vld [vmem:[%s1046_s1 + $0x30] sm:$0xff] (!%p188_p2)  ;;  %v400_v46 = vshrl.u32 (!%p188_p2), %v399_v45, 7 }
   0x8   : > { %796 = vmatpush3.bf16.msra.mxu0 (!%p188_p2), %v926_v4  ;;  %v819_v12 = vpack.c.bf16 (!%p188_p2), %v242_v11, %v241_v10  ;;  %v232_v16 = vld [vmem:[%s1046_s1 + $0x38] sm:$0xff] (!%p188_p2)  ;;  %v233_v21 = vld [vmem:[%s1046_s1 + $0x40] sm:$0xff] (!%p188_p2)  ;;  %v234_v22 = vld [vmem:[%s1046_s1 + $0x48] sm:$0xff] (!%p188_p2) }
   0x9   : > { %797 = vmatprep.subr.bf16.mxu0 (!%p188_p2), %v875_v3  ;;  %v804_v20 = vpack.c.bf16 (!%p188_p2), %v232_v16, %v231_v15  ;;  %v807_v25 = vpack.c.bf16 (!%p188_p2), %v234_v22, %v233_v21  ;;  %v235_v26 = vld [vmem:[%s1046_s1 + $0x50] sm:$0xff] (!%p188_p2)  ;;  %v236_v27 = vld [vmem:[%s1046_s1 + $0x58] sm:$0xff] (!%p188_p2)  ;;  %v237_v30 = vld [vmem:[%s1046_s1 + $0x60] sm:$0xff] (!%p188_p2)  ;;  %v401_v47 = vsub.s32 (!%p188_p2), 0, %v400_v46 }
   0xa   : > { %820 = vmatpush3.bf16.msra.mxu1 (!%p188_p2), %v819_v12  ;;  %v810_v29 = vpack.c.bf16 (!%p188_p2), %v236_v27, %v235_v26  ;;  %v238_v31 = vld [vmem:[%s1046_s1 + $0x68] sm:$0xff] (!%p188_p2)  ;;  %v239_v34 = vld [vmem:[%s1046_s1 + $0x70] sm:$0xff] (!%p188_p2)  ;;  %v240_v35 = vld [vmem:[%s1046_s1 + $0x78] sm:$0xff] (!%p188_p2) }
   0xb   : > { %821 = vmatprep.subr.bf16.mxu1 (!%p188_p2), %v875_v3  ;;  %v813_v33 = vpack.c.bf16 (!%p188_p2), %v238_v31, %v237_v30  ;;  %v816_v37 = vpack.c.bf16 (!%p188_p2), %v240_v35, %v239_v34  ;;  %v243_v39 = vld [vmem:[%s1047_s2 + $0x10] sm:$0xff] (!%p188_p2)  ;;  %v244_v40 = vld [vmem:[%s1047_s2 + $0x18] sm:$0xff] (!%p188_p2)  ;;  %v650_v9 = vld [vmem:[%s1049_s4] ss:$0 sm:$0xff] (!%p188_p2) }
   0xc   : > { %799 = vmatpush3.bf16.msra.mxu0 (!%p188_p2), %v937_v7  ;;  %v822_v41 = vpack.c.bf16 (!%p188_p2), %v244_v40, %v243_v39 }
   0xd   : > { %s1052_s19 = smov (!%p213_p3, %s640_s19), 1  ;;  %800 = vmatprep.subr.bf16.mxu0 %v875_v3 }
   0xe   : > { %s653_s7 = sshll.u32 %s1052_s19, 3  ;;  %823 = vmatpush3.bf16.msra.mxu1 %v822_v41  ;;  %s220_s24 = scalar_lea.vmem %s1050_s5, %s1052_s19 }
   0xf   : > { %s217_s14 = scalar_lea.vmem %s1045_s0, %s653_s7  ;;  %824 = vmatprep.subr.bf16.mxu1 %v875_v3 }
  0x10   : > { %v959_v14 = vld [vmem:[%s217_s14] sm:$0xff]   ;;  %802 = vmatpush3.bf16.msra.mxu0 %v801_v13 }
  0x11   : > { %v656_v17 = vunpack.c.l.bf16 %v959_v14  ;;  %v657_v18 = vunpack.c.h.bf16 %v959_v14  ;;  %803 = vmatprep.subr.bf16.mxu0 %v875_v3 }
  0x13   : > { %v247_v19 = vadd.f32 %v657_v18, %v656_v17 }
  0x14   : > { %805 = vmatpush3.bf16.msra.mxu0 %v804_v20 }
  0x15   : > { %v248_v23 = vrot.slane %v247_v19, 4  ;;  %806 = vmatprep.subr.bf16.mxu0 %v875_v3 }
  0x17   : > { %v249_v24 = vadd.f32 %v248_v23, %v247_v19 }
  0x18   : > { %808 = vmatpush3.bf16.msra.mxu0 %v807_v25 }
  0x19   : > { %v250_v28 = vrot.slane %v249_v24, 2  ;;  %809 = vmatprep.subr.bf16.mxu0 %v875_v3 }
  0x1b   : > { %v251_v32 = vadd.f32 %v250_v28, %v249_v24 }
  0x1c   : > { %811 = vmatpush3.bf16.msra.mxu0 %v810_v29 }
  0x1d   : > { %812 = vmatprep.subr.bf16.mxu0 %v875_v3  ;;  %v252_v36 = vrot.slane %v251_v32, 1 }
  0x1f   : > { %v253_v38 = vadd.f32 %v252_v36, %v251_v32 }
  0x20   : > { %814 = vmatpush3.bf16.msra.mxu0 %v813_v33 }
  0x21   : > { %815 = vmatprep.subr.bf16.mxu0 %v875_v3 }
  0x24   : > { %817 = vmatpush3.bf16.msra.mxu0 %v816_v37 }
  0x25   : > { %848 = vmatprep.subr.bf16.mxu0 %v875_v3 }
  0x27   : > { %735 = vmatmul.mubr.f32.vlgmr.msra.gmra.mrb[0].mxu0 %v253_v38 }
  0x28   : > { %850 = vmatpush3.bf16.msra.mxu0 %v819_v12  ;;  %791 = vmatprep.mubr.msk.f32.mxu0 %vm876_vm0, %v877_v6 }
  0x29   : > { %851 = vmatprep.subr.bf16.mxu0 %v875_v3 }
  0x2c   : > { %853 = vmatpush3.bf16.msra.mxu0 %v822_v41 }
  0xfa   : > { %v320_v42 = vpop.f32.mrb[0].mxu0 }
  0xfb   : > { %v324_v43 = vmul.f32 0.015625, %v320_v42  ;;  %v736_v44 = vpop.f32.mrb[1].mxu0 }
  0xfd   : > { %746 = vmatmul.mubr.msk.f32.vlgmr.msra.gmra.mrb[0].mxu1 %vm325_vm1, %v324_v43 }
  0xfe   : > { %826 = vmatpush3.bf16.msra.mxu1 %v926_v4  ;;  %780 = vmatprep.mubr.msk.f32.mxu1 %vm876_vm0, %v877_v6  ;;  %v649_v6 = vld [vmem:[%s1048_s3] ss:$0 sm:$0xff] }
  0xff   : > { %827 = vmatprep.subr.bf16.mxu1 %v875_v3 }
 0x102   : > { %829 = vmatpush3.bf16.msra.mxu1 %v937_v7 }
 0x103   : > { %830 = vmatprep.subr.bf16.mxu1 %v875_v3 }
 0x106   : > { %832 = vmatpush3.bf16.msra.mxu1 %v801_v13 }
 0x107   : > { %833 = vmatprep.subr.bf16.mxu1 %v875_v3 }
 0x10a   : > { %835 = vmatpush3.bf16.msra.mxu1 %v804_v20 }
 0x10b   : > { %836 = vmatprep.subr.bf16.mxu1 %v875_v3 }
 0x10e   : > { %838 = vmatpush3.bf16.msra.mxu1 %v807_v25 }
 0x10f   : > { %839 = vmatprep.subr.bf16.mxu1 %v875_v3 }
 0x112   : > { %841 = vmatpush3.bf16.msra.mxu1 %v810_v29 }
 0x113   : > { %842 = vmatprep.subr.bf16.mxu1 %v875_v3 }
 0x116   : > { %844 = vmatpush3.bf16.msra.mxu1 %v813_v33 }
 0x117   : > { %845 = vmatprep.subr.bf16.mxu1 %v875_v3 }
 0x11a   : > { %847 = vmatpush3.bf16.msra.mxu1 %v816_v37 }
 0x1d0   : > { %v395_v48 = vpop.f32.mrb[0].mxu1 }
 0x1d1   : > { %v402_v49 = vrot.slane %v395_v48, %v401_v47  ;;  %v747_v50 = vpop.f32.mrb[1].mxu1 }
 0x1d3   : > { %v403_v51 = vsub.f32 %v656_v17, %v402_v49  ;;  %v404_v52 = vsub.f32 %v657_v18, %v402_v49 }
 0x1d5   : > { %v405_v53 = vmul.f32 %v403_v51, %v403_v51  ;;  %v406_v54 = vmul.f32 %v404_v52, %v404_v52 }
 0x1d7   : > { %v407_v55 = vadd.f32 %v406_v54, %v405_v53 }
 0x1d9   : > { %v408_v56 = vrot.slane %v407_v55, 4 }
 0x1db   : > { %v409_v57 = vadd.f32 %v408_v56, %v407_v55 }
 0x1dd   : > { %v410_v58 = vrot.slane %v409_v57, 2 }
 0x1df   : > { %v411_v59 = vadd.f32 %v410_v58, %v409_v57 }
 0x1e1   : > { %v412_v60 = vrot.slane %v411_v59, 1 }
 0x1e3   : > { %v413_v61 = vadd.f32 %v412_v60, %v411_v59 }
 0x1e5   : > { %781 = vmatmul.mubr.f32.vlgmr.msra.gmra.mrb[2].mxu1 %v413_v61 }
 0x2b8   : > { %v480_v62 = vpop.f32.mrb[2].mxu1 }
 0x2b9   : > { %v484_v63 = vmul.f32 0.015625, %v480_v62  ;;  %v782_v0 = vpop.f32.mrb[3].mxu1 }
 0x2bb   : > { %v485_v1 = vadd.f32 1e-05, %v484_v63 }
 0x2bd   : > { %865 = vrsqrt.f32 %v485_v1 }
 0x2c7   : > { %v866_v2 = vpop.eup %865 }
 0x2c8   : > { %792 = vmatmul.mubr.msk.f32.vlgmr.msra.gmra.mrb[2].mxu0 %vm325_vm1, %v866_v2 }
 0x39b   : > { %v556_v3 = vpop.f32.mrb[2].mxu0 }
 0x39c   : > { %v563_v4 = vrot.slane %v556_v3, %v401_v47  ;;  %v793_v5 = vpop.f32.mrb[3].mxu0 }
 0x39e   : > { %v564_v7 = vmul.f32 %v563_v4, %v403_v51  ;;  %v565_v8 = vmul.f32 %v563_v4, %v404_v52 }
 0x3a0   : > { %v572_v10 = vmul.f32 %v649_v6, %v564_v7  ;;  %v573_v11 = vmul.f32 %v649_v6, %v565_v8 }
 0x3a2   : > { %v580_v12 = vadd.f32 %v650_v9, %v572_v10  ;;  %v581_v13 = vadd.f32 %v650_v9, %v573_v11 }
 0x3a4   : > { %v582_v14 = vmax.f32 %v580_v12, 0.0  ;;  %v583_v15 = vmax.f32 %v581_v13, 0.0 }
 0x3a6   : > { %v584_v16 = vadd.f32 %v583_v15, %v582_v14 }
 0x3a8   : > { %v585_v17 = vrot.slane %v584_v16, 4 }
 0x3aa   : > { %v586_v18 = vadd.f32 %v585_v17, %v584_v16 }
 0x3ac   : > { %v587_v19 = vrot.slane %v586_v18, 2 }
 0x3ae   : > { %v588_v20 = vadd.f32 %v587_v19, %v586_v18 }
 0x3b0   : > { %v589_v21 = vrot.slane %v588_v20, 1 }
 0x3b2   : > { %v590_v22 = vadd.f32 %v589_v21, %v588_v20 }
 0x3b4   : > { %v591_v23 = vmul.f32 0.0625, %v590_v22 }
 0x3b6   : > { %592 = vst [vmem:[%s220_s24] sm:$0x1] %v591_v23 }
 0x3b7 PF: > { %s15_s18 = sadd.s32 1, %s873_s18  }
 0x3b8   : > { %p12_p4 = scmp.ge.s32.totalorder %s15_s18, 4  }
 0x3ba   :  { %14 = sbr.rel (!%p12_p4) target bundleno = 1 (0x1), region = 70 }

// kernel: _lambda_.53
= control target key start
LH: loop header
LB: loop body
LE: loop exit
PB: predicated region body
PF: predicated region fallthrough
CT: control target
= control target key end

     0   :  { %v217_v1 = vmov 0.0   ;;  %vm218_vm0 = vmmov 0   ;;  %s282_s0 = inlined_call_operand.vmem [shape: bf16[2,128], index: 0, kind: input, shape index: {}]   ;;  %s283_s1 = inlined_call_operand.vmem [shape: bf16[128,10], index: 1, kind: input, shape index: {}]   ;;  %s284_s2 = inlined_call_operand.vmem [shape: f32[1,10], index: 2, kind: input, shape index: {}]   ;;  %s285_s3 = inlined_call_operand.hbm [shape: f32[2,10], index: 3, kind: output, shape index: {}]  }
   0x1   :  { %v185_v0 = vld [vmem:[%s283_s1] sm:$0xff]   ;;  %162 = vmatprep.subr.bf16.mxu0 %v217_v1  ;;  %v186_v2 = vld [vmem:[%s283_s1 + $0x8] sm:$0xff]   ;;  %178 = vmatprep.mubr.msk.bf16.mxu0 %vm218_vm0, %v217_v1  ;;  %v187_v3 = vld [vmem:[%s283_s1 + $0x10] sm:$0xff]  }
   0x2   :  { %163 = vmatpush3.bf16.msra.mxu0 %v185_v0 }
   0x3   :  { %164 = vmatprep.subr.bf16.mxu0 %v217_v1 }
   0x6   :  { %165 = vmatpush3.bf16.msra.mxu0 %v186_v2 }
   0x7   :  { %166 = vmatprep.subr.bf16.mxu0 %v217_v1 }
   0x8   :  { %8 = vsyncpa [#allocation3], 0  ;;  %v188_v4 = vld [vmem:[%s283_s1 + $0x18] sm:$0xff]   ;;  %v189_v5 = vld [vmem:[%s283_s1 + $0x20] sm:$0xff]   ;;  %s219_s5 = smov [#allocation2]   ;;  %vm128_vm1 = vcmask 74752  }
   0x9   :  { %v190_v6 = vld [vmem:[%s283_s1 + $0x28] sm:$0xff]   ;;  %v191_v7 = vld [vmem:[%s283_s1 + $0x30] sm:$0xff]   ;;  %v192_v8 = vld [vmem:[%s283_s1 + $0x38] sm:$0xff]   ;;  %s136_s6 = sshll.u32 %s219_s5, 4  ;;  %s137_s6 = int_to_ptr.vmem [resolvable:$true] %s136_s6 }
   0xa   :  { %167 = vmatpush3.bf16.msra.mxu0 %v187_v3  ;;  %v16_v9 = vld [vmem:[%s282_s0] sm:$0x1]  ;;  %s193_s1 = scalar_lea.vmem %s137_s6, 32  ;;  %p198_p1 = scmp.lt.s32.totalorder %s137_s6, %s137_s6 }
   0xb   :  { %168 = vmatprep.subr.bf16.mxu0 %v217_v1  ;;  %v144_v10 = vld [vmem:[%s284_s2] ss:$0 sm:$0xff]  ;;  %p194_p0 = scmp.ne.s32.totalorder %s137_s6, %s193_s1  ;;  %p199_p2 = scmp.lt.s32.totalorder %s193_s1, %s193_s1 }
   0xd   :  { %p200_p3 = por %p199_p2, %p198_p1 }
   0xe   :  { %169 = vmatpush3.bf16.msra.mxu0 %v188_v4 }
   0xf   :  { %170 = vmatprep.subr.bf16.mxu0 %v217_v1  ;;  %p201_p4 = pnand %p200_p3, %p194_p0 }
  0x12   :  { %171 = vmatpush3.bf16.msra.mxu0 %v189_v5 }
  0x13   :  { %172 = vmatprep.subr.bf16.mxu0 %v217_v1 }
  0x16   :  { %173 = vmatpush3.bf16.msra.mxu0 %v190_v6 }
  0x17   :  { %174 = vmatprep.subr.bf16.mxu0 %v217_v1 }
  0x1a   :  { %175 = vmatpush3.bf16.msra.mxu0 %v191_v7 }
  0x1b   :  { %176 = vmatprep.subr.bf16.mxu0 %v217_v1 }
  0x1e   :  { %177 = vmatpush3.bf16.msra.mxu0 %v192_v8 }
  0x21   :  { %179 = vmatmul.mubr.bf16.vlgmr.msra.gmra.mrb[0].mxu0 %v16_v9 }
  0xf4   :  { %v122_v11 = vpop.f32.mrb[0].mxu0 }
  0xf5   :  { %v123_v12 = vadd.f32 %v144_v10, %v122_v11  ;;  %v180_v13 = vpop.f32.mrb[1].mxu0 }
  0xf6   :  { %v125_v14 = vpop.f32.mrb[2].mxu0 }
  0xf7   :  { %v181_v15 = vpop.f32.mrb[3].mxu0  ;;  %129 = vst.msk [vmem:[#allocation2] sm:$0x3] %vm128_vm1, %v123_v12 }
  0xf8   :  { %204 = shalt.err (!%p201_p4)
}
  0xf9   :  { %s205_s2 = scalar_lea.hbm %s285_s3, 32 }
  0xfa   :  { %p206_p5 = scmp.ne.s32.totalorder %s285_s3, %s205_s2  ;;  %p209_p6 = scmp.lt.u32.totalorder %s205_s2, %s285_s3 }
  0xfc   :  { %p211_p7 = pnand %p209_p6, %p206_p5 }
  0xfe   :  { %214 = shalt.err (!%p211_p7)
}
  0xff   :  { %139 = dma.vmem_to_hbm [thread:$0]  %s137_s6, 32, %s285_s3, [#allocation3]  }
 0x100   :  { %215 = dma.done.wait [#allocation3], 32  }
 0x101   :  { %216 = vsyncadd [#allocation3], 4294967264 }
 0x102   :  { %143 = vsyncpa [#allocation3], 1 }

</bundles_post_ra>
